<compile_context>
chip_gen: v7x
topology: tpu7x:2x2x1
jax: 0.10.0
libtpu: 0.0.40
codegen_flags: <defaults>
</compile_context>

<pallas_src>
import functools

import jax
import jax.numpy as jnp
from jax.experimental import pallas as pl
from jax.experimental.pallas import tpu as pltpu


# ----------------------------------------------------------------------------
# helpers
# ----------------------------------------------------------------------------
_SMALL_INPUT_BYTES = 1 * 1024 * 1024     # below this, XLA's fused reduce wins
_LANE_TILE_CAP = 2048                    # max lane (Q) tile in the mid kernel
_ROW_TILE_CAP_MIN = 512                  # rows kernel: bounds on the row tile
_ROW_TILE_CAP_MAX = 8192


def _round_up(x, m):
    return ((x + m - 1) // m) * m


def _prod(xs):
    p = 1
    for v in xs:
        p *= int(v)
    return p


def _sublane_mult(itemsize):
    # f32 -> 8, bf16 -> 16, int8/fp8 -> 32 (sub-32-bit dtypes pack on sublanes)
    return max(8, 32 // int(itemsize))


@functools.lru_cache(maxsize=None)
def _vmem_budget():
    """Returns (per-input-buffer budget bytes, vmem_limit_bytes), TPU-gen aware."""
    cap = None
    try:
        cap = int(pltpu.get_tpu_info().vmem_capacity_bytes)
    except Exception:
        cap = None
    if cap is not None and cap >= 128 * 1024 * 1024:
        # v5e / v6e: 128 MiB physical VMEM -> raise the scoped limit, big tiles.
        return 16 * 1024 * 1024, 64 * 1024 * 1024
    # v7x (64 MiB physical) or unknown: stay under the 32 MiB scoped limit.
    return 12 * 1024 * 1024, 32 * 1024 * 1024


def _row_tile(m, sub, cap):
    """Row (parallel) tile: big, dtype-aligned, >= 2 grid steps when possible."""
    if m <= max(16, 2 * sub):
        return m                                   # full dim (always legal)
    tm = min(cap, _round_up(pl.cdiv(m, 2), sub))
    return m if tm >= m else tm


# ----------------------------------------------------------------------------
# kernel 1: reduce the LAST axis of a 2-D (M, R) array  ->  lane-dense output
# ----------------------------------------------------------------------------
def _mean_rows_kernel(x_ref, o_ref, acc_ref, *, reduce_size, tr):
    k = pl.program_id(1)
    nk = pl.num_programs(1)
    rem = reduce_size % tr                          # static python int

    @pl.when(k == 0)
    def _():
        acc_ref[...] = jnp.zeros_like(acc_ref)

    def _accumulate(mask_tail):
        x = x_ref[...].astype(jnp.float32)                     # (tm, tr)
        if mask_tail:
            col = jax.lax.broadcasted_iota(jnp.int32, x.shape, 1)
            x = jnp.where(col < rem, x, 0.0)                   # NaN-safe select
        acc_ref[...] += jnp.sum(x, axis=-1, keepdims=True)     # (tm, 1)

    def _finalize():
        mean_col = acc_ref[...] * (1.0 / reduce_size)          # (tm, 1) f32
        # Lane-dense store: put the per-row means on the lane axis so the
        # output store/writeback is dense instead of per-sublane masked.
        mean_row = jnp.transpose(mean_col, (1, 0))             # (1, tm)
        o_ref[...] = mean_row.reshape(o_ref.shape).astype(o_ref.dtype)

    if rem == 0:
        _accumulate(False)

        @pl.when(k == nk - 1)
        def _():
            _finalize()
    else:
        # Only the last reduce block needs the tail mask; keep the hot path
        # free of the iota/compare/select VALU work.
        @pl.when(k < nk - 1)
        def _():
            _accumulate(False)

        @pl.when(k == nk - 1)
        def _():
            _accumulate(True)
            _finalize()


def _pallas_mean_rows(x2d):
    """Mean over the last axis of a 2-D array; returns shape (M,)."""
    M, R = (int(s) for s in x2d.shape)
    esize = int(x2d.dtype.itemsize)
    sub = _sublane_mult(esize)
    budget, vmem_limit = _vmem_budget()

    r_pad = _round_up(R, 128)
    # Row tile: fill roughly one buffer budget per step when R is small
    # (capped to bound the f32 accumulator), keep >= 2 row blocks when possible.
    cap = min(_ROW_TILE_CAP_MAX,
              max(_ROW_TILE_CAP_MIN, ((budget // (esize * r_pad)) // sub) * sub))
    tm = _row_tile(M, sub, cap)
    tm_pad = _round_up(tm, sub)

    # Reduce (lane) tile, lane-padding aware.
    max_tr = max(128, ((budget // (esize * tm_pad)) // 128) * 128)
    tr = R if r_pad <= max_tr else max_tr

    grid_m = pl.cdiv(M, tm)
    grid = (grid_m, pl.cdiv(R, tr))
    kern = functools.partial(_mean_rows_kernel, reduce_size=R, tr=tr)

    out = pl.pallas_call(
        kern,
        # Lane-dense output slab: (row-tile index, 1, tm); garbage rows from
        # the padded last row tile are sliced off in the wrapper.
        out_shape=jax.ShapeDtypeStruct((grid_m, 1, tm), x2d.dtype),
        grid_spec=pltpu.PrefetchScalarGridSpec(
            num_scalar_prefetch=0,
            grid=grid,
            in_specs=[pl.BlockSpec((tm, tr), lambda i, k: (i, k))],
            out_specs=pl.BlockSpec((1, 1, tm), lambda i, k: (i, 0, 0)),
            scratch_shapes=[pltpu.VMEM((tm, 1), jnp.float32)],
        ),
        compiler_params=pltpu.CompilerParams(
            dimension_semantics=("parallel", "arbitrary"),
            vmem_limit_bytes=vmem_limit,
        ),
        cost_estimate=pl.CostEstimate(
            flops=M * R,
            transcendentals=0,
            bytes_accessed=M * R * esize + M * esize,
        ),
    )(x2d)
    return out.reshape(grid_m * tm)[:M]


# ----------------------------------------------------------------------------
# kernel 2: reduce the MIDDLE axis of a 3-D (P, R, Q) array  ->  (P, 1, Q)
# (used for contiguous, non-trailing reduce dims: avoids an HBM transpose copy)
# ----------------------------------------------------------------------------
def _mean_mid_kernel(x_ref, o_ref, acc_ref, *, reduce_size, tr):
    k = pl.program_id(2)
    nk = pl.num_programs(2)
    rem = reduce_size % tr                          # static python int

    @pl.when(k == 0)
    def _():
        acc_ref[...] = jnp.zeros_like(acc_ref)

    def _accumulate(mask_tail):
        x = x_ref[...].astype(jnp.float32)                     # (tp, tr, tq)
        if mask_tail:
            row = jax.lax.broadcasted_iota(jnp.int32, x.shape, 1)
            x = jnp.where(row < rem, x, 0.0)                   # NaN-safe select
        acc_ref[...] += jnp.sum(x, axis=1, keepdims=True)      # (tp, 1, tq)

    def _finalize():
        o_ref[...] = (acc_ref[...] * (1.0 / reduce_size)).astype(o_ref.dtype)

    if rem == 0:
        _accumulate(False)

        @pl.when(k == nk - 1)
        def _():
            _finalize()
    else:
        @pl.when(k < nk - 1)
        def _():
            _accumulate(False)

        @pl.when(k == nk - 1)
        def _():
            _accumulate(True)
            _finalize()


def _pallas_mean_mid(x3):
    """Mean over the middle axis of a 3-D array; returns shape (P, Q)."""
    P, R, Q = (int(s) for s in x3.shape)
    esize = int(x3.dtype.itemsize)
    sub = _sublane_mult(esize)
    budget, vmem_limit = _vmem_budget()

    # ---- lane (Q) tile ------------------------------------------------------
    tq = Q if Q <= _LANE_TILE_CAP else _LANE_TILE_CAP
    # v7x shards "parallel" grid axes across 2 TensorCores: when P == 1 and Q
    # fits in one tile, split Q so at least one parallel axis has >= 2 blocks.
    if P == 1 and Q <= _LANE_TILE_CAP and Q >= 256:
        tq = _round_up(pl.cdiv(Q, 2), 128)
    tq_pad = _round_up(tq, 128)

    # ---- reduce (R / sublane) tile, padded-footprint aware ------------------
    max_tr = max(sub, ((budget // (esize * tq_pad)) // sub) * sub)
    r_pad = _round_up(R, sub)
    tr = R if r_pad <= max_tr else max_tr
    tr_pad = _round_up(tr, sub)

    # ---- P tile: amortize the per-step overhead when the (R, Q) plane is
    # small; account for padded input (x2 double-buffered), f32 acc and output.
    per_p = (2 * tr_pad * tq_pad * esize          # double-buffered input tile
             + 8 * tq_pad * 4                     # f32 accumulator row
             + 2 * 8 * tq_pad * esize)            # double-buffered output row
    tp = max(1, (2 * budget) // per_p)
    tp = min(tp, P)
    if tp >= P and P > 1 and pl.cdiv(Q, tq) == 1:
        tp = pl.cdiv(P, 2)                        # keep >= 2 parallel P blocks

    grid = (pl.cdiv(P, tp), pl.cdiv(Q, tq), pl.cdiv(R, tr))
    kern = functools.partial(_mean_mid_kernel, reduce_size=R, tr=tr)

    out = pl.pallas_call(
        kern,
        out_shape=jax.ShapeDtypeStruct((P, 1, Q), x3.dtype),
        grid_spec=pltpu.PrefetchScalarGridSpec(
            num_scalar_prefetch=0,
            grid=grid,
            in_specs=[pl.BlockSpec((tp, tr, tq), lambda i, j, k: (i, k, j))],
            out_specs=pl.BlockSpec((tp, 1, tq), lambda i, j, k: (i, 0, j)),
            scratch_shapes=[pltpu.VMEM((tp, 1, tq), jnp.float32)],
        ),
        compiler_params=pltpu.CompilerParams(
            dimension_semantics=("parallel", "parallel", "arbitrary"),
            vmem_limit_bytes=vmem_limit,
        ),
        cost_estimate=pl.CostEstimate(
            flops=P * R * Q,
            transcendentals=0,
            bytes_accessed=P * R * Q * esize + P * Q * esize,
        ),
    )(x3)
    return out[:, 0, :]


# ----------------------------------------------------------------------------
# deephi_Mean.forward equivalent
# ----------------------------------------------------------------------------
def _mean_contiguous(x, d0, d1):
    """Mean over the contiguous dim range [d0, d1] of x, keepdim=False."""
    shape = tuple(int(s) for s in x.shape)
    kept_shape = shape[:d0] + shape[d1 + 1:]
    nbytes = _prod(shape) * int(x.dtype.itemsize)
    if nbytes <= _SMALL_INPUT_BYTES:
        # Tiny inputs: pallas_call launch / pipeline priming would dominate.
        return jnp.mean(x, axis=tuple(range(d0, d1 + 1)))
    pre = _prod(shape[:d0])
    red = _prod(shape[d0:d1 + 1])
    post = _prod(shape[d1 + 1:])
    if post == 1:
        # Trailing reduce dims: pure view, reduce along the lane axis.
        out = _pallas_mean_rows(x.reshape(pre, red))            # (pre,)
    else:
        # Contiguous middle reduce dims: pure view, no HBM transpose copy.
        out = _pallas_mean_mid(x.reshape(pre, red, post))       # (pre, post)
    return out.reshape(kept_shape)


def deephi_mean(x, dim, keepdim=False):
    """Equivalent of deephi_Mean.forward(input, dim, keepdim) (float mode)."""
    ndim = x.ndim
    dims = (dim,) if isinstance(dim, int) else tuple(dim)
    dims = tuple(sorted(set(d % ndim for d in dims)))

    # Split the reduce dims into contiguous runs and reduce them right-to-left
    # (successive means over uniform group sizes == the joint mean).  This
    # replaces the old jnp.transpose fallback, which cost a full extra HBM
    # read+write of the whole tensor for non-contiguous reduce dims.
    runs = []
    start = prev = dims[0]
    for d in dims[1:]:
        if d == prev + 1:
            prev = d
        else:
            runs.append((start, prev))
            start = prev = d
    runs.append((start, prev))

    out = x
    for d0, d1 in reversed(runs):
        out = _mean_contiguous(out, d0, d1)

    if keepdim:
        full_shape = tuple(
            1 if d in dims else int(x.shape[d]) for d in range(ndim))
        out = out.reshape(full_shape)
    return out


# ----------------------------------------------------------------------------
# self-test
# ----------------------------------------------------------------------------
if __name__ == "__main__":
    key = jax.random.PRNGKey(0)
    k1, k2, k3, k4, k5, k6 = jax.random.split(key, 6)

    # --- small NCHW cases (short-circuit to XLA's fused reduce) -------------
    x = jax.random.normal(k1, (2, 4, 16, 16), dtype=jnp.float32)

    y1 = jax.block_until_ready(deephi_mean(x, dim=(2, 3), keepdim=True))
    assert y1.shape == (2, 4, 1, 1)
    assert jnp.allclose(y1, jnp.mean(x, axis=(2, 3), keepdims=True),
                        atol=1e-5, rtol=1e-5)

    y2 = jax.block_until_ready(deephi_mean(x, dim=1, keepdim=False))
    assert y2.shape == (2, 16, 16)
    assert jnp.allclose(y2, jnp.mean(x, axis=1), atol=1e-5, rtol=1e-5)

    y3 = jax.block_until_ready(deephi_mean(x, dim=(0, 2), keepdim=False))
    assert y3.shape == (4, 16)
    assert jnp.allclose(y3, jnp.mean(x, axis=(0, 2)), atol=1e-5, rtol=1e-5)

    # --- rows kernel: tiled reduce axis + tail mask + lane-dense output -----
    xa = jax.random.normal(k2, (640, 20000), dtype=jnp.float32)
    y4 = jax.block_until_ready(deephi_mean(xa, dim=1, keepdim=True))
    assert y4.shape == (640, 1)
    assert jnp.allclose(y4, jnp.mean(xa, axis=1, keepdims=True),
                        atol=1e-5, rtol=1e-5)

    # --- mid kernel: P-blocked channel mean on NCHW -------------------------
    xb = jax.random.normal(k3, (32, 512, 8, 8), dtype=jnp.float32)
    y5 = jax.block_until_ready(deephi_mean(xb, dim=1, keepdim=False))
    assert y5.shape == (32, 8, 8)
    assert jnp.allclose(y5, jnp.mean(xb, axis=1), atol=1e-5, rtol=1e-5)

    # --- mid kernel: tiled reduce axis with tail -----------------------------
    xc = jax.random.normal(k4, (4, 40000, 64), dtype=jnp.float32)
    y6 = jax.block_until_ready(deephi_mean(xc, dim=1, keepdim=False))
    assert y6.shape == (4, 64)
    assert jnp.allclose(y6, jnp.mean(xc, axis=1), atol=1e-5, rtol=1e-5)

    # --- bf16 rows kernel ----------------------------------------------------
    xd = jax.random.normal(k5, (512, 4096), dtype=jnp.bfloat16)
    y7 = jax.block_until_ready(deephi_mean(xd, dim=1, keepdim=False))
    ref7 = jnp.mean(xd.astype(jnp.float32), axis=1)
    assert y7.shape == (512,)
    assert jnp.allclose(y7.astype(jnp.float32), ref7, atol=1e-2, rtol=1e-2)

    # --- non-contiguous dims: successive contiguous reductions (no transpose)
    xe = jax.random.normal(k6, (64, 128, 32, 64), dtype=jnp.float32)
    y8 = jax.block_until_ready(deephi_mean(xe, dim=(1, 3), keepdim=False))
    assert y8.shape == (64, 32)
    assert jnp.allclose(y8, jnp.mean(xe, axis=(1, 3)), atol=1e-5, rtol=1e-5)

    print("KERNEL_OK")
</pallas_src>

<mosaic_0001>
module attributes {stable_mosaic.version = 11 : i64} {
  func.func @_mean_rows_kernel(%arg0: i32, %arg1: i32, %arg2: memref<320x9728xf32, #tpu.memory_space<vmem>>, %arg3: memref<1x1x320xf32, #tpu.memory_space<vmem>>, %arg4: memref<320x1xf32, #tpu.memory_space<vmem>>) attributes {dimension_semantics = [#tpu.dimension_semantics<parallel>, #tpu.dimension_semantics<arbitrary>], iteration_bounds = array<i64: 2, 3>, scalar_prefetch = 0 : i64, scratch_operands = 1 : i64, tpu.core_type = #tpu.core_type<tc>, window_params = [{transform_indices = @transform_0, window_bounds = array<i64: 320, 9728>}, {transform_indices = @transform_1, window_bounds = array<i64: 1, 1, 320>}]} {
    %c0_i32 = arith.constant 0 : i32
    %0 = arith.cmpi eq, %arg1, %c0_i32 : i32
    %1 = arith.extui %0 : i1 to i32
    %c0_i32_0 = arith.constant 0 : i32
    %2 = arith.cmpi ne, %1, %c0_i32_0 : i32
    scf.if %2 {
      %cst = arith.constant 0.000000e+00 : f32
      %9 = vector.broadcast %cst : f32 to vector<320x1xf32>
      %c0 = arith.constant 0 : index
      %c0_4 = arith.constant 0 : index
      %10 = vector.load %arg4[%c0, %c0_4] : memref<320x1xf32, #tpu.memory_space<vmem>>, vector<320x1xf32>
      tpu.vector_store %arg4[%c0, %c0_4], %9 {strides = array<i32>} : memref<320x1xf32, #tpu.memory_space<vmem>>, vector<320x1xf32>,
    } else {
    }
    %c2_i32 = arith.constant 2 : i32
    %3 = arith.cmpi slt, %arg1, %c2_i32 : i32
    %4 = arith.extui %3 : i1 to i32
    %c0_i32_1 = arith.constant 0 : i32
    %5 = arith.cmpi ne, %4, %c0_i32_1 : i32
    scf.if %5 {
      %c0 = arith.constant 0 : index
      %c0_4 = arith.constant 0 : index
      %9 = vector.load %arg2[%c0, %c0_4] : memref<320x9728xf32, #tpu.memory_space<vmem>>, vector<320x9728xf32>
      %c0_5 = arith.constant 0 : index
      %c0_6 = arith.constant 0 : index
      %10 = vector.load %arg4[%c0_5, %c0_6] : memref<320x1xf32, #tpu.memory_space<vmem>>, vector<320x1xf32>
      %cst = arith.constant dense<0.000000e+00> : vector<320xf32>
      %11 = vector.multi_reduction <add>, %9, %cst [1] : vector<320x9728xf32> to vector<320xf32>
      %12 = vector.shape_cast %11 : vector<320xf32> to vector<320x1xf32>
      %13 = arith.addf %10, %12 : vector<320x1xf32>
      %c0_7 = arith.constant 0 : index
      %c0_8 = arith.constant 0 : index
      %14 = vector.load %arg4[%c0_7, %c0_8] : memref<320x1xf32, #tpu.memory_space<vmem>>, vector<320x1xf32>
      tpu.vector_store %arg4[%c0_7, %c0_8], %13 {strides = array<i32>} : memref<320x1xf32, #tpu.memory_space<vmem>>, vector<320x1xf32>,
    } else {
    }
    %c2_i32_2 = arith.constant 2 : i32
    %6 = arith.cmpi eq, %arg1, %c2_i32_2 : i32
    %7 = arith.extui %6 : i1 to i32
    %c0_i32_3 = arith.constant 0 : i32
    %8 = arith.cmpi ne, %7, %c0_i32_3 : i32
    scf.if %8 {
      %c0 = arith.constant 0 : index
      %c0_4 = arith.constant 0 : index
      %9 = vector.load %arg2[%c0, %c0_4] : memref<320x9728xf32, #tpu.memory_space<vmem>>, vector<320x9728xf32>
      %10 = tpu.iota {dimensions = array<i32: 1>} : vector<320x9728xi32>
      %c544_i32 = arith.constant 544 : i32
      %11 = vector.broadcast %c544_i32 : i32 to vector<320x9728xi32>
      %12 = arith.cmpi slt, %10, %11 : vector<320x9728xi32>
      %cst = arith.constant 0.000000e+00 : f32
      %13 = vector.broadcast %cst : f32 to vector<320x9728xf32>
      %14 = arith.select %12, %9, %13 : vector<320x9728xi1>, vector<320x9728xf32>
      %c0_5 = arith.constant 0 : index
      %c0_6 = arith.constant 0 : index
      %15 = vector.load %arg4[%c0_5, %c0_6] : memref<320x1xf32, #tpu.memory_space<vmem>>, vector<320x1xf32>
      %cst_7 = arith.constant dense<0.000000e+00> : vector<320xf32>
      %16 = vector.multi_reduction <add>, %14, %cst_7 [1] : vector<320x9728xf32> to vector<320xf32>
      %17 = vector.shape_cast %16 : vector<320xf32> to vector<320x1xf32>
      %18 = arith.addf %15, %17 : vector<320x1xf32>
      %c0_8 = arith.constant 0 : index
      %c0_9 = arith.constant 0 : index
      %19 = vector.load %arg4[%c0_8, %c0_9] : memref<320x1xf32, #tpu.memory_space<vmem>>, vector<320x1xf32>
      tpu.vector_store %arg4[%c0_8, %c0_9], %18 {strides = array<i32>} : memref<320x1xf32, #tpu.memory_space<vmem>>, vector<320x1xf32>,
      %c0_10 = arith.constant 0 : index
      %c0_11 = arith.constant 0 : index
      %20 = vector.load %arg4[%c0_10, %c0_11] : memref<320x1xf32, #tpu.memory_space<vmem>>, vector<320x1xf32>
      %cst_12 = arith.constant 5.000000e-05 : f32
      %21 = vector.broadcast %cst_12 : f32 to vector<320x1xf32>
      %22 = arith.mulf %20, %21 : vector<320x1xf32>
      %23 = tpu.transpose %22, [1, 0] : vector<320x1xf32> -> vector<1x320xf32>
      %24 = vector.shape_cast %23 : vector<1x320xf32> to vector<1x1x320xf32>
      %c0_13 = arith.constant 0 : index
      %c0_14 = arith.constant 0 : index
      %c0_15 = arith.constant 0 : index
      %25 = vector.load %arg3[%c0_13, %c0_14, %c0_15] : memref<1x1x320xf32, #tpu.memory_space<vmem>>, vector<1x1x320xf32>
      tpu.vector_store %arg3[%c0_13, %c0_14, %c0_15], %24 {strides = array<i32>} : memref<1x1x320xf32, #tpu.memory_space<vmem>>, vector<1x1x320xf32>,
    } else {
    }
    return
  }
  func.func @transform_0(%arg0: i32, %arg1: i32) -> (i32, i32) {
    %c0_i32 = arith.constant 0 : i32
    return %arg0, %arg1 : i32, i32
  }
  func.func @transform_1(%arg0: i32, %arg1: i32) -> (i32, i32, i32) {
    %c0_i32 = arith.constant 0 : i32
    %c0_i32_0 = arith.constant 0 : i32
    %c0_i32_1 = arith.constant 0 : i32
    return %arg0, %c0_i32, %c0_i32_0 : i32, i32, i32
  }
}

</mosaic_0001>

<bundles_post_ra>
// kernel: tpu_custom_call.1
= control target key start
LH: loop header
LB: loop body
LE: loop exit
PB: predicated region body
PF: predicated region fallthrough
CT: control target
= control target key end

     0   :  { %6 = vsyncpa [#allocation4], 0  ;;  %s20230_s0 = inlined_call_operand.hbm [shape: f32[640,20000], index: 0, kind: input, shape index: {}]   ;;  %s20231_s1 = inlined_call_operand.hbm [shape: f32[2,1,320], index: 1, kind: output, shape index: {}]  }
   0x1   :  { %8 = vsyncpa [#allocation4 + $0x1], 0 }
   0x2   :  { %9 = vsyncpa [#allocation5], 0 }
   0x3   :  { %11 = vsyncpa [#allocation5 + $0x1], 0  ;;  %s16491_s6 = smov 0   ;;  %s16493_s7 = smov 0  }
   0x4   :  { %s16495_s8 = smov 0   ;;  %s16497_s9 = smov 0  }
   0x5   :  { %s16499_s10 = smov 0   ;;  %s16501_s11 = smov 0  }
   0x6   :  { %s16503_s12 = smov 0   ;;  %s16505_s13 = smov 0  }
   0x7   :  { %s16507_s14 = smov 0   ;;  %s16509_s15 = smov 0  }
   0x8   :  { %s16511_s16 = smov 0  }
   0x9 LB: > { %20235 = sst [smem:[#allocation9_spill]] %s16465_s14  ;;  %s16200_s17 = sadd.s32 4294967295, %s16473_s16   ;;  %s16473_s16 = sphi %s16511_s16, %s17_s16   ;;  %s16469_s15 = sphi %s16509_s15, %s20253_s15   ;;  %s16465_s14 = sphi %s16507_s14, %s20244_s14   ;;  %s16461_s13 = sphi %s16505_s13, %s20252_s13   ;;  %s16457_s12 = sphi %s16503_s12, %s20243_s12   ;;  %s16453_s11 = sphi %s16501_s11, %s20251_s11   ;;  %s16449_s10 = sphi %s16499_s10, %s20250_s10   ;;  %s16445_s9 = sphi %s16497_s9, %s20249_s9   ;;  %s16441_s8 = sphi %s16495_s8, %s20248_s8   ;;  %s16437_s7 = sphi %s16493_s7, %s20247_s7   ;;  %s16433_s6 = sphi %s16491_s6, %s20246_s6  }
   0xa   : > { %s16201_s18 = sadd.s32 4294967294, %s16473_s16   ;;  %s26_s19 = sadd.s32 1, %s16465_s14 }
   0xb   : > { %s29_s20 = sadd.s32 1, %s16469_s15  ;;  %p27_p0 = scmp.ge.s32.totalorder %s26_s19, 3 }
   0xc   : > { %s38_s21 = sadd.s32 1, %s16453_s11  ;;  %p45_p1 = scmp.ne.s32.totalorder %s16453_s11, %s16449_s10 }
   0xd   : > { %p46_p2 = scmp.eq.s32.totalorder %s16473_s16, 0  ;;  %s20255_s19 = smov (%p27_p0, %s26_s19), 0 }
   0xe   : > { %20236 = sst [smem:[#allocation10_spill]] %s20255_s19  ;;  %s20257_s20 = smov (!%p27_p0, %s29_s20), %s16469_s15 }
   0xf   : > { %s34_s22 = ssub.s32 %s16465_s14, %s20255_s19  ;;  %p16557_p3 = por %p46_p2, %p45_p1 }
  0x10   : > { %p31_p4 = scmp.ge.s32.totalorder %s20257_s20, 2  ;;  %p51_p5 = scmp.ne.s32.totalorder %s16449_s10, %s16445_s9 }
  0x11   : > { %p52_p6 = scmp.eq.s32.totalorder %s16200_s17, 0  ;;  %s64_s24 = sadd.s32 1, %s16441_s8 }
  0x12   : > { %s20259_s20 = smov (%p31_p4, %s20257_s20), 0  ;;  %p74_p8 = scmp.ne.s32.totalorder %s16441_s8, %s16437_s7 }
  0x13   : > { %20238 = sst [smem:[#allocation11_spill]] %s20259_s20  ;;  %p16565_p7 = por %p52_p6, %p51_p5 }
  0x14   : > { %s33_s26 = ssub.s32 %s16469_s15, %s20259_s20  ;;  %p75_p9 = scmp.eq.s32.totalorder %s16200_s17, 5 }
  0x15   : > { %s35_s27 = sor.u32 %s34_s22, %s33_s26  ;;  %p62_p10 = scmp.eq.s32.totalorder %s33_s26, 0 }
  0x16   : > { %p36_p11 = scmp.eq.s32.totalorder %s35_s27, 0  ;;  %p16573_p12 = por %p75_p9, %p74_p8 }
  0x17   : > { %s16578_s29 = scalar_select %p62_p10, %s16441_s8, %s64_s24  }
  0x18   : > { %s16581_s30 = scalar_select %p36_p11, %s16453_s11, %s38_s21  }
  0x19   : > { %p80_p13 = scmp.ne.s32.totalorder %s16437_s7, %s16433_s6  ;;  %p81_p0 = scmp.eq.s32.totalorder %s16201_s18, 5 }
  0x1a   : > { %p16203_p2 = scmp.ge.s32.totalorder %s16473_s16, 6 }
  0x1b   : > { %p16585_p1 = por %p81_p0, %p80_p13 }
  0x1c   : > { %97 = sbr.rel (%p16203_p2) target bundleno = 73 (0x49), region = 16 }
  0x1d   : > { %s20241_s2 = scalar_select %p16585_p1, 1, 0 }
  0x23   : > { %100 = sbr.rel (!%p16557_p3) target bundleno = 73 (0x49), region = 20  ;;  %s101_s3 = sand.u32 (%p16557_p3), 1, %s16453_s11  }
  0x24   : > { %s16216_s4 = smul.u32 (%p16557_p3), 24320, %s101_s3  ;;  %s16600_s21 = scalar_lea.sflag (%p16557_p3), [#allocation4], %s101_s3 }
  0x25   : > { %s107_s5 = smul.u32 (%p16557_p3), 76, %s16465_s14 }
  0x26   : > { %s105_s22 = scalar_lea.vmem (%p16557_p3), [#allocation3], %s16216_s4 }
  0x27   : > { %s108_s9 = ssub.s32 (%p16557_p3), 157, %s107_s5 }
  0x28   : > { %p109_p4 = scmp.lt.s32.totalorder (%p16557_p3), %s108_s9, 76 }
  0x2a   : > { %s20261_s9 = smov (!%p109_p4, %s108_s9), 76 }
  0x2b   : > { %s16597_s17 = smul.u32 5120, %s20261_s9 }
  0x2d   : > { %s113_s18 = ssub.s32 389120, %s16597_s17 }
  0x2e   : > { %114 = vsyncadd %s16600_s21, %s113_s18  ;;  %p16204_p3 = scmp.ne.s32.totalorder %s16597_s17, 0  ;;  %s16228_s23 = smul.u32 6280, %s16469_s15 }
  0x2f   : > { %s16206_s24 = sshll.u32 %s20261_s9, 3  ;;  %s122_s26 = sshll.u32 %s105_s22, 4  ;;  %s16606_s26 = int_to_ptr.vmem [resolvable:$true] %s122_s26 }
  0x30   : > { %s117_s27 = sadd.s32 %s16228_s23, %s107_s5  ;;  %s16327_s5 = scalar_lea.hbm %s20230_s0, 1607680 }
  0x31   : > { %s16205_s20 = sshll.u32 %s117_s27, 7 }
  0x32   : > { %s16611_s3 = scalar_lea.hbm %s20230_s0, %s16205_s20 }
  0x33   : > { %s16323_s4 = scalar_lea.hbm %s16611_s3, %s16597_s17  ;;  %p16328_p9 = scmp.lt.u32.totalorder %s16611_s3, %s20230_s0 }
  0x34   : > { %p16324_p5 = scmp.ne.s32.totalorder %s16611_s3, %s16323_s4  ;;  %p16329_p10 = scmp.lt.u32.totalorder %s16327_s5, %s16323_s4 }
  0x35   : > { %p16331_p13 = scmp.lt.u32.totalorder %s16323_s4, %s16611_s3 }
  0x36   : > { %p16325_p6 = pnand %p16324_p5, %p16204_p3  ;;  %p16330_p11 = por %p16329_p10, %p16328_p9 }
  0x38   : > { %p16326_p8 = pneg %p16325_p6  ;;  %p16332_p0 = por %p16331_p13, %p16330_p11 }
  0x3a   : > { %p16333_p2 = pnand %p16332_p0, %p16326_p8 }
  0x3c   : > { %16336 = shalt.err (!%p16333_p2)
}
  0x3d   : > { %s16337_s14 = scalar_lea.vmem %s16606_s26, %s16597_s17  ;;  %s16475_s19 = smov [#allocation3]  }
  0x3e   : > { %p16338_p4 = scmp.ne.s32.totalorder %s16606_s26, %s16337_s14  ;;  %s16341_s20 = sshll.u32 %s16475_s19, 4  ;;  %s16342_s20 = int_to_ptr.vmem [resolvable:$false] %s16341_s20 }
  0x3f   : > { %s16343_s18 = scalar_lea.vmem %s16342_s20, 778240  ;;  %p16344_p1 = scmp.lt.s32.totalorder %s16606_s26, %s16342_s20 }
  0x40   : > { %p16339_p5 = pnand %p16338_p4, %p16204_p3  ;;  %p16345_p9 = scmp.lt.s32.totalorder %s16343_s18, %s16337_s14 }
  0x42   : > { %p16340_p6 = pneg %p16339_p5  ;;  %p16346_p10 = por %p16345_p9, %p16344_p1 }
  0x44   : > { %p16347_p11 = pnand %p16346_p10, %p16340_p6 }
  0x46   : > { %16350 = shalt.err (!%p16347_p11)
}
  0x47   : > { %s16476_s4 = smov 20096   ;;  %s16477_s22 = smov 9728  }
  0x48   : > { %128 = dma.hbm_to_vmem [thread:$0]  (%p16204_p3), %s16611_s3, %s16597_s17, %s16606_s26, %s16600_s21, %s16476_s4, %s16477_s22, %s16206_s24  }
  0x49 PF: > { %p16209_p8 = scmp.ge.s32.totalorder %s16473_s16, 1  ;;  %p130_p13 = scmp.lt.s32.totalorder %s16473_s16, 7 }
  0x4b   : > { %p131_p1 = pnand %p16209_p8, %p130_p13 }
  0x4c   : > { %s136_s5 = sand.u32 (!%p131_p1), 1, %s16449_s10  }
  0x4d   : > { %134 = sbr.rel (%p131_p1) target bundleno = 1782 (0x6f6), region = 24  ;;  %s137_s27 = scalar_lea.sflag (!%p131_p1), [#allocation4], %s136_s5 }
  0x4e   : > { %s16218_s23 = smul.u32 (!%p131_p1), 24320, %s136_s5 }
  0x50   : > { %s16643_s14 = scalar_lea.vmem (!%p131_p1), [#allocation3], %s16218_s23 }
  0x54   : > { %16424 = dma.done.wait (%p16565_p7), %s137_s27, 389120  }
  0x55   : > { %16426 = vsyncadd (%p16565_p7), %s137_s27, 4294578176  ;;  %s156_s9 = sand.u32 1, %s16437_s7   ;;  %p16210_p3 = scmp.ne.s32.totalorder %s16457_s12, 0 }
  0x56   : > { %s16652_s17 = smul.u32 3, %s156_s9  ;;  %vm169_vm0 = vcmask (!%p16210_p3), 7168   ;;  %v16478_v0 = vmov (!%p16210_p3), 0.0  }
  0x57   : > { %168 = sbr.rel (%p16210_p3) target bundleno = 107 (0x6b), region = 32  ;;  %170 = vst.msk [vmem:[#allocation2] sm:$0xff] (!%p16210_p3), %vm169_vm0, %v16478_v0  ;;  %171 = vst.msk [vmem:[#allocation2 + $0x8] sm:$0xff] (!%p16210_p3), %vm169_vm0, %v16478_v0 }
  0x58   : > { %s158_s21 = scalar_lea.vmem [#allocation6], %s16652_s17  ;;  %172 = vst.msk [vmem:[#allocation2 + $0x10] sm:$0xff] (!%p16210_p3), %vm169_vm0, %v16478_v0  ;;  %173 = vst.msk [vmem:[#allocation2 + $0x18] sm:$0xff] (!%p16210_p3), %vm169_vm0, %v16478_v0 }
  0x59   : > { %174 = vst.msk [vmem:[#allocation2 + $0x20] sm:$0xff] (!%p16210_p3), %vm169_vm0, %v16478_v0  ;;  %175 = vst.msk [vmem:[#allocation2 + $0x28] sm:$0xff] (!%p16210_p3), %vm169_vm0, %v16478_v0 }
  0x5a   : > { %176 = vst.msk [vmem:[#allocation2 + $0x30] sm:$0xff] (!%p16210_p3), %vm169_vm0, %v16478_v0  ;;  %177 = vst.msk [vmem:[#allocation2 + $0x38] sm:$0xff] (!%p16210_p3), %vm169_vm0, %v16478_v0 }
  0x5b   : > { %178 = vst.msk [vmem:[#allocation2 + $0x40] sm:$0xff] (!%p16210_p3), %vm169_vm0, %v16478_v0  ;;  %179 = vst.msk [vmem:[#allocation2 + $0x48] sm:$0xff] (!%p16210_p3), %vm169_vm0, %v16478_v0 }
  0x5c   : > { %180 = vst.msk [vmem:[#allocation2 + $0x50] sm:$0xff] (!%p16210_p3), %vm169_vm0, %v16478_v0  ;;  %181 = vst.msk [vmem:[#allocation2 + $0x58] sm:$0xff] (!%p16210_p3), %vm169_vm0, %v16478_v0 }
  0x5d   : > { %182 = vst.msk [vmem:[#allocation2 + $0x60] sm:$0xff] (!%p16210_p3), %vm169_vm0, %v16478_v0  ;;  %183 = vst.msk [vmem:[#allocation2 + $0x68] sm:$0xff] (!%p16210_p3), %vm169_vm0, %v16478_v0 }
  0x5e   : > { %184 = vst.msk [vmem:[#allocation2 + $0x70] sm:$0xff] %vm169_vm0, %v16478_v0  ;;  %185 = vst.msk [vmem:[#allocation2 + $0x78] sm:$0xff] %vm169_vm0, %v16478_v0 }
  0x5f   : > { %186 = vst.msk [vmem:[#allocation2 + $0x80] sm:$0xff] %vm169_vm0, %v16478_v0  ;;  %187 = vst.msk [vmem:[#allocation2 + $0x88] sm:$0xff] %vm169_vm0, %v16478_v0 }
  0x60   : > { %188 = vst.msk [vmem:[#allocation2 + $0x90] sm:$0xff] %vm169_vm0, %v16478_v0  ;;  %189 = vst.msk [vmem:[#allocation2 + $0x98] sm:$0xff] %vm169_vm0, %v16478_v0 }
  0x61   : > { %190 = vst.msk [vmem:[#allocation2 + $0xa0] sm:$0xff] %vm169_vm0, %v16478_v0  ;;  %191 = vst.msk [vmem:[#allocation2 + $0xa8] sm:$0xff] %vm169_vm0, %v16478_v0 }
  0x62   : > { %192 = vst.msk [vmem:[#allocation2 + $0xb0] sm:$0xff] %vm169_vm0, %v16478_v0  ;;  %193 = vst.msk [vmem:[#allocation2 + $0xb8] sm:$0xff] %vm169_vm0, %v16478_v0 }
  0x63   : > { %194 = vst.msk [vmem:[#allocation2 + $0xc0] sm:$0xff] %vm169_vm0, %v16478_v0  ;;  %195 = vst.msk [vmem:[#allocation2 + $0xc8] sm:$0xff] %vm169_vm0, %v16478_v0 }
  0x64   : > { %196 = vst.msk [vmem:[#allocation2 + $0xd0] sm:$0xff] %vm169_vm0, %v16478_v0  ;;  %197 = vst.msk [vmem:[#allocation2 + $0xd8] sm:$0xff] %vm169_vm0, %v16478_v0 }
  0x65   : > { %198 = vst.msk [vmem:[#allocation2 + $0xe0] sm:$0xff] %vm169_vm0, %v16478_v0  ;;  %199 = vst.msk [vmem:[#allocation2 + $0xe8] sm:$0xff] %vm169_vm0, %v16478_v0 }
  0x66   : > { %200 = vst.msk [vmem:[#allocation2 + $0xf0] sm:$0xff] %vm169_vm0, %v16478_v0  ;;  %201 = vst.msk [vmem:[#allocation2 + $0xf8] sm:$0xff] %vm169_vm0, %v16478_v0 }
  0x67   : > { %202 = vst.msk [vmem:[#allocation2 + $0x100] sm:$0xff] %vm169_vm0, %v16478_v0  ;;  %203 = vst.msk [vmem:[#allocation2 + $0x108] sm:$0xff] %vm169_vm0, %v16478_v0 }
  0x68   : > { %204 = vst.msk [vmem:[#allocation2 + $0x110] sm:$0xff] %vm169_vm0, %v16478_v0  ;;  %205 = vst.msk [vmem:[#allocation2 + $0x118] sm:$0xff] %vm169_vm0, %v16478_v0 }
  0x69   : > { %206 = vst.msk [vmem:[#allocation2 + $0x120] sm:$0xff] %vm169_vm0, %v16478_v0  ;;  %207 = vst.msk [vmem:[#allocation2 + $0x128] sm:$0xff] %vm169_vm0, %v16478_v0 }
  0x6a   : > { %208 = vst.msk [vmem:[#allocation2 + $0x130] sm:$0xff] %vm169_vm0, %v16478_v0  ;;  %209 = vst.msk [vmem:[#allocation2 + $0x138] sm:$0xff] %vm169_vm0, %v16478_v0 }
  0x6b PF: > { %p16211_p7 = scmp.ge.s32.totalorder %s16457_s12, 2 }
  0x6c   : > { %v366_v1 = vld [vmem:[%s16643_s14 + $0x4c0] sm:$0xff] (!%p16211_p7)  ;;  %v367_v2 = vld [vmem:[%s16643_s14 + $0x4c8] sm:$0xff] (!%p16211_p7)  ;;  %v368_v3 = vld [vmem:[%s16643_s14 + $0x4d0] sm:$0xff] (!%p16211_p7)  ;;  %vm6414_vm1 = vcmask (!%p16211_p7), 7168  }
  0x6d   : > { %213 = sbr.rel (%p16211_p7) target bundleno = 1380 (0x564), region = 36  ;;  %v3448_v4 = vadd.f32 (!%p16211_p7), %v367_v2, %v366_v1  ;;  %v369_v5 = vld [vmem:[%s16643_s14 + $0x4d8] sm:$0xff] (!%p16211_p7)  ;;  %v370_v7 = vld [vmem:[%s16643_s14 + $0x4e0] sm:$0xff] (!%p16211_p7)  ;;  %v371_v9 = vld [vmem:[%s16643_s14 + $0x4e8] sm:$0xff] (!%p16211_p7) }
  0x6e   : > { %v372_v11 = vld [vmem:[%s16643_s14 + $0x4f0] sm:$0xff] (!%p16211_p7)  ;;  %v373_v13 = vld [vmem:[%s16643_s14 + $0x4f8] sm:$0xff] (!%p16211_p7)  ;;  %v374_v15 = vld [vmem:[%s16643_s14 + $0x500] sm:$0xff] (!%p16211_p7) }
  0x6f   : > { %v3449_v6 = vadd.f32 (!%p16211_p7), %v3448_v4, %v368_v3  ;;  %v375_v17 = vld [vmem:[%s16643_s14 + $0x508] sm:$0xff] (!%p16211_p7)  ;;  %v376_v19 = vld [vmem:[%s16643_s14 + $0x510] sm:$0xff] (!%p16211_p7)  ;;  %v377_v21 = vld [vmem:[%s16643_s14 + $0x518] sm:$0xff] (!%p16211_p7) }
  0x70   : > { %v378_v23 = vld [vmem:[%s16643_s14 + $0x520] sm:$0xff] (!%p16211_p7)  ;;  %v379_v25 = vld [vmem:[%s16643_s14 + $0x528] sm:$0xff] (!%p16211_p7)  ;;  %v380_v27 = vld [vmem:[%s16643_s14 + $0x530] sm:$0xff] (!%p16211_p7) }
  0x71   : > { %v3450_v8 = vadd.f32 (!%p16211_p7), %v3449_v6, %v369_v5  ;;  %v214_v29 = vld [vmem:[%s16643_s14] sm:$0xff] (!%p16211_p7)  ;;  %v215_v30 = vld [vmem:[%s16643_s14 + $0x8] sm:$0xff] (!%p16211_p7)  ;;  %v381_v31 = vld [vmem:[%s16643_s14 + $0x538] sm:$0xff] (!%p16211_p7) }
  0x72   : > { %v216_v32 = vld [vmem:[%s16643_s14 + $0x10] sm:$0xff] (!%p16211_p7)  ;;  %v3294_v33 = vadd.f32 (!%p16211_p7), %v215_v30, %v214_v29  ;;  %v217_v35 = vld [vmem:[%s16643_s14 + $0x18] sm:$0xff] (!%p16211_p7)  ;;  %v382_v36 = vld [vmem:[%s16643_s14 + $0x540] sm:$0xff] (!%p16211_p7) }
  0x73   : > { %v3451_v10 = vadd.f32 (!%p16211_p7), %v3450_v8, %v370_v7  ;;  %v218_v39 = vld [vmem:[%s16643_s14 + $0x20] sm:$0xff] (!%p16211_p7)  ;;  %v383_v40 = vld [vmem:[%s16643_s14 + $0x548] sm:$0xff] (!%p16211_p7)  ;;  %v384_v44 = vld [vmem:[%s16643_s14 + $0x550] sm:$0xff] (!%p16211_p7) }
  0x74   : > { %v3295_v37 = vadd.f32 %v3294_v33, %v216_v32  ;;  %v219_v43 = vld [vmem:[%s16643_s14 + $0x28] sm:$0xff]  ;;  %v220_v47 = vld [vmem:[%s16643_s14 + $0x30] sm:$0xff]  ;;  %v385_v48 = vld [vmem:[%s16643_s14 + $0x558] sm:$0xff] }
  0x75   : > { %v3452_v12 = vadd.f32 %v3451_v10, %v371_v9  ;;  %v221_v51 = vld [vmem:[%s16643_s14 + $0x38] sm:$0xff]  ;;  %v386_v52 = vld [vmem:[%s16643_s14 + $0x560] sm:$0xff]  ;;  %v387_v56 = vld [vmem:[%s16643_s14 + $0x568] sm:$0xff] }
  0x76   : > { %v3296_v41 = vadd.f32 %v3295_v37, %v217_v35  ;;  %v222_v55 = vld [vmem:[%s16643_s14 + $0x40] sm:$0xff]  ;;  %v223_v59 = vld [vmem:[%s16643_s14 + $0x48] sm:$0xff]  ;;  %v388_v60 = vld [vmem:[%s16643_s14 + $0x570] sm:$0xff] }
  0x77   : > { %v3453_v14 = vadd.f32 %v3452_v12, %v372_v11  ;;  %v224_v63 = vld [vmem:[%s16643_s14 + $0x50] sm:$0xff]  ;;  %v389_v0 = vld [vmem:[%s16643_s14 + $0x578] sm:$0xff]  ;;  %v390_v4 = vld [vmem:[%s16643_s14 + $0x580] sm:$0xff] }
  0x78   : > { %v3297_v45 = vadd.f32 %v3296_v41, %v218_v39  ;;  %v225_v3 = vld [vmem:[%s16643_s14 + $0x58] sm:$0xff]  ;;  %v226_v7 = vld [vmem:[%s16643_s14 + $0x60] sm:$0xff]  ;;  %v391_v8 = vld [vmem:[%s16643_s14 + $0x588] sm:$0xff] }
  0x79   : > { %v3454_v16 = vadd.f32 %v3453_v14, %v373_v13  ;;  %v227_v11 = vld [vmem:[%s16643_s14 + $0x68] sm:$0xff]  ;;  %v392_v12 = vld [vmem:[%s16643_s14 + $0x590] sm:$0xff]  ;;  %v397_v41 = vld [vmem:[%s16643_s14 + $0x5b8] sm:$0xff] }
  0x7a   : > { %v3298_v49 = vadd.f32 %v3297_v45, %v219_v43  ;;  %v395_v29 = vld [vmem:[%s16643_s14 + $0x5a8] sm:$0xff]  ;;  %v396_v35 = vld [vmem:[%s16643_s14 + $0x5b0] sm:$0xff]  ;;  %v233_v45 = vld [vmem:[%s16643_s14 + $0x98] sm:$0xff] }
  0x7b   : > { %v3455_v18 = vadd.f32 %v3454_v16, %v374_v15  ;;  %v228_v15 = vld [vmem:[%s16643_s14 + $0x70] sm:$0xff]  ;;  %v393_v16 = vld [vmem:[%s16643_s14 + $0x598] sm:$0xff]  ;;  %v231_v33 = vld [vmem:[%s16643_s14 + $0x88] sm:$0xff] }
  0x7c   : > { %v3299_v53 = vadd.f32 %v3298_v49, %v220_v47  ;;  %v232_v39 = vld [vmem:[%s16643_s14 + $0x90] sm:$0xff]  ;;  %v398_v47 = vld [vmem:[%s16643_s14 + $0x5c0] sm:$0xff] }
  0x7d   : > { %v3456_v20 = vadd.f32 %v3455_v18, %v375_v17  ;;  %v442_v18 = vld [vmem:[%s16643_s14 + $0x720] sm:$0xff] }
  0x7e   : > { %v3300_v57 = vadd.f32 %v3299_v53, %v221_v51  ;;  %v234_v51 = vld [vmem:[%s16643_s14 + $0xa0] sm:$0xff]  ;;  %v399_v53 = vld [vmem:[%s16643_s14 + $0x5c8] sm:$0xff] }
  0x7f   : > { %v3457_v22 = vadd.f32 %v3456_v20, %v376_v19  ;;  %v229_v20 = vld [vmem:[%s16643_s14 + $0x78] sm:$0xff] }
  0x80   : > { %v3301_v61 = vadd.f32 %v3300_v57, %v222_v55  ;;  %v235_v57 = vld [vmem:[%s16643_s14 + $0xa8] sm:$0xff] }
  0x81   : > { %v3458_v24 = vadd.f32 %v3457_v22, %v377_v21  ;;  %v443_v21 = vld [vmem:[%s16643_s14 + $0x728] sm:$0xff]  ;;  %v444_v22 = vld [vmem:[%s16643_s14 + $0x730] sm:$0xff] }
  0x82   : > { %v3302_v1 = vadd.f32 %v3301_v61, %v223_v59  ;;  %v400_v59 = vld [vmem:[%s16643_s14 + $0x5d0] sm:$0xff] }
  0x83   : > { %v3459_v26 = vadd.f32 %v3458_v24, %v378_v23  ;;  %v394_v23 = vld [vmem:[%s16643_s14 + $0x5a0] sm:$0xff] }
  0x84   : > { %v3303_v5 = vadd.f32 %v3302_v1, %v224_v63  ;;  %v236_v63 = vld [vmem:[%s16643_s14 + $0xb0] sm:$0xff]  ;;  %v401_v1 = vld [vmem:[%s16643_s14 + $0x5d8] sm:$0xff] }
  0x85   : > { %v3460_v28 = vadd.f32 %v3459_v26, %v379_v25  ;;  %v3525_v25 = vadd.f32 %v443_v21, %v442_v18  ;;  %v454_v18 = vld [vmem:[%s16643_s14 + $0x780] sm:$0xff] }
  0x86   : > { %v3304_v9 = vadd.f32 %v3303_v5, %v225_v3  ;;  %v237_v5 = vld [vmem:[%s16643_s14 + $0xb8] sm:$0xff] }
  0x87   : > { %v3461_v34 = vadd.f32 %v3460_v28, %v380_v27  ;;  %v230_v27 = vld [vmem:[%s16643_s14 + $0x80] sm:$0xff]  ;;  %v445_v28 = vld [vmem:[%s16643_s14 + $0x738] sm:$0xff] }
  0x88   : > { %v3305_v13 = vadd.f32 %v3304_v9, %v226_v7  ;;  %v402_v7 = vld [vmem:[%s16643_s14 + $0x5e0] sm:$0xff] }
  0x89   : > { %v3462_v38 = vadd.f32 %v3461_v34, %v381_v31  ;;  %v3526_v31 = vadd.f32 %v3525_v25, %v444_v22  ;;  %v446_v34 = vld [vmem:[%s16643_s14 + $0x740] sm:$0xff]  ;;  %v405_v25 = vld [vmem:[%s16643_s14 + $0x5f8] sm:$0xff] }
  0x8a   : > { %v3306_v17 = vadd.f32 %v3305_v13, %v227_v11  ;;  %v238_v11 = vld [vmem:[%s16643_s14 + $0xc0] sm:$0xff]  ;;  %v403_v13 = vld [vmem:[%s16643_s14 + $0x5e8] sm:$0xff] }
  0x8b   : > { %v3463_v42 = vadd.f32 %v3462_v38, %v382_v36  ;;  %v3527_v37 = vadd.f32 %v3526_v31, %v445_v28  ;;  %v406_v28 = vld [vmem:[%s16643_s14 + $0x600] sm:$0xff]  ;;  %v456_v31 = vld [vmem:[%s16643_s14 + $0x790] sm:$0xff] }
  0x8c   : > { %v3307_v24 = vadd.f32 %v3306_v17, %v228_v15  ;;  %v239_v17 = vld [vmem:[%s16643_s14 + $0xc8] sm:$0xff] }
  0x8d   : > { %v3464_v46 = vadd.f32 %v3463_v42, %v383_v40  ;;  %v447_v40 = vld [vmem:[%s16643_s14 + $0x748] sm:$0xff]  ;;  %v3528_v43 = vadd.f32 %v3527_v37, %v446_v34  ;;  %v290_v34 = vld [vmem:[%s16643_s14 + $0x260] sm:$0xff] }
  0x8e   : > { %v3308_v30 = vadd.f32 %v3307_v24, %v229_v20  ;;  %v455_v24 = vld [vmem:[%s16643_s14 + $0x788] sm:$0xff] }
  0x8f   : > { %v3465_v50 = vadd.f32 %v3464_v46, %v384_v44  ;;  %v448_v46 = vld [vmem:[%s16643_s14 + $0x750] sm:$0xff]  ;;  %v3529_v49 = vadd.f32 %v3528_v43, %v447_v40 }
  0x90   : > { %v3309_v36 = vadd.f32 %v3308_v30, %v230_v27  ;;  %v241_v30 = vld [vmem:[%s16643_s14 + $0xd8] sm:$0xff] }
  0x91   : > { %v3466_v54 = vadd.f32 %v3465_v50, %v385_v48  ;;  %v3530_v55 = vadd.f32 %v3529_v49, %v448_v46  ;;  %v243_v46 = vld [vmem:[%s16643_s14 + $0xe8] sm:$0xff]  ;;  %v408_v49 = vld [vmem:[%s16643_s14 + $0x610] sm:$0xff] }
  0x92   : > { %v3310_v42 = vadd.f32 %v3309_v36, %v231_v33  ;;  %v292_v36 = vld [vmem:[%s16643_s14 + $0x270] sm:$0xff] }
  0x93   : > { %v3467_v58 = vadd.f32 %v3466_v54, %v386_v52  ;;  %v449_v52 = vld [vmem:[%s16643_s14 + $0x758] sm:$0xff] }
  0x94   : > { %v3311_v48 = vadd.f32 %v3310_v42, %v232_v39  ;;  %v3531_v61 = vadd.f32 %v3530_v55, %v449_v52  ;;  %v457_v39 = vld [vmem:[%s16643_s14 + $0x798] sm:$0xff]  ;;  %v294_v52 = vld [vmem:[%s16643_s14 + $0x280] sm:$0xff]  ;;  %v459_v55 = vld [vmem:[%s16643_s14 + $0x7a8] sm:$0xff] }
  0x95   : > { %v3468_v62 = vadd.f32 %v3467_v58, %v387_v56  ;;  %v450_v58 = vld [vmem:[%s16643_s14 + $0x760] sm:$0xff] }
  0x96   : > { %v3312_v54 = vadd.f32 %v3311_v48, %v233_v45  ;;  %v3532_v3 = vadd.f32 %v3531_v61, %v450_v58 }
  0x97   : > { %v3469_v2 = vadd.f32 %v3468_v62, %v388_v60 }
  0x98   : > { %v3313_v60 = vadd.f32 %v3312_v54, %v234_v51  ;;  %v244_v54 = vld [vmem:[%s16643_s14 + $0xf0] sm:$0xff] }
  0x99   : > { %v3470_v6 = vadd.f32 %v3469_v2, %v389_v0  ;;  %v451_v0 = vld [vmem:[%s16643_s14 + $0x768] sm:$0xff] }
  0x9a   : > { %v3314_v2 = vadd.f32 %v3313_v60, %v235_v57  ;;  %v3533_v9 = vadd.f32 %v3532_v3, %v451_v0  ;;  %v409_v57 = vld [vmem:[%s16643_s14 + $0x618] sm:$0xff]  ;;  %v295_v60 = vld [vmem:[%s16643_s14 + $0x288] sm:$0xff] }
  0x9b   : > { %v3471_v10 = vadd.f32 %v3470_v6, %v390_v4  ;;  %v452_v6 = vld [vmem:[%s16643_s14 + $0x770] sm:$0xff] }
  0x9c   : > { %v3534_v15 = vadd.f32 %v3533_v9, %v452_v6  ;;  %v246_v6 = vld [vmem:[%s16643_s14 + $0x100] sm:$0xff]  ;;  %v411_v9 = vld [vmem:[%s16643_s14 + $0x628] sm:$0xff] }
  0x9d   : > { %v3472_v14 = vadd.f32 %v3471_v10, %v391_v8  ;;  %v3315_v8 = vadd.f32 %v3314_v2, %v236_v63  ;;  %v460_v63 = vld [vmem:[%s16643_s14 + $0x7b0] sm:$0xff] }
  0x9f   : > { %v3473_v19 = vadd.f32 %v3472_v14, %v392_v12  ;;  %v453_v12 = vld [vmem:[%s16643_s14 + $0x778] sm:$0xff]  ;;  %v3316_v14 = vadd.f32 %v3315_v8, %v237_v5 }
  0xa0   : > { %v3535_v21 = vadd.f32 %v3534_v15, %v453_v12  ;;  %v297_v12 = vld [vmem:[%s16643_s14 + $0x298] sm:$0xff]  ;;  %v462_v15 = vld [vmem:[%s16643_s14 + $0x7c0] sm:$0xff] }
  0xa1   : > { %v3474_v26 = vadd.f32 %v3473_v19, %v393_v16  ;;  %v404_v19 = vld [vmem:[%s16643_s14 + $0x5f0] sm:$0xff]  ;;  %v3317_v20 = vadd.f32 %v3316_v14, %v238_v11  ;;  %v247_v14 = vld [vmem:[%s16643_s14 + $0x108] sm:$0xff] }
  0xa2   : > { %v3536_v27 = vadd.f32 %v3535_v21, %v454_v18 }
  0xa3   : > { %v3475_v32 = vadd.f32 %v3474_v26, %v394_v23  ;;  %v240_v23 = vld [vmem:[%s16643_s14 + $0xd0] sm:$0xff]  ;;  %v3318_v26 = vadd.f32 %v3317_v20, %v239_v17  ;;  %v298_v20 = vld [vmem:[%s16643_s14 + $0x2a0] sm:$0xff] }
  0xa4   : > { %v3537_v33 = vadd.f32 %v3536_v27, %v455_v24  ;;  %v412_v17 = vld [vmem:[%s16643_s14 + $0x630] sm:$0xff] }
  0xa5   : > { %v3476_v38 = vadd.f32 %v3475_v32, %v395_v29  ;;  %v3319_v32 = vadd.f32 %v3318_v26, %v240_v23  ;;  %v463_v23 = vld [vmem:[%s16643_s14 + $0x7c8] sm:$0xff] }
  0xa6   : > { %v3538_v43 = vadd.f32 %v3537_v33, %v456_v31  ;;  %v464_v31 = vld [vmem:[%s16643_s14 + $0x7d0] sm:$0xff]  ;;  %v414_v33 = vld [vmem:[%s16643_s14 + $0x640] sm:$0xff] }
  0xa7   : > { %v3477_v44 = vadd.f32 %v3476_v38, %v396_v35  ;;  %v291_v35 = vld [vmem:[%s16643_s14 + $0x268] sm:$0xff]  ;;  %v242_v38 = vld [vmem:[%s16643_s14 + $0xe0] sm:$0xff]  ;;  %v3320_v42 = vadd.f32 %v3319_v32, %v241_v30  ;;  %v249_v30 = vld [vmem:[%s16643_s14 + $0x118] sm:$0xff] }
  0xa8   : > { %v3371_v40 = vadd.f32 %v291_v35, %v290_v34  ;;  %v3539_v51 = vadd.f32 %v3538_v43, %v457_v39  ;;  %v465_v39 = vld [vmem:[%s16643_s14 + $0x7d8] sm:$0xff] }
  0xa9   : > { %v3478_v50 = vadd.f32 %v3477_v44, %v397_v41  ;;  %v407_v41 = vld [vmem:[%s16643_s14 + $0x608] sm:$0xff]  ;;  %v293_v44 = vld [vmem:[%s16643_s14 + $0x278] sm:$0xff] }
  0xaa   : > { %v3372_v48 = vadd.f32 %v3371_v40, %v292_v36  ;;  %v300_v36 = vld [vmem:[%s16643_s14 + $0x2b0] sm:$0xff] }
  0xab   : > { %v3479_v56 = vadd.f32 %v3478_v50, %v398_v47  ;;  %v458_v47 = vld [vmem:[%s16643_s14 + $0x7a0] sm:$0xff]  ;;  %v3321_v50 = vadd.f32 %v3320_v42, %v242_v38 }
  0xac   : > { %v250_v38 = vld [vmem:[%s16643_s14 + $0x120] sm:$0xff] }
  0xad   : > { %v3480_v62 = vadd.f32 %v3479_v56, %v399_v53  ;;  %v3373_v56 = vadd.f32 %v3372_v48, %v293_v44  ;;  %v3322_v58 = vadd.f32 %v3321_v50, %v243_v46  ;;  %v301_v44 = vld [vmem:[%s16643_s14 + $0x2b8] sm:$0xff]  ;;  %v251_v46 = vld [vmem:[%s16643_s14 + $0x128] sm:$0xff] }
  0xaf   : > { %v3481_v4 = vadd.f32 %v3480_v62, %v400_v59  ;;  %v3540_v59 = vadd.f32 %v3539_v51, %v458_v47  ;;  %v245_v62 = vld [vmem:[%s16643_s14 + $0xf8] sm:$0xff]  ;;  %v3374_v0 = vadd.f32 %v3373_v56, %v294_v52  ;;  %v3323_v2 = vadd.f32 %v3322_v58, %v244_v54  ;;  %v466_v47 = vld [vmem:[%s16643_s14 + $0x7e0] sm:$0xff]  ;;  %v252_v54 = vld [vmem:[%s16643_s14 + $0x130] sm:$0xff] }
  0xb0   : > { %v302_v52 = vld [vmem:[%s16643_s14 + $0x2c0] sm:$0xff] }
  0xb1   : > { %v3482_v10 = vadd.f32 %v3481_v4, %v401_v1  ;;  %v410_v1 = vld [vmem:[%s16643_s14 + $0x620] sm:$0xff]  ;;  %v3541_v3 = vadd.f32 %v3540_v59, %v459_v55  ;;  %v296_v4 = vld [vmem:[%s16643_s14 + $0x290] sm:$0xff]  ;;  %v3375_v8 = vadd.f32 %v3374_v0, %v295_v60  ;;  %v467_v55 = vld [vmem:[%s16643_s14 + $0x7e8] sm:$0xff] }
  0xb2   : > { %v303_v60 = vld [vmem:[%s16643_s14 + $0x2c8] sm:$0xff] }
  0xb3   : > { %v3483_v16 = vadd.f32 %v3482_v10, %v402_v7  ;;  %v461_v7 = vld [vmem:[%s16643_s14 + $0x7b8] sm:$0xff]  ;;  %v3324_v10 = vadd.f32 %v3323_v2, %v245_v62  ;;  %v3542_v11 = vadd.f32 %v3541_v3, %v460_v63  ;;  %v468_v63 = vld [vmem:[%s16643_s14 + $0x7f0] sm:$0xff]  ;;  %v254_v2 = vld [vmem:[%s16643_s14 + $0x140] sm:$0xff] }
  0xb4   : > { %v253_v62 = vld [vmem:[%s16643_s14 + $0x138] sm:$0xff] }
  0xb5   : > { %v3484_v22 = vadd.f32 %v3483_v16, %v403_v13  ;;  %v3376_v16 = vadd.f32 %v3375_v8, %v296_v4  ;;  %v3325_v18 = vadd.f32 %v3324_v10, %v246_v6  ;;  %v595_v10 = vld [vmem:[%s16643_s14 + $0xbe8] sm:$0xff] }
  0xb7   : > { %v3485_v29 = vadd.f32 %v3484_v22, %v404_v19  ;;  %v3543_v19 = vadd.f32 %v3542_v11, %v461_v7  ;;  %v248_v22 = vld [vmem:[%s16643_s14 + $0x110] sm:$0xff]  ;;  %v3377_v24 = vadd.f32 %v3376_v16, %v297_v12  ;;  %v3326_v26 = vadd.f32 %v3325_v18, %v247_v14  ;;  %v469_v7 = vld [vmem:[%s16643_s14 + $0x7f8] sm:$0xff]  ;;  %v419_v11 = vld [vmem:[%s16643_s14 + $0x668] sm:$0xff] }
  0xb8   : > { %v305_v14 = vld [vmem:[%s16643_s14 + $0x2d8] sm:$0xff]  ;;  %v255_v18 = vld [vmem:[%s16643_s14 + $0x148] sm:$0xff] }
  0xb9   : > { %v3486_v37 = vadd.f32 %v3485_v29, %v405_v25  ;;  %v413_v25 = vld [vmem:[%s16643_s14 + $0x638] sm:$0xff]  ;;  %v3544_v27 = vadd.f32 %v3543_v19, %v462_v15  ;;  %v3378_v32 = vadd.f32 %v3377_v24, %v298_v20  ;;  %v3327_v34 = vadd.f32 %v3326_v26, %v248_v22  ;;  %v596_v15 = vld [vmem:[%s16643_s14 + $0xbf0] sm:$0xff]  ;;  %v470_v19 = vld [vmem:[%s16643_s14 + $0x800] sm:$0xff] }
  0xba   : > { %v420_v22 = vld [vmem:[%s16643_s14 + $0x670] sm:$0xff] }
  0xbb   : > { %v3487_v45 = vadd.f32 %v3486_v37, %v406_v28  ;;  %v299_v28 = vld [vmem:[%s16643_s14 + $0x2a8] sm:$0xff]  ;;  %v3545_v35 = vadd.f32 %v3544_v27, %v463_v23  ;;  %v3328_v42 = vadd.f32 %v3327_v34, %v249_v30 }
  0xbc   : > { %v3379_v40 = vadd.f32 %v3378_v32, %v299_v28  ;;  %v256_v28 = vld [vmem:[%s16643_s14 + $0x150] sm:$0xff]  ;;  %v421_v32 = vld [vmem:[%s16643_s14 + $0x678] sm:$0xff] }
  0xbd   : > { %v3488_v53 = vadd.f32 %v3487_v45, %v407_v41  ;;  %v415_v41 = vld [vmem:[%s16643_s14 + $0x648] sm:$0xff]  ;;  %v3546_v43 = vadd.f32 %v3545_v35, %v464_v31  ;;  %v3329_v50 = vadd.f32 %v3328_v42, %v250_v38  ;;  %v598_v31 = vld [vmem:[%s16643_s14 + $0xc00] sm:$0xff]  ;;  %v257_v38 = vld [vmem:[%s16643_s14 + $0x158] sm:$0xff] }
  0xbe   : > { %v3380_v48 = vadd.f32 %v3379_v40, %v300_v36  ;;  %v307_v35 = vld [vmem:[%s16643_s14 + $0x2e8] sm:$0xff]  ;;  %v422_v42 = vld [vmem:[%s16643_s14 + $0x680] sm:$0xff] }
  0xbf   : > { %v3489_v61 = vadd.f32 %v3488_v53, %v408_v49  ;;  %v416_v49 = vld [vmem:[%s16643_s14 + $0x650] sm:$0xff]  ;;  %v3547_v51 = vadd.f32 %v3546_v43, %v465_v39  ;;  %v3330_v58 = vadd.f32 %v3329_v50, %v251_v46 }
  0xc0   : > { %v3381_v56 = vadd.f32 %v3380_v48, %v301_v44  ;;  %v472_v39 = vld [vmem:[%s16643_s14 + $0x810] sm:$0xff]  ;;  %v258_v48 = vld [vmem:[%s16643_s14 + $0x160] sm:$0xff] }
  0xc1   : > { %v3490_v5 = vadd.f32 %v3489_v61, %v409_v57  ;;  %v417_v57 = vld [vmem:[%s16643_s14 + $0x658] sm:$0xff]  ;;  %v3548_v59 = vadd.f32 %v3547_v51, %v466_v47  ;;  %v3331_v3 = vadd.f32 %v3330_v58, %v252_v54  ;;  %v600_v51 = vld [vmem:[%s16643_s14 + $0xc10] sm:$0xff]  ;;  %v259_v58 = vld [vmem:[%s16643_s14 + $0x168] sm:$0xff] }
  0xc2   : > { %v3382_v0 = vadd.f32 %v3381_v56, %v302_v52  ;;  %v423_v52 = vld [vmem:[%s16643_s14 + $0x688] sm:$0xff] }
  0xc3   : > { %v3491_v13 = vadd.f32 %v3490_v5, %v410_v1  ;;  %v418_v1 = vld [vmem:[%s16643_s14 + $0x660] sm:$0xff]  ;;  %v3549_v4 = vadd.f32 %v3548_v59, %v467_v55  ;;  %v304_v5 = vld [vmem:[%s16643_s14 + $0x2d0] sm:$0xff]  ;;  %v3332_v12 = vadd.f32 %v3331_v3, %v253_v62  ;;  %v309_v55 = vld [vmem:[%s16643_s14 + $0x2f8] sm:$0xff] }
  0xc4   : > { %v3383_v8 = vadd.f32 %v3382_v0, %v303_v60  ;;  %v474_v59 = vld [vmem:[%s16643_s14 + $0x820] sm:$0xff]  ;;  %v424_v62 = vld [vmem:[%s16643_s14 + $0x690] sm:$0xff] }
  0xc5   : > { %v3492_v21 = vadd.f32 %v3491_v13, %v411_v9  ;;  %v594_v9 = vld [vmem:[%s16643_s14 + $0xbe0] sm:$0xff]  ;;  %v3550_v13 = vadd.f32 %v3549_v4, %v468_v63  ;;  %v3333_v23 = vadd.f32 %v3332_v12, %v254_v2  ;;  %v260_v4 = vld [vmem:[%s16643_s14 + $0x170] sm:$0xff] }
  0xc6   : > { %v3679_v16 = vadd.f32 %v595_v10, %v594_v9  ;;  %v3384_v20 = vadd.f32 %v3383_v8, %v304_v5  ;;  %v475_v5 = vld [vmem:[%s16643_s14 + $0x828] sm:$0xff]  ;;  %v425_v8 = vld [vmem:[%s16643_s14 + $0x698] sm:$0xff] }
  0xc7   : > { %v3493_v29 = vadd.f32 %v3492_v21, %v412_v17  ;;  %v597_v21 = vld [vmem:[%s16643_s14 + $0xbf8] sm:$0xff]  ;;  %v3551_v24 = vadd.f32 %v3550_v13, %v469_v7  ;;  %v602_v7 = vld [vmem:[%s16643_s14 + $0xc20] sm:$0xff] }
  0xc8   : > { %v3680_v26 = vadd.f32 %v3679_v16, %v596_v15  ;;  %v3385_v30 = vadd.f32 %v3384_v20, %v305_v14  ;;  %v261_v14 = vld [vmem:[%s16643_s14 + $0x178] sm:$0xff]  ;;  %v476_v15 = vld [vmem:[%s16643_s14 + $0x830] sm:$0xff] }
  0xc9   : > { %v3494_v37 = vadd.f32 %v3493_v29, %v413_v25  ;;  %v306_v25 = vld [vmem:[%s16643_s14 + $0x2e0] sm:$0xff]  ;;  %v471_v29 = vld [vmem:[%s16643_s14 + $0x808] sm:$0xff]  ;;  %v3552_v34 = vadd.f32 %v3551_v24, %v470_v19 }
  0xca   : > { %v3681_v36 = vadd.f32 %v3680_v26, %v597_v21  ;;  %v3386_v40 = vadd.f32 %v3385_v30, %v306_v25  ;;  %v312_v21 = vld [vmem:[%s16643_s14 + $0x310] sm:$0xff]  ;;  %v262_v24 = vld [vmem:[%s16643_s14 + $0x180] sm:$0xff]  ;;  %v477_v25 = vld [vmem:[%s16643_s14 + $0x838] sm:$0xff] }
  0xcb   : > { %v3495_v45 = vadd.f32 %v3494_v37, %v414_v33  ;;  %v3334_v33 = vadd.f32 %v3333_v23, %v255_v18  ;;  %v3553_v44 = vadd.f32 %v3552_v34, %v471_v29  ;;  %v426_v18 = vld [vmem:[%s16643_s14 + $0x6a0] sm:$0xff]  ;;  %v263_v34 = vld [vmem:[%s16643_s14 + $0x188] sm:$0xff] }
  0xcc   : > { %v3682_v46 = vadd.f32 %v3681_v36, %v598_v31  ;;  %v3387_v50 = vadd.f32 %v3386_v40, %v307_v35  ;;  %v313_v31 = vld [vmem:[%s16643_s14 + $0x318] sm:$0xff]  ;;  %v478_v35 = vld [vmem:[%s16643_s14 + $0x840] sm:$0xff] }
  0xcd   : > { %v3496_v53 = vadd.f32 %v3495_v45, %v415_v41  ;;  %v599_v41 = vld [vmem:[%s16643_s14 + $0xc08] sm:$0xff]  ;;  %v3335_v43 = vadd.f32 %v3334_v33, %v256_v28  ;;  %v308_v45 = vld [vmem:[%s16643_s14 + $0x2f0] sm:$0xff]  ;;  %v3554_v54 = vadd.f32 %v3553_v44, %v472_v39 }
  0xce   : > { %v3683_v56 = vadd.f32 %v3682_v46, %v599_v41  ;;  %v3388_v60 = vadd.f32 %v3387_v50, %v308_v45  ;;  %v427_v28 = vld [vmem:[%s16643_s14 + $0x6a8] sm:$0xff]  ;;  %v314_v41 = vld [vmem:[%s16643_s14 + $0x320] sm:$0xff]  ;;  %v264_v44 = vld [vmem:[%s16643_s14 + $0x190] sm:$0xff] }
  0xcf   : > { %v3497_v61 = vadd.f32 %v3496_v53, %v416_v49  ;;  %v473_v49 = vld [vmem:[%s16643_s14 + $0x818] sm:$0xff]  ;;  %v3336_v53 = vadd.f32 %v3335_v43, %v257_v38  ;;  %v428_v38 = vld [vmem:[%s16643_s14 + $0x6b0] sm:$0xff]  ;;  %v479_v45 = vld [vmem:[%s16643_s14 + $0x848] sm:$0xff] }
  0xd0   : > { %v3555_v0 = vadd.f32 %v3554_v54, %v473_v49  ;;  %v3684_v2 = vadd.f32 %v3683_v56, %v600_v51  ;;  %v430_v49 = vld [vmem:[%s16643_s14 + $0x6c0] sm:$0xff]  ;;  %v480_v56 = vld [vmem:[%s16643_s14 + $0x850] sm:$0xff] }
  0xd1   : > { %v3498_v6 = vadd.f32 %v3497_v61, %v417_v57  ;;  %v601_v61 = vld [vmem:[%s16643_s14 + $0xc18] sm:$0xff]  ;;  %v3337_v63 = vadd.f32 %v3336_v53, %v258_v48 }
  0xd2   : > { %v3556_v10 = vadd.f32 %v3555_v0, %v474_v59  ;;  %v3685_v12 = vadd.f32 %v3684_v2, %v601_v61  ;;  %v429_v48 = vld [vmem:[%s16643_s14 + $0x6b8] sm:$0xff]  ;;  %v431_v59 = vld [vmem:[%s16643_s14 + $0x6c8] sm:$0xff] }
  0xd3   : > { %v3499_v17 = vadd.f32 %v3498_v6, %v418_v1  ;;  %v310_v1 = vld [vmem:[%s16643_s14 + $0x300] sm:$0xff]  ;;  %v3389_v6 = vadd.f32 %v3388_v60, %v309_v55  ;;  %v3338_v9 = vadd.f32 %v3337_v63, %v259_v58  ;;  %v265_v55 = vld [vmem:[%s16643_s14 + $0x198] sm:$0xff]  ;;  %v607_v58 = vld [vmem:[%s16643_s14 + $0xc48] sm:$0xff] }
  0xd4   : > { %v3557_v20 = vadd.f32 %v3556_v10, %v475_v5  ;;  %v266_v60 = vld [vmem:[%s16643_s14 + $0x1a0] sm:$0xff]  ;;  %v316_v63 = vld [vmem:[%s16643_s14 + $0x330] sm:$0xff]  ;;  %v267_v2 = vld [vmem:[%s16643_s14 + $0x1a8] sm:$0xff] }
  0xd5   : > { %v3500_v27 = vadd.f32 %v3499_v17, %v419_v11  ;;  %v311_v11 = vld [vmem:[%s16643_s14 + $0x308] sm:$0xff]  ;;  %v3390_v16 = vadd.f32 %v3389_v6, %v310_v1  ;;  %v3339_v19 = vadd.f32 %v3338_v9, %v260_v4  ;;  %v608_v5 = vld [vmem:[%s16643_s14 + $0xc50] sm:$0xff]  ;;  %v317_v9 = vld [vmem:[%s16643_s14 + $0x338] sm:$0xff] }
  0xd6   : > { %v603_v17 = vld [vmem:[%s16643_s14 + $0xc28] sm:$0xff]  ;;  %v3558_v30 = vadd.f32 %v3557_v20, %v476_v15 }
  0xd7   : > { %v3501_v37 = vadd.f32 %v3500_v27, %v420_v22  ;;  %v3686_v22 = vadd.f32 %v3685_v12, %v602_v7  ;;  %v3391_v26 = vadd.f32 %v3390_v16, %v311_v11  ;;  %v604_v27 = vld [vmem:[%s16643_s14 + $0xc30] sm:$0xff]  ;;  %v3340_v29 = vadd.f32 %v3339_v19, %v261_v14  ;;  %v482_v7 = vld [vmem:[%s16643_s14 + $0x860] sm:$0xff]  ;;  %v609_v14 = vld [vmem:[%s16643_s14 + $0xc58] sm:$0xff] }
  0xd8   : > { %v3559_v40 = vadd.f32 %v3558_v30, %v477_v25  ;;  %v518_v11 = vld [vmem:[%s16643_s14 + $0x980] sm:$0xff]  ;;  %v519_v15 = vld [vmem:[%s16643_s14 + $0x988] sm:$0xff]  ;;  %v520_v16 = vld [vmem:[%s16643_s14 + $0x990] sm:$0xff] }
  0xd9   : > { %v3502_v47 = vadd.f32 %v3501_v37, %v421_v32  ;;  %v3687_v32 = vadd.f32 %v3686_v22, %v603_v17  ;;  %v3392_v36 = vadd.f32 %v3391_v26, %v312_v21  ;;  %v605_v37 = vld [vmem:[%s16643_s14 + $0xc38] sm:$0xff]  ;;  %v3341_v39 = vadd.f32 %v3340_v29, %v262_v24  ;;  %v432_v17 = vld [vmem:[%s16643_s14 + $0x6d0] sm:$0xff]  ;;  %v318_v21 = vld [vmem:[%s16643_s14 + $0x340] sm:$0xff] }
  0xda   : > { %v3560_v51 = vadd.f32 %v3559_v40, %v478_v35  ;;  %v483_v25 = vld [vmem:[%s16643_s14 + $0x868] sm:$0xff]  ;;  %v433_v29 = vld [vmem:[%s16643_s14 + $0x6d8] sm:$0xff]  ;;  %v522_v40 = vld [vmem:[%s16643_s14 + $0x9a0] sm:$0xff] }
  0xdb   : > { %v3503_v57 = vadd.f32 %v3502_v47, %v422_v42  ;;  %v3688_v42 = vadd.f32 %v3687_v32, %v604_v27  ;;  %v3393_v46 = vadd.f32 %v3392_v36, %v313_v31  ;;  %v606_v47 = vld [vmem:[%s16643_s14 + $0xc40] sm:$0xff]  ;;  %v3342_v50 = vadd.f32 %v3341_v39, %v263_v34  ;;  %v269_v30 = vld [vmem:[%s16643_s14 + $0x1b8] sm:$0xff]  ;;  %v611_v39 = vld [vmem:[%s16643_s14 + $0xc68] sm:$0xff] }
  0xdc   : > { %v610_v27 = vld [vmem:[%s16643_s14 + $0xc60] sm:$0xff] }
  0xdd   : > { %v3504_v3 = vadd.f32 %v3503_v57, %v423_v52  ;;  %v315_v52 = vld [vmem:[%s16643_s14 + $0x328] sm:$0xff]  ;;  %v3689_v53 = vadd.f32 %v3688_v42, %v605_v37  ;;  %v3394_v57 = vadd.f32 %v3393_v46, %v314_v41  ;;  %v3343_v61 = vadd.f32 %v3342_v50, %v264_v44  ;;  %v484_v37 = vld [vmem:[%s16643_s14 + $0x870] sm:$0xff]  ;;  %v434_v41 = vld [vmem:[%s16643_s14 + $0x6e0] sm:$0xff] }
  0xde   : > { %v270_v42 = vld [vmem:[%s16643_s14 + $0x1c0] sm:$0xff] }
  0xdf   : > { %v3505_v13 = vadd.f32 %v3504_v3, %v424_v62  ;;  %v3561_v62 = vadd.f32 %v3560_v51, %v479_v45  ;;  %v3690_v0 = vadd.f32 %v3689_v53, %v606_v47  ;;  %v481_v3 = vld [vmem:[%s16643_s14 + $0x858] sm:$0xff]  ;;  %v3395_v4 = vadd.f32 %v3394_v57, %v315_v52  ;;  %v320_v45 = vld [vmem:[%s16643_s14 + $0x350] sm:$0xff]  ;;  %v523_v52 = vld [vmem:[%s16643_s14 + $0x9a8] sm:$0xff] }
  0xe0   : > { %v3344_v6 = vadd.f32 %v3343_v61, %v265_v55  ;;  %v612_v51 = vld [vmem:[%s16643_s14 + $0xc70] sm:$0xff]  ;;  %v435_v53 = vld [vmem:[%s16643_s14 + $0x6e8] sm:$0xff]  ;;  %v321_v57 = vld [vmem:[%s16643_s14 + $0x358] sm:$0xff] }
  0xe1   : > { %v3506_v23 = vadd.f32 %v3505_v13, %v425_v8  ;;  %v3562_v8 = vadd.f32 %v3561_v62, %v480_v56  ;;  %v3691_v10 = vadd.f32 %v3690_v0, %v607_v58  ;;  %v3396_v13 = vadd.f32 %v3395_v4, %v316_v63  ;;  %v486_v61 = vld [vmem:[%s16643_s14 + $0x880] sm:$0xff]  ;;  %v613_v63 = vld [vmem:[%s16643_s14 + $0xc78] sm:$0xff]  ;;  %v524_v0 = vld [vmem:[%s16643_s14 + $0x9b0] sm:$0xff] }
  0xe2   : > { %v3345_v19 = vadd.f32 %v3344_v6, %v266_v60 }
  0xe3   : > { %v3507_v33 = vadd.f32 %v3506_v23, %v426_v18  ;;  %v268_v18 = vld [vmem:[%s16643_s14 + $0x1b0] sm:$0xff]  ;;  %v3563_v20 = vadd.f32 %v3562_v8, %v481_v3  ;;  %v3692_v22 = vadd.f32 %v3691_v10, %v608_v5  ;;  %v3602_v23 = vadd.f32 %v519_v15, %v518_v11  ;;  %v322_v5 = vld [vmem:[%s16643_s14 + $0x360] sm:$0xff] }
  0xe4   : > { %v3397_v26 = vadd.f32 %v3396_v13, %v317_v9  ;;  %v3346_v31 = vadd.f32 %v3345_v19, %v267_v2  ;;  %v272_v2 = vld [vmem:[%s16643_s14 + $0x1d0] sm:$0xff]  ;;  %v487_v9 = vld [vmem:[%s16643_s14 + $0x888] sm:$0xff]  ;;  %v614_v11 = vld [vmem:[%s16643_s14 + $0xc80] sm:$0xff] }
  0xe5   : > { %v3508_v43 = vadd.f32 %v3507_v33, %v427_v28  ;;  %v521_v28 = vld [vmem:[%s16643_s14 + $0x998] sm:$0xff]  ;;  %v3564_v32 = vadd.f32 %v3563_v20, %v482_v7  ;;  %v319_v33 = vld [vmem:[%s16643_s14 + $0x348] sm:$0xff]  ;;  %v3693_v34 = vadd.f32 %v3692_v22, %v609_v14  ;;  %v3603_v35 = vadd.f32 %v3602_v23, %v520_v16 }
  0xe6   : > { %v437_v13 = vld [vmem:[%s16643_s14 + $0x6f8] sm:$0xff]  ;;  %v615_v23 = vld [vmem:[%s16643_s14 + $0xc88] sm:$0xff] }
  0xe7   : > { %v3509_v54 = vadd.f32 %v3508_v43, %v428_v38  ;;  %v3398_v38 = vadd.f32 %v3397_v26, %v318_v21  ;;  %v3347_v43 = vadd.f32 %v3346_v31, %v268_v18  ;;  %v3565_v44 = vadd.f32 %v3564_v32, %v483_v25  ;;  %v273_v14 = vld [vmem:[%s16643_s14 + $0x1d8] sm:$0xff]  ;;  %v488_v21 = vld [vmem:[%s16643_s14 + $0x890] sm:$0xff]  ;;  %v438_v25 = vld [vmem:[%s16643_s14 + $0x700] sm:$0xff] }
  0xe8   : > { %v3694_v46 = vadd.f32 %v3693_v34, %v610_v27  ;;  %v3604_v47 = vadd.f32 %v3603_v35, %v521_v28  ;;  %v274_v26 = vld [vmem:[%s16643_s14 + $0x1e0] sm:$0xff]  ;;  %v616_v35 = vld [vmem:[%s16643_s14 + $0xc90] sm:$0xff] }
  0xe9   : > { %v3510_v1 = vadd.f32 %v3509_v54, %v429_v48  ;;  %v3399_v50 = vadd.f32 %v3398_v38, %v319_v33  ;;  %v271_v54 = vld [vmem:[%s16643_s14 + $0x1c8] sm:$0xff]  ;;  %v3348_v55 = vadd.f32 %v3347_v43, %v269_v30  ;;  %v3566_v56 = vadd.f32 %v3565_v44, %v484_v37  ;;  %v489_v33 = vld [vmem:[%s16643_s14 + $0x898] sm:$0xff] }
  0xea   : > { %v3695_v58 = vadd.f32 %v3694_v46, %v611_v39  ;;  %v439_v37 = vld [vmem:[%s16643_s14 + $0x708] sm:$0xff] }
  0xeb   : > { %v3511_v12 = vadd.f32 %v3510_v1, %v430_v49  ;;  %v485_v49 = vld [vmem:[%s16643_s14 + $0x878] sm:$0xff]  ;;  %v3400_v62 = vadd.f32 %v3399_v50, %v320_v45  ;;  %v436_v1 = vld [vmem:[%s16643_s14 + $0x6f0] sm:$0xff]  ;;  %v3349_v3 = vadd.f32 %v3348_v55, %v270_v42  ;;  %v275_v38 = vld [vmem:[%s16643_s14 + $0x1e8] sm:$0xff] }
  0xec   : > { %v3567_v4 = vadd.f32 %v3566_v56, %v485_v49  ;;  %v3696_v6 = vadd.f32 %v3695_v58, %v612_v51  ;;  %v490_v45 = vld [vmem:[%s16643_s14 + $0x8a0] sm:$0xff]  ;;  %v440_v49 = vld [vmem:[%s16643_s14 + $0x710] sm:$0xff] }
  0xed   : > { %v3512_v24 = vadd.f32 %v3511_v12, %v431_v59  ;;  %v3605_v59 = vadd.f32 %v3604_v47, %v522_v40  ;;  %v3401_v10 = vadd.f32 %v3400_v62, %v321_v57  ;;  %v525_v12 = vld [vmem:[%s16643_s14 + $0x9b8] sm:$0xff]  ;;  %v3350_v15 = vadd.f32 %v3349_v3, %v271_v54  ;;  %v276_v50 = vld [vmem:[%s16643_s14 + $0x1f0] sm:$0xff]  ;;  %v491_v57 = vld [vmem:[%s16643_s14 + $0x8a8] sm:$0xff] }
  0xee   : > { %v3568_v16 = vadd.f32 %v3567_v4, %v486_v61  ;;  %v3697_v18 = vadd.f32 %v3696_v6, %v613_v63  ;;  %v617_v47 = vld [vmem:[%s16643_s14 + $0xc98] sm:$0xff] }
  0xef   : > { %v3513_v36 = vadd.f32 %v3512_v24, %v432_v17  ;;  %v3606_v7 = vadd.f32 %v3605_v59, %v523_v52  ;;  %v323_v17 = vld [vmem:[%s16643_s14 + $0x368] sm:$0xff]  ;;  %v3402_v22 = vadd.f32 %v3401_v10, %v322_v5  ;;  %v526_v24 = vld [vmem:[%s16643_s14 + $0x9c0] sm:$0xff]  ;;  %v3351_v27 = vadd.f32 %v3350_v15, %v272_v2  ;;  %v441_v61 = vld [vmem:[%s16643_s14 + $0x718] sm:$0xff] }
  0xf0   : > { %v3569_v28 = vadd.f32 %v3568_v16, %v487_v9  ;;  %v3698_v30 = vadd.f32 %v3697_v18, %v614_v11  ;;  %v618_v59 = vld [vmem:[%s16643_s14 + $0xca0] sm:$0xff]  ;;  %v277_v62 = vld [vmem:[%s16643_s14 + $0x1f8] sm:$0xff]  ;;  %v492_v5 = vld [vmem:[%s16643_s14 + $0x8b0] sm:$0xff] }
  0xf1   : > { %v3514_v48 = vadd.f32 %v3513_v36, %v433_v29  ;;  %v3607_v19 = vadd.f32 %v3606_v7, %v524_v0  ;;  %v324_v29 = vld [vmem:[%s16643_s14 + $0x370] sm:$0xff]  ;;  %v3403_v34 = vadd.f32 %v3402_v22, %v323_v17  ;;  %v527_v36 = vld [vmem:[%s16643_s14 + $0x9c8] sm:$0xff]  ;;  %v3352_v39 = vadd.f32 %v3351_v27, %v273_v14  ;;  %v278_v9 = vld [vmem:[%s16643_s14 + $0x200] sm:$0xff] }
  0xf2   : > { %v3570_v40 = vadd.f32 %v3569_v28, %v488_v21  ;;  %v3699_v42 = vadd.f32 %v3698_v30, %v615_v23  ;;  %v619_v7 = vld [vmem:[%s16643_s14 + $0xca8] sm:$0xff]  ;;  %v493_v16 = vld [vmem:[%s16643_s14 + $0x8b8] sm:$0xff]  ;;  %v620_v18 = vld [vmem:[%s16643_s14 + $0xcb0] sm:$0xff] }
  0xf3   : > { %v3515_v60 = vadd.f32 %v3514_v48, %v434_v41  ;;  %v3608_v31 = vadd.f32 %v3607_v19, %v525_v12  ;;  %v325_v41 = vld [vmem:[%s16643_s14 + $0x378] sm:$0xff]  ;;  %v3404_v46 = vadd.f32 %v3403_v34, %v324_v29  ;;  %v528_v48 = vld [vmem:[%s16643_s14 + $0x9d0] sm:$0xff]  ;;  %v3353_v51 = vadd.f32 %v3352_v39, %v274_v26  ;;  %v531_v19 = vld [vmem:[%s16643_s14 + $0x9e8] sm:$0xff] }
  0xf4   : > { %v3571_v52 = vadd.f32 %v3570_v40, %v489_v33  ;;  %v3700_v54 = vadd.f32 %v3699_v42, %v616_v35  ;;  %v328_v12 = vld [vmem:[%s16643_s14 + $0x390] sm:$0xff]  ;;  %v494_v22 = vld [vmem:[%s16643_s14 + $0x8c0] sm:$0xff]  ;;  %v621_v30 = vld [vmem:[%s16643_s14 + $0xcb8] sm:$0xff] }
  0xf5   : > { %v3516_v8 = vadd.f32 %v3515_v60, %v435_v53  ;;  %v3609_v43 = vadd.f32 %v3608_v31, %v526_v24  ;;  %v326_v53 = vld [vmem:[%s16643_s14 + $0x380] sm:$0xff]  ;;  %v3405_v58 = vadd.f32 %v3404_v46, %v325_v41  ;;  %v529_v60 = vld [vmem:[%s16643_s14 + $0x9d8] sm:$0xff]  ;;  %v3354_v63 = vadd.f32 %v3353_v51, %v275_v38  ;;  %v280_v27 = vld [vmem:[%s16643_s14 + $0x210] sm:$0xff] }
  0xf6   : > { %v3572_v0 = vadd.f32 %v3571_v52, %v490_v45  ;;  %v3701_v2 = vadd.f32 %v3700_v54, %v617_v47  ;;  %v329_v24 = vld [vmem:[%s16643_s14 + $0x398] sm:$0xff]  ;;  %v330_v28 = vld [vmem:[%s16643_s14 + $0x3a0] sm:$0xff]  ;;  %v532_v31 = vld [vmem:[%s16643_s14 + $0x9f0] sm:$0xff] }
  0xf7   : > { %v3517_v20 = vadd.f32 %v3516_v8, %v436_v1  ;;  %v3610_v55 = vadd.f32 %v3609_v43, %v527_v36  ;;  %v327_v1 = vld [vmem:[%s16643_s14 + $0x388] sm:$0xff]  ;;  %v3406_v6 = vadd.f32 %v3405_v58, %v326_v53  ;;  %v530_v8 = vld [vmem:[%s16643_s14 + $0x9e0] sm:$0xff]  ;;  %v3355_v10 = vadd.f32 %v3354_v63, %v276_v50  ;;  %v748_v38 = vld [vmem:[%s16643_s14 + $0x10b0] sm:$0xff] }
  0xf8   : > { %v3573_v11 = vadd.f32 %v3572_v0, %v491_v57  ;;  %v746_v36 = vld [vmem:[%s16643_s14 + $0x10a0] sm:$0xff]  ;;  %v495_v39 = vld [vmem:[%s16643_s14 + $0x8c8] sm:$0xff]  ;;  %v533_v42 = vld [vmem:[%s16643_s14 + $0x9f8] sm:$0xff] }
  0xf9   : > { %v3518_v32 = vadd.f32 %v3517_v20, %v437_v13  ;;  %v3611_v3 = vadd.f32 %v3610_v55, %v528_v48  ;;  %v3702_v13 = vadd.f32 %v3701_v2, %v618_v59  ;;  %v3407_v17 = vadd.f32 %v3406_v6, %v327_v1  ;;  %v279_v20 = vld [vmem:[%s16643_s14 + $0x208] sm:$0xff]  ;;  %v622_v41 = vld [vmem:[%s16643_s14 + $0xcc0] sm:$0xff]  ;;  %v749_v50 = vld [vmem:[%s16643_s14 + $0x10b8] sm:$0xff] }
  0xfa   : > { %v3356_v21 = vadd.f32 %v3355_v10, %v277_v62  ;;  %v3574_v23 = vadd.f32 %v3573_v11, %v492_v5  ;;  %v331_v47 = vld [vmem:[%s16643_s14 + $0x3a8] sm:$0xff]  ;;  %v496_v51 = vld [vmem:[%s16643_s14 + $0x8d0] sm:$0xff]  ;;  %v534_v54 = vld [vmem:[%s16643_s14 + $0xa00] sm:$0xff] }
  0xfb   : > { %v3519_v44 = vadd.f32 %v3518_v32, %v438_v25  ;;  %v3612_v14 = vadd.f32 %v3611_v3, %v529_v60  ;;  %v3703_v25 = vadd.f32 %v3702_v13, %v619_v7  ;;  %v3408_v29 = vadd.f32 %v3407_v17, %v328_v12  ;;  %v623_v53 = vld [vmem:[%s16643_s14 + $0xcc8] sm:$0xff]  ;;  %v332_v59 = vld [vmem:[%s16643_s14 + $0x3b0] sm:$0xff]  ;;  %v750_v62 = vld [vmem:[%s16643_s14 + $0x10c0] sm:$0xff] }
  0xfc   : > { %v3357_v32 = vadd.f32 %v3356_v21, %v278_v9  ;;  %v3575_v33 = vadd.f32 %v3574_v23, %v493_v16  ;;  %v497_v63 = vld [vmem:[%s16643_s14 + $0x8d8] sm:$0xff]  ;;  %v624_v1 = vld [vmem:[%s16643_s14 + $0xcd0] sm:$0xff]  ;;  %v535_v2 = vld [vmem:[%s16643_s14 + $0xa08] sm:$0xff] }
  0xfd   : > { %v3520_v56 = vadd.f32 %v3519_v44, %v439_v37  ;;  %v3613_v26 = vadd.f32 %v3612_v14, %v530_v8  ;;  %v3704_v34 = vadd.f32 %v3703_v25, %v620_v18  ;;  %v747_v37 = vld [vmem:[%s16643_s14 + $0x10a8] sm:$0xff]  ;;  %v3409_v40 = vadd.f32 %v3408_v29, %v329_v24  ;;  %v281_v44 = vld [vmem:[%s16643_s14 + $0x218] sm:$0xff]  ;;  %v498_v11 = vld [vmem:[%s16643_s14 + $0x8e0] sm:$0xff] }
  0xfe   : > { %v3833_v43 = vadd.f32 %v747_v37, %v746_v36  ;;  %v3358_v45 = vadd.f32 %v3357_v32, %v279_v20  ;;  %v3576_v46 = vadd.f32 %v3575_v33, %v494_v22  ;;  %v333_v7 = vld [vmem:[%s16643_s14 + $0x3b8] sm:$0xff]  ;;  %v751_v10 = vld [vmem:[%s16643_s14 + $0x10c8] sm:$0xff]  ;;  %v536_v14 = vld [vmem:[%s16643_s14 + $0xa10] sm:$0xff] }
  0xff   : > { %v3521_v4 = vadd.f32 %v3520_v56, %v440_v49  ;;  %v3614_v35 = vadd.f32 %v3613_v26, %v531_v19  ;;  %v3705_v48 = vadd.f32 %v3704_v34, %v621_v30  ;;  %v3410_v52 = vadd.f32 %v3409_v40, %v330_v28  ;;  %v282_v56 = vld [vmem:[%s16643_s14 + $0x220] sm:$0xff]  ;;  %v625_v13 = vld [vmem:[%s16643_s14 + $0xcd8] sm:$0xff]  ;;  %v284_v16 = vld [vmem:[%s16643_s14 + $0x230] sm:$0xff] }
 0x100   : > { %v3834_v55 = vadd.f32 %v3833_v43, %v748_v38  ;;  %v3359_v57 = vadd.f32 %v3358_v45, %v280_v27  ;;  %v3577_v58 = vadd.f32 %v3576_v46, %v495_v39  ;;  %v334_v19 = vld [vmem:[%s16643_s14 + $0x3c0] sm:$0xff]  ;;  %v752_v22 = vld [vmem:[%s16643_s14 + $0x10d0] sm:$0xff]  ;;  %v499_v23 = vld [vmem:[%s16643_s14 + $0x8e8] sm:$0xff] }
 0x101   : > { %v3522_v15 = vadd.f32 %v3521_v4, %v441_v61  ;;  %v3615_v49 = vadd.f32 %v3614_v35, %v532_v31  ;;  %v3706_v60 = vadd.f32 %v3705_v48, %v622_v41  ;;  %v3411_v0 = vadd.f32 %v3410_v52, %v331_v47  ;;  %v283_v4 = vld [vmem:[%s16643_s14 + $0x228] sm:$0xff]  ;;  %v626_v25 = vld [vmem:[%s16643_s14 + $0xce0] sm:$0xff]  ;;  %v537_v26 = vld [vmem:[%s16643_s14 + $0xa18] sm:$0xff] }
 0x102   : > { %v3835_v3 = vadd.f32 %v3834_v55, %v749_v50  ;;  %v3360_v5 = vadd.f32 %v3359_v57, %v281_v44  ;;  %v3578_v6 = vadd.f32 %v3577_v58, %v496_v51  ;;  %v285_v28 = vld [vmem:[%s16643_s14 + $0x238] sm:$0xff]  ;;  %v335_v31 = vld [vmem:[%s16643_s14 + $0x3c8] sm:$0xff]  ;;  %v500_v35 = vld [vmem:[%s16643_s14 + $0x8f0] sm:$0xff] }
 0x103   : > { %3523 = vadd.xlane.f32.xlu1 %v3522_v15  ;;  %v3616_v61 = vadd.f32 %v3615_v49, %v533_v42  ;;  %v3707_v8 = vadd.f32 %v3706_v60, %v623_v53  ;;  %v3412_v12 = vadd.f32 %v3411_v0, %v332_v59  ;;  %v753_v34 = vld [vmem:[%s16643_s14 + $0x10d8] sm:$0xff]  ;;  %v627_v37 = vld [vmem:[%s16643_s14 + $0xce8] sm:$0xff]  ;;  %v538_v38 = vld [vmem:[%s16643_s14 + $0xa20] sm:$0xff] }
 0x104   : > { %v3836_v15 = vadd.f32 %v3835_v3, %v750_v62  ;;  %v3361_v17 = vadd.f32 %v3360_v5, %v282_v56  ;;  %v3579_v18 = vadd.f32 %v3578_v6, %v497_v63  ;;  %v286_v40 = vld [vmem:[%s16643_s14 + $0x240] sm:$0xff]  ;;  %v336_v43 = vld [vmem:[%s16643_s14 + $0x3d0] sm:$0xff]  ;;  %v501_v47 = vld [vmem:[%s16643_s14 + $0x8f8] sm:$0xff] }
 0x105   : > { %v3617_v9 = vadd.f32 %v3616_v61, %v534_v54  ;;  %v3708_v20 = vadd.f32 %v3707_v8, %v624_v1  ;;  %v3413_v24 = vadd.f32 %v3412_v12, %v333_v7  ;;  %v754_v46 = vld [vmem:[%s16643_s14 + $0x10e0] sm:$0xff]  ;;  %v628_v49 = vld [vmem:[%s16643_s14 + $0xcf0] sm:$0xff]  ;;  %v539_v50 = vld [vmem:[%s16643_s14 + $0xa28] sm:$0xff] }
 0x106   : > { %v3837_v27 = vadd.f32 %v3836_v15, %v751_v10  ;;  %v3362_v29 = vadd.f32 %v3361_v17, %v283_v4  ;;  %v3580_v30 = vadd.f32 %v3579_v18, %v498_v11  ;;  %v287_v52 = vld [vmem:[%s16643_s14 + $0x248] sm:$0xff]  ;;  %v337_v55 = vld [vmem:[%s16643_s14 + $0x3d8] sm:$0xff]  ;;  %v502_v59 = vld [vmem:[%s16643_s14 + $0x900] sm:$0xff] }
 0x107   : > { %v3618_v21 = vadd.f32 %v3617_v9, %v535_v2  ;;  %v3709_v32 = vadd.f32 %v3708_v20, %v625_v13  ;;  %v3414_v36 = vadd.f32 %v3413_v24, %v334_v19  ;;  %v755_v58 = vld [vmem:[%s16643_s14 + $0x10e8] sm:$0xff]  ;;  %v629_v61 = vld [vmem:[%s16643_s14 + $0xcf8] sm:$0xff]  ;;  %v540_v62 = vld [vmem:[%s16643_s14 + $0xa30] sm:$0xff] }
 0x108   : > { %v3838_v39 = vadd.f32 %v3837_v27, %v752_v22  ;;  %v3363_v41 = vadd.f32 %v3362_v29, %v284_v16  ;;  %v3581_v42 = vadd.f32 %v3580_v30, %v499_v23  ;;  %v288_v0 = vld [vmem:[%s16643_s14 + $0x250] sm:$0xff]  ;;  %v338_v3 = vld [vmem:[%s16643_s14 + $0x3e0] sm:$0xff]  ;;  %v503_v7 = vld [vmem:[%s16643_s14 + $0x908] sm:$0xff] }
 0x109   : > { %v3619_v33 = vadd.f32 %v3618_v21, %v536_v14  ;;  %v3710_v44 = vadd.f32 %v3709_v32, %v626_v25  ;;  %v3415_v48 = vadd.f32 %v3414_v36, %v335_v31  ;;  %v756_v6 = vld [vmem:[%s16643_s14 + $0x10f0] sm:$0xff]  ;;  %v630_v9 = vld [vmem:[%s16643_s14 + $0xd00] sm:$0xff]  ;;  %v541_v10 = vld [vmem:[%s16643_s14 + $0xa38] sm:$0xff] }
 0x10a   : > { %v3839_v51 = vadd.f32 %v3838_v39, %v753_v34  ;;  %v3364_v53 = vadd.f32 %v3363_v41, %v285_v28  ;;  %v3582_v54 = vadd.f32 %v3581_v42, %v500_v35  ;;  %v289_v12 = vld [vmem:[%s16643_s14 + $0x258] sm:$0xff]  ;;  %v339_v15 = vld [vmem:[%s16643_s14 + $0x3e8] sm:$0xff]  ;;  %v504_v19 = vld [vmem:[%s16643_s14 + $0x910] sm:$0xff] }
 0x10b   : > { %v3620_v45 = vadd.f32 %v3619_v33, %v537_v26  ;;  %v3711_v56 = vadd.f32 %v3710_v44, %v627_v37  ;;  %v3416_v60 = vadd.f32 %v3415_v48, %v336_v43  ;;  %v757_v18 = vld [vmem:[%s16643_s14 + $0x10f8] sm:$0xff]  ;;  %v631_v21 = vld [vmem:[%s16643_s14 + $0xd08] sm:$0xff]  ;;  %v542_v22 = vld [vmem:[%s16643_s14 + $0xa40] sm:$0xff] }
 0x10c   : > { %v3840_v63 = vadd.f32 %v3839_v51, %v754_v46  ;;  %v3365_v1 = vadd.f32 %v3364_v53, %v286_v40  ;;  %v3583_v2 = vadd.f32 %v3582_v54, %v501_v47  ;;  %v340_v26 = vld [vmem:[%s16643_s14 + $0x3f0] sm:$0xff]  ;;  %v758_v29 = vld [vmem:[%s16643_s14 + $0x1100] sm:$0xff]  ;;  %v505_v30 = vld [vmem:[%s16643_s14 + $0x918] sm:$0xff] }
 0x10d   : > { %v3621_v57 = vadd.f32 %v3620_v45, %v538_v38  ;;  %v3712_v4 = vadd.f32 %v3711_v56, %v628_v49  ;;  %v3417_v8 = vadd.f32 %v3416_v60, %v337_v55  ;;  %v632_v32 = vld [vmem:[%s16643_s14 + $0xd10] sm:$0xff]  ;;  %v543_v33 = vld [vmem:[%s16643_s14 + $0xa48] sm:$0xff]  ;;  %v506_v36 = vld [vmem:[%s16643_s14 + $0x920] sm:$0xff] }
 0x10e   : > { %v3841_v11 = vadd.f32 %v3840_v63, %v755_v58  ;;  %v3366_v13 = vadd.f32 %v3365_v1, %v287_v52  ;;  %v3584_v14 = vadd.f32 %v3583_v2, %v502_v59  ;;  %v341_v38 = vld [vmem:[%s16643_s14 + $0x3f8] sm:$0xff]  ;;  %v759_v41 = vld [vmem:[%s16643_s14 + $0x1108] sm:$0xff]  ;;  %v544_v45 = vld [vmem:[%s16643_s14 + $0xa50] sm:$0xff] }
 0x10f   : > { %v3622_v5 = vadd.f32 %v3621_v57, %v539_v50  ;;  %v3713_v16 = vadd.f32 %v3712_v4, %v629_v61  ;;  %v3418_v20 = vadd.f32 %v3417_v8, %v338_v3  ;;  %v507_v42 = vld [vmem:[%s16643_s14 + $0x928] sm:$0xff]  ;;  %v633_v44 = vld [vmem:[%s16643_s14 + $0xd18] sm:$0xff]  ;;  %v342_v48 = vld [vmem:[%s16643_s14 + $0x400] sm:$0xff] }
 0x110   : > { %v3842_v23 = vadd.f32 %v3841_v11, %v756_v6  ;;  %v3367_v24 = vadd.f32 %v3366_v13, %v288_v0  ;;  %v3585_v25 = vadd.f32 %v3584_v14, %v503_v7  ;;  %v634_v49 = vld [vmem:[%s16643_s14 + $0xd20] sm:$0xff]  ;;  %v760_v52 = vld [vmem:[%s16643_s14 + $0x1110] sm:$0xff]  ;;  %v545_v55 = vld [vmem:[%s16643_s14 + $0xa58] sm:$0xff] }
 0x111   : > { %v3623_v17 = vadd.f32 %v3622_v5, %v540_v62  ;;  %v3714_v27 = vadd.f32 %v3713_v16, %v630_v9  ;;  %v3419_v31 = vadd.f32 %v3418_v20, %v339_v15  ;;  %v508_v53 = vld [vmem:[%s16643_s14 + $0x930] sm:$0xff]  ;;  %v670_v57 = vld [vmem:[%s16643_s14 + $0xe40] sm:$0xff]  ;;  %v671_v58 = vld [vmem:[%s16643_s14 + $0xe48] sm:$0xff] }
 0x112   : > { %v3843_v34 = vadd.f32 %v3842_v23, %v757_v18  ;;  %v3368_v35 = vadd.f32 %v3367_v24, %v289_v12  ;;  %v3586_v37 = vadd.f32 %v3585_v25, %v504_v19  ;;  %v343_v60 = vld [vmem:[%s16643_s14 + $0x408] sm:$0xff]  ;;  %v761_v63 = vld [vmem:[%s16643_s14 + $0x1118] sm:$0xff]  ;;  %v672_v0 = vld [vmem:[%s16643_s14 + $0xe50] sm:$0xff]  ;;  %v3756_v1 = vadd.f32 %v671_v58, %v670_v57 }
 0x113   : > { %v3624_v28 = vadd.f32 %v3623_v17, %v541_v10  ;;  %v3715_v39 = vadd.f32 %v3714_v27, %v631_v21  ;;  %v3420_v43 = vadd.f32 %v3419_v31, %v340_v26  ;;  %v635_v3 = vld [vmem:[%s16643_s14 + $0xd28] sm:$0xff]  ;;  %v546_v4 = vld [vmem:[%s16643_s14 + $0xa60] sm:$0xff]  ;;  %v673_v6 = vld [vmem:[%s16643_s14 + $0xe58] sm:$0xff] }
 0x114   : > { %v3844_v46 = vadd.f32 %v3843_v34, %v758_v29  ;;  %3369 = vadd.xlane.f32.xlu0 %v3368_v35  ;;  %v3587_v47 = vadd.f32 %v3586_v37, %v505_v30  ;;  %v509_v7 = vld [vmem:[%s16643_s14 + $0x938] sm:$0xff]  ;;  %v344_v9 = vld [vmem:[%s16643_s14 + $0x410] sm:$0xff]  ;;  %v762_v12 = vld [vmem:[%s16643_s14 + $0x1120] sm:$0xff]  ;;  %v3757_v13 = vadd.f32 %v3756_v1, %v672_v0 }
 0x115   : > { %v3625_v40 = vadd.f32 %v3624_v28, %v542_v22  ;;  %v3716_v50 = vadd.f32 %v3715_v39, %v632_v32  ;;  %v3421_v54 = vadd.f32 %v3420_v43, %v341_v38  ;;  %v636_v15 = vld [vmem:[%s16643_s14 + $0xd30] sm:$0xff]  ;;  %v547_v16 = vld [vmem:[%s16643_s14 + $0xa68] sm:$0xff]  ;;  %v674_v18 = vld [vmem:[%s16643_s14 + $0xe60] sm:$0xff] }
 0x116   : > { %v3845_v56 = vadd.f32 %v3844_v46, %v759_v41  ;;  %v3588_v59 = vadd.f32 %v3587_v47, %v506_v36  ;;  %v510_v19 = vld [vmem:[%s16643_s14 + $0x940] sm:$0xff]  ;;  %v345_v21 = vld [vmem:[%s16643_s14 + $0x418] sm:$0xff]  ;;  %v763_v24 = vld [vmem:[%s16643_s14 + $0x1128] sm:$0xff]  ;;  %v3758_v25 = vadd.f32 %v3757_v13, %v673_v6 }
 0x117   : > { %v3626_v51 = vadd.f32 %v3625_v40, %v543_v33  ;;  %v3717_v61 = vadd.f32 %v3716_v50, %v633_v44  ;;  %v3422_v2 = vadd.f32 %v3421_v54, %v342_v48  ;;  %v637_v27 = vld [vmem:[%s16643_s14 + $0xd38] sm:$0xff]  ;;  %v548_v28 = vld [vmem:[%s16643_s14 + $0xa70] sm:$0xff]  ;;  %v675_v30 = vld [vmem:[%s16643_s14 + $0xe68] sm:$0xff] }
 0x118   : > { %v3846_v5 = vadd.f32 %v3845_v56, %v760_v52  ;;  %v3589_v8 = vadd.f32 %v3588_v59, %v507_v42  ;;  %v511_v31 = vld [vmem:[%s16643_s14 + $0x948] sm:$0xff]  ;;  %v346_v33 = vld [vmem:[%s16643_s14 + $0x420] sm:$0xff]  ;;  %v764_v36 = vld [vmem:[%s16643_s14 + $0x1130] sm:$0xff]  ;;  %v3759_v37 = vadd.f32 %v3758_v25, %v674_v18 }
 0x119   : > { %v3627_v62 = vadd.f32 %v3626_v51, %v544_v45  ;;  %v3718_v10 = vadd.f32 %v3717_v61, %v634_v49  ;;  %v3423_v14 = vadd.f32 %v3422_v2, %v343_v60  ;;  %v638_v39 = vld [vmem:[%s16643_s14 + $0xd40] sm:$0xff]  ;;  %v549_v40 = vld [vmem:[%s16643_s14 + $0xa78] sm:$0xff]  ;;  %v676_v42 = vld [vmem:[%s16643_s14 + $0xe70] sm:$0xff] }
 0x11a   : > { %v3847_v17 = vadd.f32 %v3846_v5, %v761_v63  ;;  %v3590_v20 = vadd.f32 %v3589_v8, %v508_v53  ;;  %v512_v43 = vld [vmem:[%s16643_s14 + $0x950] sm:$0xff]  ;;  %v347_v45 = vld [vmem:[%s16643_s14 + $0x428] sm:$0xff]  ;;  %v765_v48 = vld [vmem:[%s16643_s14 + $0x1138] sm:$0xff]  ;;  %v3760_v49 = vadd.f32 %v3759_v37, %v675_v30 }
 0x11b   : > { %v3628_v11 = vadd.f32 %v3627_v62, %v545_v55  ;;  %v3719_v22 = vadd.f32 %v3718_v10, %v635_v3  ;;  %v3424_v26 = vadd.f32 %v3423_v14, %v344_v9  ;;  %v639_v51 = vld [vmem:[%s16643_s14 + $0xd48] sm:$0xff]  ;;  %v550_v52 = vld [vmem:[%s16643_s14 + $0xa80] sm:$0xff]  ;;  %v677_v54 = vld [vmem:[%s16643_s14 + $0xe78] sm:$0xff] }
 0x11c   : > { %v3848_v29 = vadd.f32 %v3847_v17, %v762_v12  ;;  %v3591_v32 = vadd.f32 %v3590_v20, %v509_v7  ;;  %v513_v55 = vld [vmem:[%s16643_s14 + $0x958] sm:$0xff]  ;;  %v348_v57 = vld [vmem:[%s16643_s14 + $0x430] sm:$0xff]  ;;  %v766_v60 = vld [vmem:[%s16643_s14 + $0x1140] sm:$0xff]  ;;  %v3761_v61 = vadd.f32 %v3760_v49, %v676_v42 }
 0x11d   : > { %v3629_v23 = vadd.f32 %v3628_v11, %v546_v4  ;;  %v3720_v34 = vadd.f32 %v3719_v22, %v636_v15  ;;  %v3425_v38 = vadd.f32 %v3424_v26, %v345_v21  ;;  %v640_v63 = vld [vmem:[%s16643_s14 + $0xd50] sm:$0xff]  ;;  %v551_v0 = vld [vmem:[%s16643_s14 + $0xa88] sm:$0xff]  ;;  %v678_v2 = vld [vmem:[%s16643_s14 + $0xe80] sm:$0xff] }
 0x11e   : > { %v3849_v41 = vadd.f32 %v3848_v29, %v763_v24  ;;  %v3592_v44 = vadd.f32 %v3591_v32, %v510_v19  ;;  %v514_v3 = vld [vmem:[%s16643_s14 + $0x960] sm:$0xff]  ;;  %v349_v5 = vld [vmem:[%s16643_s14 + $0x438] sm:$0xff]  ;;  %v767_v8 = vld [vmem:[%s16643_s14 + $0x1148] sm:$0xff]  ;;  %v3762_v9 = vadd.f32 %v3761_v61, %v677_v54 }
 0x11f   : > { %v3630_v35 = vadd.f32 %v3629_v23, %v547_v16  ;;  %v3721_v46 = vadd.f32 %v3720_v34, %v637_v27  ;;  %v3426_v50 = vadd.f32 %v3425_v38, %v346_v33  ;;  %v641_v11 = vld [vmem:[%s16643_s14 + $0xd58] sm:$0xff]  ;;  %v552_v12 = vld [vmem:[%s16643_s14 + $0xa90] sm:$0xff]  ;;  %v679_v14 = vld [vmem:[%s16643_s14 + $0xe88] sm:$0xff] }
 0x120   : > { %v3850_v53 = vadd.f32 %v3849_v41, %v764_v36  ;;  %v3593_v56 = vadd.f32 %v3592_v44, %v511_v31  ;;  %v515_v15 = vld [vmem:[%s16643_s14 + $0x968] sm:$0xff]  ;;  %v350_v17 = vld [vmem:[%s16643_s14 + $0x440] sm:$0xff]  ;;  %v768_v20 = vld [vmem:[%s16643_s14 + $0x1150] sm:$0xff]  ;;  %v3763_v21 = vadd.f32 %v3762_v9, %v678_v2 }
 0x121   : > { %v3631_v47 = vadd.f32 %v3630_v35, %v548_v28  ;;  %v3722_v58 = vadd.f32 %v3721_v46, %v638_v39  ;;  %v3427_v62 = vadd.f32 %v3426_v50, %v347_v45  ;;  %v642_v23 = vld [vmem:[%s16643_s14 + $0xd60] sm:$0xff]  ;;  %v553_v24 = vld [vmem:[%s16643_s14 + $0xa98] sm:$0xff]  ;;  %v680_v26 = vld [vmem:[%s16643_s14 + $0xe90] sm:$0xff] }
 0x122   : > { %v3851_v1 = vadd.f32 %v3850_v53, %v765_v48  ;;  %v3594_v4 = vadd.f32 %v3593_v56, %v512_v43  ;;  %v516_v27 = vld [vmem:[%s16643_s14 + $0x970] sm:$0xff]  ;;  %v351_v29 = vld [vmem:[%s16643_s14 + $0x448] sm:$0xff]  ;;  %v769_v32 = vld [vmem:[%s16643_s14 + $0x1158] sm:$0xff]  ;;  %v3764_v33 = vadd.f32 %v3763_v21, %v679_v14 }
 0x123   : > { %v3632_v59 = vadd.f32 %v3631_v47, %v549_v40  ;;  %v3723_v6 = vadd.f32 %v3722_v58, %v639_v51  ;;  %v3428_v10 = vadd.f32 %v3427_v62, %v348_v57  ;;  %v643_v35 = vld [vmem:[%s16643_s14 + $0xd68] sm:$0xff]  ;;  %v554_v36 = vld [vmem:[%s16643_s14 + $0xaa0] sm:$0xff]  ;;  %v681_v38 = vld [vmem:[%s16643_s14 + $0xe98] sm:$0xff] }
 0x124   : > { %v3852_v13 = vadd.f32 %v3851_v1, %v766_v60  ;;  %v3595_v16 = vadd.f32 %v3594_v4, %v513_v55  ;;  %v517_v39 = vld [vmem:[%s16643_s14 + $0x978] sm:$0xff]  ;;  %v352_v41 = vld [vmem:[%s16643_s14 + $0x450] sm:$0xff]  ;;  %v770_v44 = vld [vmem:[%s16643_s14 + $0x1160] sm:$0xff]  ;;  %v3765_v45 = vadd.f32 %v3764_v33, %v680_v26 }
 0x125   : > { %v3633_v7 = vadd.f32 %v3632_v59, %v550_v52  ;;  %v3724_v18 = vadd.f32 %v3723_v6, %v640_v63  ;;  %v3429_v22 = vadd.f32 %v3428_v10, %v349_v5  ;;  %v644_v47 = vld [vmem:[%s16643_s14 + $0xd70] sm:$0xff]  ;;  %v555_v48 = vld [vmem:[%s16643_s14 + $0xaa8] sm:$0xff]  ;;  %v682_v50 = vld [vmem:[%s16643_s14 + $0xea0] sm:$0xff] }
 0x126   : > { %v3853_v25 = vadd.f32 %v3852_v13, %v767_v8  ;;  %v3596_v28 = vadd.f32 %v3595_v16, %v514_v3  ;;  %v353_v52 = vld [vmem:[%s16643_s14 + $0x458] sm:$0xff]  ;;  %v354_v53 = vld [vmem:[%s16643_s14 + $0x460] sm:$0xff]  ;;  %v771_v56 = vld [vmem:[%s16643_s14 + $0x1168] sm:$0xff]  ;;  %v3766_v57 = vadd.f32 %v3765_v45, %v681_v38 }
 0x127   : > { %v3634_v19 = vadd.f32 %v3633_v7, %v551_v0  ;;  %v3725_v30 = vadd.f32 %v3724_v18, %v641_v11  ;;  %v3430_v34 = vadd.f32 %v3429_v22, %v350_v17  ;;  %v645_v59 = vld [vmem:[%s16643_s14 + $0xd78] sm:$0xff]  ;;  %v556_v60 = vld [vmem:[%s16643_s14 + $0xab0] sm:$0xff]  ;;  %v683_v62 = vld [vmem:[%s16643_s14 + $0xea8] sm:$0xff] }
 0x128   : > { %v3854_v37 = vadd.f32 %v3853_v25, %v768_v20  ;;  %v3597_v40 = vadd.f32 %v3596_v28, %v515_v15  ;;  %v355_v0 = vld [vmem:[%s16643_s14 + $0x468] sm:$0xff]  ;;  %v646_v1 = vld [vmem:[%s16643_s14 + $0xd80] sm:$0xff]  ;;  %v772_v4 = vld [vmem:[%s16643_s14 + $0x1170] sm:$0xff]  ;;  %v3767_v5 = vadd.f32 %v3766_v57, %v682_v50 }
 0x129   : > { %v3635_v31 = vadd.f32 %v3634_v19, %v552_v12  ;;  %v3726_v42 = vadd.f32 %v3725_v30, %v642_v23  ;;  %v3431_v46 = vadd.f32 %v3430_v34, %v351_v29  ;;  %v647_v7 = vld [vmem:[%s16643_s14 + $0xd88] sm:$0xff]  ;;  %v557_v8 = vld [vmem:[%s16643_s14 + $0xab8] sm:$0xff]  ;;  %v684_v10 = vld [vmem:[%s16643_s14 + $0xeb0] sm:$0xff] }
 0x12a   : > { %v3855_v49 = vadd.f32 %v3854_v37, %v769_v32  ;;  %v3598_v51 = vadd.f32 %v3597_v40, %v516_v27  ;;  %v558_v12 = vld [vmem:[%s16643_s14 + $0xac0] sm:$0xff]  ;;  %v773_v14 = vld [vmem:[%s16643_s14 + $0x1178] sm:$0xff]  ;;  %v3768_v15 = vadd.f32 %v3767_v5, %v683_v62  ;;  %v899_v20 = vld [vmem:[%s16643_s14 + $0x1568] sm:$0xff] }
 0x12b   : > { %v3636_v43 = vadd.f32 %v3635_v31, %v553_v24  ;;  %v3727_v54 = vadd.f32 %v3726_v42, %v643_v35  ;;  %v3432_v58 = vadd.f32 %v3431_v46, %v352_v41  ;;  %v898_v16 = vld [vmem:[%s16643_s14 + $0x1560] sm:$0xff]  ;;  %v685_v19 = vld [vmem:[%s16643_s14 + $0xeb8] sm:$0xff]  ;;  %v900_v21 = vld [vmem:[%s16643_s14 + $0x1570] sm:$0xff] }
 0x12c   : > { %v3856_v61 = vadd.f32 %v3855_v49, %v770_v44  ;;  %v3599_v63 = vadd.f32 %v3598_v51, %v517_v39  ;;  %v356_v22 = vld [vmem:[%s16643_s14 + $0x470] sm:$0xff]  ;;  %v774_v26 = vld [vmem:[%s16643_s14 + $0x1180] sm:$0xff]  ;;  %v3769_v27 = vadd.f32 %v3768_v15, %v684_v10  ;;  %v3987_v28 = vadd.f32 %v899_v20, %v898_v16  ;;  %v559_v30 = vld [vmem:[%s16643_s14 + $0xac8] sm:$0xff] }
 0x12d   : > { %v3637_v55 = vadd.f32 %v3636_v43, %v554_v36  ;;  %v3728_v2 = vadd.f32 %v3727_v54, %v644_v47  ;;  %v3433_v6 = vadd.f32 %v3432_v58, %v353_v52  ;;  %v648_v23 = vld [vmem:[%s16643_s14 + $0xd90] sm:$0xff]  ;;  %v686_v32 = vld [vmem:[%s16643_s14 + $0xec0] sm:$0xff]  ;;  %v901_v33 = vld [vmem:[%s16643_s14 + $0x1578] sm:$0xff] }
 0x12e   : > { %v3857_v9 = vadd.f32 %v3856_v61, %v771_v56  ;;  %3600 = vadd.xlane.f32.xlu1 %v3599_v63  ;;  %v357_v34 = vld [vmem:[%s16643_s14 + $0x478] sm:$0xff]  ;;  %v775_v38 = vld [vmem:[%s16643_s14 + $0x1188] sm:$0xff]  ;;  %v3770_v39 = vadd.f32 %v3769_v27, %v685_v19  ;;  %v3988_v40 = vadd.f32 %v3987_v28, %v900_v21  ;;  %v560_v42 = vld [vmem:[%s16643_s14 + $0xad0] sm:$0xff] }
 0x12f   : > { %v3638_v3 = vadd.f32 %v3637_v55, %v555_v48  ;;  %v3729_v11 = vadd.f32 %v3728_v2, %v645_v59  ;;  %v3434_v17 = vadd.f32 %v3433_v6, %v354_v53  ;;  %v649_v35 = vld [vmem:[%s16643_s14 + $0xd98] sm:$0xff]  ;;  %v687_v44 = vld [vmem:[%s16643_s14 + $0xec8] sm:$0xff]  ;;  %v902_v45 = vld [vmem:[%s16643_s14 + $0x1580] sm:$0xff] }
 0x130   : > { %v3858_v18 = vadd.f32 %v3857_v9, %v772_v4  ;;  %v358_v46 = vld [vmem:[%s16643_s14 + $0x480] sm:$0xff]  ;;  %v776_v50 = vld [vmem:[%s16643_s14 + $0x1190] sm:$0xff]  ;;  %v3771_v51 = vadd.f32 %v3770_v39, %v686_v32  ;;  %v3989_v52 = vadd.f32 %v3988_v40, %v901_v33  ;;  %v561_v54 = vld [vmem:[%s16643_s14 + $0xad8] sm:$0xff] }
 0x131   : > { %v3639_v13 = vadd.f32 %v3638_v3, %v556_v60  ;;  %v3730_v24 = vadd.f32 %v3729_v11, %v646_v1  ;;  %v3435_v29 = vadd.f32 %v3434_v17, %v355_v0  ;;  %v650_v47 = vld [vmem:[%s16643_s14 + $0xda0] sm:$0xff]  ;;  %v688_v56 = vld [vmem:[%s16643_s14 + $0xed0] sm:$0xff]  ;;  %v903_v57 = vld [vmem:[%s16643_s14 + $0x1588] sm:$0xff] }
 0x132   : > { %v3859_v31 = vadd.f32 %v3858_v18, %v773_v14  ;;  %v359_v58 = vld [vmem:[%s16643_s14 + $0x488] sm:$0xff]  ;;  %v777_v62 = vld [vmem:[%s16643_s14 + $0x1198] sm:$0xff]  ;;  %v3772_v63 = vadd.f32 %v3771_v51, %v687_v44  ;;  %v3990_v0 = vadd.f32 %v3989_v52, %v902_v45  ;;  %v562_v2 = vld [vmem:[%s16643_s14 + $0xae0] sm:$0xff] }
 0x133   : > { %v3640_v25 = vadd.f32 %v3639_v13, %v557_v8  ;;  %v3731_v36 = vadd.f32 %v3730_v24, %v647_v7  ;;  %v3436_v41 = vadd.f32 %v3435_v29, %v356_v22  ;;  %v651_v59 = vld [vmem:[%s16643_s14 + $0xda8] sm:$0xff]  ;;  %v689_v4 = vld [vmem:[%s16643_s14 + $0xed8] sm:$0xff]  ;;  %v904_v5 = vld [vmem:[%s16643_s14 + $0x1590] sm:$0xff] }
 0x134   : > { %v3860_v43 = vadd.f32 %v3859_v31, %v774_v26  ;;  %v360_v6 = vld [vmem:[%s16643_s14 + $0x490] sm:$0xff]  ;;  %v778_v10 = vld [vmem:[%s16643_s14 + $0x11a0] sm:$0xff]  ;;  %v3773_v11 = vadd.f32 %v3772_v63, %v688_v56  ;;  %v563_v14 = vld [vmem:[%s16643_s14 + $0xae8] sm:$0xff] }
 0x135   : > { %v3641_v37 = vadd.f32 %v3640_v25, %v558_v12  ;;  %v3732_v48 = vadd.f32 %v3731_v36, %v648_v23  ;;  %v3437_v53 = vadd.f32 %v3436_v41, %v357_v34  ;;  %v652_v7 = vld [vmem:[%s16643_s14 + $0xdb0] sm:$0xff]  ;;  %v3991_v12 = vadd.f32 %v3990_v0, %v903_v57  ;;  %v690_v16 = vld [vmem:[%s16643_s14 + $0xee0] sm:$0xff]  ;;  %v905_v17 = vld [vmem:[%s16643_s14 + $0x1598] sm:$0xff] }
 0x136   : > { %v3861_v55 = vadd.f32 %v3860_v43, %v775_v38  ;;  %v361_v18 = vld [vmem:[%s16643_s14 + $0x498] sm:$0xff]  ;;  %v779_v22 = vld [vmem:[%s16643_s14 + $0x11a8] sm:$0xff]  ;;  %v3774_v23 = vadd.f32 %v3773_v11, %v689_v4  ;;  %v564_v26 = vld [vmem:[%s16643_s14 + $0xaf0] sm:$0xff] }
 0x137   : > { %v3642_v49 = vadd.f32 %v3641_v37, %v559_v30  ;;  %v3733_v60 = vadd.f32 %v3732_v48, %v649_v35  ;;  %v3438_v1 = vadd.f32 %v3437_v53, %v358_v46  ;;  %v653_v19 = vld [vmem:[%s16643_s14 + $0xdb8] sm:$0xff]  ;;  %v3992_v24 = vadd.f32 %v3991_v12, %v904_v5  ;;  %v691_v28 = vld [vmem:[%s16643_s14 + $0xee8] sm:$0xff]  ;;  %v906_v29 = vld [vmem:[%s16643_s14 + $0x15a0] sm:$0xff] }
 0x138   : > { %v3862_v3 = vadd.f32 %v3861_v55, %v776_v50  ;;  %v362_v30 = vld [vmem:[%s16643_s14 + $0x4a0] sm:$0xff]  ;;  %v780_v34 = vld [vmem:[%s16643_s14 + $0x11b0] sm:$0xff]  ;;  %v3775_v35 = vadd.f32 %v3774_v23, %v690_v16  ;;  %v565_v38 = vld [vmem:[%s16643_s14 + $0xaf8] sm:$0xff] }
 0x139   : > { %v3643_v61 = vadd.f32 %v3642_v49, %v560_v42  ;;  %v3734_v8 = vadd.f32 %v3733_v60, %v650_v47  ;;  %v3439_v13 = vadd.f32 %v3438_v1, %v359_v58  ;;  %v654_v31 = vld [vmem:[%s16643_s14 + $0xdc0] sm:$0xff]  ;;  %v3993_v36 = vadd.f32 %v3992_v24, %v905_v17  ;;  %v692_v40 = vld [vmem:[%s16643_s14 + $0xef0] sm:$0xff]  ;;  %v907_v41 = vld [vmem:[%s16643_s14 + $0x15a8] sm:$0xff] }
 0x13a   : > { %v3863_v15 = vadd.f32 %v3862_v3, %v777_v62  ;;  %v363_v42 = vld [vmem:[%s16643_s14 + $0x4a8] sm:$0xff]  ;;  %v781_v46 = vld [vmem:[%s16643_s14 + $0x11b8] sm:$0xff]  ;;  %v3776_v47 = vadd.f32 %v3775_v35, %v691_v28  ;;  %v566_v50 = vld [vmem:[%s16643_s14 + $0xb00] sm:$0xff] }
 0x13b   : > { %v3644_v9 = vadd.f32 %v3643_v61, %v561_v54  ;;  %v3735_v20 = vadd.f32 %v3734_v8, %v651_v59  ;;  %v3440_v25 = vadd.f32 %v3439_v13, %v360_v6  ;;  %v655_v43 = vld [vmem:[%s16643_s14 + $0xdc8] sm:$0xff]  ;;  %v3994_v48 = vadd.f32 %v3993_v36, %v906_v29  ;;  %v693_v52 = vld [vmem:[%s16643_s14 + $0xef8] sm:$0xff]  ;;  %v908_v53 = vld [vmem:[%s16643_s14 + $0x15b0] sm:$0xff] }
 0x13c   : > { %v3864_v27 = vadd.f32 %v3863_v15, %v778_v10  ;;  %v364_v54 = vld [vmem:[%s16643_s14 + $0x4b0] sm:$0xff]  ;;  %v782_v58 = vld [vmem:[%s16643_s14 + $0x11c0] sm:$0xff]  ;;  %v3777_v59 = vadd.f32 %v3776_v47, %v692_v40  ;;  %v567_v62 = vld [vmem:[%s16643_s14 + $0xb08] sm:$0xff] }
 0x13d   : > { %v3645_v21 = vadd.f32 %v3644_v9, %v562_v2  ;;  %v3736_v32 = vadd.f32 %v3735_v20, %v652_v7  ;;  %v3441_v37 = vadd.f32 %v3440_v25, %v361_v18  ;;  %v656_v55 = vld [vmem:[%s16643_s14 + $0xdd0] sm:$0xff]  ;;  %v3995_v60 = vadd.f32 %v3994_v48, %v907_v41  ;;  %v694_v0 = vld [vmem:[%s16643_s14 + $0xf00] sm:$0xff]  ;;  %v909_v1 = vld [vmem:[%s16643_s14 + $0x15b8] sm:$0xff] }
 0x13e   : > { %v3865_v39 = vadd.f32 %v3864_v27, %v779_v22  ;;  %v365_v2 = vld [vmem:[%s16643_s14 + $0x4b8] sm:$0xff]  ;;  %v783_v6 = vld [vmem:[%s16643_s14 + $0x11c8] sm:$0xff]  ;;  %v3778_v7 = vadd.f32 %v3777_v59, %v693_v52  ;;  %v568_v10 = vld [vmem:[%s16643_s14 + $0xb10] sm:$0xff] }
 0x13f   : > { %v3646_v33 = vadd.f32 %v3645_v21, %v563_v14  ;;  %v3737_v44 = vadd.f32 %v3736_v32, %v653_v19  ;;  %v3442_v49 = vadd.f32 %v3441_v37, %v362_v30  ;;  %v657_v3 = vld [vmem:[%s16643_s14 + $0xdd8] sm:$0xff]  ;;  %v3996_v8 = vadd.f32 %v3995_v60, %v908_v53  ;;  %v695_v12 = vld [vmem:[%s16643_s14 + $0xf08] sm:$0xff]  ;;  %v910_v13 = vld [vmem:[%s16643_s14 + $0x15c0] sm:$0xff] }
 0x140   : > { %v3866_v51 = vadd.f32 %v3865_v39, %v780_v34  ;;  %v658_v14 = vld [vmem:[%s16643_s14 + $0xde0] sm:$0xff]  ;;  %v784_v17 = vld [vmem:[%s16643_s14 + $0x11d0] sm:$0xff]  ;;  %v3779_v18 = vadd.f32 %v3778_v7, %v694_v0  ;;  %v569_v21 = vld [vmem:[%s16643_s14 + $0xb18] sm:$0xff] }
 0x141   : > { %v3647_v45 = vadd.f32 %v3646_v33, %v564_v26  ;;  %v3738_v56 = vadd.f32 %v3737_v44, %v654_v31  ;;  %v3443_v61 = vadd.f32 %v3442_v49, %v363_v42  ;;  %v3997_v19 = vadd.f32 %v3996_v8, %v909_v1  ;;  %v696_v23 = vld [vmem:[%s16643_s14 + $0xf10] sm:$0xff]  ;;  %v911_v24 = vld [vmem:[%s16643_s14 + $0x15c8] sm:$0xff]  ;;  %v570_v27 = vld [vmem:[%s16643_s14 + $0xb20] sm:$0xff] }
 0x142   : > { %v3867_v63 = vadd.f32 %v3866_v51, %v781_v46  ;;  %v659_v25 = vld [vmem:[%s16643_s14 + $0xde8] sm:$0xff]  ;;  %v785_v29 = vld [vmem:[%s16643_s14 + $0x11d8] sm:$0xff]  ;;  %v3780_v30 = vadd.f32 %v3779_v18, %v695_v12  ;;  %v660_v32 = vld [vmem:[%s16643_s14 + $0xdf0] sm:$0xff] }
 0x143   : > { %v3648_v57 = vadd.f32 %v3647_v45, %v565_v38  ;;  %v3739_v4 = vadd.f32 %v3738_v56, %v655_v43  ;;  %v3444_v9 = vadd.f32 %v3443_v61, %v364_v54  ;;  %v3998_v31 = vadd.f32 %v3997_v19, %v910_v13  ;;  %v786_v33 = vld [vmem:[%s16643_s14 + $0x11e0] sm:$0xff]  ;;  %v697_v35 = vld [vmem:[%s16643_s14 + $0xf18] sm:$0xff]  ;;  %v912_v36 = vld [vmem:[%s16643_s14 + $0x15d0] sm:$0xff] }
 0x144   : > { %v3868_v11 = vadd.f32 %v3867_v63, %v782_v58  ;;  %v3781_v39 = vadd.f32 %v3780_v30, %v696_v23  ;;  %v822_v41 = vld [vmem:[%s16643_s14 + $0x1300] sm:$0xff]  ;;  %v823_v42 = vld [vmem:[%s16643_s14 + $0x1308] sm:$0xff]  ;;  %v824_v43 = vld [vmem:[%s16643_s14 + $0x1310] sm:$0xff] }
 0x145   : > { %v3649_v5 = vadd.f32 %v3648_v57, %v566_v50  ;;  %v3740_v15 = vadd.f32 %v3739_v4, %v656_v55  ;;  %v3445_v20 = vadd.f32 %v3444_v9, %v365_v2  ;;  %v3999_v40 = vadd.f32 %v3998_v31, %v911_v24  ;;  %v571_v44 = vld [vmem:[%s16643_s14 + $0xb28] sm:$0xff]  ;;  %v698_v46 = vld [vmem:[%s16643_s14 + $0xf20] sm:$0xff]  ;;  %v913_v47 = vld [vmem:[%s16643_s14 + $0x15d8] sm:$0xff] }
 0x146   : > { %v3869_v22 = vadd.f32 %v3868_v11, %v783_v6  ;;  %v3910_v48 = vadd.f32 %v823_v42, %v822_v41  ;;  %v661_v49 = vld [vmem:[%s16643_s14 + $0xdf8] sm:$0xff]  ;;  %v787_v52 = vld [vmem:[%s16643_s14 + $0x11e8] sm:$0xff]  ;;  %v3782_v53 = vadd.f32 %v3781_v39, %v697_v35  ;;  %v572_v56 = vld [vmem:[%s16643_s14 + $0xb30] sm:$0xff] }
 0x147   : > { %v3650_v16 = vadd.f32 %v3649_v5, %v567_v62  ;;  %v3741_v26 = vadd.f32 %v3740_v15, %v657_v3  ;;  %3446 = vadd.xlane.f32.xlu0 %v3445_v20  ;;  %v4000_v54 = vadd.f32 %v3999_v40, %v912_v36  ;;  %v825_v55 = vld [vmem:[%s16643_s14 + $0x1318] sm:$0xff]  ;;  %v699_v58 = vld [vmem:[%s16643_s14 + $0xf28] sm:$0xff]  ;;  %v914_v59 = vld [vmem:[%s16643_s14 + $0x15e0] sm:$0xff] }
 0x148   : > { %v3870_v34 = vadd.f32 %v3869_v22, %v784_v17  ;;  %v3911_v60 = vadd.f32 %v3910_v48, %v824_v43  ;;  %v662_v61 = vld [vmem:[%s16643_s14 + $0xe00] sm:$0xff]  ;;  %v788_v0 = vld [vmem:[%s16643_s14 + $0x11f0] sm:$0xff]  ;;  %v3783_v1 = vadd.f32 %v3782_v53, %v698_v46  ;;  %v573_v4 = vld [vmem:[%s16643_s14 + $0xb38] sm:$0xff] }
 0x149   : > { %v3651_v28 = vadd.f32 %v3650_v16, %v568_v10  ;;  %v3742_v37 = vadd.f32 %v3741_v26, %v658_v14  ;;  %v4001_v2 = vadd.f32 %v4000_v54, %v913_v47  ;;  %v826_v3 = vld [vmem:[%s16643_s14 + $0x1320] sm:$0xff]  ;;  %v700_v6 = vld [vmem:[%s16643_s14 + $0xf30] sm:$0xff]  ;;  %v915_v7 = vld [vmem:[%s16643_s14 + $0x15e8] sm:$0xff] }
 0x14a   : > { %v3871_v45 = vadd.f32 %v3870_v34, %v785_v29  ;;  %v3912_v8 = vadd.f32 %v3911_v60, %v825_v55  ;;  %v663_v9 = vld [vmem:[%s16643_s14 + $0xe08] sm:$0xff]  ;;  %v789_v12 = vld [vmem:[%s16643_s14 + $0x11f8] sm:$0xff]  ;;  %v3784_v13 = vadd.f32 %v3783_v1, %v699_v58  ;;  %v574_v16 = vld [vmem:[%s16643_s14 + $0xb40] sm:$0xff] }
 0x14b   : > { %v3652_v38 = vadd.f32 %v3651_v28, %v569_v21  ;;  %v3743_v50 = vadd.f32 %v3742_v37, %v659_v25  ;;  %v4002_v14 = vadd.f32 %v4001_v2, %v914_v59  ;;  %v827_v15 = vld [vmem:[%s16643_s14 + $0x1328] sm:$0xff]  ;;  %v701_v18 = vld [vmem:[%s16643_s14 + $0xf38] sm:$0xff]  ;;  %v916_v19 = vld [vmem:[%s16643_s14 + $0x15f0] sm:$0xff] }
 0x14c   : > { %v3872_v57 = vadd.f32 %v3871_v45, %v786_v33  ;;  %v3913_v20 = vadd.f32 %v3912_v8, %v826_v3  ;;  %v664_v21 = vld [vmem:[%s16643_s14 + $0xe10] sm:$0xff]  ;;  %v790_v24 = vld [vmem:[%s16643_s14 + $0x1200] sm:$0xff]  ;;  %v3785_v25 = vadd.f32 %v3784_v13, %v700_v6  ;;  %v575_v28 = vld [vmem:[%s16643_s14 + $0xb48] sm:$0xff] }
 0x14d   : > { %v3653_v51 = vadd.f32 %v3652_v38, %v570_v27  ;;  %v3744_v62 = vadd.f32 %v3743_v50, %v660_v32  ;;  %v4003_v26 = vadd.f32 %v4002_v14, %v915_v7  ;;  %v828_v27 = vld [vmem:[%s16643_s14 + $0x1330] sm:$0xff]  ;;  %v702_v30 = vld [vmem:[%s16643_s14 + $0xf40] sm:$0xff]  ;;  %v917_v31 = vld [vmem:[%s16643_s14 + $0x15f8] sm:$0xff] }
 0x14e   : > { %v3873_v5 = vadd.f32 %v3872_v57, %v787_v52  ;;  %v3914_v32 = vadd.f32 %v3913_v20, %v827_v15  ;;  %v665_v33 = vld [vmem:[%s16643_s14 + $0xe18] sm:$0xff]  ;;  %v791_v36 = vld [vmem:[%s16643_s14 + $0x1208] sm:$0xff]  ;;  %v3786_v37 = vadd.f32 %v3785_v25, %v701_v18  ;;  %v576_v40 = vld [vmem:[%s16643_s14 + $0xb50] sm:$0xff] }
 0x14f   : > { %v3654_v63 = vadd.f32 %v3653_v51, %v571_v44  ;;  %v3745_v10 = vadd.f32 %v3744_v62, %v661_v49  ;;  %v4004_v38 = vadd.f32 %v4003_v26, %v916_v19  ;;  %v829_v39 = vld [vmem:[%s16643_s14 + $0x1338] sm:$0xff]  ;;  %v703_v42 = vld [vmem:[%s16643_s14 + $0xf48] sm:$0xff]  ;;  %v918_v43 = vld [vmem:[%s16643_s14 + $0x1600] sm:$0xff] }
 0x150   : > { %v3874_v17 = vadd.f32 %v3873_v5, %v788_v0  ;;  %v3915_v44 = vadd.f32 %v3914_v32, %v828_v27  ;;  %v666_v45 = vld [vmem:[%s16643_s14 + $0xe20] sm:$0xff]  ;;  %v792_v48 = vld [vmem:[%s16643_s14 + $0x1210] sm:$0xff]  ;;  %v3787_v49 = vadd.f32 %v3786_v37, %v702_v30  ;;  %v577_v52 = vld [vmem:[%s16643_s14 + $0xb58] sm:$0xff] }
 0x151   : > { %v3655_v11 = vadd.f32 %v3654_v63, %v572_v56  ;;  %v3746_v22 = vadd.f32 %v3745_v10, %v662_v61  ;;  %v4005_v50 = vadd.f32 %v4004_v38, %v917_v31  ;;  %v830_v51 = vld [vmem:[%s16643_s14 + $0x1340] sm:$0xff]  ;;  %v704_v54 = vld [vmem:[%s16643_s14 + $0xf50] sm:$0xff]  ;;  %v919_v55 = vld [vmem:[%s16643_s14 + $0x1608] sm:$0xff] }
 0x152   : > { %v3875_v29 = vadd.f32 %v3874_v17, %v789_v12  ;;  %v3916_v56 = vadd.f32 %v3915_v44, %v829_v39  ;;  %v667_v57 = vld [vmem:[%s16643_s14 + $0xe28] sm:$0xff]  ;;  %v793_v60 = vld [vmem:[%s16643_s14 + $0x1218] sm:$0xff]  ;;  %v3788_v61 = vadd.f32 %v3787_v49, %v703_v42  ;;  %v578_v0 = vld [vmem:[%s16643_s14 + $0xb60] sm:$0xff] }
 0x153   : > { %v3656_v23 = vadd.f32 %v3655_v11, %v573_v4  ;;  %v3747_v34 = vadd.f32 %v3746_v22, %v663_v9  ;;  %v4006_v62 = vadd.f32 %v4005_v50, %v918_v43  ;;  %v831_v63 = vld [vmem:[%s16643_s14 + $0x1348] sm:$0xff]  ;;  %v705_v2 = vld [vmem:[%s16643_s14 + $0xf58] sm:$0xff]  ;;  %v920_v3 = vld [vmem:[%s16643_s14 + $0x1610] sm:$0xff] }
 0x154   : > { %v3876_v41 = vadd.f32 %v3875_v29, %v790_v24  ;;  %v3917_v4 = vadd.f32 %v3916_v56, %v830_v51  ;;  %v668_v5 = vld [vmem:[%s16643_s14 + $0xe30] sm:$0xff]  ;;  %v794_v8 = vld [vmem:[%s16643_s14 + $0x1220] sm:$0xff]  ;;  %v3789_v9 = vadd.f32 %v3788_v61, %v704_v54  ;;  %v579_v12 = vld [vmem:[%s16643_s14 + $0xb68] sm:$0xff] }
 0x155   : > { %v3657_v35 = vadd.f32 %v3656_v23, %v574_v16  ;;  %v3748_v46 = vadd.f32 %v3747_v34, %v664_v21  ;;  %v4007_v10 = vadd.f32 %v4006_v62, %v919_v55  ;;  %v832_v11 = vld [vmem:[%s16643_s14 + $0x1350] sm:$0xff]  ;;  %v706_v14 = vld [vmem:[%s16643_s14 + $0xf60] sm:$0xff]  ;;  %v921_v15 = vld [vmem:[%s16643_s14 + $0x1618] sm:$0xff] }
 0x156   : > { %v3877_v53 = vadd.f32 %v3876_v41, %v791_v36  ;;  %v3918_v16 = vadd.f32 %v3917_v4, %v831_v63  ;;  %v669_v17 = vld [vmem:[%s16643_s14 + $0xe38] sm:$0xff]  ;;  %v795_v20 = vld [vmem:[%s16643_s14 + $0x1228] sm:$0xff]  ;;  %v3790_v21 = vadd.f32 %v3789_v9, %v705_v2  ;;  %v580_v24 = vld [vmem:[%s16643_s14 + $0xb70] sm:$0xff] }
 0x157   : > { %v3658_v47 = vadd.f32 %v3657_v35, %v575_v28  ;;  %v3749_v58 = vadd.f32 %v3748_v46, %v665_v33  ;;  %v4008_v22 = vadd.f32 %v4007_v10, %v920_v3  ;;  %v833_v23 = vld [vmem:[%s16643_s14 + $0x1358] sm:$0xff]  ;;  %v707_v26 = vld [vmem:[%s16643_s14 + $0xf68] sm:$0xff]  ;;  %v922_v27 = vld [vmem:[%s16643_s14 + $0x1620] sm:$0xff] }
 0x158   : > { %v3878_v1 = vadd.f32 %v3877_v53, %v792_v48  ;;  %v3919_v28 = vadd.f32 %v3918_v16, %v832_v11  ;;  %v796_v31 = vld [vmem:[%s16643_s14 + $0x1230] sm:$0xff]  ;;  %v3791_v32 = vadd.f32 %v3790_v21, %v706_v14  ;;  %v834_v34 = vld [vmem:[%s16643_s14 + $0x1360] sm:$0xff]  ;;  %v581_v35 = vld [vmem:[%s16643_s14 + $0xb78] sm:$0xff] }
 0x159   : > { %v3659_v59 = vadd.f32 %v3658_v47, %v576_v40  ;;  %v3750_v6 = vadd.f32 %v3749_v58, %v666_v45  ;;  %v4009_v33 = vadd.f32 %v4008_v22, %v921_v15  ;;  %v708_v37 = vld [vmem:[%s16643_s14 + $0xf70] sm:$0xff]  ;;  %v923_v38 = vld [vmem:[%s16643_s14 + $0x1628] sm:$0xff]  ;;  %v582_v41 = vld [vmem:[%s16643_s14 + $0xb80] sm:$0xff] }
 0x15a   : > { %v3879_v13 = vadd.f32 %v3878_v1, %v793_v60  ;;  %v3920_v39 = vadd.f32 %v3919_v28, %v833_v23  ;;  %v797_v43 = vld [vmem:[%s16643_s14 + $0x1238] sm:$0xff]  ;;  %v3792_v44 = vadd.f32 %v3791_v32, %v707_v26  ;;  %v835_v46 = vld [vmem:[%s16643_s14 + $0x1368] sm:$0xff]  ;;  %v924_v50 = vld [vmem:[%s16643_s14 + $0x1630] sm:$0xff] }
 0x15b   : > { %v3660_v7 = vadd.f32 %v3659_v59, %v577_v52  ;;  %v3751_v18 = vadd.f32 %v3750_v6, %v667_v57  ;;  %v4010_v45 = vadd.f32 %v4009_v33, %v922_v27  ;;  %v583_v47 = vld [vmem:[%s16643_s14 + $0xb88] sm:$0xff]  ;;  %v709_v49 = vld [vmem:[%s16643_s14 + $0xf78] sm:$0xff]  ;;  %v798_v53 = vld [vmem:[%s16643_s14 + $0x1240] sm:$0xff] }
 0x15c   : > { %v3880_v25 = vadd.f32 %v3879_v13, %v794_v8  ;;  %v3921_v51 = vadd.f32 %v3920_v39, %v834_v34  ;;  %v710_v54 = vld [vmem:[%s16643_s14 + $0xf80] sm:$0xff]  ;;  %v3793_v55 = vadd.f32 %v3792_v44, %v708_v37  ;;  %v836_v57 = vld [vmem:[%s16643_s14 + $0x1370] sm:$0xff]  ;;  %v925_v60 = vld [vmem:[%s16643_s14 + $0x1638] sm:$0xff] }
 0x15d   : > { %v3661_v19 = vadd.f32 %v3660_v7, %v578_v0  ;;  %v3752_v29 = vadd.f32 %v3751_v18, %v668_v5  ;;  %v4011_v56 = vadd.f32 %v4010_v45, %v923_v38  ;;  %v584_v58 = vld [vmem:[%s16643_s14 + $0xb90] sm:$0xff]  ;;  %v1050_v62 = vld [vmem:[%s16643_s14 + $0x1a20] sm:$0xff]  ;;  %v1051_v63 = vld [vmem:[%s16643_s14 + $0x1a28] sm:$0xff] }
 0x15e   : > { %v3881_v36 = vadd.f32 %v3880_v25, %v795_v20  ;;  %v3922_v61 = vadd.f32 %v3921_v51, %v835_v46  ;;  %v799_v1 = vld [vmem:[%s16643_s14 + $0x1248] sm:$0xff]  ;;  %v3794_v2 = vadd.f32 %v3793_v55, %v709_v49  ;;  %v837_v4 = vld [vmem:[%s16643_s14 + $0x1378] sm:$0xff]  ;;  %v1052_v5 = vld [vmem:[%s16643_s14 + $0x1a30] sm:$0xff]  ;;  %v4141_v6 = vadd.f32 %v1051_v63, %v1050_v62 }
 0x15f   : > { %v3662_v30 = vadd.f32 %v3661_v19, %v579_v12  ;;  %v3753_v40 = vadd.f32 %v3752_v29, %v669_v17  ;;  %v4012_v3 = vadd.f32 %v4011_v56, %v924_v50  ;;  %v711_v8 = vld [vmem:[%s16643_s14 + $0xf88] sm:$0xff]  ;;  %v926_v9 = vld [vmem:[%s16643_s14 + $0x1640] sm:$0xff]  ;;  %v1053_v11 = vld [vmem:[%s16643_s14 + $0x1a38] sm:$0xff] }
 0x160   : > { %v3882_v48 = vadd.f32 %v3881_v36, %v796_v31  ;;  %v3923_v10 = vadd.f32 %v3922_v61, %v836_v57  ;;  %v585_v12 = vld [vmem:[%s16643_s14 + $0xb98] sm:$0xff]  ;;  %v800_v14 = vld [vmem:[%s16643_s14 + $0x1250] sm:$0xff]  ;;  %v3795_v15 = vadd.f32 %v3794_v2, %v710_v54  ;;  %v838_v17 = vld [vmem:[%s16643_s14 + $0x1380] sm:$0xff]  ;;  %v4142_v18 = vadd.f32 %v4141_v6, %v1052_v5 }
 0x161   : > { %v3663_v42 = vadd.f32 %v3662_v30, %v580_v24  ;;  %3754 = vadd.xlane.f32.xlu1 %v3753_v40  ;;  %v4013_v16 = vadd.f32 %v4012_v3, %v925_v60  ;;  %v712_v20 = vld [vmem:[%s16643_s14 + $0xf90] sm:$0xff]  ;;  %v927_v21 = vld [vmem:[%s16643_s14 + $0x1648] sm:$0xff]  ;;  %v1054_v23 = vld [vmem:[%s16643_s14 + $0x1a40] sm:$0xff] }
 0x162   : > { %v3883_v59 = vadd.f32 %v3882_v48, %v797_v43  ;;  %v3924_v22 = vadd.f32 %v3923_v10, %v837_v4  ;;  %v586_v24 = vld [vmem:[%s16643_s14 + $0xba0] sm:$0xff]  ;;  %v801_v26 = vld [vmem:[%s16643_s14 + $0x1258] sm:$0xff]  ;;  %v3796_v27 = vadd.f32 %v3795_v15, %v711_v8  ;;  %v839_v29 = vld [vmem:[%s16643_s14 + $0x1388] sm:$0xff]  ;;  %v4143_v30 = vadd.f32 %v4142_v18, %v1053_v11 }
 0x163   : > { %v3664_v52 = vadd.f32 %v3663_v42, %v581_v35  ;;  %v4014_v28 = vadd.f32 %v4013_v16, %v926_v9  ;;  %v713_v32 = vld [vmem:[%s16643_s14 + $0xf98] sm:$0xff]  ;;  %v928_v33 = vld [vmem:[%s16643_s14 + $0x1650] sm:$0xff]  ;;  %v1055_v35 = vld [vmem:[%s16643_s14 + $0x1a48] sm:$0xff] }
 0x164   : > { %v3884_v7 = vadd.f32 %v3883_v59, %v798_v53  ;;  %v3925_v34 = vadd.f32 %v3924_v22, %v838_v17  ;;  %v587_v36 = vld [vmem:[%s16643_s14 + $0xba8] sm:$0xff]  ;;  %v802_v38 = vld [vmem:[%s16643_s14 + $0x1260] sm:$0xff]  ;;  %v3797_v39 = vadd.f32 %v3796_v27, %v712_v20  ;;  %v4144_v42 = vadd.f32 %v4143_v30, %v1054_v23  ;;  %v929_v45 = vld [vmem:[%s16643_s14 + $0x1658] sm:$0xff] }
 0x165   : > { %v3665_v0 = vadd.f32 %v3664_v52, %v582_v41  ;;  %v4015_v40 = vadd.f32 %v4014_v28, %v927_v21  ;;  %v840_v41 = vld [vmem:[%s16643_s14 + $0x1390] sm:$0xff]  ;;  %v714_v44 = vld [vmem:[%s16643_s14 + $0xfa0] sm:$0xff]  ;;  %v803_v50 = vld [vmem:[%s16643_s14 + $0x1268] sm:$0xff] }
 0x166   : > { %v3885_v19 = vadd.f32 %v3884_v7, %v799_v1  ;;  %v3926_v46 = vadd.f32 %v3925_v34, %v839_v29  ;;  %v588_v48 = vld [vmem:[%s16643_s14 + $0xbb0] sm:$0xff]  ;;  %v3798_v51 = vadd.f32 %v3797_v39, %v713_v32  ;;  %v841_v53 = vld [vmem:[%s16643_s14 + $0x1398] sm:$0xff]  ;;  %v4145_v54 = vadd.f32 %v4144_v42, %v1055_v35  ;;  %v715_v56 = vld [vmem:[%s16643_s14 + $0xfa8] sm:$0xff] }
 0x167   : > { %v3666_v13 = vadd.f32 %v3665_v0, %v583_v47  ;;  %v1056_v47 = vld [vmem:[%s16643_s14 + $0x1a50] sm:$0xff]  ;;  %v4016_v52 = vadd.f32 %v4015_v40, %v928_v33  ;;  %v930_v57 = vld [vmem:[%s16643_s14 + $0x1660] sm:$0xff]  ;;  %v1057_v59 = vld [vmem:[%s16643_s14 + $0x1a58] sm:$0xff] }
 0x168   : > { %v3886_v31 = vadd.f32 %v3885_v19, %v800_v14  ;;  %v589_v60 = vld [vmem:[%s16643_s14 + $0xbb8] sm:$0xff]  ;;  %v804_v62 = vld [vmem:[%s16643_s14 + $0x1270] sm:$0xff]  ;;  %v3799_v63 = vadd.f32 %v3798_v51, %v714_v44  ;;  %v842_v1 = vld [vmem:[%s16643_s14 + $0x13a0] sm:$0xff]  ;;  %v4146_v2 = vadd.f32 %v4145_v54, %v1056_v47 }
 0x169   : > { %v3667_v25 = vadd.f32 %v3666_v13, %v584_v58  ;;  %v3927_v58 = vadd.f32 %v3926_v46, %v840_v41  ;;  %v4017_v0 = vadd.f32 %v4016_v52, %v929_v45  ;;  %v716_v4 = vld [vmem:[%s16643_s14 + $0xfb0] sm:$0xff]  ;;  %v931_v5 = vld [vmem:[%s16643_s14 + $0x1668] sm:$0xff]  ;;  %v1058_v7 = vld [vmem:[%s16643_s14 + $0x1a60] sm:$0xff] }
 0x16a   : > { %v3887_v43 = vadd.f32 %v3886_v31, %v801_v26  ;;  %v590_v8 = vld [vmem:[%s16643_s14 + $0xbc0] sm:$0xff]  ;;  %v805_v10 = vld [vmem:[%s16643_s14 + $0x1278] sm:$0xff]  ;;  %v3800_v11 = vadd.f32 %v3799_v63, %v715_v56  ;;  %v843_v13 = vld [vmem:[%s16643_s14 + $0x13a8] sm:$0xff]  ;;  %v4147_v14 = vadd.f32 %v4146_v2, %v1057_v59 }
 0x16b   : > { %v3668_v37 = vadd.f32 %v3667_v25, %v585_v12  ;;  %v3928_v6 = vadd.f32 %v3927_v58, %v841_v53  ;;  %v4018_v12 = vadd.f32 %v4017_v0, %v930_v57  ;;  %v717_v16 = vld [vmem:[%s16643_s14 + $0xfb8] sm:$0xff]  ;;  %v932_v17 = vld [vmem:[%s16643_s14 + $0x1670] sm:$0xff]  ;;  %v1059_v19 = vld [vmem:[%s16643_s14 + $0x1a68] sm:$0xff] }
 0x16c   : > { %v3888_v55 = vadd.f32 %v3887_v43, %v802_v38  ;;  %v591_v20 = vld [vmem:[%s16643_s14 + $0xbc8] sm:$0xff]  ;;  %v806_v22 = vld [vmem:[%s16643_s14 + $0x1280] sm:$0xff]  ;;  %v3801_v23 = vadd.f32 %v3800_v11, %v716_v4  ;;  %v844_v25 = vld [vmem:[%s16643_s14 + $0x13b0] sm:$0xff]  ;;  %v4148_v26 = vadd.f32 %v4147_v14, %v1058_v7 }
 0x16d   : > { %v3669_v49 = vadd.f32 %v3668_v37, %v586_v24  ;;  %v3929_v18 = vadd.f32 %v3928_v6, %v842_v1  ;;  %v4019_v24 = vadd.f32 %v4018_v12, %v931_v5  ;;  %v718_v28 = vld [vmem:[%s16643_s14 + $0xfc0] sm:$0xff]  ;;  %v933_v29 = vld [vmem:[%s16643_s14 + $0x1678] sm:$0xff]  ;;  %v1060_v31 = vld [vmem:[%s16643_s14 + $0x1a70] sm:$0xff] }
 0x16e   : > { %v3889_v3 = vadd.f32 %v3888_v55, %v803_v50  ;;  %v592_v32 = vld [vmem:[%s16643_s14 + $0xbd0] sm:$0xff]  ;;  %v807_v34 = vld [vmem:[%s16643_s14 + $0x1288] sm:$0xff]  ;;  %v3802_v35 = vadd.f32 %v3801_v23, %v717_v16  ;;  %v845_v37 = vld [vmem:[%s16643_s14 + $0x13b8] sm:$0xff]  ;;  %v4149_v38 = vadd.f32 %v4148_v26, %v1059_v19 }
 0x16f   : > { %v3670_v61 = vadd.f32 %v3669_v49, %v587_v36  ;;  %v3930_v30 = vadd.f32 %v3929_v18, %v843_v13  ;;  %v4020_v36 = vadd.f32 %v4019_v24, %v932_v17  ;;  %v719_v40 = vld [vmem:[%s16643_s14 + $0xfc8] sm:$0xff]  ;;  %v934_v41 = vld [vmem:[%s16643_s14 + $0x1680] sm:$0xff]  ;;  %v1061_v43 = vld [vmem:[%s16643_s14 + $0x1a78] sm:$0xff] }
 0x170   : > { %v3890_v15 = vadd.f32 %v3889_v3, %v804_v62  ;;  %v593_v44 = vld [vmem:[%s16643_s14 + $0xbd8] sm:$0xff]  ;;  %v808_v46 = vld [vmem:[%s16643_s14 + $0x1290] sm:$0xff]  ;;  %v3803_v47 = vadd.f32 %v3802_v35, %v718_v28  ;;  %v846_v49 = vld [vmem:[%s16643_s14 + $0x13c0] sm:$0xff]  ;;  %v4150_v50 = vadd.f32 %v4149_v38, %v1060_v31 }
 0x171   : > { %v3671_v9 = vadd.f32 %v3670_v61, %v588_v48  ;;  %v3931_v42 = vadd.f32 %v3930_v30, %v844_v25  ;;  %v4021_v48 = vadd.f32 %v4020_v36, %v933_v29  ;;  %v720_v52 = vld [vmem:[%s16643_s14 + $0xfd0] sm:$0xff]  ;;  %v935_v53 = vld [vmem:[%s16643_s14 + $0x1688] sm:$0xff]  ;;  %v1062_v55 = vld [vmem:[%s16643_s14 + $0x1a80] sm:$0xff] }
 0x172   : > { %v3891_v27 = vadd.f32 %v3890_v15, %v805_v10  ;;  %v809_v57 = vld [vmem:[%s16643_s14 + $0x1298] sm:$0xff]  ;;  %v810_v58 = vld [vmem:[%s16643_s14 + $0x12a0] sm:$0xff]  ;;  %v3804_v59 = vadd.f32 %v3803_v47, %v719_v40  ;;  %v847_v61 = vld [vmem:[%s16643_s14 + $0x13c8] sm:$0xff]  ;;  %v4151_v62 = vadd.f32 %v4150_v50, %v1061_v43 }
 0x173   : > { %v3672_v21 = vadd.f32 %v3671_v9, %v589_v60  ;;  %v3932_v54 = vadd.f32 %v3931_v42, %v845_v37  ;;  %v4022_v60 = vadd.f32 %v4021_v48, %v934_v41  ;;  %v721_v0 = vld [vmem:[%s16643_s14 + $0xfd8] sm:$0xff]  ;;  %v936_v1 = vld [vmem:[%s16643_s14 + $0x1690] sm:$0xff]  ;;  %v1063_v3 = vld [vmem:[%s16643_s14 + $0x1a88] sm:$0xff] }
 0x174   : > { %v3892_v39 = vadd.f32 %v3891_v27, %v806_v22  ;;  %v811_v5 = vld [vmem:[%s16643_s14 + $0x12a8] sm:$0xff]  ;;  %v722_v6 = vld [vmem:[%s16643_s14 + $0xfe0] sm:$0xff]  ;;  %v3805_v7 = vadd.f32 %v3804_v59, %v720_v52  ;;  %v848_v9 = vld [vmem:[%s16643_s14 + $0x13d0] sm:$0xff]  ;;  %v4152_v10 = vadd.f32 %v4151_v62, %v1062_v55 }
 0x175   : > { %v3673_v33 = vadd.f32 %v3672_v21, %v590_v8  ;;  %v3933_v2 = vadd.f32 %v3932_v54, %v846_v49  ;;  %v4023_v8 = vadd.f32 %v4022_v60, %v935_v53  ;;  %v723_v12 = vld [vmem:[%s16643_s14 + $0xfe8] sm:$0xff]  ;;  %v937_v13 = vld [vmem:[%s16643_s14 + $0x1698] sm:$0xff]  ;;  %v1064_v15 = vld [vmem:[%s16643_s14 + $0x1a90] sm:$0xff] }
 0x176   : > { %v3893_v51 = vadd.f32 %v3892_v39, %v807_v34  ;;  %v3806_v16 = vadd.f32 %v3805_v7, %v721_v0  ;;  %v938_v17 = vld [vmem:[%s16643_s14 + $0x16a0] sm:$0xff]  ;;  %v849_v19 = vld [vmem:[%s16643_s14 + $0x13d8] sm:$0xff]  ;;  %v975_v25 = vld [vmem:[%s16643_s14 + $0x17c8] sm:$0xff] }
 0x177   : > { %v3674_v45 = vadd.f32 %v3673_v33, %v591_v20  ;;  %v3934_v14 = vadd.f32 %v3933_v2, %v847_v61  ;;  %v4024_v18 = vadd.f32 %v4023_v8, %v936_v1  ;;  %v4153_v20 = vadd.f32 %v4152_v10, %v1063_v3  ;;  %v974_v21 = vld [vmem:[%s16643_s14 + $0x17c0] sm:$0xff]  ;;  %v1065_v24 = vld [vmem:[%s16643_s14 + $0x1a98] sm:$0xff]  ;;  %v976_v26 = vld [vmem:[%s16643_s14 + $0x17d0] sm:$0xff] }
 0x178   : > { %v3894_v63 = vadd.f32 %v3893_v51, %v808_v46  ;;  %v812_v27 = vld [vmem:[%s16643_s14 + $0x12b0] sm:$0xff]  ;;  %v3807_v29 = vadd.f32 %v3806_v16, %v722_v6  ;;  %v850_v31 = vld [vmem:[%s16643_s14 + $0x13e0] sm:$0xff]  ;;  %v4064_v33 = vadd.f32 %v975_v25, %v974_v21  ;;  %v939_v35 = vld [vmem:[%s16643_s14 + $0x16a8] sm:$0xff] }
 0x179   : > { %v3675_v56 = vadd.f32 %v3674_v45, %v592_v32  ;;  %v3935_v23 = vadd.f32 %v3934_v14, %v848_v9  ;;  %v724_v28 = vld [vmem:[%s16643_s14 + $0xff0] sm:$0xff]  ;;  %v4025_v30 = vadd.f32 %v4024_v18, %v937_v13  ;;  %v4154_v32 = vadd.f32 %v4153_v20, %v1064_v15  ;;  %v1066_v37 = vld [vmem:[%s16643_s14 + $0x1aa0] sm:$0xff]  ;;  %v977_v38 = vld [vmem:[%s16643_s14 + $0x17d8] sm:$0xff] }
 0x17a   : > { %v3895_v11 = vadd.f32 %v3894_v63, %v809_v57  ;;  %v813_v39 = vld [vmem:[%s16643_s14 + $0x12b8] sm:$0xff]  ;;  %v3808_v41 = vadd.f32 %v3807_v29, %v723_v12  ;;  %v851_v43 = vld [vmem:[%s16643_s14 + $0x13e8] sm:$0xff]  ;;  %v4065_v45 = vadd.f32 %v4064_v33, %v976_v26  ;;  %v940_v47 = vld [vmem:[%s16643_s14 + $0x16b0] sm:$0xff] }
 0x17b   : > { %v3676_v4 = vadd.f32 %v3675_v56, %v593_v44  ;;  %v3936_v36 = vadd.f32 %v3935_v23, %v849_v19  ;;  %v725_v40 = vld [vmem:[%s16643_s14 + $0xff8] sm:$0xff]  ;;  %v4026_v42 = vadd.f32 %v4025_v30, %v938_v17  ;;  %v4155_v44 = vadd.f32 %v4154_v32, %v1065_v24  ;;  %v1067_v49 = vld [vmem:[%s16643_s14 + $0x1aa8] sm:$0xff]  ;;  %v978_v50 = vld [vmem:[%s16643_s14 + $0x17e0] sm:$0xff] }
 0x17c   : > { %v3896_v22 = vadd.f32 %v3895_v11, %v810_v58  ;;  %v814_v51 = vld [vmem:[%s16643_s14 + $0x12c0] sm:$0xff]  ;;  %v3809_v53 = vadd.f32 %v3808_v41, %v724_v28  ;;  %v852_v55 = vld [vmem:[%s16643_s14 + $0x13f0] sm:$0xff]  ;;  %v4066_v57 = vadd.f32 %v4065_v45, %v977_v38  ;;  %v941_v59 = vld [vmem:[%s16643_s14 + $0x16b8] sm:$0xff] }
 0x17d   : > { %3677 = vadd.xlane.f32.xlu0 %v3676_v4  ;;  %v3937_v48 = vadd.f32 %v3936_v36, %v850_v31  ;;  %v726_v52 = vld [vmem:[%s16643_s14 + $0x1000] sm:$0xff]  ;;  %v4027_v54 = vadd.f32 %v4026_v42, %v939_v35  ;;  %v4156_v56 = vadd.f32 %v4155_v44, %v1066_v37  ;;  %v1068_v61 = vld [vmem:[%s16643_s14 + $0x1ab0] sm:$0xff]  ;;  %v979_v62 = vld [vmem:[%s16643_s14 + $0x17e8] sm:$0xff] }
 0x17e   : > { %v3897_v34 = vadd.f32 %v3896_v22, %v811_v5  ;;  %v815_v63 = vld [vmem:[%s16643_s14 + $0x12c8] sm:$0xff]  ;;  %v3810_v1 = vadd.f32 %v3809_v53, %v725_v40  ;;  %v853_v3 = vld [vmem:[%s16643_s14 + $0x13f8] sm:$0xff]  ;;  %v4067_v5 = vadd.f32 %v4066_v57, %v978_v50  ;;  %v942_v7 = vld [vmem:[%s16643_s14 + $0x16c0] sm:$0xff] }
 0x17f   : > { %v3938_v60 = vadd.f32 %v3937_v48, %v851_v43  ;;  %v727_v0 = vld [vmem:[%s16643_s14 + $0x1008] sm:$0xff]  ;;  %v4028_v2 = vadd.f32 %v4027_v54, %v940_v47  ;;  %v4157_v4 = vadd.f32 %v4156_v56, %v1067_v49  ;;  %v1069_v9 = vld [vmem:[%s16643_s14 + $0x1ab8] sm:$0xff]  ;;  %v980_v10 = vld [vmem:[%s16643_s14 + $0x17f0] sm:$0xff] }
 0x180   : > { %v3898_v46 = vadd.f32 %v3897_v34, %v812_v27  ;;  %v816_v11 = vld [vmem:[%s16643_s14 + $0x12d0] sm:$0xff]  ;;  %v3811_v13 = vadd.f32 %v3810_v1, %v726_v52  ;;  %v854_v15 = vld [vmem:[%s16643_s14 + $0x1400] sm:$0xff]  ;;  %v4068_v17 = vadd.f32 %v4067_v5, %v979_v62  ;;  %v943_v19 = vld [vmem:[%s16643_s14 + $0x16c8] sm:$0xff] }
 0x181   : > { %v3939_v8 = vadd.f32 %v3938_v60, %v852_v55  ;;  %v728_v12 = vld [vmem:[%s16643_s14 + $0x1010] sm:$0xff]  ;;  %v4029_v14 = vadd.f32 %v4028_v2, %v941_v59  ;;  %v4158_v16 = vadd.f32 %v4157_v4, %v1068_v61  ;;  %v1070_v21 = vld [vmem:[%s16643_s14 + $0x1ac0] sm:$0xff]  ;;  %v981_v22 = vld [vmem:[%s16643_s14 + $0x17f8] sm:$0xff] }
 0x182   : > { %v3899_v58 = vadd.f32 %v3898_v46, %v813_v39  ;;  %v817_v23 = vld [vmem:[%s16643_s14 + $0x12d8] sm:$0xff]  ;;  %v3812_v25 = vadd.f32 %v3811_v13, %v727_v0  ;;  %v855_v27 = vld [vmem:[%s16643_s14 + $0x1408] sm:$0xff]  ;;  %v4069_v29 = vadd.f32 %v4068_v17, %v980_v10  ;;  %v944_v31 = vld [vmem:[%s16643_s14 + $0x16d0] sm:$0xff] }
 0x183   : > { %v3940_v20 = vadd.f32 %v3939_v8, %v853_v3  ;;  %v729_v24 = vld [vmem:[%s16643_s14 + $0x1018] sm:$0xff]  ;;  %v4030_v26 = vadd.f32 %v4029_v14, %v942_v7  ;;  %v4159_v28 = vadd.f32 %v4158_v16, %v1069_v9  ;;  %v1071_v33 = vld [vmem:[%s16643_s14 + $0x1ac8] sm:$0xff]  ;;  %v982_v34 = vld [vmem:[%s16643_s14 + $0x1800] sm:$0xff] }
 0x184   : > { %v3900_v6 = vadd.f32 %v3899_v58, %v814_v51  ;;  %v818_v35 = vld [vmem:[%s16643_s14 + $0x12e0] sm:$0xff]  ;;  %v3813_v37 = vadd.f32 %v3812_v25, %v728_v12  ;;  %v856_v39 = vld [vmem:[%s16643_s14 + $0x1410] sm:$0xff]  ;;  %v4070_v41 = vadd.f32 %v4069_v29, %v981_v22  ;;  %v945_v43 = vld [vmem:[%s16643_s14 + $0x16d8] sm:$0xff] }
 0x185   : > { %v3941_v32 = vadd.f32 %v3940_v20, %v854_v15  ;;  %v730_v36 = vld [vmem:[%s16643_s14 + $0x1020] sm:$0xff]  ;;  %v4031_v38 = vadd.f32 %v4030_v26, %v943_v19  ;;  %v4160_v40 = vadd.f32 %v4159_v28, %v1070_v21  ;;  %v1072_v45 = vld [vmem:[%s16643_s14 + $0x1ad0] sm:$0xff]  ;;  %v983_v46 = vld [vmem:[%s16643_s14 + $0x1808] sm:$0xff] }
 0x186   : > { %v3901_v18 = vadd.f32 %v3900_v6, %v815_v63  ;;  %v819_v47 = vld [vmem:[%s16643_s14 + $0x12e8] sm:$0xff]  ;;  %v3814_v49 = vadd.f32 %v3813_v37, %v729_v24  ;;  %v857_v51 = vld [vmem:[%s16643_s14 + $0x1418] sm:$0xff]  ;;  %v4071_v53 = vadd.f32 %v4070_v41, %v982_v34  ;;  %v946_v55 = vld [vmem:[%s16643_s14 + $0x16e0] sm:$0xff] }
 0x187   : > { %v3942_v44 = vadd.f32 %v3941_v32, %v855_v27  ;;  %v731_v48 = vld [vmem:[%s16643_s14 + $0x1028] sm:$0xff]  ;;  %v4032_v50 = vadd.f32 %v4031_v38, %v944_v31  ;;  %v4161_v52 = vadd.f32 %v4160_v40, %v1071_v33  ;;  %v1073_v57 = vld [vmem:[%s16643_s14 + $0x1ad8] sm:$0xff]  ;;  %v984_v58 = vld [vmem:[%s16643_s14 + $0x1810] sm:$0xff] }
 0x188   : > { %v3902_v30 = vadd.f32 %v3901_v18, %v816_v11  ;;  %v820_v59 = vld [vmem:[%s16643_s14 + $0x12f0] sm:$0xff]  ;;  %v3815_v61 = vadd.f32 %v3814_v49, %v730_v36  ;;  %v858_v63 = vld [vmem:[%s16643_s14 + $0x1420] sm:$0xff]  ;;  %v4072_v1 = vadd.f32 %v4071_v53, %v983_v46  ;;  %v947_v3 = vld [vmem:[%s16643_s14 + $0x16e8] sm:$0xff] }
 0x189   : > { %v3943_v56 = vadd.f32 %v3942_v44, %v856_v39  ;;  %v732_v60 = vld [vmem:[%s16643_s14 + $0x1030] sm:$0xff]  ;;  %v4033_v62 = vadd.f32 %v4032_v50, %v945_v43  ;;  %v4162_v0 = vadd.f32 %v4161_v52, %v1072_v45  ;;  %v1074_v5 = vld [vmem:[%s16643_s14 + $0x1ae0] sm:$0xff]  ;;  %v985_v6 = vld [vmem:[%s16643_s14 + $0x1818] sm:$0xff] }
 0x18a   : > { %v3903_v42 = vadd.f32 %v3902_v30, %v817_v23  ;;  %v821_v7 = vld [vmem:[%s16643_s14 + $0x12f8] sm:$0xff]  ;;  %v3816_v9 = vadd.f32 %v3815_v61, %v731_v48  ;;  %v859_v11 = vld [vmem:[%s16643_s14 + $0x1428] sm:$0xff]  ;;  %v4073_v13 = vadd.f32 %v4072_v1, %v984_v58  ;;  %v948_v15 = vld [vmem:[%s16643_s14 + $0x16f0] sm:$0xff] }
 0x18b   : > { %v3944_v4 = vadd.f32 %v3943_v56, %v857_v51  ;;  %v733_v8 = vld [vmem:[%s16643_s14 + $0x1038] sm:$0xff]  ;;  %v4034_v10 = vadd.f32 %v4033_v62, %v946_v55  ;;  %v4163_v12 = vadd.f32 %v4162_v0, %v1073_v57  ;;  %v1075_v17 = vld [vmem:[%s16643_s14 + $0x1ae8] sm:$0xff]  ;;  %v986_v18 = vld [vmem:[%s16643_s14 + $0x1820] sm:$0xff] }
 0x18c   : > { %v3904_v54 = vadd.f32 %v3903_v42, %v818_v35  ;;  %v734_v19 = vld [vmem:[%s16643_s14 + $0x1040] sm:$0xff]  ;;  %v3817_v20 = vadd.f32 %v3816_v9, %v732_v60  ;;  %v860_v22 = vld [vmem:[%s16643_s14 + $0x1430] sm:$0xff]  ;;  %v4074_v24 = vadd.f32 %v4073_v13, %v985_v6  ;;  %v949_v26 = vld [vmem:[%s16643_s14 + $0x16f8] sm:$0xff] }
 0x18d   : > { %v3945_v16 = vadd.f32 %v3944_v4, %v858_v63  ;;  %v4035_v21 = vadd.f32 %v4034_v10, %v947_v3  ;;  %v4164_v23 = vadd.f32 %v4163_v12, %v1074_v5  ;;  %v1076_v28 = vld [vmem:[%s16643_s14 + $0x1af0] sm:$0xff]  ;;  %v987_v29 = vld [vmem:[%s16643_s14 + $0x1828] sm:$0xff]  ;;  %v950_v32 = vld [vmem:[%s16643_s14 + $0x1700] sm:$0xff] }
 0x18e   : > { %v3905_v2 = vadd.f32 %v3904_v54, %v819_v47  ;;  %v735_v30 = vld [vmem:[%s16643_s14 + $0x1048] sm:$0xff]  ;;  %v3818_v31 = vadd.f32 %v3817_v20, %v733_v8  ;;  %v861_v34 = vld [vmem:[%s16643_s14 + $0x1438] sm:$0xff]  ;;  %v4075_v36 = vadd.f32 %v4074_v24, %v986_v18  ;;  %v736_v37 = vld [vmem:[%s16643_s14 + $0x1050] sm:$0xff] }
 0x18f   : > { %v3946_v27 = vadd.f32 %v3945_v16, %v859_v11  ;;  %v4036_v33 = vadd.f32 %v4035_v21, %v948_v15  ;;  %v4165_v35 = vadd.f32 %v4164_v23, %v1075_v17  ;;  %v862_v38 = vld [vmem:[%s16643_s14 + $0x1440] sm:$0xff]  ;;  %v1077_v40 = vld [vmem:[%s16643_s14 + $0x1af8] sm:$0xff]  ;;  %v988_v41 = vld [vmem:[%s16643_s14 + $0x1830] sm:$0xff] }
 0x190   : > { %v3906_v14 = vadd.f32 %v3905_v2, %v820_v59  ;;  %v3819_v42 = vadd.f32 %v3818_v31, %v734_v19  ;;  %v4076_v45 = vadd.f32 %v4075_v36, %v987_v29  ;;  %v1202_v46 = vld [vmem:[%s16643_s14 + $0x1ee0] sm:$0xff]  ;;  %v1203_v47 = vld [vmem:[%s16643_s14 + $0x1ee8] sm:$0xff]  ;;  %v1204_v48 = vld [vmem:[%s16643_s14 + $0x1ef0] sm:$0xff] }
 0x191   : > { %v3947_v39 = vadd.f32 %v3946_v27, %v860_v22  ;;  %v4037_v43 = vadd.f32 %v4036_v33, %v949_v26  ;;  %v4166_v44 = vadd.f32 %v4165_v35, %v1076_v28  ;;  %v951_v49 = vld [vmem:[%s16643_s14 + $0x1708] sm:$0xff]  ;;  %v1078_v51 = vld [vmem:[%s16643_s14 + $0x1b00] sm:$0xff]  ;;  %v989_v52 = vld [vmem:[%s16643_s14 + $0x1838] sm:$0xff]  ;;  %v4295_v53 = vadd.f32 %v1203_v47, %v1202_v46 }
 0x192   : > { %v3907_v25 = vadd.f32 %v3906_v14, %v821_v7  ;;  %v737_v54 = vld [vmem:[%s16643_s14 + $0x1058] sm:$0xff]  ;;  %v3820_v55 = vadd.f32 %v3819_v42, %v735_v30  ;;  %v863_v57 = vld [vmem:[%s16643_s14 + $0x1448] sm:$0xff]  ;;  %v4077_v59 = vadd.f32 %v4076_v45, %v988_v41  ;;  %v952_v61 = vld [vmem:[%s16643_s14 + $0x1710] sm:$0xff] }
 0x193   : > { %v3948_v50 = vadd.f32 %v3947_v39, %v861_v34  ;;  %v4038_v56 = vadd.f32 %v4037_v43, %v950_v32  ;;  %v4167_v58 = vadd.f32 %v4166_v44, %v1077_v40  ;;  %v1205_v60 = vld [vmem:[%s16643_s14 + $0x1ef8] sm:$0xff]  ;;  %v1079_v63 = vld [vmem:[%s16643_s14 + $0x1b08] sm:$0xff]  ;;  %v990_v0 = vld [vmem:[%s16643_s14 + $0x1840] sm:$0xff]  ;;  %v4296_v1 = vadd.f32 %v4295_v53, %v1204_v48 }
 0x194   : > { %3908 = vadd.xlane.f32.xlu1 %v3907_v25  ;;  %v738_v2 = vld [vmem:[%s16643_s14 + $0x1060] sm:$0xff]  ;;  %v3821_v3 = vadd.f32 %v3820_v55, %v736_v37  ;;  %v864_v5 = vld [vmem:[%s16643_s14 + $0x1450] sm:$0xff]  ;;  %v4078_v7 = vadd.f32 %v4077_v59, %v989_v52  ;;  %v953_v9 = vld [vmem:[%s16643_s14 + $0x1718] sm:$0xff] }
 0x195   : > { %v3949_v62 = vadd.f32 %v3948_v50, %v862_v38  ;;  %v4039_v4 = vadd.f32 %v4038_v56, %v951_v49  ;;  %v4168_v6 = vadd.f32 %v4167_v58, %v1078_v51  ;;  %v1206_v8 = vld [vmem:[%s16643_s14 + $0x1f00] sm:$0xff]  ;;  %v1080_v11 = vld [vmem:[%s16643_s14 + $0x1b10] sm:$0xff]  ;;  %v991_v12 = vld [vmem:[%s16643_s14 + $0x1848] sm:$0xff]  ;;  %v4297_v13 = vadd.f32 %v4296_v1, %v1205_v60 }
 0x196   : > { %v739_v14 = vld [vmem:[%s16643_s14 + $0x1068] sm:$0xff]  ;;  %v3822_v15 = vadd.f32 %v3821_v3, %v737_v54  ;;  %v865_v17 = vld [vmem:[%s16643_s14 + $0x1458] sm:$0xff]  ;;  %v4079_v19 = vadd.f32 %v4078_v7, %v990_v0  ;;  %v954_v21 = vld [vmem:[%s16643_s14 + $0x1720] sm:$0xff] }
 0x197   : > { %v3950_v10 = vadd.f32 %v3949_v62, %v863_v57  ;;  %v4040_v16 = vadd.f32 %v4039_v4, %v952_v61  ;;  %v4169_v18 = vadd.f32 %v4168_v6, %v1079_v63  ;;  %v1207_v20 = vld [vmem:[%s16643_s14 + $0x1f08] sm:$0xff]  ;;  %v1081_v23 = vld [vmem:[%s16643_s14 + $0x1b18] sm:$0xff]  ;;  %v992_v24 = vld [vmem:[%s16643_s14 + $0x1850] sm:$0xff]  ;;  %v4298_v25 = vadd.f32 %v4297_v13, %v1206_v8 }
 0x198   : > { %v740_v26 = vld [vmem:[%s16643_s14 + $0x1070] sm:$0xff]  ;;  %v3823_v27 = vadd.f32 %v3822_v15, %v738_v2  ;;  %v866_v29 = vld [vmem:[%s16643_s14 + $0x1460] sm:$0xff]  ;;  %v4080_v31 = vadd.f32 %v4079_v19, %v991_v12  ;;  %v955_v33 = vld [vmem:[%s16643_s14 + $0x1728] sm:$0xff] }
 0x199   : > { %v3951_v22 = vadd.f32 %v3950_v10, %v864_v5  ;;  %v4041_v28 = vadd.f32 %v4040_v16, %v953_v9  ;;  %v4170_v30 = vadd.f32 %v4169_v18, %v1080_v11  ;;  %v1208_v32 = vld [vmem:[%s16643_s14 + $0x1f10] sm:$0xff]  ;;  %v1082_v35 = vld [vmem:[%s16643_s14 + $0x1b20] sm:$0xff]  ;;  %v993_v36 = vld [vmem:[%s16643_s14 + $0x1858] sm:$0xff]  ;;  %v4299_v37 = vadd.f32 %v4298_v25, %v1207_v20 }
 0x19a   : > { %v741_v38 = vld [vmem:[%s16643_s14 + $0x1078] sm:$0xff]  ;;  %v3824_v39 = vadd.f32 %v3823_v27, %v739_v14  ;;  %v867_v41 = vld [vmem:[%s16643_s14 + $0x1468] sm:$0xff]  ;;  %v4081_v43 = vadd.f32 %v4080_v31, %v992_v24  ;;  %v956_v45 = vld [vmem:[%s16643_s14 + $0x1730] sm:$0xff] }
 0x19b   : > { %v3952_v34 = vadd.f32 %v3951_v22, %v865_v17  ;;  %v4042_v40 = vadd.f32 %v4041_v28, %v954_v21  ;;  %v4171_v42 = vadd.f32 %v4170_v30, %v1081_v23  ;;  %v1209_v44 = vld [vmem:[%s16643_s14 + $0x1f18] sm:$0xff]  ;;  %v1083_v47 = vld [vmem:[%s16643_s14 + $0x1b28] sm:$0xff]  ;;  %v994_v48 = vld [vmem:[%s16643_s14 + $0x1860] sm:$0xff]  ;;  %v4300_v49 = vadd.f32 %v4299_v37, %v1208_v32 }
 0x19c   : > { %v742_v50 = vld [vmem:[%s16643_s14 + $0x1080] sm:$0xff]  ;;  %v3825_v51 = vadd.f32 %v3824_v39, %v740_v26  ;;  %v868_v53 = vld [vmem:[%s16643_s14 + $0x1470] sm:$0xff]  ;;  %v4082_v55 = vadd.f32 %v4081_v43, %v993_v36  ;;  %v957_v57 = vld [vmem:[%s16643_s14 + $0x1738] sm:$0xff] }
 0x19d   : > { %v3953_v46 = vadd.f32 %v3952_v34, %v866_v29  ;;  %v4043_v52 = vadd.f32 %v4042_v40, %v955_v33  ;;  %v4172_v54 = vadd.f32 %v4171_v42, %v1082_v35  ;;  %v1210_v56 = vld [vmem:[%s16643_s14 + $0x1f20] sm:$0xff]  ;;  %v1084_v59 = vld [vmem:[%s16643_s14 + $0x1b30] sm:$0xff]  ;;  %v995_v60 = vld [vmem:[%s16643_s14 + $0x1868] sm:$0xff]  ;;  %v4301_v61 = vadd.f32 %v4300_v49, %v1209_v44 }
 0x19e   : > { %v743_v62 = vld [vmem:[%s16643_s14 + $0x1088] sm:$0xff]  ;;  %v3826_v63 = vadd.f32 %v3825_v51, %v741_v38  ;;  %v869_v1 = vld [vmem:[%s16643_s14 + $0x1478] sm:$0xff]  ;;  %v4083_v3 = vadd.f32 %v4082_v55, %v994_v48  ;;  %v958_v5 = vld [vmem:[%s16643_s14 + $0x1740] sm:$0xff] }
 0x19f   : > { %v3954_v58 = vadd.f32 %v3953_v46, %v867_v41  ;;  %v4044_v0 = vadd.f32 %v4043_v52, %v956_v45  ;;  %v4173_v2 = vadd.f32 %v4172_v54, %v1083_v47  ;;  %v1211_v4 = vld [vmem:[%s16643_s14 + $0x1f28] sm:$0xff]  ;;  %v1085_v7 = vld [vmem:[%s16643_s14 + $0x1b38] sm:$0xff]  ;;  %v996_v8 = vld [vmem:[%s16643_s14 + $0x1870] sm:$0xff]  ;;  %v4302_v9 = vadd.f32 %v4301_v61, %v1210_v56 }
 0x1a0   : > { %v744_v10 = vld [vmem:[%s16643_s14 + $0x1090] sm:$0xff]  ;;  %v3827_v11 = vadd.f32 %v3826_v63, %v742_v50  ;;  %v870_v13 = vld [vmem:[%s16643_s14 + $0x1480] sm:$0xff]  ;;  %v4084_v15 = vadd.f32 %v4083_v3, %v995_v60  ;;  %v959_v17 = vld [vmem:[%s16643_s14 + $0x1748] sm:$0xff] }
 0x1a1   : > { %v3955_v6 = vadd.f32 %v3954_v58, %v868_v53  ;;  %v4045_v12 = vadd.f32 %v4044_v0, %v957_v57  ;;  %v4174_v14 = vadd.f32 %v4173_v2, %v1084_v59  ;;  %v1212_v16 = vld [vmem:[%s16643_s14 + $0x1f30] sm:$0xff]  ;;  %v1086_v19 = vld [vmem:[%s16643_s14 + $0x1b40] sm:$0xff]  ;;  %v997_v20 = vld [vmem:[%s16643_s14 + $0x1878] sm:$0xff]  ;;  %v4303_v21 = vadd.f32 %v4302_v9, %v1211_v4 }
 0x1a2   : > { %v745_v22 = vld [vmem:[%s16643_s14 + $0x1098] sm:$0xff]  ;;  %v3828_v23 = vadd.f32 %v3827_v11, %v743_v62  ;;  %v871_v25 = vld [vmem:[%s16643_s14 + $0x1488] sm:$0xff]  ;;  %v4085_v27 = vadd.f32 %v4084_v15, %v996_v8  ;;  %v960_v29 = vld [vmem:[%s16643_s14 + $0x1750] sm:$0xff] }
 0x1a3   : > { %v3956_v18 = vadd.f32 %v3955_v6, %v869_v1  ;;  %v4046_v24 = vadd.f32 %v4045_v12, %v958_v5  ;;  %v4175_v26 = vadd.f32 %v4174_v14, %v1085_v7  ;;  %v1213_v28 = vld [vmem:[%s16643_s14 + $0x1f38] sm:$0xff]  ;;  %v1087_v31 = vld [vmem:[%s16643_s14 + $0x1b48] sm:$0xff]  ;;  %v998_v32 = vld [vmem:[%s16643_s14 + $0x1880] sm:$0xff]  ;;  %v4304_v33 = vadd.f32 %v4303_v21, %v1212_v16 }
 0x1a4   : > { %v3829_v34 = vadd.f32 %v3828_v23, %v744_v10  ;;  %v872_v36 = vld [vmem:[%s16643_s14 + $0x1490] sm:$0xff]  ;;  %v4086_v38 = vadd.f32 %v4085_v27, %v997_v20  ;;  %v1214_v39 = vld [vmem:[%s16643_s14 + $0x1f40] sm:$0xff]  ;;  %v961_v40 = vld [vmem:[%s16643_s14 + $0x1758] sm:$0xff] }
 0x1a5   : > { %v3957_v30 = vadd.f32 %v3956_v18, %v870_v13  ;;  %v4047_v35 = vadd.f32 %v4046_v24, %v959_v17  ;;  %v4176_v37 = vadd.f32 %v4175_v26, %v1086_v19  ;;  %v1088_v42 = vld [vmem:[%s16643_s14 + $0x1b50] sm:$0xff]  ;;  %v999_v43 = vld [vmem:[%s16643_s14 + $0x1888] sm:$0xff]  ;;  %v4305_v44 = vadd.f32 %v4304_v33, %v1213_v28  ;;  %v962_v46 = vld [vmem:[%s16643_s14 + $0x1760] sm:$0xff] }
 0x1a6   : > { %v3830_v45 = vadd.f32 %v3829_v34, %v745_v22  ;;  %v873_v48 = vld [vmem:[%s16643_s14 + $0x1498] sm:$0xff]  ;;  %v4087_v50 = vadd.f32 %v4086_v38, %v998_v32  ;;  %v1215_v51 = vld [vmem:[%s16643_s14 + $0x1f48] sm:$0xff]  ;;  %v1000_v55 = vld [vmem:[%s16643_s14 + $0x1890] sm:$0xff] }
 0x1a7   : > { %v3958_v41 = vadd.f32 %v3957_v30, %v871_v25  ;;  %v4048_v47 = vadd.f32 %v4047_v35, %v960_v29  ;;  %v4177_v49 = vadd.f32 %v4176_v37, %v1087_v31  ;;  %v963_v52 = vld [vmem:[%s16643_s14 + $0x1768] sm:$0xff]  ;;  %v1089_v54 = vld [vmem:[%s16643_s14 + $0x1b58] sm:$0xff]  ;;  %v4306_v56 = vadd.f32 %v4305_v44, %v1214_v39  ;;  %v874_v58 = vld [vmem:[%s16643_s14 + $0x14a0] sm:$0xff] }
 0x1a8   : > { %3831 = vadd.xlane.f32.xlu0 %v3830_v45  ;;  %v1090_v59 = vld [vmem:[%s16643_s14 + $0x1b60] sm:$0xff]  ;;  %v4088_v61 = vadd.f32 %v4087_v50, %v999_v43  ;;  %v1216_v62 = vld [vmem:[%s16643_s14 + $0x1f50] sm:$0xff]  ;;  %v1001_v1 = vld [vmem:[%s16643_s14 + $0x1898] sm:$0xff] }
 0x1a9   : > { %v3959_v53 = vadd.f32 %v3958_v41, %v872_v36  ;;  %v4049_v57 = vadd.f32 %v4048_v47, %v961_v40  ;;  %v4178_v60 = vadd.f32 %v4177_v49, %v1088_v42  ;;  %v964_v63 = vld [vmem:[%s16643_s14 + $0x1770] sm:$0xff]  ;;  %v4307_v2 = vadd.f32 %v4306_v56, %v1215_v51  ;;  %v1126_v3 = vld [vmem:[%s16643_s14 + $0x1c80] sm:$0xff]  ;;  %v1127_v4 = vld [vmem:[%s16643_s14 + $0x1c88] sm:$0xff] }
 0x1aa   : > { %v875_v6 = vld [vmem:[%s16643_s14 + $0x14a8] sm:$0xff]  ;;  %v4089_v8 = vadd.f32 %v4088_v61, %v1000_v55  ;;  %v1217_v9 = vld [vmem:[%s16643_s14 + $0x1f58] sm:$0xff]  ;;  %v1128_v10 = vld [vmem:[%s16643_s14 + $0x1c90] sm:$0xff]  ;;  %v4218_v11 = vadd.f32 %v1127_v4, %v1126_v3 }
 0x1ab   : > { %v3960_v0 = vadd.f32 %v3959_v53, %v873_v48  ;;  %v4050_v5 = vadd.f32 %v4049_v57, %v962_v46  ;;  %v4179_v7 = vadd.f32 %v4178_v60, %v1089_v54  ;;  %v1091_v13 = vld [vmem:[%s16643_s14 + $0x1b68] sm:$0xff]  ;;  %v1002_v14 = vld [vmem:[%s16643_s14 + $0x18a0] sm:$0xff]  ;;  %v4308_v15 = vadd.f32 %v4307_v2, %v1216_v62  ;;  %v1129_v16 = vld [vmem:[%s16643_s14 + $0x1c98] sm:$0xff] }
 0x1ac   : > { %v965_v17 = vld [vmem:[%s16643_s14 + $0x1778] sm:$0xff]  ;;  %v876_v19 = vld [vmem:[%s16643_s14 + $0x14b0] sm:$0xff]  ;;  %v4090_v21 = vadd.f32 %v4089_v8, %v1001_v1  ;;  %v1218_v22 = vld [vmem:[%s16643_s14 + $0x1f60] sm:$0xff]  ;;  %v4219_v23 = vadd.f32 %v4218_v11, %v1128_v10 }
 0x1ad   : > { %v3961_v12 = vadd.f32 %v3960_v0, %v874_v58  ;;  %v4051_v18 = vadd.f32 %v4050_v5, %v963_v52  ;;  %v4180_v20 = vadd.f32 %v4179_v7, %v1090_v59  ;;  %v1092_v25 = vld [vmem:[%s16643_s14 + $0x1b70] sm:$0xff]  ;;  %v1003_v26 = vld [vmem:[%s16643_s14 + $0x18a8] sm:$0xff]  ;;  %v4309_v27 = vadd.f32 %v4308_v15, %v1217_v9  ;;  %v1130_v28 = vld [vmem:[%s16643_s14 + $0x1ca0] sm:$0xff] }
 0x1ae   : > { %v966_v29 = vld [vmem:[%s16643_s14 + $0x1780] sm:$0xff]  ;;  %v877_v31 = vld [vmem:[%s16643_s14 + $0x14b8] sm:$0xff]  ;;  %v4091_v33 = vadd.f32 %v4090_v21, %v1002_v14  ;;  %v1219_v34 = vld [vmem:[%s16643_s14 + $0x1f68] sm:$0xff]  ;;  %v4220_v35 = vadd.f32 %v4219_v23, %v1129_v16 }
 0x1af   : > { %v3962_v24 = vadd.f32 %v3961_v12, %v875_v6  ;;  %v4052_v30 = vadd.f32 %v4051_v18, %v964_v63  ;;  %v4181_v32 = vadd.f32 %v4180_v20, %v1091_v13  ;;  %v1093_v37 = vld [vmem:[%s16643_s14 + $0x1b78] sm:$0xff]  ;;  %v1004_v38 = vld [vmem:[%s16643_s14 + $0x18b0] sm:$0xff]  ;;  %v4310_v39 = vadd.f32 %v4309_v27, %v1218_v22  ;;  %v1131_v40 = vld [vmem:[%s16643_s14 + $0x1ca8] sm:$0xff] }
 0x1b0   : > { %v967_v41 = vld [vmem:[%s16643_s14 + $0x1788] sm:$0xff]  ;;  %v878_v43 = vld [vmem:[%s16643_s14 + $0x14c0] sm:$0xff]  ;;  %v4092_v45 = vadd.f32 %v4091_v33, %v1003_v26  ;;  %v1220_v46 = vld [vmem:[%s16643_s14 + $0x1f70] sm:$0xff]  ;;  %v4221_v47 = vadd.f32 %v4220_v35, %v1130_v28 }
 0x1b1   : > { %v3963_v36 = vadd.f32 %v3962_v24, %v876_v19  ;;  %v4053_v42 = vadd.f32 %v4052_v30, %v965_v17  ;;  %v4182_v44 = vadd.f32 %v4181_v32, %v1092_v25  ;;  %v1094_v49 = vld [vmem:[%s16643_s14 + $0x1b80] sm:$0xff]  ;;  %v1005_v50 = vld [vmem:[%s16643_s14 + $0x18b8] sm:$0xff]  ;;  %v4311_v51 = vadd.f32 %v4310_v39, %v1219_v34  ;;  %v1132_v52 = vld [vmem:[%s16643_s14 + $0x1cb0] sm:$0xff] }
 0x1b2   : > { %v968_v53 = vld [vmem:[%s16643_s14 + $0x1790] sm:$0xff]  ;;  %v879_v55 = vld [vmem:[%s16643_s14 + $0x14c8] sm:$0xff]  ;;  %v4093_v57 = vadd.f32 %v4092_v45, %v1004_v38  ;;  %v1221_v58 = vld [vmem:[%s16643_s14 + $0x1f78] sm:$0xff]  ;;  %v4222_v59 = vadd.f32 %v4221_v47, %v1131_v40 }
 0x1b3   : > { %v3964_v48 = vadd.f32 %v3963_v36, %v877_v31  ;;  %v4054_v54 = vadd.f32 %v4053_v42, %v966_v29  ;;  %v4183_v56 = vadd.f32 %v4182_v44, %v1093_v37  ;;  %v1095_v61 = vld [vmem:[%s16643_s14 + $0x1b88] sm:$0xff]  ;;  %v1006_v62 = vld [vmem:[%s16643_s14 + $0x18c0] sm:$0xff]  ;;  %v4312_v63 = vadd.f32 %v4311_v51, %v1220_v46  ;;  %v1133_v0 = vld [vmem:[%s16643_s14 + $0x1cb8] sm:$0xff] }
 0x1b4   : > { %v969_v1 = vld [vmem:[%s16643_s14 + $0x1798] sm:$0xff]  ;;  %v880_v3 = vld [vmem:[%s16643_s14 + $0x14d0] sm:$0xff]  ;;  %v4094_v5 = vadd.f32 %v4093_v57, %v1005_v50  ;;  %v1222_v6 = vld [vmem:[%s16643_s14 + $0x1f80] sm:$0xff]  ;;  %v4223_v7 = vadd.f32 %v4222_v59, %v1132_v52 }
 0x1b5   : > { %v3965_v60 = vadd.f32 %v3964_v48, %v878_v43  ;;  %v4055_v2 = vadd.f32 %v4054_v54, %v967_v41  ;;  %v4184_v4 = vadd.f32 %v4183_v56, %v1094_v49  ;;  %v1096_v9 = vld [vmem:[%s16643_s14 + $0x1b90] sm:$0xff]  ;;  %v1007_v10 = vld [vmem:[%s16643_s14 + $0x18c8] sm:$0xff]  ;;  %v4313_v11 = vadd.f32 %v4312_v63, %v1221_v58  ;;  %v1134_v12 = vld [vmem:[%s16643_s14 + $0x1cc0] sm:$0xff] }
 0x1b6   : > { %v970_v13 = vld [vmem:[%s16643_s14 + $0x17a0] sm:$0xff]  ;;  %v881_v15 = vld [vmem:[%s16643_s14 + $0x14d8] sm:$0xff]  ;;  %v4095_v17 = vadd.f32 %v4094_v5, %v1006_v62  ;;  %v1223_v18 = vld [vmem:[%s16643_s14 + $0x1f88] sm:$0xff]  ;;  %v4224_v19 = vadd.f32 %v4223_v7, %v1133_v0 }
 0x1b7   : > { %v3966_v8 = vadd.f32 %v3965_v60, %v879_v55  ;;  %v4056_v14 = vadd.f32 %v4055_v2, %v968_v53  ;;  %v4185_v16 = vadd.f32 %v4184_v4, %v1095_v61  ;;  %v1097_v21 = vld [vmem:[%s16643_s14 + $0x1b98] sm:$0xff]  ;;  %v1008_v22 = vld [vmem:[%s16643_s14 + $0x18d0] sm:$0xff]  ;;  %v4314_v23 = vadd.f32 %v4313_v11, %v1222_v6  ;;  %v1135_v24 = vld [vmem:[%s16643_s14 + $0x1cc8] sm:$0xff] }
 0x1b8   : > { %v971_v25 = vld [vmem:[%s16643_s14 + $0x17a8] sm:$0xff]  ;;  %v882_v27 = vld [vmem:[%s16643_s14 + $0x14e0] sm:$0xff]  ;;  %v4096_v29 = vadd.f32 %v4095_v17, %v1007_v10  ;;  %v1224_v30 = vld [vmem:[%s16643_s14 + $0x1f90] sm:$0xff]  ;;  %v4225_v31 = vadd.f32 %v4224_v19, %v1134_v12 }
 0x1b9   : > { %v3967_v20 = vadd.f32 %v3966_v8, %v880_v3  ;;  %v4057_v26 = vadd.f32 %v4056_v14, %v969_v1  ;;  %v4186_v28 = vadd.f32 %v4185_v16, %v1096_v9  ;;  %v1098_v33 = vld [vmem:[%s16643_s14 + $0x1ba0] sm:$0xff]  ;;  %v1009_v34 = vld [vmem:[%s16643_s14 + $0x18d8] sm:$0xff]  ;;  %v4315_v35 = vadd.f32 %v4314_v23, %v1223_v18  ;;  %v1136_v36 = vld [vmem:[%s16643_s14 + $0x1cd0] sm:$0xff] }
 0x1ba   : > { %v972_v37 = vld [vmem:[%s16643_s14 + $0x17b0] sm:$0xff]  ;;  %v883_v39 = vld [vmem:[%s16643_s14 + $0x14e8] sm:$0xff]  ;;  %v4097_v41 = vadd.f32 %v4096_v29, %v1008_v22  ;;  %v1225_v42 = vld [vmem:[%s16643_s14 + $0x1f98] sm:$0xff]  ;;  %v4226_v43 = vadd.f32 %v4225_v31, %v1135_v24 }
 0x1bb   : > { %v3968_v32 = vadd.f32 %v3967_v20, %v881_v15  ;;  %v4058_v38 = vadd.f32 %v4057_v26, %v970_v13  ;;  %v4187_v40 = vadd.f32 %v4186_v28, %v1097_v21  ;;  %v1099_v45 = vld [vmem:[%s16643_s14 + $0x1ba8] sm:$0xff]  ;;  %v1010_v46 = vld [vmem:[%s16643_s14 + $0x18e0] sm:$0xff]  ;;  %v4316_v47 = vadd.f32 %v4315_v35, %v1224_v30  ;;  %v1137_v48 = vld [vmem:[%s16643_s14 + $0x1cd8] sm:$0xff] }
 0x1bc   : > { %v973_v49 = vld [vmem:[%s16643_s14 + $0x17b8] sm:$0xff]  ;;  %v884_v51 = vld [vmem:[%s16643_s14 + $0x14f0] sm:$0xff]  ;;  %v4098_v53 = vadd.f32 %v4097_v41, %v1009_v34  ;;  %v1226_v54 = vld [vmem:[%s16643_s14 + $0x1fa0] sm:$0xff]  ;;  %v4227_v55 = vadd.f32 %v4226_v43, %v1136_v36 }
 0x1bd   : > { %v3969_v44 = vadd.f32 %v3968_v32, %v882_v27  ;;  %v4059_v50 = vadd.f32 %v4058_v38, %v971_v25  ;;  %v4188_v52 = vadd.f32 %v4187_v40, %v1098_v33  ;;  %v1100_v57 = vld [vmem:[%s16643_s14 + $0x1bb0] sm:$0xff]  ;;  %v1011_v58 = vld [vmem:[%s16643_s14 + $0x18e8] sm:$0xff]  ;;  %v4317_v59 = vadd.f32 %v4316_v47, %v1225_v42  ;;  %v1138_v60 = vld [vmem:[%s16643_s14 + $0x1ce0] sm:$0xff] }
 0x1be   : > { %v885_v62 = vld [vmem:[%s16643_s14 + $0x14f8] sm:$0xff]  ;;  %v886_v63 = vld [vmem:[%s16643_s14 + $0x1500] sm:$0xff]  ;;  %v4099_v1 = vadd.f32 %v4098_v53, %v1010_v46  ;;  %v1227_v2 = vld [vmem:[%s16643_s14 + $0x1fa8] sm:$0xff]  ;;  %v4228_v3 = vadd.f32 %v4227_v55, %v1137_v48 }
 0x1bf   : > { %v3970_v56 = vadd.f32 %v3969_v44, %v883_v39  ;;  %v4060_v61 = vadd.f32 %v4059_v50, %v972_v37  ;;  %v4189_v0 = vadd.f32 %v4188_v52, %v1099_v45  ;;  %v1101_v5 = vld [vmem:[%s16643_s14 + $0x1bb8] sm:$0xff]  ;;  %v1012_v6 = vld [vmem:[%s16643_s14 + $0x18f0] sm:$0xff]  ;;  %v4318_v7 = vadd.f32 %v4317_v59, %v1226_v54  ;;  %v1139_v8 = vld [vmem:[%s16643_s14 + $0x1ce8] sm:$0xff] }
 0x1c0   : > { %v887_v10 = vld [vmem:[%s16643_s14 + $0x1508] sm:$0xff]  ;;  %v1102_v11 = vld [vmem:[%s16643_s14 + $0x1bc0] sm:$0xff]  ;;  %v4100_v13 = vadd.f32 %v4099_v1, %v1011_v58  ;;  %v1228_v14 = vld [vmem:[%s16643_s14 + $0x1fb0] sm:$0xff]  ;;  %v4229_v15 = vadd.f32 %v4228_v3, %v1138_v60 }
 0x1c1   : > { %v3971_v4 = vadd.f32 %v3970_v56, %v884_v51  ;;  %v4061_v9 = vadd.f32 %v4060_v61, %v973_v49  ;;  %v4190_v12 = vadd.f32 %v4189_v0, %v1100_v57  ;;  %v1103_v17 = vld [vmem:[%s16643_s14 + $0x1bc8] sm:$0xff]  ;;  %v1013_v18 = vld [vmem:[%s16643_s14 + $0x18f8] sm:$0xff]  ;;  %v4319_v19 = vadd.f32 %v4318_v7, %v1227_v2  ;;  %v1140_v20 = vld [vmem:[%s16643_s14 + $0x1cf0] sm:$0xff] }
 0x1c2   : > { %v1014_v22 = vld [vmem:[%s16643_s14 + $0x1900] sm:$0xff]  ;;  %v4101_v23 = vadd.f32 %v4100_v13, %v1012_v6  ;;  %v1229_v24 = vld [vmem:[%s16643_s14 + $0x1fb8] sm:$0xff]  ;;  %v4230_v25 = vadd.f32 %v4229_v15, %v1139_v8  ;;  %v1355_v30 = vld [vmem:[%s16643_s14 + $0x23a8] sm:$0xff] }
 0x1c3   : > { %v3972_v16 = vadd.f32 %v3971_v4, %v885_v62  ;;  %4062 = vadd.xlane.f32.xlu1 %v4061_v9  ;;  %v4191_v21 = vadd.f32 %v4190_v12, %v1101_v5  ;;  %v1354_v26 = vld [vmem:[%s16643_s14 + $0x23a0] sm:$0xff]  ;;  %v4320_v28 = vadd.f32 %v4319_v19, %v1228_v14  ;;  %v1141_v29 = vld [vmem:[%s16643_s14 + $0x1cf8] sm:$0xff]  ;;  %v1356_v31 = vld [vmem:[%s16643_s14 + $0x23b0] sm:$0xff] }
 0x1c4   : > { %v888_v32 = vld [vmem:[%s16643_s14 + $0x1510] sm:$0xff]  ;;  %v4102_v35 = vadd.f32 %v4101_v23, %v1013_v18  ;;  %v1230_v36 = vld [vmem:[%s16643_s14 + $0x1fc0] sm:$0xff]  ;;  %v4231_v37 = vadd.f32 %v4230_v25, %v1140_v20  ;;  %v4449_v38 = vadd.f32 %v1355_v30, %v1354_v26  ;;  %v1015_v40 = vld [vmem:[%s16643_s14 + $0x1908] sm:$0xff] }
 0x1c5   : > { %v3973_v27 = vadd.f32 %v3972_v16, %v886_v63  ;;  %v1104_v33 = vld [vmem:[%s16643_s14 + $0x1bd0] sm:$0xff]  ;;  %v4192_v34 = vadd.f32 %v4191_v21, %v1102_v11  ;;  %v4321_v41 = vadd.f32 %v4320_v28, %v1229_v24  ;;  %v1142_v42 = vld [vmem:[%s16643_s14 + $0x1d00] sm:$0xff]  ;;  %v1357_v43 = vld [vmem:[%s16643_s14 + $0x23b8] sm:$0xff] }
 0x1c6   : > { %v889_v44 = vld [vmem:[%s16643_s14 + $0x1518] sm:$0xff]  ;;  %v4103_v47 = vadd.f32 %v4102_v35, %v1014_v22  ;;  %v1231_v48 = vld [vmem:[%s16643_s14 + $0x1fc8] sm:$0xff]  ;;  %v4232_v49 = vadd.f32 %v4231_v37, %v1141_v29  ;;  %v4450_v50 = vadd.f32 %v4449_v38, %v1356_v31  ;;  %v1016_v52 = vld [vmem:[%s16643_s14 + $0x1910] sm:$0xff] }
 0x1c7   : > { %v3974_v39 = vadd.f32 %v3973_v27, %v887_v10  ;;  %v1105_v45 = vld [vmem:[%s16643_s14 + $0x1bd8] sm:$0xff]  ;;  %v4193_v46 = vadd.f32 %v4192_v34, %v1103_v17  ;;  %v4322_v53 = vadd.f32 %v4321_v41, %v1230_v36  ;;  %v1143_v54 = vld [vmem:[%s16643_s14 + $0x1d08] sm:$0xff]  ;;  %v1358_v55 = vld [vmem:[%s16643_s14 + $0x23c0] sm:$0xff] }
 0x1c8   : > { %v890_v56 = vld [vmem:[%s16643_s14 + $0x1520] sm:$0xff]  ;;  %v4104_v59 = vadd.f32 %v4103_v47, %v1015_v40  ;;  %v1232_v60 = vld [vmem:[%s16643_s14 + $0x1fd0] sm:$0xff]  ;;  %v4233_v61 = vadd.f32 %v4232_v49, %v1142_v42  ;;  %v4451_v62 = vadd.f32 %v4450_v50, %v1357_v43  ;;  %v1017_v0 = vld [vmem:[%s16643_s14 + $0x1918] sm:$0xff] }
 0x1c9   : > { %v3975_v51 = vadd.f32 %v3974_v39, %v888_v32  ;;  %v1106_v57 = vld [vmem:[%s16643_s14 + $0x1be0] sm:$0xff]  ;;  %v4194_v58 = vadd.f32 %v4193_v46, %v1104_v33  ;;  %v4323_v1 = vadd.f32 %v4322_v53, %v1231_v48  ;;  %v1144_v2 = vld [vmem:[%s16643_s14 + $0x1d10] sm:$0xff]  ;;  %v1359_v3 = vld [vmem:[%s16643_s14 + $0x23c8] sm:$0xff] }
 0x1ca   : > { %v891_v4 = vld [vmem:[%s16643_s14 + $0x1528] sm:$0xff]  ;;  %v4105_v7 = vadd.f32 %v4104_v59, %v1016_v52  ;;  %v1233_v8 = vld [vmem:[%s16643_s14 + $0x1fd8] sm:$0xff]  ;;  %v4234_v9 = vadd.f32 %v4233_v61, %v1143_v54  ;;  %v4452_v10 = vadd.f32 %v4451_v62, %v1358_v55  ;;  %v1018_v12 = vld [vmem:[%s16643_s14 + $0x1920] sm:$0xff] }
 0x1cb   : > { %v3976_v63 = vadd.f32 %v3975_v51, %v889_v44  ;;  %v1107_v5 = vld [vmem:[%s16643_s14 + $0x1be8] sm:$0xff]  ;;  %v4195_v6 = vadd.f32 %v4194_v58, %v1105_v45  ;;  %v4324_v13 = vadd.f32 %v4323_v1, %v1232_v60  ;;  %v1145_v14 = vld [vmem:[%s16643_s14 + $0x1d18] sm:$0xff]  ;;  %v1360_v15 = vld [vmem:[%s16643_s14 + $0x23d0] sm:$0xff] }
 0x1cc   : > { %v892_v16 = vld [vmem:[%s16643_s14 + $0x1530] sm:$0xff]  ;;  %v4106_v19 = vadd.f32 %v4105_v7, %v1017_v0  ;;  %v1234_v20 = vld [vmem:[%s16643_s14 + $0x1fe0] sm:$0xff]  ;;  %v4235_v21 = vadd.f32 %v4234_v9, %v1144_v2  ;;  %v4453_v22 = vadd.f32 %v4452_v10, %v1359_v3  ;;  %v1019_v24 = vld [vmem:[%s16643_s14 + $0x1928] sm:$0xff] }
 0x1cd   : > { %v3977_v11 = vadd.f32 %v3976_v63, %v890_v56  ;;  %v1108_v17 = vld [vmem:[%s16643_s14 + $0x1bf0] sm:$0xff]  ;;  %v4196_v18 = vadd.f32 %v4195_v6, %v1106_v57  ;;  %v4325_v25 = vadd.f32 %v4324_v13, %v1233_v8  ;;  %v1146_v26 = vld [vmem:[%s16643_s14 + $0x1d20] sm:$0xff]  ;;  %v1361_v27 = vld [vmem:[%s16643_s14 + $0x23d8] sm:$0xff] }
 0x1ce   : > { %v893_v28 = vld [vmem:[%s16643_s14 + $0x1538] sm:$0xff]  ;;  %v4107_v31 = vadd.f32 %v4106_v19, %v1018_v12  ;;  %v1235_v32 = vld [vmem:[%s16643_s14 + $0x1fe8] sm:$0xff]  ;;  %v4236_v33 = vadd.f32 %v4235_v21, %v1145_v14  ;;  %v4454_v34 = vadd.f32 %v4453_v22, %v1360_v15  ;;  %v1020_v36 = vld [vmem:[%s16643_s14 + $0x1930] sm:$0xff] }
 0x1cf   : > { %v3978_v23 = vadd.f32 %v3977_v11, %v891_v4  ;;  %v1109_v29 = vld [vmem:[%s16643_s14 + $0x1bf8] sm:$0xff]  ;;  %v4197_v30 = vadd.f32 %v4196_v18, %v1107_v5  ;;  %v4326_v37 = vadd.f32 %v4325_v25, %v1234_v20  ;;  %v1147_v38 = vld [vmem:[%s16643_s14 + $0x1d28] sm:$0xff]  ;;  %v1362_v39 = vld [vmem:[%s16643_s14 + $0x23e0] sm:$0xff] }
 0x1d0   : > { %v894_v40 = vld [vmem:[%s16643_s14 + $0x1540] sm:$0xff]  ;;  %v4108_v43 = vadd.f32 %v4107_v31, %v1019_v24  ;;  %v1236_v44 = vld [vmem:[%s16643_s14 + $0x1ff0] sm:$0xff]  ;;  %v4237_v45 = vadd.f32 %v4236_v33, %v1146_v26  ;;  %v4455_v46 = vadd.f32 %v4454_v34, %v1361_v27  ;;  %v1021_v48 = vld [vmem:[%s16643_s14 + $0x1938] sm:$0xff] }
 0x1d1   : > { %v3979_v35 = vadd.f32 %v3978_v23, %v892_v16  ;;  %v1110_v41 = vld [vmem:[%s16643_s14 + $0x1c00] sm:$0xff]  ;;  %v4198_v42 = vadd.f32 %v4197_v30, %v1108_v17  ;;  %v4327_v49 = vadd.f32 %v4326_v37, %v1235_v32  ;;  %v1148_v50 = vld [vmem:[%s16643_s14 + $0x1d30] sm:$0xff]  ;;  %v1363_v51 = vld [vmem:[%s16643_s14 + $0x23e8] sm:$0xff] }
 0x1d2   : > { %v895_v52 = vld [vmem:[%s16643_s14 + $0x1548] sm:$0xff]  ;;  %v4109_v55 = vadd.f32 %v4108_v43, %v1020_v36  ;;  %v1237_v56 = vld [vmem:[%s16643_s14 + $0x1ff8] sm:$0xff]  ;;  %v4238_v57 = vadd.f32 %v4237_v45, %v1147_v38  ;;  %v4456_v58 = vadd.f32 %v4455_v46, %v1362_v39  ;;  %v1022_v60 = vld [vmem:[%s16643_s14 + $0x1940] sm:$0xff] }
 0x1d3   : > { %v3980_v47 = vadd.f32 %v3979_v35, %v893_v28  ;;  %v1111_v53 = vld [vmem:[%s16643_s14 + $0x1c08] sm:$0xff]  ;;  %v4199_v54 = vadd.f32 %v4198_v42, %v1109_v29  ;;  %v4328_v61 = vadd.f32 %v4327_v49, %v1236_v44  ;;  %v1149_v62 = vld [vmem:[%s16643_s14 + $0x1d38] sm:$0xff]  ;;  %v1364_v63 = vld [vmem:[%s16643_s14 + $0x23f0] sm:$0xff] }
 0x1d4   : > { %v896_v0 = vld [vmem:[%s16643_s14 + $0x1550] sm:$0xff]  ;;  %v4110_v3 = vadd.f32 %v4109_v55, %v1021_v48  ;;  %v1238_v4 = vld [vmem:[%s16643_s14 + $0x2000] sm:$0xff]  ;;  %v4239_v5 = vadd.f32 %v4238_v57, %v1148_v50  ;;  %v4457_v6 = vadd.f32 %v4456_v58, %v1363_v51  ;;  %v1023_v8 = vld [vmem:[%s16643_s14 + $0x1948] sm:$0xff] }
 0x1d5   : > { %v3981_v59 = vadd.f32 %v3980_v47, %v894_v40  ;;  %v1112_v1 = vld [vmem:[%s16643_s14 + $0x1c10] sm:$0xff]  ;;  %v4200_v2 = vadd.f32 %v4199_v54, %v1110_v41  ;;  %v4329_v9 = vadd.f32 %v4328_v61, %v1237_v56  ;;  %v1150_v10 = vld [vmem:[%s16643_s14 + $0x1d40] sm:$0xff]  ;;  %v1365_v11 = vld [vmem:[%s16643_s14 + $0x23f8] sm:$0xff] }
 0x1d6   : > { %v897_v12 = vld [vmem:[%s16643_s14 + $0x1558] sm:$0xff]  ;;  %v4111_v15 = vadd.f32 %v4110_v3, %v1022_v60  ;;  %v1239_v16 = vld [vmem:[%s16643_s14 + $0x2008] sm:$0xff]  ;;  %v4240_v17 = vadd.f32 %v4239_v5, %v1149_v62  ;;  %v4458_v18 = vadd.f32 %v4457_v6, %v1364_v63  ;;  %v1024_v20 = vld [vmem:[%s16643_s14 + $0x1950] sm:$0xff] }
 0x1d7   : > { %v3982_v7 = vadd.f32 %v3981_v59, %v895_v52  ;;  %v1113_v13 = vld [vmem:[%s16643_s14 + $0x1c18] sm:$0xff]  ;;  %v4201_v14 = vadd.f32 %v4200_v2, %v1111_v53  ;;  %v4330_v21 = vadd.f32 %v4329_v9, %v1238_v4  ;;  %v1151_v22 = vld [vmem:[%s16643_s14 + $0x1d48] sm:$0xff]  ;;  %v1366_v23 = vld [vmem:[%s16643_s14 + $0x2400] sm:$0xff] }
 0x1d8   : > { %v1114_v24 = vld [vmem:[%s16643_s14 + $0x1c20] sm:$0xff]  ;;  %v4112_v26 = vadd.f32 %v4111_v15, %v1023_v8  ;;  %v1240_v27 = vld [vmem:[%s16643_s14 + $0x2010] sm:$0xff]  ;;  %v4241_v28 = vadd.f32 %v4240_v17, %v1150_v10  ;;  %v4459_v29 = vadd.f32 %v4458_v18, %v1365_v11  ;;  %v1025_v31 = vld [vmem:[%s16643_s14 + $0x1958] sm:$0xff] }
 0x1d9   : > { %v3983_v19 = vadd.f32 %v3982_v7, %v896_v0  ;;  %v4202_v25 = vadd.f32 %v4201_v14, %v1112_v1  ;;  %v4331_v32 = vadd.f32 %v4330_v21, %v1239_v16  ;;  %v1152_v33 = vld [vmem:[%s16643_s14 + $0x1d50] sm:$0xff]  ;;  %v1367_v34 = vld [vmem:[%s16643_s14 + $0x2408] sm:$0xff]  ;;  %v1026_v37 = vld [vmem:[%s16643_s14 + $0x1960] sm:$0xff] }
 0x1da   : > { %v1115_v35 = vld [vmem:[%s16643_s14 + $0x1c28] sm:$0xff]  ;;  %v4113_v38 = vadd.f32 %v4112_v26, %v1024_v20  ;;  %v1241_v39 = vld [vmem:[%s16643_s14 + $0x2018] sm:$0xff]  ;;  %v4242_v40 = vadd.f32 %v4241_v28, %v1151_v22  ;;  %v4460_v41 = vadd.f32 %v4459_v29, %v1366_v23  ;;  %v1116_v42 = vld [vmem:[%s16643_s14 + $0x1c30] sm:$0xff] }
 0x1db   : > { %v3984_v30 = vadd.f32 %v3983_v19, %v897_v12  ;;  %v4203_v36 = vadd.f32 %v4202_v25, %v1113_v13  ;;  %v1242_v43 = vld [vmem:[%s16643_s14 + $0x2020] sm:$0xff]  ;;  %v4332_v44 = vadd.f32 %v4331_v32, %v1240_v27  ;;  %v1153_v45 = vld [vmem:[%s16643_s14 + $0x1d58] sm:$0xff]  ;;  %v1368_v46 = vld [vmem:[%s16643_s14 + $0x2410] sm:$0xff] }
 0x1dc   : > { %v4114_v48 = vadd.f32 %v4113_v38, %v1025_v31  ;;  %v4243_v49 = vadd.f32 %v4242_v40, %v1152_v33  ;;  %v4461_v50 = vadd.f32 %v4460_v41, %v1367_v34  ;;  %v1278_v51 = vld [vmem:[%s16643_s14 + $0x2140] sm:$0xff]  ;;  %v1279_v52 = vld [vmem:[%s16643_s14 + $0x2148] sm:$0xff]  ;;  %v1280_v53 = vld [vmem:[%s16643_s14 + $0x2150] sm:$0xff] }
 0x1dd   : > { %3985 = vadd.xlane.f32.xlu0 %v3984_v30  ;;  %v4204_v47 = vadd.f32 %v4203_v36, %v1114_v24  ;;  %v1027_v54 = vld [vmem:[%s16643_s14 + $0x1968] sm:$0xff]  ;;  %v4333_v55 = vadd.f32 %v4332_v44, %v1241_v39  ;;  %v1154_v56 = vld [vmem:[%s16643_s14 + $0x1d60] sm:$0xff]  ;;  %v1369_v57 = vld [vmem:[%s16643_s14 + $0x2418] sm:$0xff]  ;;  %v4372_v58 = vadd.f32 %v1279_v52, %v1278_v51 }
 0x1de   : > { %v1117_v59 = vld [vmem:[%s16643_s14 + $0x1c38] sm:$0xff]  ;;  %v4115_v61 = vadd.f32 %v4114_v48, %v1026_v37  ;;  %v1243_v62 = vld [vmem:[%s16643_s14 + $0x2028] sm:$0xff]  ;;  %v4244_v63 = vadd.f32 %v4243_v49, %v1153_v45  ;;  %v4462_v0 = vadd.f32 %v4461_v50, %v1368_v46  ;;  %v1028_v2 = vld [vmem:[%s16643_s14 + $0x1970] sm:$0xff] }
 0x1df   : > { %v4205_v60 = vadd.f32 %v4204_v47, %v1115_v35  ;;  %v1281_v1 = vld [vmem:[%s16643_s14 + $0x2158] sm:$0xff]  ;;  %v4334_v3 = vadd.f32 %v4333_v55, %v1242_v43  ;;  %v1155_v4 = vld [vmem:[%s16643_s14 + $0x1d68] sm:$0xff]  ;;  %v1370_v5 = vld [vmem:[%s16643_s14 + $0x2420] sm:$0xff]  ;;  %v4373_v6 = vadd.f32 %v4372_v58, %v1280_v53 }
 0x1e0   : > { %v1118_v7 = vld [vmem:[%s16643_s14 + $0x1c40] sm:$0xff]  ;;  %v4116_v9 = vadd.f32 %v4115_v61, %v1027_v54  ;;  %v1244_v10 = vld [vmem:[%s16643_s14 + $0x2030] sm:$0xff]  ;;  %v4245_v11 = vadd.f32 %v4244_v63, %v1154_v56  ;;  %v4463_v12 = vadd.f32 %v4462_v0, %v1369_v57  ;;  %v1029_v14 = vld [vmem:[%s16643_s14 + $0x1978] sm:$0xff] }
 0x1e1   : > { %v4206_v8 = vadd.f32 %v4205_v60, %v1116_v42  ;;  %v1282_v13 = vld [vmem:[%s16643_s14 + $0x2160] sm:$0xff]  ;;  %v4335_v15 = vadd.f32 %v4334_v3, %v1243_v62  ;;  %v1156_v16 = vld [vmem:[%s16643_s14 + $0x1d70] sm:$0xff]  ;;  %v1371_v17 = vld [vmem:[%s16643_s14 + $0x2428] sm:$0xff]  ;;  %v4374_v18 = vadd.f32 %v4373_v6, %v1281_v1 }
 0x1e2   : > { %v1119_v19 = vld [vmem:[%s16643_s14 + $0x1c48] sm:$0xff]  ;;  %v4117_v21 = vadd.f32 %v4116_v9, %v1028_v2  ;;  %v1245_v22 = vld [vmem:[%s16643_s14 + $0x2038] sm:$0xff]  ;;  %v4246_v23 = vadd.f32 %v4245_v11, %v1155_v4  ;;  %v4464_v24 = vadd.f32 %v4463_v12, %v1370_v5  ;;  %v1030_v26 = vld [vmem:[%s16643_s14 + $0x1980] sm:$0xff] }
 0x1e3   : > { %v4207_v20 = vadd.f32 %v4206_v8, %v1117_v59  ;;  %v1283_v25 = vld [vmem:[%s16643_s14 + $0x2168] sm:$0xff]  ;;  %v4336_v27 = vadd.f32 %v4335_v15, %v1244_v10  ;;  %v1157_v28 = vld [vmem:[%s16643_s14 + $0x1d78] sm:$0xff]  ;;  %v1372_v29 = vld [vmem:[%s16643_s14 + $0x2430] sm:$0xff]  ;;  %v4375_v30 = vadd.f32 %v4374_v18, %v1282_v13 }
 0x1e4   : > { %v1120_v31 = vld [vmem:[%s16643_s14 + $0x1c50] sm:$0xff]  ;;  %v4118_v33 = vadd.f32 %v4117_v21, %v1029_v14  ;;  %v1246_v34 = vld [vmem:[%s16643_s14 + $0x2040] sm:$0xff]  ;;  %v4247_v35 = vadd.f32 %v4246_v23, %v1156_v16  ;;  %v4465_v36 = vadd.f32 %v4464_v24, %v1371_v17  ;;  %v1031_v38 = vld [vmem:[%s16643_s14 + $0x1988] sm:$0xff] }
 0x1e5   : > { %v4208_v32 = vadd.f32 %v4207_v20, %v1118_v7  ;;  %v1284_v37 = vld [vmem:[%s16643_s14 + $0x2170] sm:$0xff]  ;;  %v4337_v39 = vadd.f32 %v4336_v27, %v1245_v22  ;;  %v1158_v40 = vld [vmem:[%s16643_s14 + $0x1d80] sm:$0xff]  ;;  %v1373_v41 = vld [vmem:[%s16643_s14 + $0x2438] sm:$0xff]  ;;  %v4376_v42 = vadd.f32 %v4375_v30, %v1283_v25 }
 0x1e6   : > { %v1121_v43 = vld [vmem:[%s16643_s14 + $0x1c58] sm:$0xff]  ;;  %v4119_v45 = vadd.f32 %v4118_v33, %v1030_v26  ;;  %v1247_v46 = vld [vmem:[%s16643_s14 + $0x2048] sm:$0xff]  ;;  %v4248_v47 = vadd.f32 %v4247_v35, %v1157_v28  ;;  %v4466_v48 = vadd.f32 %v4465_v36, %v1372_v29  ;;  %v1032_v50 = vld [vmem:[%s16643_s14 + $0x1990] sm:$0xff] }
 0x1e7   : > { %v4209_v44 = vadd.f32 %v4208_v32, %v1119_v19  ;;  %v1285_v49 = vld [vmem:[%s16643_s14 + $0x2178] sm:$0xff]  ;;  %v4338_v51 = vadd.f32 %v4337_v39, %v1246_v34  ;;  %v1159_v52 = vld [vmem:[%s16643_s14 + $0x1d88] sm:$0xff]  ;;  %v1374_v53 = vld [vmem:[%s16643_s14 + $0x2440] sm:$0xff]  ;;  %v4377_v54 = vadd.f32 %v4376_v42, %v1284_v37 }
 0x1e8   : > { %v1122_v55 = vld [vmem:[%s16643_s14 + $0x1c60] sm:$0xff]  ;;  %v4120_v57 = vadd.f32 %v4119_v45, %v1031_v38  ;;  %v1248_v58 = vld [vmem:[%s16643_s14 + $0x2050] sm:$0xff]  ;;  %v4249_v59 = vadd.f32 %v4248_v47, %v1158_v40  ;;  %v4467_v60 = vadd.f32 %v4466_v48, %v1373_v41  ;;  %v1033_v62 = vld [vmem:[%s16643_s14 + $0x1998] sm:$0xff] }
 0x1e9   : > { %v4210_v56 = vadd.f32 %v4209_v44, %v1120_v31  ;;  %v1286_v61 = vld [vmem:[%s16643_s14 + $0x2180] sm:$0xff]  ;;  %v4339_v63 = vadd.f32 %v4338_v51, %v1247_v46  ;;  %v1160_v0 = vld [vmem:[%s16643_s14 + $0x1d90] sm:$0xff]  ;;  %v1375_v1 = vld [vmem:[%s16643_s14 + $0x2448] sm:$0xff]  ;;  %v4378_v2 = vadd.f32 %v4377_v54, %v1285_v49 }
 0x1ea   : > { %v1123_v3 = vld [vmem:[%s16643_s14 + $0x1c68] sm:$0xff]  ;;  %v4121_v5 = vadd.f32 %v4120_v57, %v1032_v50  ;;  %v1249_v6 = vld [vmem:[%s16643_s14 + $0x2058] sm:$0xff]  ;;  %v4250_v7 = vadd.f32 %v4249_v59, %v1159_v52  ;;  %v4468_v8 = vadd.f32 %v4467_v60, %v1374_v53  ;;  %v1034_v10 = vld [vmem:[%s16643_s14 + $0x19a0] sm:$0xff] }
 0x1eb   : > { %v4211_v4 = vadd.f32 %v4210_v56, %v1121_v43  ;;  %v1287_v9 = vld [vmem:[%s16643_s14 + $0x2188] sm:$0xff]  ;;  %v4340_v11 = vadd.f32 %v4339_v63, %v1248_v58  ;;  %v1161_v12 = vld [vmem:[%s16643_s14 + $0x1d98] sm:$0xff]  ;;  %v1376_v13 = vld [vmem:[%s16643_s14 + $0x2450] sm:$0xff]  ;;  %v4379_v14 = vadd.f32 %v4378_v2, %v1286_v61 }
 0x1ec   : > { %v1124_v15 = vld [vmem:[%s16643_s14 + $0x1c70] sm:$0xff]  ;;  %v4122_v17 = vadd.f32 %v4121_v5, %v1033_v62  ;;  %v1250_v18 = vld [vmem:[%s16643_s14 + $0x2060] sm:$0xff]  ;;  %v4251_v19 = vadd.f32 %v4250_v7, %v1160_v0  ;;  %v4469_v20 = vadd.f32 %v4468_v8, %v1375_v1  ;;  %v1035_v22 = vld [vmem:[%s16643_s14 + $0x19a8] sm:$0xff] }
 0x1ed   : > { %v4212_v16 = vadd.f32 %v4211_v4, %v1122_v55  ;;  %v1288_v21 = vld [vmem:[%s16643_s14 + $0x2190] sm:$0xff]  ;;  %v4341_v23 = vadd.f32 %v4340_v11, %v1249_v6  ;;  %v1162_v24 = vld [vmem:[%s16643_s14 + $0x1da0] sm:$0xff]  ;;  %v1377_v25 = vld [vmem:[%s16643_s14 + $0x2458] sm:$0xff]  ;;  %v4380_v26 = vadd.f32 %v4379_v14, %v1287_v9 }
 0x1ee   : > { %v1125_v27 = vld [vmem:[%s16643_s14 + $0x1c78] sm:$0xff]  ;;  %v4123_v29 = vadd.f32 %v4122_v17, %v1034_v10  ;;  %v1251_v30 = vld [vmem:[%s16643_s14 + $0x2068] sm:$0xff]  ;;  %v4252_v31 = vadd.f32 %v4251_v19, %v1161_v12  ;;  %v4470_v32 = vadd.f32 %v4469_v20, %v1376_v13  ;;  %v1036_v34 = vld [vmem:[%s16643_s14 + $0x19b0] sm:$0xff] }
 0x1ef   : > { %v4213_v28 = vadd.f32 %v4212_v16, %v1123_v3  ;;  %v1289_v33 = vld [vmem:[%s16643_s14 + $0x2198] sm:$0xff]  ;;  %v4342_v35 = vadd.f32 %v4341_v23, %v1250_v18  ;;  %v1163_v36 = vld [vmem:[%s16643_s14 + $0x1da8] sm:$0xff]  ;;  %v1378_v37 = vld [vmem:[%s16643_s14 + $0x2460] sm:$0xff]  ;;  %v4381_v38 = vadd.f32 %v4380_v26, %v1288_v21 }
 0x1f0   : > { %v4124_v40 = vadd.f32 %v4123_v29, %v1035_v22  ;;  %v1252_v41 = vld [vmem:[%s16643_s14 + $0x2070] sm:$0xff]  ;;  %v4253_v42 = vadd.f32 %v4252_v31, %v1162_v24  ;;  %v4471_v43 = vadd.f32 %v4470_v32, %v1377_v25  ;;  %v1290_v44 = vld [vmem:[%s16643_s14 + $0x21a0] sm:$0xff]  ;;  %v1037_v45 = vld [vmem:[%s16643_s14 + $0x19b8] sm:$0xff] }
 0x1f1   : > { %v4214_v39 = vadd.f32 %v4213_v28, %v1124_v15  ;;  %v4343_v46 = vadd.f32 %v4342_v35, %v1251_v30  ;;  %v1164_v47 = vld [vmem:[%s16643_s14 + $0x1db0] sm:$0xff]  ;;  %v1379_v48 = vld [vmem:[%s16643_s14 + $0x2468] sm:$0xff]  ;;  %v4382_v49 = vadd.f32 %v4381_v38, %v1289_v33  ;;  %v1038_v51 = vld [vmem:[%s16643_s14 + $0x19c0] sm:$0xff] }
 0x1f2   : > { %v4125_v52 = vadd.f32 %v4124_v40, %v1036_v34  ;;  %v1253_v53 = vld [vmem:[%s16643_s14 + $0x2078] sm:$0xff]  ;;  %v4254_v54 = vadd.f32 %v4253_v42, %v1163_v36  ;;  %v4472_v55 = vadd.f32 %v4471_v43, %v1378_v37  ;;  %v1291_v56 = vld [vmem:[%s16643_s14 + $0x21a8] sm:$0xff]  ;;  %v1380_v60 = vld [vmem:[%s16643_s14 + $0x2470] sm:$0xff] }
 0x1f3   : > { %v4215_v50 = vadd.f32 %v4214_v39, %v1125_v27  ;;  %v1039_v57 = vld [vmem:[%s16643_s14 + $0x19c8] sm:$0xff]  ;;  %v4344_v58 = vadd.f32 %v4343_v46, %v1252_v41  ;;  %v1165_v59 = vld [vmem:[%s16643_s14 + $0x1db8] sm:$0xff]  ;;  %v4383_v61 = vadd.f32 %v4382_v49, %v1290_v44  ;;  %v1254_v63 = vld [vmem:[%s16643_s14 + $0x2080] sm:$0xff] }
 0x1f4   : > { %v4126_v62 = vadd.f32 %v4125_v52, %v1037_v45  ;;  %v1166_v0 = vld [vmem:[%s16643_s14 + $0x1dc0] sm:$0xff]  ;;  %v4255_v1 = vadd.f32 %v4254_v54, %v1164_v47  ;;  %v4473_v2 = vadd.f32 %v4472_v55, %v1379_v48  ;;  %v1292_v3 = vld [vmem:[%s16643_s14 + $0x21b0] sm:$0xff]  ;;  %v1381_v6 = vld [vmem:[%s16643_s14 + $0x2478] sm:$0xff] }
 0x1f5   : > { %4216 = vadd.xlane.f32.xlu1 %v4215_v50  ;;  %v1040_v4 = vld [vmem:[%s16643_s14 + $0x19d0] sm:$0xff]  ;;  %v4345_v5 = vadd.f32 %v4344_v58, %v1253_v53  ;;  %v4384_v7 = vadd.f32 %v4383_v61, %v1291_v56  ;;  %v1506_v8 = vld [vmem:[%s16643_s14 + $0x2860] sm:$0xff]  ;;  %v1507_v9 = vld [vmem:[%s16643_s14 + $0x2868] sm:$0xff] }
 0x1f6   : > { %v4127_v10 = vadd.f32 %v4126_v62, %v1038_v51  ;;  %v1255_v11 = vld [vmem:[%s16643_s14 + $0x2088] sm:$0xff]  ;;  %v4256_v12 = vadd.f32 %v4255_v1, %v1165_v59  ;;  %v4474_v13 = vadd.f32 %v4473_v2, %v1380_v60  ;;  %v1293_v14 = vld [vmem:[%s16643_s14 + $0x21b8] sm:$0xff]  ;;  %v1508_v15 = vld [vmem:[%s16643_s14 + $0x2870] sm:$0xff]  ;;  %v4603_v16 = vadd.f32 %v1507_v9, %v1506_v8 }
 0x1f7   : > { %v4346_v17 = vadd.f32 %v4345_v5, %v1254_v63  ;;  %v1167_v18 = vld [vmem:[%s16643_s14 + $0x1dc8] sm:$0xff]  ;;  %v1382_v19 = vld [vmem:[%s16643_s14 + $0x2480] sm:$0xff]  ;;  %v4385_v20 = vadd.f32 %v4384_v7, %v1292_v3  ;;  %v1509_v21 = vld [vmem:[%s16643_s14 + $0x2878] sm:$0xff] }
 0x1f8   : > { %v1041_v22 = vld [vmem:[%s16643_s14 + $0x19d8] sm:$0xff]  ;;  %v4128_v23 = vadd.f32 %v4127_v10, %v1039_v57  ;;  %v1256_v24 = vld [vmem:[%s16643_s14 + $0x2090] sm:$0xff]  ;;  %v4257_v25 = vadd.f32 %v4256_v12, %v1166_v0  ;;  %v4475_v26 = vadd.f32 %v4474_v13, %v1381_v6  ;;  %v1294_v27 = vld [vmem:[%s16643_s14 + $0x21c0] sm:$0xff]  ;;  %v4604_v28 = vadd.f32 %v4603_v16, %v1508_v15 }
 0x1f9   : > { %v4347_v29 = vadd.f32 %v4346_v17, %v1255_v11  ;;  %v1168_v30 = vld [vmem:[%s16643_s14 + $0x1dd0] sm:$0xff]  ;;  %v1383_v31 = vld [vmem:[%s16643_s14 + $0x2488] sm:$0xff]  ;;  %v4386_v32 = vadd.f32 %v4385_v20, %v1293_v14  ;;  %v1510_v33 = vld [vmem:[%s16643_s14 + $0x2880] sm:$0xff] }
 0x1fa   : > { %v1042_v34 = vld [vmem:[%s16643_s14 + $0x19e0] sm:$0xff]  ;;  %v4129_v35 = vadd.f32 %v4128_v23, %v1040_v4  ;;  %v1257_v36 = vld [vmem:[%s16643_s14 + $0x2098] sm:$0xff]  ;;  %v4258_v37 = vadd.f32 %v4257_v25, %v1167_v18  ;;  %v4476_v38 = vadd.f32 %v4475_v26, %v1382_v19  ;;  %v1295_v39 = vld [vmem:[%s16643_s14 + $0x21c8] sm:$0xff]  ;;  %v4605_v40 = vadd.f32 %v4604_v28, %v1509_v21 }
 0x1fb   : > { %v4348_v41 = vadd.f32 %v4347_v29, %v1256_v24  ;;  %v1169_v42 = vld [vmem:[%s16643_s14 + $0x1dd8] sm:$0xff]  ;;  %v1384_v43 = vld [vmem:[%s16643_s14 + $0x2490] sm:$0xff]  ;;  %v4387_v44 = vadd.f32 %v4386_v32, %v1294_v27  ;;  %v1511_v45 = vld [vmem:[%s16643_s14 + $0x2888] sm:$0xff] }
 0x1fc   : > { %v1043_v46 = vld [vmem:[%s16643_s14 + $0x19e8] sm:$0xff]  ;;  %v4130_v47 = vadd.f32 %v4129_v35, %v1041_v22  ;;  %v1258_v48 = vld [vmem:[%s16643_s14 + $0x20a0] sm:$0xff]  ;;  %v4259_v49 = vadd.f32 %v4258_v37, %v1168_v30  ;;  %v4477_v50 = vadd.f32 %v4476_v38, %v1383_v31  ;;  %v1296_v51 = vld [vmem:[%s16643_s14 + $0x21d0] sm:$0xff]  ;;  %v4606_v52 = vadd.f32 %v4605_v40, %v1510_v33 }
 0x1fd   : > { %v4349_v53 = vadd.f32 %v4348_v41, %v1257_v36  ;;  %v1170_v54 = vld [vmem:[%s16643_s14 + $0x1de0] sm:$0xff]  ;;  %v1385_v55 = vld [vmem:[%s16643_s14 + $0x2498] sm:$0xff]  ;;  %v4388_v56 = vadd.f32 %v4387_v44, %v1295_v39  ;;  %v1512_v57 = vld [vmem:[%s16643_s14 + $0x2890] sm:$0xff] }
 0x1fe   : > { %v1044_v58 = vld [vmem:[%s16643_s14 + $0x19f0] sm:$0xff]  ;;  %v4131_v59 = vadd.f32 %v4130_v47, %v1042_v34  ;;  %v1259_v60 = vld [vmem:[%s16643_s14 + $0x20a8] sm:$0xff]  ;;  %v4260_v61 = vadd.f32 %v4259_v49, %v1169_v42  ;;  %v4478_v62 = vadd.f32 %v4477_v50, %v1384_v43  ;;  %v1297_v63 = vld [vmem:[%s16643_s14 + $0x21d8] sm:$0xff]  ;;  %v4607_v0 = vadd.f32 %v4606_v52, %v1511_v45 }
 0x1ff   : > { %v4350_v1 = vadd.f32 %v4349_v53, %v1258_v48  ;;  %v1171_v2 = vld [vmem:[%s16643_s14 + $0x1de8] sm:$0xff]  ;;  %v1386_v3 = vld [vmem:[%s16643_s14 + $0x24a0] sm:$0xff]  ;;  %v4389_v4 = vadd.f32 %v4388_v56, %v1296_v51  ;;  %v1513_v5 = vld [vmem:[%s16643_s14 + $0x2898] sm:$0xff] }
 0x200   : > { %v1045_v6 = vld [vmem:[%s16643_s14 + $0x19f8] sm:$0xff]  ;;  %v4132_v7 = vadd.f32 %v4131_v59, %v1043_v46  ;;  %v1260_v8 = vld [vmem:[%s16643_s14 + $0x20b0] sm:$0xff]  ;;  %v4261_v9 = vadd.f32 %v4260_v61, %v1170_v54  ;;  %v4479_v10 = vadd.f32 %v4478_v62, %v1385_v55  ;;  %v1298_v11 = vld [vmem:[%s16643_s14 + $0x21e0] sm:$0xff]  ;;  %v4608_v12 = vadd.f32 %v4607_v0, %v1512_v57 }
 0x201   : > { %v4351_v13 = vadd.f32 %v4350_v1, %v1259_v60  ;;  %v1172_v14 = vld [vmem:[%s16643_s14 + $0x1df0] sm:$0xff]  ;;  %v1387_v15 = vld [vmem:[%s16643_s14 + $0x24a8] sm:$0xff]  ;;  %v4390_v16 = vadd.f32 %v4389_v4, %v1297_v63  ;;  %v1514_v17 = vld [vmem:[%s16643_s14 + $0x28a0] sm:$0xff] }
 0x202   : > { %v1046_v18 = vld [vmem:[%s16643_s14 + $0x1a00] sm:$0xff]  ;;  %v4133_v19 = vadd.f32 %v4132_v7, %v1044_v58  ;;  %v1261_v20 = vld [vmem:[%s16643_s14 + $0x20b8] sm:$0xff]  ;;  %v4262_v21 = vadd.f32 %v4261_v9, %v1171_v2  ;;  %v4480_v22 = vadd.f32 %v4479_v10, %v1386_v3  ;;  %v1299_v23 = vld [vmem:[%s16643_s14 + $0x21e8] sm:$0xff]  ;;  %v4609_v24 = vadd.f32 %v4608_v12, %v1513_v5 }
 0x203   : > { %v4352_v25 = vadd.f32 %v4351_v13, %v1260_v8  ;;  %v1173_v26 = vld [vmem:[%s16643_s14 + $0x1df8] sm:$0xff]  ;;  %v1388_v27 = vld [vmem:[%s16643_s14 + $0x24b0] sm:$0xff]  ;;  %v4391_v28 = vadd.f32 %v4390_v16, %v1298_v11  ;;  %v1515_v29 = vld [vmem:[%s16643_s14 + $0x28a8] sm:$0xff] }
 0x204   : > { %v1047_v30 = vld [vmem:[%s16643_s14 + $0x1a08] sm:$0xff]  ;;  %v4134_v31 = vadd.f32 %v4133_v19, %v1045_v6  ;;  %v1262_v32 = vld [vmem:[%s16643_s14 + $0x20c0] sm:$0xff]  ;;  %v4263_v33 = vadd.f32 %v4262_v21, %v1172_v14  ;;  %v4481_v34 = vadd.f32 %v4480_v22, %v1387_v15  ;;  %v1300_v35 = vld [vmem:[%s16643_s14 + $0x21f0] sm:$0xff]  ;;  %v4610_v36 = vadd.f32 %v4609_v24, %v1514_v17 }
 0x205   : > { %v4353_v37 = vadd.f32 %v4352_v25, %v1261_v20  ;;  %v1174_v38 = vld [vmem:[%s16643_s14 + $0x1e00] sm:$0xff]  ;;  %v1389_v39 = vld [vmem:[%s16643_s14 + $0x24b8] sm:$0xff]  ;;  %v4392_v40 = vadd.f32 %v4391_v28, %v1299_v23  ;;  %v1516_v41 = vld [vmem:[%s16643_s14 + $0x28b0] sm:$0xff] }
 0x206   : > { %v1048_v42 = vld [vmem:[%s16643_s14 + $0x1a10] sm:$0xff]  ;;  %v4135_v43 = vadd.f32 %v4134_v31, %v1046_v18  ;;  %v1263_v44 = vld [vmem:[%s16643_s14 + $0x20c8] sm:$0xff]  ;;  %v4264_v45 = vadd.f32 %v4263_v33, %v1173_v26  ;;  %v4482_v46 = vadd.f32 %v4481_v34, %v1388_v27  ;;  %v1301_v47 = vld [vmem:[%s16643_s14 + $0x21f8] sm:$0xff]  ;;  %v4611_v48 = vadd.f32 %v4610_v36, %v1515_v29 }
 0x207   : > { %v4354_v49 = vadd.f32 %v4353_v37, %v1262_v32  ;;  %v1175_v50 = vld [vmem:[%s16643_s14 + $0x1e08] sm:$0xff]  ;;  %v1390_v51 = vld [vmem:[%s16643_s14 + $0x24c0] sm:$0xff]  ;;  %v4393_v52 = vadd.f32 %v4392_v40, %v1300_v35  ;;  %v1517_v53 = vld [vmem:[%s16643_s14 + $0x28b8] sm:$0xff] }
 0x208   : > { %v1049_v54 = vld [vmem:[%s16643_s14 + $0x1a18] sm:$0xff]  ;;  %v4136_v55 = vadd.f32 %v4135_v43, %v1047_v30  ;;  %v1264_v56 = vld [vmem:[%s16643_s14 + $0x20d0] sm:$0xff]  ;;  %v4265_v57 = vadd.f32 %v4264_v45, %v1174_v38  ;;  %v4483_v58 = vadd.f32 %v4482_v46, %v1389_v39  ;;  %v1302_v59 = vld [vmem:[%s16643_s14 + $0x2200] sm:$0xff]  ;;  %v4612_v60 = vadd.f32 %v4611_v48, %v1516_v41 }
 0x209   : > { %v4355_v61 = vadd.f32 %v4354_v49, %v1263_v44  ;;  %v1176_v62 = vld [vmem:[%s16643_s14 + $0x1e10] sm:$0xff]  ;;  %v1391_v63 = vld [vmem:[%s16643_s14 + $0x24c8] sm:$0xff]  ;;  %v4394_v0 = vadd.f32 %v4393_v52, %v1301_v47  ;;  %v1518_v1 = vld [vmem:[%s16643_s14 + $0x28c0] sm:$0xff] }
 0x20a   : > { %v4137_v2 = vadd.f32 %v4136_v55, %v1048_v42  ;;  %v1265_v3 = vld [vmem:[%s16643_s14 + $0x20d8] sm:$0xff]  ;;  %v1266_v4 = vld [vmem:[%s16643_s14 + $0x20e0] sm:$0xff]  ;;  %v4266_v5 = vadd.f32 %v4265_v57, %v1175_v50  ;;  %v4484_v6 = vadd.f32 %v4483_v58, %v1390_v51  ;;  %v1303_v7 = vld [vmem:[%s16643_s14 + $0x2208] sm:$0xff]  ;;  %v4613_v8 = vadd.f32 %v4612_v60, %v1517_v53 }
 0x20b   : > { %v4356_v9 = vadd.f32 %v4355_v61, %v1264_v56  ;;  %v1177_v10 = vld [vmem:[%s16643_s14 + $0x1e18] sm:$0xff]  ;;  %v1392_v11 = vld [vmem:[%s16643_s14 + $0x24d0] sm:$0xff]  ;;  %v4395_v12 = vadd.f32 %v4394_v0, %v1302_v59  ;;  %v1519_v13 = vld [vmem:[%s16643_s14 + $0x28c8] sm:$0xff] }
 0x20c   : > { %v4138_v14 = vadd.f32 %v4137_v2, %v1049_v54  ;;  %v1267_v15 = vld [vmem:[%s16643_s14 + $0x20e8] sm:$0xff]  ;;  %v1178_v16 = vld [vmem:[%s16643_s14 + $0x1e20] sm:$0xff]  ;;  %v4267_v17 = vadd.f32 %v4266_v5, %v1176_v62  ;;  %v4485_v18 = vadd.f32 %v4484_v6, %v1391_v63  ;;  %v1304_v19 = vld [vmem:[%s16643_s14 + $0x2210] sm:$0xff]  ;;  %v4614_v20 = vadd.f32 %v4613_v8, %v1518_v1 }
 0x20d   : > { %v4357_v21 = vadd.f32 %v4356_v9, %v1265_v3  ;;  %v1179_v22 = vld [vmem:[%s16643_s14 + $0x1e28] sm:$0xff]  ;;  %v1393_v23 = vld [vmem:[%s16643_s14 + $0x24d8] sm:$0xff]  ;;  %v4396_v24 = vadd.f32 %v4395_v12, %v1303_v7  ;;  %v1520_v25 = vld [vmem:[%s16643_s14 + $0x28d0] sm:$0xff] }
 0x20e   : > { %4139 = vadd.xlane.f32.xlu0 %v4138_v14  ;;  %v4268_v26 = vadd.f32 %v4267_v17, %v1177_v10  ;;  %v1394_v27 = vld [vmem:[%s16643_s14 + $0x24e0] sm:$0xff]  ;;  %v4486_v28 = vadd.f32 %v4485_v18, %v1392_v11  ;;  %v1305_v29 = vld [vmem:[%s16643_s14 + $0x2218] sm:$0xff]  ;;  %v4615_v30 = vadd.f32 %v4614_v20, %v1519_v13  ;;  %v1431_v35 = vld [vmem:[%s16643_s14 + $0x2608] sm:$0xff] }
 0x20f   : > { %v1430_v31 = vld [vmem:[%s16643_s14 + $0x2600] sm:$0xff]  ;;  %v4358_v32 = vadd.f32 %v4357_v21, %v1266_v4  ;;  %v4397_v33 = vadd.f32 %v4396_v24, %v1304_v19  ;;  %v1521_v34 = vld [vmem:[%s16643_s14 + $0x28d8] sm:$0xff]  ;;  %v1432_v36 = vld [vmem:[%s16643_s14 + $0x2610] sm:$0xff] }
 0x210   : > { %v1268_v37 = vld [vmem:[%s16643_s14 + $0x20f0] sm:$0xff]  ;;  %v4269_v39 = vadd.f32 %v4268_v26, %v1178_v16  ;;  %v4487_v40 = vadd.f32 %v4486_v28, %v1393_v23  ;;  %v1306_v41 = vld [vmem:[%s16643_s14 + $0x2220] sm:$0xff]  ;;  %v4616_v42 = vadd.f32 %v4615_v30, %v1520_v25  ;;  %v4526_v43 = vadd.f32 %v1431_v35, %v1430_v31  ;;  %v1395_v45 = vld [vmem:[%s16643_s14 + $0x24e8] sm:$0xff] }
 0x211   : > { %v1180_v38 = vld [vmem:[%s16643_s14 + $0x1e30] sm:$0xff]  ;;  %v4359_v44 = vadd.f32 %v4358_v32, %v1267_v15  ;;  %v4398_v46 = vadd.f32 %v4397_v33, %v1305_v29  ;;  %v1522_v47 = vld [vmem:[%s16643_s14 + $0x28e0] sm:$0xff]  ;;  %v1433_v48 = vld [vmem:[%s16643_s14 + $0x2618] sm:$0xff] }
 0x212   : > { %v1269_v49 = vld [vmem:[%s16643_s14 + $0x20f8] sm:$0xff]  ;;  %v4270_v51 = vadd.f32 %v4269_v39, %v1179_v22  ;;  %v4488_v52 = vadd.f32 %v4487_v40, %v1394_v27  ;;  %v1307_v53 = vld [vmem:[%s16643_s14 + $0x2228] sm:$0xff]  ;;  %v4617_v54 = vadd.f32 %v4616_v42, %v1521_v34  ;;  %v4527_v55 = vadd.f32 %v4526_v43, %v1432_v36  ;;  %v1396_v57 = vld [vmem:[%s16643_s14 + $0x24f0] sm:$0xff] }
 0x213   : > { %v1181_v50 = vld [vmem:[%s16643_s14 + $0x1e38] sm:$0xff]  ;;  %v4360_v56 = vadd.f32 %v4359_v44, %v1268_v37  ;;  %v4399_v58 = vadd.f32 %v4398_v46, %v1306_v41  ;;  %v1523_v59 = vld [vmem:[%s16643_s14 + $0x28e8] sm:$0xff]  ;;  %v1434_v60 = vld [vmem:[%s16643_s14 + $0x2620] sm:$0xff] }
 0x214   : > { %v1270_v61 = vld [vmem:[%s16643_s14 + $0x2100] sm:$0xff]  ;;  %v4271_v63 = vadd.f32 %v4270_v51, %v1180_v38  ;;  %v4489_v0 = vadd.f32 %v4488_v52, %v1395_v45  ;;  %v1308_v1 = vld [vmem:[%s16643_s14 + $0x2230] sm:$0xff]  ;;  %v4618_v2 = vadd.f32 %v4617_v54, %v1522_v47  ;;  %v4528_v3 = vadd.f32 %v4527_v55, %v1433_v48  ;;  %v1397_v5 = vld [vmem:[%s16643_s14 + $0x24f8] sm:$0xff] }
 0x215   : > { %v1182_v62 = vld [vmem:[%s16643_s14 + $0x1e40] sm:$0xff]  ;;  %v4361_v4 = vadd.f32 %v4360_v56, %v1269_v49  ;;  %v4400_v6 = vadd.f32 %v4399_v58, %v1307_v53  ;;  %v1524_v7 = vld [vmem:[%s16643_s14 + $0x28f0] sm:$0xff]  ;;  %v1435_v8 = vld [vmem:[%s16643_s14 + $0x2628] sm:$0xff] }
 0x216   : > { %v1271_v9 = vld [vmem:[%s16643_s14 + $0x2108] sm:$0xff]  ;;  %v4272_v11 = vadd.f32 %v4271_v63, %v1181_v50  ;;  %v4490_v12 = vadd.f32 %v4489_v0, %v1396_v57  ;;  %v1309_v13 = vld [vmem:[%s16643_s14 + $0x2238] sm:$0xff]  ;;  %v4619_v14 = vadd.f32 %v4618_v2, %v1523_v59  ;;  %v4529_v15 = vadd.f32 %v4528_v3, %v1434_v60  ;;  %v1398_v17 = vld [vmem:[%s16643_s14 + $0x2500] sm:$0xff] }
 0x217   : > { %v1183_v10 = vld [vmem:[%s16643_s14 + $0x1e48] sm:$0xff]  ;;  %v4362_v16 = vadd.f32 %v4361_v4, %v1270_v61  ;;  %v4401_v18 = vadd.f32 %v4400_v6, %v1308_v1  ;;  %v1525_v19 = vld [vmem:[%s16643_s14 + $0x28f8] sm:$0xff]  ;;  %v1436_v20 = vld [vmem:[%s16643_s14 + $0x2630] sm:$0xff] }
 0x218   : > { %v1272_v21 = vld [vmem:[%s16643_s14 + $0x2110] sm:$0xff]  ;;  %v4273_v23 = vadd.f32 %v4272_v11, %v1182_v62  ;;  %v4491_v24 = vadd.f32 %v4490_v12, %v1397_v5  ;;  %v1310_v25 = vld [vmem:[%s16643_s14 + $0x2240] sm:$0xff]  ;;  %v4620_v26 = vadd.f32 %v4619_v14, %v1524_v7  ;;  %v4530_v27 = vadd.f32 %v4529_v15, %v1435_v8  ;;  %v1399_v29 = vld [vmem:[%s16643_s14 + $0x2508] sm:$0xff] }
 0x219   : > { %v1184_v22 = vld [vmem:[%s16643_s14 + $0x1e50] sm:$0xff]  ;;  %v4363_v28 = vadd.f32 %v4362_v16, %v1271_v9  ;;  %v4402_v30 = vadd.f32 %v4401_v18, %v1309_v13  ;;  %v1526_v31 = vld [vmem:[%s16643_s14 + $0x2900] sm:$0xff]  ;;  %v1437_v32 = vld [vmem:[%s16643_s14 + $0x2638] sm:$0xff] }
 0x21a   : > { %v1273_v33 = vld [vmem:[%s16643_s14 + $0x2118] sm:$0xff]  ;;  %v4274_v35 = vadd.f32 %v4273_v23, %v1183_v10  ;;  %v4492_v36 = vadd.f32 %v4491_v24, %v1398_v17  ;;  %v1311_v37 = vld [vmem:[%s16643_s14 + $0x2248] sm:$0xff]  ;;  %v4621_v38 = vadd.f32 %v4620_v26, %v1525_v19  ;;  %v4531_v39 = vadd.f32 %v4530_v27, %v1436_v20  ;;  %v1400_v41 = vld [vmem:[%s16643_s14 + $0x2510] sm:$0xff] }
 0x21b   : > { %v1185_v34 = vld [vmem:[%s16643_s14 + $0x1e58] sm:$0xff]  ;;  %v4364_v40 = vadd.f32 %v4363_v28, %v1272_v21  ;;  %v4403_v42 = vadd.f32 %v4402_v30, %v1310_v25  ;;  %v1527_v43 = vld [vmem:[%s16643_s14 + $0x2908] sm:$0xff]  ;;  %v1438_v44 = vld [vmem:[%s16643_s14 + $0x2640] sm:$0xff] }
 0x21c   : > { %v1274_v45 = vld [vmem:[%s16643_s14 + $0x2120] sm:$0xff]  ;;  %v4275_v47 = vadd.f32 %v4274_v35, %v1184_v22  ;;  %v4493_v48 = vadd.f32 %v4492_v36, %v1399_v29  ;;  %v1312_v49 = vld [vmem:[%s16643_s14 + $0x2250] sm:$0xff]  ;;  %v4622_v50 = vadd.f32 %v4621_v38, %v1526_v31  ;;  %v4532_v51 = vadd.f32 %v4531_v39, %v1437_v32  ;;  %v1401_v53 = vld [vmem:[%s16643_s14 + $0x2518] sm:$0xff] }
 0x21d   : > { %v1186_v46 = vld [vmem:[%s16643_s14 + $0x1e60] sm:$0xff]  ;;  %v4365_v52 = vadd.f32 %v4364_v40, %v1273_v33  ;;  %v4404_v54 = vadd.f32 %v4403_v42, %v1311_v37  ;;  %v1528_v55 = vld [vmem:[%s16643_s14 + $0x2910] sm:$0xff]  ;;  %v1439_v56 = vld [vmem:[%s16643_s14 + $0x2648] sm:$0xff] }
 0x21e   : > { %v1275_v57 = vld [vmem:[%s16643_s14 + $0x2128] sm:$0xff]  ;;  %v4276_v59 = vadd.f32 %v4275_v47, %v1185_v34  ;;  %v4494_v60 = vadd.f32 %v4493_v48, %v1400_v41  ;;  %v1313_v61 = vld [vmem:[%s16643_s14 + $0x2258] sm:$0xff]  ;;  %v4623_v62 = vadd.f32 %v4622_v50, %v1527_v43  ;;  %v4533_v63 = vadd.f32 %v4532_v51, %v1438_v44  ;;  %v1402_v1 = vld [vmem:[%s16643_s14 + $0x2520] sm:$0xff] }
 0x21f   : > { %v1187_v58 = vld [vmem:[%s16643_s14 + $0x1e68] sm:$0xff]  ;;  %v4366_v0 = vadd.f32 %v4365_v52, %v1274_v45  ;;  %v4405_v2 = vadd.f32 %v4404_v54, %v1312_v49  ;;  %v1529_v3 = vld [vmem:[%s16643_s14 + $0x2918] sm:$0xff]  ;;  %v1440_v4 = vld [vmem:[%s16643_s14 + $0x2650] sm:$0xff] }
 0x220   : > { %v1276_v5 = vld [vmem:[%s16643_s14 + $0x2130] sm:$0xff]  ;;  %v4277_v7 = vadd.f32 %v4276_v59, %v1186_v46  ;;  %v4495_v8 = vadd.f32 %v4494_v60, %v1401_v53  ;;  %v1314_v9 = vld [vmem:[%s16643_s14 + $0x2260] sm:$0xff]  ;;  %v4624_v10 = vadd.f32 %v4623_v62, %v1528_v55  ;;  %v4534_v11 = vadd.f32 %v4533_v63, %v1439_v56  ;;  %v1403_v13 = vld [vmem:[%s16643_s14 + $0x2528] sm:$0xff] }
 0x221   : > { %v1188_v6 = vld [vmem:[%s16643_s14 + $0x1e70] sm:$0xff]  ;;  %v4367_v12 = vadd.f32 %v4366_v0, %v1275_v57  ;;  %v4406_v14 = vadd.f32 %v4405_v2, %v1313_v61  ;;  %v1530_v15 = vld [vmem:[%s16643_s14 + $0x2920] sm:$0xff]  ;;  %v1441_v16 = vld [vmem:[%s16643_s14 + $0x2658] sm:$0xff] }
 0x222   : > { %v1277_v17 = vld [vmem:[%s16643_s14 + $0x2138] sm:$0xff]  ;;  %v4278_v19 = vadd.f32 %v4277_v7, %v1187_v58  ;;  %v4496_v20 = vadd.f32 %v4495_v8, %v1402_v1  ;;  %v1315_v21 = vld [vmem:[%s16643_s14 + $0x2268] sm:$0xff]  ;;  %v4625_v22 = vadd.f32 %v4624_v10, %v1529_v3  ;;  %v4535_v23 = vadd.f32 %v4534_v11, %v1440_v4  ;;  %v1404_v25 = vld [vmem:[%s16643_s14 + $0x2530] sm:$0xff] }
 0x223   : > { %v1189_v18 = vld [vmem:[%s16643_s14 + $0x1e78] sm:$0xff]  ;;  %v4368_v24 = vadd.f32 %v4367_v12, %v1276_v5  ;;  %v4407_v26 = vadd.f32 %v4406_v14, %v1314_v9  ;;  %v1531_v27 = vld [vmem:[%s16643_s14 + $0x2928] sm:$0xff]  ;;  %v1442_v28 = vld [vmem:[%s16643_s14 + $0x2660] sm:$0xff] }
 0x224   : > { %v1190_v29 = vld [vmem:[%s16643_s14 + $0x1e80] sm:$0xff]  ;;  %v4279_v30 = vadd.f32 %v4278_v19, %v1188_v6  ;;  %v4497_v31 = vadd.f32 %v4496_v20, %v1403_v13  ;;  %v1316_v32 = vld [vmem:[%s16643_s14 + $0x2270] sm:$0xff]  ;;  %v4626_v33 = vadd.f32 %v4625_v22, %v1530_v15  ;;  %v4536_v34 = vadd.f32 %v4535_v23, %v1441_v16  ;;  %v1405_v36 = vld [vmem:[%s16643_s14 + $0x2538] sm:$0xff] }
 0x225   : > { %v4369_v35 = vadd.f32 %v4368_v24, %v1277_v17  ;;  %v4408_v37 = vadd.f32 %v4407_v26, %v1315_v21  ;;  %v1532_v38 = vld [vmem:[%s16643_s14 + $0x2930] sm:$0xff]  ;;  %v1443_v39 = vld [vmem:[%s16643_s14 + $0x2668] sm:$0xff]  ;;  %v1406_v42 = vld [vmem:[%s16643_s14 + $0x2540] sm:$0xff] }
 0x226   : > { %v1191_v40 = vld [vmem:[%s16643_s14 + $0x1e88] sm:$0xff]  ;;  %v4280_v41 = vadd.f32 %v4279_v30, %v1189_v18  ;;  %v4498_v43 = vadd.f32 %v4497_v31, %v1404_v25  ;;  %v1317_v44 = vld [vmem:[%s16643_s14 + $0x2278] sm:$0xff]  ;;  %v4627_v45 = vadd.f32 %v4626_v33, %v1531_v27  ;;  %v4537_v46 = vadd.f32 %v4536_v34, %v1442_v28  ;;  %v1192_v47 = vld [vmem:[%s16643_s14 + $0x1e90] sm:$0xff] }
 0x227   : > { %4370 = vadd.xlane.f32.xlu1 %v4369_v35  ;;  %v1318_v48 = vld [vmem:[%s16643_s14 + $0x2280] sm:$0xff]  ;;  %v4409_v49 = vadd.f32 %v4408_v37, %v1316_v32  ;;  %v1533_v50 = vld [vmem:[%s16643_s14 + $0x2938] sm:$0xff]  ;;  %v1444_v51 = vld [vmem:[%s16643_s14 + $0x2670] sm:$0xff] }
 0x228   : > { %v4281_v52 = vadd.f32 %v4280_v41, %v1190_v29  ;;  %v4499_v53 = vadd.f32 %v4498_v43, %v1405_v36  ;;  %v4628_v54 = vadd.f32 %v4627_v45, %v1532_v38  ;;  %v4538_v55 = vadd.f32 %v4537_v46, %v1443_v39  ;;  %v1658_v56 = vld [vmem:[%s16643_s14 + $0x2d20] sm:$0xff]  ;;  %v1659_v57 = vld [vmem:[%s16643_s14 + $0x2d28] sm:$0xff]  ;;  %v1660_v58 = vld [vmem:[%s16643_s14 + $0x2d30] sm:$0xff] }
 0x229   : > { %v1407_v59 = vld [vmem:[%s16643_s14 + $0x2548] sm:$0xff]  ;;  %v4410_v60 = vadd.f32 %v4409_v49, %v1317_v44  ;;  %v1534_v61 = vld [vmem:[%s16643_s14 + $0x2940] sm:$0xff]  ;;  %v1445_v62 = vld [vmem:[%s16643_s14 + $0x2678] sm:$0xff]  ;;  %v4757_v63 = vadd.f32 %v1659_v57, %v1658_v56 }
 0x22a   : > { %v1193_v0 = vld [vmem:[%s16643_s14 + $0x1e98] sm:$0xff]  ;;  %v4282_v1 = vadd.f32 %v4281_v52, %v1191_v40  ;;  %v4500_v2 = vadd.f32 %v4499_v53, %v1406_v42  ;;  %v1319_v3 = vld [vmem:[%s16643_s14 + $0x2288] sm:$0xff]  ;;  %v4629_v4 = vadd.f32 %v4628_v54, %v1533_v50  ;;  %v4539_v5 = vadd.f32 %v4538_v55, %v1444_v51  ;;  %v1408_v7 = vld [vmem:[%s16643_s14 + $0x2550] sm:$0xff] }
 0x22b   : > { %v1661_v6 = vld [vmem:[%s16643_s14 + $0x2d38] sm:$0xff]  ;;  %v4411_v8 = vadd.f32 %v4410_v60, %v1318_v48  ;;  %v1535_v9 = vld [vmem:[%s16643_s14 + $0x2948] sm:$0xff]  ;;  %v1446_v10 = vld [vmem:[%s16643_s14 + $0x2680] sm:$0xff]  ;;  %v4758_v11 = vadd.f32 %v4757_v63, %v1660_v58 }
 0x22c   : > { %v1194_v12 = vld [vmem:[%s16643_s14 + $0x1ea0] sm:$0xff]  ;;  %v4283_v13 = vadd.f32 %v4282_v1, %v1192_v47  ;;  %v4501_v14 = vadd.f32 %v4500_v2, %v1407_v59  ;;  %v1320_v15 = vld [vmem:[%s16643_s14 + $0x2290] sm:$0xff]  ;;  %v4630_v16 = vadd.f32 %v4629_v4, %v1534_v61  ;;  %v4540_v17 = vadd.f32 %v4539_v5, %v1445_v62  ;;  %v1409_v19 = vld [vmem:[%s16643_s14 + $0x2558] sm:$0xff] }
 0x22d   : > { %v1662_v18 = vld [vmem:[%s16643_s14 + $0x2d40] sm:$0xff]  ;;  %v4412_v20 = vadd.f32 %v4411_v8, %v1319_v3  ;;  %v1536_v21 = vld [vmem:[%s16643_s14 + $0x2950] sm:$0xff]  ;;  %v1447_v22 = vld [vmem:[%s16643_s14 + $0x2688] sm:$0xff]  ;;  %v4759_v23 = vadd.f32 %v4758_v11, %v1661_v6 }
 0x22e   : > { %v1195_v24 = vld [vmem:[%s16643_s14 + $0x1ea8] sm:$0xff]  ;;  %v4284_v25 = vadd.f32 %v4283_v13, %v1193_v0  ;;  %v4502_v26 = vadd.f32 %v4501_v14, %v1408_v7  ;;  %v1321_v27 = vld [vmem:[%s16643_s14 + $0x2298] sm:$0xff]  ;;  %v4631_v28 = vadd.f32 %v4630_v16, %v1535_v9  ;;  %v4541_v29 = vadd.f32 %v4540_v17, %v1446_v10  ;;  %v1410_v31 = vld [vmem:[%s16643_s14 + $0x2560] sm:$0xff] }
 0x22f   : > { %v1663_v30 = vld [vmem:[%s16643_s14 + $0x2d48] sm:$0xff]  ;;  %v4413_v32 = vadd.f32 %v4412_v20, %v1320_v15  ;;  %v1537_v33 = vld [vmem:[%s16643_s14 + $0x2958] sm:$0xff]  ;;  %v1448_v34 = vld [vmem:[%s16643_s14 + $0x2690] sm:$0xff]  ;;  %v4760_v35 = vadd.f32 %v4759_v23, %v1662_v18 }
 0x230   : > { %v1196_v36 = vld [vmem:[%s16643_s14 + $0x1eb0] sm:$0xff]  ;;  %v4285_v37 = vadd.f32 %v4284_v25, %v1194_v12  ;;  %v4503_v38 = vadd.f32 %v4502_v26, %v1409_v19  ;;  %v1322_v39 = vld [vmem:[%s16643_s14 + $0x22a0] sm:$0xff]  ;;  %v4632_v40 = vadd.f32 %v4631_v28, %v1536_v21  ;;  %v4542_v41 = vadd.f32 %v4541_v29, %v1447_v22  ;;  %v1411_v43 = vld [vmem:[%s16643_s14 + $0x2568] sm:$0xff] }
 0x231   : > { %v1664_v42 = vld [vmem:[%s16643_s14 + $0x2d50] sm:$0xff]  ;;  %v4414_v44 = vadd.f32 %v4413_v32, %v1321_v27  ;;  %v1538_v45 = vld [vmem:[%s16643_s14 + $0x2960] sm:$0xff]  ;;  %v1449_v46 = vld [vmem:[%s16643_s14 + $0x2698] sm:$0xff]  ;;  %v4761_v47 = vadd.f32 %v4760_v35, %v1663_v30 }
 0x232   : > { %v1197_v48 = vld [vmem:[%s16643_s14 + $0x1eb8] sm:$0xff]  ;;  %v4286_v49 = vadd.f32 %v4285_v37, %v1195_v24  ;;  %v4504_v50 = vadd.f32 %v4503_v38, %v1410_v31  ;;  %v1323_v51 = vld [vmem:[%s16643_s14 + $0x22a8] sm:$0xff]  ;;  %v4633_v52 = vadd.f32 %v4632_v40, %v1537_v33  ;;  %v4543_v53 = vadd.f32 %v4542_v41, %v1448_v34  ;;  %v1412_v55 = vld [vmem:[%s16643_s14 + $0x2570] sm:$0xff] }
 0x233   : > { %v1665_v54 = vld [vmem:[%s16643_s14 + $0x2d58] sm:$0xff]  ;;  %v4415_v56 = vadd.f32 %v4414_v44, %v1322_v39  ;;  %v1539_v57 = vld [vmem:[%s16643_s14 + $0x2968] sm:$0xff]  ;;  %v1450_v58 = vld [vmem:[%s16643_s14 + $0x26a0] sm:$0xff]  ;;  %v4762_v59 = vadd.f32 %v4761_v47, %v1664_v42 }
 0x234   : > { %v1198_v60 = vld [vmem:[%s16643_s14 + $0x1ec0] sm:$0xff]  ;;  %v4287_v61 = vadd.f32 %v4286_v49, %v1196_v36  ;;  %v4505_v62 = vadd.f32 %v4504_v50, %v1411_v43  ;;  %v1324_v63 = vld [vmem:[%s16643_s14 + $0x22b0] sm:$0xff]  ;;  %v4634_v0 = vadd.f32 %v4633_v52, %v1538_v45  ;;  %v4544_v1 = vadd.f32 %v4543_v53, %v1449_v46  ;;  %v1413_v3 = vld [vmem:[%s16643_s14 + $0x2578] sm:$0xff] }
 0x235   : > { %v1666_v2 = vld [vmem:[%s16643_s14 + $0x2d60] sm:$0xff]  ;;  %v4416_v4 = vadd.f32 %v4415_v56, %v1323_v51  ;;  %v1540_v5 = vld [vmem:[%s16643_s14 + $0x2970] sm:$0xff]  ;;  %v1451_v6 = vld [vmem:[%s16643_s14 + $0x26a8] sm:$0xff]  ;;  %v4763_v7 = vadd.f32 %v4762_v59, %v1665_v54 }
 0x236   : > { %v1199_v8 = vld [vmem:[%s16643_s14 + $0x1ec8] sm:$0xff]  ;;  %v4288_v9 = vadd.f32 %v4287_v61, %v1197_v48  ;;  %v4506_v10 = vadd.f32 %v4505_v62, %v1412_v55  ;;  %v1325_v11 = vld [vmem:[%s16643_s14 + $0x22b8] sm:$0xff]  ;;  %v4635_v12 = vadd.f32 %v4634_v0, %v1539_v57  ;;  %v4545_v13 = vadd.f32 %v4544_v1, %v1450_v58  ;;  %v1414_v15 = vld [vmem:[%s16643_s14 + $0x2580] sm:$0xff] }
 0x237   : > { %v1667_v14 = vld [vmem:[%s16643_s14 + $0x2d68] sm:$0xff]  ;;  %v4417_v16 = vadd.f32 %v4416_v4, %v1324_v63  ;;  %v1541_v17 = vld [vmem:[%s16643_s14 + $0x2978] sm:$0xff]  ;;  %v1452_v18 = vld [vmem:[%s16643_s14 + $0x26b0] sm:$0xff]  ;;  %v4764_v19 = vadd.f32 %v4763_v7, %v1666_v2 }
 0x238   : > { %v1200_v20 = vld [vmem:[%s16643_s14 + $0x1ed0] sm:$0xff]  ;;  %v4289_v21 = vadd.f32 %v4288_v9, %v1198_v60  ;;  %v4507_v22 = vadd.f32 %v4506_v10, %v1413_v3  ;;  %v1326_v23 = vld [vmem:[%s16643_s14 + $0x22c0] sm:$0xff]  ;;  %v4636_v24 = vadd.f32 %v4635_v12, %v1540_v5  ;;  %v4546_v25 = vadd.f32 %v4545_v13, %v1451_v6  ;;  %v1415_v27 = vld [vmem:[%s16643_s14 + $0x2588] sm:$0xff] }
 0x239   : > { %v1668_v26 = vld [vmem:[%s16643_s14 + $0x2d70] sm:$0xff]  ;;  %v4418_v28 = vadd.f32 %v4417_v16, %v1325_v11  ;;  %v1542_v29 = vld [vmem:[%s16643_s14 + $0x2980] sm:$0xff]  ;;  %v1453_v30 = vld [vmem:[%s16643_s14 + $0x26b8] sm:$0xff]  ;;  %v4765_v31 = vadd.f32 %v4764_v19, %v1667_v14 }
 0x23a   : > { %v1201_v32 = vld [vmem:[%s16643_s14 + $0x1ed8] sm:$0xff]  ;;  %v4290_v33 = vadd.f32 %v4289_v21, %v1199_v8  ;;  %v4508_v34 = vadd.f32 %v4507_v22, %v1414_v15  ;;  %v1327_v35 = vld [vmem:[%s16643_s14 + $0x22c8] sm:$0xff]  ;;  %v4637_v36 = vadd.f32 %v4636_v24, %v1541_v17  ;;  %v4547_v37 = vadd.f32 %v4546_v25, %v1452_v18  ;;  %v1416_v39 = vld [vmem:[%s16643_s14 + $0x2590] sm:$0xff] }
 0x23b   : > { %v1669_v38 = vld [vmem:[%s16643_s14 + $0x2d78] sm:$0xff]  ;;  %v4419_v40 = vadd.f32 %v4418_v28, %v1326_v23  ;;  %v1543_v41 = vld [vmem:[%s16643_s14 + $0x2988] sm:$0xff]  ;;  %v1454_v42 = vld [vmem:[%s16643_s14 + $0x26c0] sm:$0xff]  ;;  %v4766_v43 = vadd.f32 %v4765_v31, %v1668_v26 }
 0x23c   : > { %v4291_v44 = vadd.f32 %v4290_v33, %v1200_v20  ;;  %v4509_v45 = vadd.f32 %v4508_v34, %v1415_v27  ;;  %v1328_v46 = vld [vmem:[%s16643_s14 + $0x22d0] sm:$0xff]  ;;  %v4638_v47 = vadd.f32 %v4637_v36, %v1542_v29  ;;  %v4548_v48 = vadd.f32 %v4547_v37, %v1453_v30  ;;  %v1670_v49 = vld [vmem:[%s16643_s14 + $0x2d80] sm:$0xff]  ;;  %v1417_v50 = vld [vmem:[%s16643_s14 + $0x2598] sm:$0xff] }
 0x23d   : > { %v4420_v51 = vadd.f32 %v4419_v40, %v1327_v35  ;;  %v1544_v52 = vld [vmem:[%s16643_s14 + $0x2990] sm:$0xff]  ;;  %v1455_v53 = vld [vmem:[%s16643_s14 + $0x26c8] sm:$0xff]  ;;  %v4767_v54 = vadd.f32 %v4766_v43, %v1669_v38  ;;  %v1418_v56 = vld [vmem:[%s16643_s14 + $0x25a0] sm:$0xff] }
 0x23e   : > { %v4292_v55 = vadd.f32 %v4291_v44, %v1201_v32  ;;  %v4510_v57 = vadd.f32 %v4509_v45, %v1416_v39  ;;  %v1329_v58 = vld [vmem:[%s16643_s14 + $0x22d8] sm:$0xff]  ;;  %v4639_v59 = vadd.f32 %v4638_v47, %v1543_v41  ;;  %v4549_v60 = vadd.f32 %v4548_v48, %v1454_v42  ;;  %v1671_v61 = vld [vmem:[%s16643_s14 + $0x2d88] sm:$0xff]  ;;  %v1456_v1 = vld [vmem:[%s16643_s14 + $0x26d0] sm:$0xff] }
 0x23f   : > { %v1419_v62 = vld [vmem:[%s16643_s14 + $0x25a8] sm:$0xff]  ;;  %v4421_v63 = vadd.f32 %v4420_v51, %v1328_v46  ;;  %v1545_v0 = vld [vmem:[%s16643_s14 + $0x2998] sm:$0xff]  ;;  %v4768_v2 = vadd.f32 %v4767_v54, %v1670_v49  ;;  %v1330_v4 = vld [vmem:[%s16643_s14 + $0x22e0] sm:$0xff] }
 0x240   : > { %4293 = vadd.xlane.f32.xlu0 %v4292_v55  ;;  %v4511_v3 = vadd.f32 %v4510_v57, %v1417_v50  ;;  %v1546_v5 = vld [vmem:[%s16643_s14 + $0x29a0] sm:$0xff]  ;;  %v4640_v6 = vadd.f32 %v4639_v59, %v1544_v52  ;;  %v4550_v7 = vadd.f32 %v4549_v60, %v1455_v53  ;;  %v1672_v8 = vld [vmem:[%s16643_s14 + $0x2d90] sm:$0xff]  ;;  %v1457_v11 = vld [vmem:[%s16643_s14 + $0x26d8] sm:$0xff] }
 0x241   : > { %v1420_v9 = vld [vmem:[%s16643_s14 + $0x25b0] sm:$0xff]  ;;  %v4422_v10 = vadd.f32 %v4421_v63, %v1329_v58  ;;  %v4769_v12 = vadd.f32 %v4768_v2, %v1671_v61  ;;  %v1582_v13 = vld [vmem:[%s16643_s14 + $0x2ac0] sm:$0xff]  ;;  %v1583_v14 = vld [vmem:[%s16643_s14 + $0x2ac8] sm:$0xff] }
 0x242   : > { %v4512_v15 = vadd.f32 %v4511_v3, %v1418_v56  ;;  %v1331_v16 = vld [vmem:[%s16643_s14 + $0x22e8] sm:$0xff]  ;;  %v4641_v17 = vadd.f32 %v4640_v6, %v1545_v0  ;;  %v4551_v18 = vadd.f32 %v4550_v7, %v1456_v1  ;;  %v1673_v19 = vld [vmem:[%s16643_s14 + $0x2d98] sm:$0xff]  ;;  %v1584_v20 = vld [vmem:[%s16643_s14 + $0x2ad0] sm:$0xff]  ;;  %v4680_v21 = vadd.f32 %v1583_v14, %v1582_v13 }
 0x243   : > { %v4423_v22 = vadd.f32 %v4422_v10, %v1330_v4  ;;  %v1547_v23 = vld [vmem:[%s16643_s14 + $0x29a8] sm:$0xff]  ;;  %v1458_v24 = vld [vmem:[%s16643_s14 + $0x26e0] sm:$0xff]  ;;  %v4770_v25 = vadd.f32 %v4769_v12, %v1672_v8  ;;  %v1585_v26 = vld [vmem:[%s16643_s14 + $0x2ad8] sm:$0xff] }
 0x244   : > { %v1421_v27 = vld [vmem:[%s16643_s14 + $0x25b8] sm:$0xff]  ;;  %v4513_v28 = vadd.f32 %v4512_v15, %v1419_v62  ;;  %v1332_v29 = vld [vmem:[%s16643_s14 + $0x22f0] sm:$0xff]  ;;  %v4642_v30 = vadd.f32 %v4641_v17, %v1546_v5  ;;  %v4552_v31 = vadd.f32 %v4551_v18, %v1457_v11  ;;  %v1674_v32 = vld [vmem:[%s16643_s14 + $0x2da0] sm:$0xff]  ;;  %v4681_v33 = vadd.f32 %v4680_v21, %v1584_v20 }
 0x245   : > { %v4424_v34 = vadd.f32 %v4423_v22, %v1331_v16  ;;  %v1548_v35 = vld [vmem:[%s16643_s14 + $0x29b0] sm:$0xff]  ;;  %v1459_v36 = vld [vmem:[%s16643_s14 + $0x26e8] sm:$0xff]  ;;  %v4771_v37 = vadd.f32 %v4770_v25, %v1673_v19  ;;  %v1586_v38 = vld [vmem:[%s16643_s14 + $0x2ae0] sm:$0xff] }
 0x246   : > { %v1422_v39 = vld [vmem:[%s16643_s14 + $0x25c0] sm:$0xff]  ;;  %v4514_v40 = vadd.f32 %v4513_v28, %v1420_v9  ;;  %v1333_v41 = vld [vmem:[%s16643_s14 + $0x22f8] sm:$0xff]  ;;  %v4643_v42 = vadd.f32 %v4642_v30, %v1547_v23  ;;  %v4553_v43 = vadd.f32 %v4552_v31, %v1458_v24  ;;  %v1675_v44 = vld [vmem:[%s16643_s14 + $0x2da8] sm:$0xff]  ;;  %v4682_v45 = vadd.f32 %v4681_v33, %v1585_v26 }
 0x247   : > { %v4425_v46 = vadd.f32 %v4424_v34, %v1332_v29  ;;  %v1549_v47 = vld [vmem:[%s16643_s14 + $0x29b8] sm:$0xff]  ;;  %v1460_v48 = vld [vmem:[%s16643_s14 + $0x26f0] sm:$0xff]  ;;  %v4772_v49 = vadd.f32 %v4771_v37, %v1674_v32  ;;  %v1587_v50 = vld [vmem:[%s16643_s14 + $0x2ae8] sm:$0xff] }
 0x248   : > { %v1423_v51 = vld [vmem:[%s16643_s14 + $0x25c8] sm:$0xff]  ;;  %v4515_v52 = vadd.f32 %v4514_v40, %v1421_v27  ;;  %v1334_v53 = vld [vmem:[%s16643_s14 + $0x2300] sm:$0xff]  ;;  %v4644_v54 = vadd.f32 %v4643_v42, %v1548_v35  ;;  %v4554_v55 = vadd.f32 %v4553_v43, %v1459_v36  ;;  %v1676_v56 = vld [vmem:[%s16643_s14 + $0x2db0] sm:$0xff]  ;;  %v4683_v57 = vadd.f32 %v4682_v45, %v1586_v38 }
 0x249   : > { %v4426_v58 = vadd.f32 %v4425_v46, %v1333_v41  ;;  %v1550_v59 = vld [vmem:[%s16643_s14 + $0x29c0] sm:$0xff]  ;;  %v1461_v60 = vld [vmem:[%s16643_s14 + $0x26f8] sm:$0xff]  ;;  %v4773_v61 = vadd.f32 %v4772_v49, %v1675_v44  ;;  %v1588_v62 = vld [vmem:[%s16643_s14 + $0x2af0] sm:$0xff] }
 0x24a   : > { %v1424_v63 = vld [vmem:[%s16643_s14 + $0x25d0] sm:$0xff]  ;;  %v4516_v0 = vadd.f32 %v4515_v52, %v1422_v39  ;;  %v1335_v1 = vld [vmem:[%s16643_s14 + $0x2308] sm:$0xff]  ;;  %v4645_v2 = vadd.f32 %v4644_v54, %v1549_v47  ;;  %v4555_v3 = vadd.f32 %v4554_v55, %v1460_v48  ;;  %v1677_v4 = vld [vmem:[%s16643_s14 + $0x2db8] sm:$0xff]  ;;  %v4684_v5 = vadd.f32 %v4683_v57, %v1587_v50 }
 0x24b   : > { %v4427_v6 = vadd.f32 %v4426_v58, %v1334_v53  ;;  %v1551_v7 = vld [vmem:[%s16643_s14 + $0x29c8] sm:$0xff]  ;;  %v1462_v8 = vld [vmem:[%s16643_s14 + $0x2700] sm:$0xff]  ;;  %v4774_v9 = vadd.f32 %v4773_v61, %v1676_v56  ;;  %v1589_v10 = vld [vmem:[%s16643_s14 + $0x2af8] sm:$0xff] }
 0x24c   : > { %v1425_v11 = vld [vmem:[%s16643_s14 + $0x25d8] sm:$0xff]  ;;  %v4517_v12 = vadd.f32 %v4516_v0, %v1423_v51  ;;  %v1336_v13 = vld [vmem:[%s16643_s14 + $0x2310] sm:$0xff]  ;;  %v4646_v14 = vadd.f32 %v4645_v2, %v1550_v59  ;;  %v4556_v15 = vadd.f32 %v4555_v3, %v1461_v60  ;;  %v1678_v16 = vld [vmem:[%s16643_s14 + $0x2dc0] sm:$0xff]  ;;  %v4685_v17 = vadd.f32 %v4684_v5, %v1588_v62 }
 0x24d   : > { %v4428_v18 = vadd.f32 %v4427_v6, %v1335_v1  ;;  %v1552_v19 = vld [vmem:[%s16643_s14 + $0x29d0] sm:$0xff]  ;;  %v1463_v20 = vld [vmem:[%s16643_s14 + $0x2708] sm:$0xff]  ;;  %v4775_v21 = vadd.f32 %v4774_v9, %v1677_v4  ;;  %v1590_v22 = vld [vmem:[%s16643_s14 + $0x2b00] sm:$0xff] }
 0x24e   : > { %v1426_v23 = vld [vmem:[%s16643_s14 + $0x25e0] sm:$0xff]  ;;  %v4518_v24 = vadd.f32 %v4517_v12, %v1424_v63  ;;  %v1337_v25 = vld [vmem:[%s16643_s14 + $0x2318] sm:$0xff]  ;;  %v4647_v26 = vadd.f32 %v4646_v14, %v1551_v7  ;;  %v4557_v27 = vadd.f32 %v4556_v15, %v1462_v8  ;;  %v1679_v28 = vld [vmem:[%s16643_s14 + $0x2dc8] sm:$0xff]  ;;  %v4686_v29 = vadd.f32 %v4685_v17, %v1589_v10 }
 0x24f   : > { %v4429_v30 = vadd.f32 %v4428_v18, %v1336_v13  ;;  %v1553_v31 = vld [vmem:[%s16643_s14 + $0x29d8] sm:$0xff]  ;;  %v1464_v32 = vld [vmem:[%s16643_s14 + $0x2710] sm:$0xff]  ;;  %v4776_v33 = vadd.f32 %v4775_v21, %v1678_v16  ;;  %v1591_v34 = vld [vmem:[%s16643_s14 + $0x2b08] sm:$0xff] }
 0x250   : > { %v1427_v35 = vld [vmem:[%s16643_s14 + $0x25e8] sm:$0xff]  ;;  %v4519_v36 = vadd.f32 %v4518_v24, %v1425_v11  ;;  %v1338_v37 = vld [vmem:[%s16643_s14 + $0x2320] sm:$0xff]  ;;  %v4648_v38 = vadd.f32 %v4647_v26, %v1552_v19  ;;  %v4558_v39 = vadd.f32 %v4557_v27, %v1463_v20  ;;  %v1680_v40 = vld [vmem:[%s16643_s14 + $0x2dd0] sm:$0xff]  ;;  %v4687_v41 = vadd.f32 %v4686_v29, %v1590_v22 }
 0x251   : > { %v4430_v42 = vadd.f32 %v4429_v30, %v1337_v25  ;;  %v1554_v43 = vld [vmem:[%s16643_s14 + $0x29e0] sm:$0xff]  ;;  %v1465_v44 = vld [vmem:[%s16643_s14 + $0x2718] sm:$0xff]  ;;  %v4777_v45 = vadd.f32 %v4776_v33, %v1679_v28  ;;  %v1592_v46 = vld [vmem:[%s16643_s14 + $0x2b10] sm:$0xff] }
 0x252   : > { %v1428_v47 = vld [vmem:[%s16643_s14 + $0x25f0] sm:$0xff]  ;;  %v4520_v48 = vadd.f32 %v4519_v36, %v1426_v23  ;;  %v1339_v49 = vld [vmem:[%s16643_s14 + $0x2328] sm:$0xff]  ;;  %v4649_v50 = vadd.f32 %v4648_v38, %v1553_v31  ;;  %v4559_v51 = vadd.f32 %v4558_v39, %v1464_v32  ;;  %v1681_v52 = vld [vmem:[%s16643_s14 + $0x2dd8] sm:$0xff]  ;;  %v4688_v53 = vadd.f32 %v4687_v41, %v1591_v34 }
 0x253   : > { %v4431_v54 = vadd.f32 %v4430_v42, %v1338_v37  ;;  %v1555_v55 = vld [vmem:[%s16643_s14 + $0x29e8] sm:$0xff]  ;;  %v1466_v56 = vld [vmem:[%s16643_s14 + $0x2720] sm:$0xff]  ;;  %v4778_v57 = vadd.f32 %v4777_v45, %v1680_v40  ;;  %v1593_v58 = vld [vmem:[%s16643_s14 + $0x2b18] sm:$0xff] }
 0x254   : > { %v1429_v59 = vld [vmem:[%s16643_s14 + $0x25f8] sm:$0xff]  ;;  %v4521_v60 = vadd.f32 %v4520_v48, %v1427_v35  ;;  %v1340_v61 = vld [vmem:[%s16643_s14 + $0x2330] sm:$0xff]  ;;  %v4650_v62 = vadd.f32 %v4649_v50, %v1554_v43  ;;  %v4560_v63 = vadd.f32 %v4559_v51, %v1465_v44  ;;  %v1682_v0 = vld [vmem:[%s16643_s14 + $0x2de0] sm:$0xff]  ;;  %v4689_v1 = vadd.f32 %v4688_v53, %v1592_v46 }
 0x255   : > { %v4432_v2 = vadd.f32 %v4431_v54, %v1339_v49  ;;  %v1556_v3 = vld [vmem:[%s16643_s14 + $0x29f0] sm:$0xff]  ;;  %v1467_v4 = vld [vmem:[%s16643_s14 + $0x2728] sm:$0xff]  ;;  %v4779_v5 = vadd.f32 %v4778_v57, %v1681_v52  ;;  %v1594_v6 = vld [vmem:[%s16643_s14 + $0x2b20] sm:$0xff] }
 0x256   : > { %v4522_v7 = vadd.f32 %v4521_v60, %v1428_v47  ;;  %v1341_v8 = vld [vmem:[%s16643_s14 + $0x2338] sm:$0xff]  ;;  %v1342_v9 = vld [vmem:[%s16643_s14 + $0x2340] sm:$0xff]  ;;  %v4651_v10 = vadd.f32 %v4650_v62, %v1555_v55  ;;  %v4561_v11 = vadd.f32 %v4560_v63, %v1466_v56  ;;  %v1683_v12 = vld [vmem:[%s16643_s14 + $0x2de8] sm:$0xff]  ;;  %v4690_v13 = vadd.f32 %v4689_v1, %v1593_v58 }
 0x257   : > { %v4433_v14 = vadd.f32 %v4432_v2, %v1340_v61  ;;  %v1557_v15 = vld [vmem:[%s16643_s14 + $0x29f8] sm:$0xff]  ;;  %v1468_v16 = vld [vmem:[%s16643_s14 + $0x2730] sm:$0xff]  ;;  %v4780_v17 = vadd.f32 %v4779_v5, %v1682_v0  ;;  %v1595_v18 = vld [vmem:[%s16643_s14 + $0x2b28] sm:$0xff] }
 0x258   : > { %v4523_v19 = vadd.f32 %v4522_v7, %v1429_v59  ;;  %v1343_v20 = vld [vmem:[%s16643_s14 + $0x2348] sm:$0xff]  ;;  %v1558_v21 = vld [vmem:[%s16643_s14 + $0x2a00] sm:$0xff]  ;;  %v4652_v22 = vadd.f32 %v4651_v10, %v1556_v3  ;;  %v4562_v23 = vadd.f32 %v4561_v11, %v1467_v4  ;;  %v1684_v24 = vld [vmem:[%s16643_s14 + $0x2df0] sm:$0xff]  ;;  %v4691_v25 = vadd.f32 %v4690_v13, %v1594_v6 }
 0x259   : > { %v4434_v26 = vadd.f32 %v4433_v14, %v1341_v8  ;;  %v1559_v27 = vld [vmem:[%s16643_s14 + $0x2a08] sm:$0xff]  ;;  %v1469_v28 = vld [vmem:[%s16643_s14 + $0x2738] sm:$0xff]  ;;  %v4781_v29 = vadd.f32 %v4780_v17, %v1683_v12  ;;  %v1596_v30 = vld [vmem:[%s16643_s14 + $0x2b30] sm:$0xff] }
 0x25a   : > { %4524 = vadd.xlane.f32.xlu1 %v4523_v19  ;;  %v4653_v31 = vadd.f32 %v4652_v22, %v1557_v15  ;;  %v1470_v32 = vld [vmem:[%s16643_s14 + $0x2740] sm:$0xff]  ;;  %v4563_v33 = vadd.f32 %v4562_v23, %v1468_v16  ;;  %v1685_v34 = vld [vmem:[%s16643_s14 + $0x2df8] sm:$0xff]  ;;  %v4692_v35 = vadd.f32 %v4691_v25, %v1595_v18  ;;  %v1811_v40 = vld [vmem:[%s16643_s14 + $0x31e8] sm:$0xff] }
 0x25b   : > { %v1810_v36 = vld [vmem:[%s16643_s14 + $0x31e0] sm:$0xff]  ;;  %v4435_v37 = vadd.f32 %v4434_v26, %v1342_v9  ;;  %v4782_v38 = vadd.f32 %v4781_v29, %v1684_v24  ;;  %v1597_v39 = vld [vmem:[%s16643_s14 + $0x2b38] sm:$0xff]  ;;  %v1812_v41 = vld [vmem:[%s16643_s14 + $0x31f0] sm:$0xff] }
 0x25c   : > { %v1344_v42 = vld [vmem:[%s16643_s14 + $0x2350] sm:$0xff]  ;;  %v4654_v44 = vadd.f32 %v4653_v31, %v1558_v21  ;;  %v4564_v45 = vadd.f32 %v4563_v33, %v1469_v28  ;;  %v1686_v46 = vld [vmem:[%s16643_s14 + $0x2e00] sm:$0xff]  ;;  %v4693_v47 = vadd.f32 %v4692_v35, %v1596_v30  ;;  %v4911_v48 = vadd.f32 %v1811_v40, %v1810_v36  ;;  %v1471_v50 = vld [vmem:[%s16643_s14 + $0x2748] sm:$0xff] }
 0x25d   : > { %v1560_v43 = vld [vmem:[%s16643_s14 + $0x2a10] sm:$0xff]  ;;  %v4436_v49 = vadd.f32 %v4435_v37, %v1343_v20  ;;  %v4783_v51 = vadd.f32 %v4782_v38, %v1685_v34  ;;  %v1598_v52 = vld [vmem:[%s16643_s14 + $0x2b40] sm:$0xff]  ;;  %v1813_v53 = vld [vmem:[%s16643_s14 + $0x31f8] sm:$0xff] }
 0x25e   : > { %v1345_v54 = vld [vmem:[%s16643_s14 + $0x2358] sm:$0xff]  ;;  %v4655_v56 = vadd.f32 %v4654_v44, %v1559_v27  ;;  %v4565_v57 = vadd.f32 %v4564_v45, %v1470_v32  ;;  %v1687_v58 = vld [vmem:[%s16643_s14 + $0x2e08] sm:$0xff]  ;;  %v4694_v59 = vadd.f32 %v4693_v47, %v1597_v39  ;;  %v4912_v60 = vadd.f32 %v4911_v48, %v1812_v41  ;;  %v1472_v62 = vld [vmem:[%s16643_s14 + $0x2750] sm:$0xff] }
 0x25f   : > { %v1561_v55 = vld [vmem:[%s16643_s14 + $0x2a18] sm:$0xff]  ;;  %v4437_v61 = vadd.f32 %v4436_v49, %v1344_v42  ;;  %v4784_v63 = vadd.f32 %v4783_v51, %v1686_v46  ;;  %v1599_v0 = vld [vmem:[%s16643_s14 + $0x2b48] sm:$0xff]  ;;  %v1814_v1 = vld [vmem:[%s16643_s14 + $0x3200] sm:$0xff] }
 0x260   : > { %v1346_v2 = vld [vmem:[%s16643_s14 + $0x2360] sm:$0xff]  ;;  %v4656_v4 = vadd.f32 %v4655_v56, %v1560_v43  ;;  %v4566_v5 = vadd.f32 %v4565_v57, %v1471_v50  ;;  %v1688_v6 = vld [vmem:[%s16643_s14 + $0x2e10] sm:$0xff]  ;;  %v4695_v7 = vadd.f32 %v4694_v59, %v1598_v52  ;;  %v4913_v8 = vadd.f32 %v4912_v60, %v1813_v53  ;;  %v1473_v10 = vld [vmem:[%s16643_s14 + $0x2758] sm:$0xff] }
 0x261   : > { %v1562_v3 = vld [vmem:[%s16643_s14 + $0x2a20] sm:$0xff]  ;;  %v4438_v9 = vadd.f32 %v4437_v61, %v1345_v54  ;;  %v4785_v11 = vadd.f32 %v4784_v63, %v1687_v58  ;;  %v1600_v12 = vld [vmem:[%s16643_s14 + $0x2b50] sm:$0xff]  ;;  %v1815_v13 = vld [vmem:[%s16643_s14 + $0x3208] sm:$0xff] }
 0x262   : > { %v1347_v14 = vld [vmem:[%s16643_s14 + $0x2368] sm:$0xff]  ;;  %v4657_v16 = vadd.f32 %v4656_v4, %v1561_v55  ;;  %v4567_v17 = vadd.f32 %v4566_v5, %v1472_v62  ;;  %v1689_v18 = vld [vmem:[%s16643_s14 + $0x2e18] sm:$0xff]  ;;  %v4696_v19 = vadd.f32 %v4695_v7, %v1599_v0  ;;  %v4914_v20 = vadd.f32 %v4913_v8, %v1814_v1  ;;  %v1474_v22 = vld [vmem:[%s16643_s14 + $0x2760] sm:$0xff] }
 0x263   : > { %v1563_v15 = vld [vmem:[%s16643_s14 + $0x2a28] sm:$0xff]  ;;  %v4439_v21 = vadd.f32 %v4438_v9, %v1346_v2  ;;  %v4786_v23 = vadd.f32 %v4785_v11, %v1688_v6  ;;  %v1601_v24 = vld [vmem:[%s16643_s14 + $0x2b58] sm:$0xff]  ;;  %v1816_v25 = vld [vmem:[%s16643_s14 + $0x3210] sm:$0xff] }
 0x264   : > { %v1348_v26 = vld [vmem:[%s16643_s14 + $0x2370] sm:$0xff]  ;;  %v4658_v28 = vadd.f32 %v4657_v16, %v1562_v3  ;;  %v4568_v29 = vadd.f32 %v4567_v17, %v1473_v10  ;;  %v1690_v30 = vld [vmem:[%s16643_s14 + $0x2e20] sm:$0xff]  ;;  %v4697_v31 = vadd.f32 %v4696_v19, %v1600_v12  ;;  %v4915_v32 = vadd.f32 %v4914_v20, %v1815_v13  ;;  %v1475_v34 = vld [vmem:[%s16643_s14 + $0x2768] sm:$0xff] }
 0x265   : > { %v1564_v27 = vld [vmem:[%s16643_s14 + $0x2a30] sm:$0xff]  ;;  %v4440_v33 = vadd.f32 %v4439_v21, %v1347_v14  ;;  %v4787_v35 = vadd.f32 %v4786_v23, %v1689_v18  ;;  %v1602_v36 = vld [vmem:[%s16643_s14 + $0x2b60] sm:$0xff]  ;;  %v1817_v37 = vld [vmem:[%s16643_s14 + $0x3218] sm:$0xff] }
 0x266   : > { %v1349_v38 = vld [vmem:[%s16643_s14 + $0x2378] sm:$0xff]  ;;  %v4659_v40 = vadd.f32 %v4658_v28, %v1563_v15  ;;  %v4569_v41 = vadd.f32 %v4568_v29, %v1474_v22  ;;  %v1691_v42 = vld [vmem:[%s16643_s14 + $0x2e28] sm:$0xff]  ;;  %v4698_v43 = vadd.f32 %v4697_v31, %v1601_v24  ;;  %v4916_v44 = vadd.f32 %v4915_v32, %v1816_v25  ;;  %v1476_v46 = vld [vmem:[%s16643_s14 + $0x2770] sm:$0xff] }
 0x267   : > { %v1565_v39 = vld [vmem:[%s16643_s14 + $0x2a38] sm:$0xff]  ;;  %v4441_v45 = vadd.f32 %v4440_v33, %v1348_v26  ;;  %v4788_v47 = vadd.f32 %v4787_v35, %v1690_v30  ;;  %v1603_v48 = vld [vmem:[%s16643_s14 + $0x2b68] sm:$0xff]  ;;  %v1818_v49 = vld [vmem:[%s16643_s14 + $0x3220] sm:$0xff] }
 0x268   : > { %v1350_v50 = vld [vmem:[%s16643_s14 + $0x2380] sm:$0xff]  ;;  %v4660_v52 = vadd.f32 %v4659_v40, %v1564_v27  ;;  %v4570_v53 = vadd.f32 %v4569_v41, %v1475_v34  ;;  %v1692_v54 = vld [vmem:[%s16643_s14 + $0x2e30] sm:$0xff]  ;;  %v4699_v55 = vadd.f32 %v4698_v43, %v1602_v36  ;;  %v4917_v56 = vadd.f32 %v4916_v44, %v1817_v37  ;;  %v1477_v58 = vld [vmem:[%s16643_s14 + $0x2778] sm:$0xff] }
 0x269   : > { %v1566_v51 = vld [vmem:[%s16643_s14 + $0x2a40] sm:$0xff]  ;;  %v4442_v57 = vadd.f32 %v4441_v45, %v1349_v38  ;;  %v4789_v59 = vadd.f32 %v4788_v47, %v1691_v42  ;;  %v1604_v60 = vld [vmem:[%s16643_s14 + $0x2b70] sm:$0xff]  ;;  %v1819_v61 = vld [vmem:[%s16643_s14 + $0x3228] sm:$0xff] }
 0x26a   : > { %v1351_v62 = vld [vmem:[%s16643_s14 + $0x2388] sm:$0xff]  ;;  %v4661_v0 = vadd.f32 %v4660_v52, %v1565_v39  ;;  %v4571_v1 = vadd.f32 %v4570_v53, %v1476_v46  ;;  %v1693_v2 = vld [vmem:[%s16643_s14 + $0x2e38] sm:$0xff]  ;;  %v4700_v3 = vadd.f32 %v4699_v55, %v1603_v48  ;;  %v4918_v4 = vadd.f32 %v4917_v56, %v1818_v49  ;;  %v1478_v6 = vld [vmem:[%s16643_s14 + $0x2780] sm:$0xff] }
 0x26b   : > { %v1567_v63 = vld [vmem:[%s16643_s14 + $0x2a48] sm:$0xff]  ;;  %v4443_v5 = vadd.f32 %v4442_v57, %v1350_v50  ;;  %v4790_v7 = vadd.f32 %v4789_v59, %v1692_v54  ;;  %v1605_v8 = vld [vmem:[%s16643_s14 + $0x2b78] sm:$0xff]  ;;  %v1820_v9 = vld [vmem:[%s16643_s14 + $0x3230] sm:$0xff] }
 0x26c   : > { %v1352_v10 = vld [vmem:[%s16643_s14 + $0x2390] sm:$0xff]  ;;  %v4662_v12 = vadd.f32 %v4661_v0, %v1566_v51  ;;  %v4572_v13 = vadd.f32 %v4571_v1, %v1477_v58  ;;  %v1694_v14 = vld [vmem:[%s16643_s14 + $0x2e40] sm:$0xff]  ;;  %v4701_v15 = vadd.f32 %v4700_v3, %v1604_v60  ;;  %v4919_v16 = vadd.f32 %v4918_v4, %v1819_v61  ;;  %v1479_v18 = vld [vmem:[%s16643_s14 + $0x2788] sm:$0xff] }
 0x26d   : > { %v1568_v11 = vld [vmem:[%s16643_s14 + $0x2a50] sm:$0xff]  ;;  %v4444_v17 = vadd.f32 %v4443_v5, %v1351_v62  ;;  %v4791_v19 = vadd.f32 %v4790_v7, %v1693_v2  ;;  %v1606_v20 = vld [vmem:[%s16643_s14 + $0x2b80] sm:$0xff]  ;;  %v1821_v21 = vld [vmem:[%s16643_s14 + $0x3238] sm:$0xff] }
 0x26e   : > { %v1353_v22 = vld [vmem:[%s16643_s14 + $0x2398] sm:$0xff]  ;;  %v4663_v24 = vadd.f32 %v4662_v12, %v1567_v63  ;;  %v4573_v25 = vadd.f32 %v4572_v13, %v1478_v6  ;;  %v1695_v26 = vld [vmem:[%s16643_s14 + $0x2e48] sm:$0xff]  ;;  %v4702_v27 = vadd.f32 %v4701_v15, %v1605_v8  ;;  %v4920_v28 = vadd.f32 %v4919_v16, %v1820_v9  ;;  %v1480_v30 = vld [vmem:[%s16643_s14 + $0x2790] sm:$0xff] }
 0x26f   : > { %v1569_v23 = vld [vmem:[%s16643_s14 + $0x2a58] sm:$0xff]  ;;  %v4445_v29 = vadd.f32 %v4444_v17, %v1352_v10  ;;  %v4792_v31 = vadd.f32 %v4791_v19, %v1694_v14  ;;  %v1607_v32 = vld [vmem:[%s16643_s14 + $0x2b88] sm:$0xff]  ;;  %v1822_v33 = vld [vmem:[%s16643_s14 + $0x3240] sm:$0xff] }
 0x270   : > { %v1570_v34 = vld [vmem:[%s16643_s14 + $0x2a60] sm:$0xff]  ;;  %v4664_v35 = vadd.f32 %v4663_v24, %v1568_v11  ;;  %v4574_v36 = vadd.f32 %v4573_v25, %v1479_v18  ;;  %v1696_v37 = vld [vmem:[%s16643_s14 + $0x2e50] sm:$0xff]  ;;  %v4703_v38 = vadd.f32 %v4702_v27, %v1606_v20  ;;  %v4921_v39 = vadd.f32 %v4920_v28, %v1821_v21  ;;  %v1481_v41 = vld [vmem:[%s16643_s14 + $0x2798] sm:$0xff] }
 0x271   : > { %v4446_v40 = vadd.f32 %v4445_v29, %v1353_v22  ;;  %v4793_v42 = vadd.f32 %v4792_v31, %v1695_v26  ;;  %v1608_v43 = vld [vmem:[%s16643_s14 + $0x2b90] sm:$0xff]  ;;  %v1823_v44 = vld [vmem:[%s16643_s14 + $0x3248] sm:$0xff]  ;;  %v1482_v47 = vld [vmem:[%s16643_s14 + $0x27a0] sm:$0xff] }
 0x272   : > { %v1571_v45 = vld [vmem:[%s16643_s14 + $0x2a68] sm:$0xff]  ;;  %v4665_v46 = vadd.f32 %v4664_v35, %v1569_v23  ;;  %v4575_v48 = vadd.f32 %v4574_v36, %v1480_v30  ;;  %v1697_v49 = vld [vmem:[%s16643_s14 + $0x2e58] sm:$0xff]  ;;  %v4704_v50 = vadd.f32 %v4703_v38, %v1607_v32  ;;  %v4922_v51 = vadd.f32 %v4921_v39, %v1822_v33  ;;  %v1572_v52 = vld [vmem:[%s16643_s14 + $0x2a70] sm:$0xff] }
 0x273   : > { %4447 = vadd.xlane.f32.xlu0 %v4446_v40  ;;  %v1698_v53 = vld [vmem:[%s16643_s14 + $0x2e60] sm:$0xff]  ;;  %v4794_v54 = vadd.f32 %v4793_v42, %v1696_v37  ;;  %v1609_v55 = vld [vmem:[%s16643_s14 + $0x2b98] sm:$0xff]  ;;  %v1824_v56 = vld [vmem:[%s16643_s14 + $0x3250] sm:$0xff] }
 0x274   : > { %v4666_v57 = vadd.f32 %v4665_v46, %v1570_v34  ;;  %v4576_v58 = vadd.f32 %v4575_v48, %v1481_v41  ;;  %v4705_v59 = vadd.f32 %v4704_v50, %v1608_v43  ;;  %v4923_v60 = vadd.f32 %v4922_v51, %v1823_v44  ;;  %v1734_v61 = vld [vmem:[%s16643_s14 + $0x2f80] sm:$0xff]  ;;  %v1735_v62 = vld [vmem:[%s16643_s14 + $0x2f88] sm:$0xff]  ;;  %v1736_v63 = vld [vmem:[%s16643_s14 + $0x2f90] sm:$0xff] }
 0x275   : > { %v1483_v0 = vld [vmem:[%s16643_s14 + $0x27a8] sm:$0xff]  ;;  %v4795_v1 = vadd.f32 %v4794_v54, %v1697_v49  ;;  %v1610_v2 = vld [vmem:[%s16643_s14 + $0x2ba0] sm:$0xff]  ;;  %v1825_v3 = vld [vmem:[%s16643_s14 + $0x3258] sm:$0xff]  ;;  %v4834_v4 = vadd.f32 %v1735_v62, %v1734_v61 }
 0x276   : > { %v1573_v5 = vld [vmem:[%s16643_s14 + $0x2a78] sm:$0xff]  ;;  %v4667_v6 = vadd.f32 %v4666_v57, %v1571_v45  ;;  %v4577_v7 = vadd.f32 %v4576_v58, %v1482_v47  ;;  %v1699_v8 = vld [vmem:[%s16643_s14 + $0x2e68] sm:$0xff]  ;;  %v4706_v9 = vadd.f32 %v4705_v59, %v1609_v55  ;;  %v4924_v10 = vadd.f32 %v4923_v60, %v1824_v56  ;;  %v1484_v12 = vld [vmem:[%s16643_s14 + $0x27b0] sm:$0xff] }
 0x277   : > { %v1737_v11 = vld [vmem:[%s16643_s14 + $0x2f98] sm:$0xff]  ;;  %v4796_v13 = vadd.f32 %v4795_v1, %v1698_v53  ;;  %v1611_v14 = vld [vmem:[%s16643_s14 + $0x2ba8] sm:$0xff]  ;;  %v1826_v15 = vld [vmem:[%s16643_s14 + $0x3260] sm:$0xff]  ;;  %v4835_v16 = vadd.f32 %v4834_v4, %v1736_v63 }
 0x278   : > { %v1574_v17 = vld [vmem:[%s16643_s14 + $0x2a80] sm:$0xff]  ;;  %v4668_v18 = vadd.f32 %v4667_v6, %v1572_v52  ;;  %v4578_v19 = vadd.f32 %v4577_v7, %v1483_v0  ;;  %v1700_v20 = vld [vmem:[%s16643_s14 + $0x2e70] sm:$0xff]  ;;  %v4707_v21 = vadd.f32 %v4706_v9, %v1610_v2  ;;  %v4925_v22 = vadd.f32 %v4924_v10, %v1825_v3  ;;  %v1485_v24 = vld [vmem:[%s16643_s14 + $0x27b8] sm:$0xff] }
 0x279   : > { %v1738_v23 = vld [vmem:[%s16643_s14 + $0x2fa0] sm:$0xff]  ;;  %v4797_v25 = vadd.f32 %v4796_v13, %v1699_v8  ;;  %v1612_v26 = vld [vmem:[%s16643_s14 + $0x2bb0] sm:$0xff]  ;;  %v1827_v27 = vld [vmem:[%s16643_s14 + $0x3268] sm:$0xff]  ;;  %v4836_v28 = vadd.f32 %v4835_v16, %v1737_v11 }
 0x27a   : > { %v1575_v29 = vld [vmem:[%s16643_s14 + $0x2a88] sm:$0xff]  ;;  %v4669_v30 = vadd.f32 %v4668_v18, %v1573_v5  ;;  %v4579_v31 = vadd.f32 %v4578_v19, %v1484_v12  ;;  %v1701_v32 = vld [vmem:[%s16643_s14 + $0x2e78] sm:$0xff]  ;;  %v4708_v33 = vadd.f32 %v4707_v21, %v1611_v14  ;;  %v4926_v34 = vadd.f32 %v4925_v22, %v1826_v15  ;;  %v1486_v36 = vld [vmem:[%s16643_s14 + $0x27c0] sm:$0xff] }
 0x27b   : > { %v1739_v35 = vld [vmem:[%s16643_s14 + $0x2fa8] sm:$0xff]  ;;  %v4798_v37 = vadd.f32 %v4797_v25, %v1700_v20  ;;  %v1613_v38 = vld [vmem:[%s16643_s14 + $0x2bb8] sm:$0xff]  ;;  %v1828_v39 = vld [vmem:[%s16643_s14 + $0x3270] sm:$0xff]  ;;  %v4837_v40 = vadd.f32 %v4836_v28, %v1738_v23 }
 0x27c   : > { %v1576_v41 = vld [vmem:[%s16643_s14 + $0x2a90] sm:$0xff]  ;;  %v4670_v42 = vadd.f32 %v4669_v30, %v1574_v17  ;;  %v4580_v43 = vadd.f32 %v4579_v31, %v1485_v24  ;;  %v1702_v44 = vld [vmem:[%s16643_s14 + $0x2e80] sm:$0xff]  ;;  %v4709_v45 = vadd.f32 %v4708_v33, %v1612_v26  ;;  %v4927_v46 = vadd.f32 %v4926_v34, %v1827_v27  ;;  %v1487_v48 = vld [vmem:[%s16643_s14 + $0x27c8] sm:$0xff] }
 0x27d   : > { %v1740_v47 = vld [vmem:[%s16643_s14 + $0x2fb0] sm:$0xff]  ;;  %v4799_v49 = vadd.f32 %v4798_v37, %v1701_v32  ;;  %v1614_v50 = vld [vmem:[%s16643_s14 + $0x2bc0] sm:$0xff]  ;;  %v1829_v51 = vld [vmem:[%s16643_s14 + $0x3278] sm:$0xff]  ;;  %v4838_v52 = vadd.f32 %v4837_v40, %v1739_v35 }
 0x27e   : > { %v1577_v53 = vld [vmem:[%s16643_s14 + $0x2a98] sm:$0xff]  ;;  %v4671_v54 = vadd.f32 %v4670_v42, %v1575_v29  ;;  %v4581_v55 = vadd.f32 %v4580_v43, %v1486_v36  ;;  %v1703_v56 = vld [vmem:[%s16643_s14 + $0x2e88] sm:$0xff]  ;;  %v4710_v57 = vadd.f32 %v4709_v45, %v1613_v38  ;;  %v4928_v58 = vadd.f32 %v4927_v46, %v1828_v39  ;;  %v1488_v60 = vld [vmem:[%s16643_s14 + $0x27d0] sm:$0xff] }
 0x27f   : > { %v1741_v59 = vld [vmem:[%s16643_s14 + $0x2fb8] sm:$0xff]  ;;  %v4800_v61 = vadd.f32 %v4799_v49, %v1702_v44  ;;  %v1615_v62 = vld [vmem:[%s16643_s14 + $0x2bc8] sm:$0xff]  ;;  %v1830_v63 = vld [vmem:[%s16643_s14 + $0x3280] sm:$0xff]  ;;  %v4839_v0 = vadd.f32 %v4838_v52, %v1740_v47 }
 0x280   : > { %v1578_v1 = vld [vmem:[%s16643_s14 + $0x2aa0] sm:$0xff]  ;;  %v4672_v2 = vadd.f32 %v4671_v54, %v1576_v41  ;;  %v4582_v3 = vadd.f32 %v4581_v55, %v1487_v48  ;;  %v1704_v4 = vld [vmem:[%s16643_s14 + $0x2e90] sm:$0xff]  ;;  %v4711_v5 = vadd.f32 %v4710_v57, %v1614_v50  ;;  %v4929_v6 = vadd.f32 %v4928_v58, %v1829_v51  ;;  %v1489_v8 = vld [vmem:[%s16643_s14 + $0x27d8] sm:$0xff] }
 0x281   : > { %v1742_v7 = vld [vmem:[%s16643_s14 + $0x2fc0] sm:$0xff]  ;;  %v4801_v9 = vadd.f32 %v4800_v61, %v1703_v56  ;;  %v1616_v10 = vld [vmem:[%s16643_s14 + $0x2bd0] sm:$0xff]  ;;  %v1831_v11 = vld [vmem:[%s16643_s14 + $0x3288] sm:$0xff]  ;;  %v4840_v12 = vadd.f32 %v4839_v0, %v1741_v59 }
 0x282   : > { %v1579_v13 = vld [vmem:[%s16643_s14 + $0x2aa8] sm:$0xff]  ;;  %v4673_v14 = vadd.f32 %v4672_v2, %v1577_v53  ;;  %v4583_v15 = vadd.f32 %v4582_v3, %v1488_v60  ;;  %v1705_v16 = vld [vmem:[%s16643_s14 + $0x2e98] sm:$0xff]  ;;  %v4712_v17 = vadd.f32 %v4711_v5, %v1615_v62  ;;  %v4930_v18 = vadd.f32 %v4929_v6, %v1830_v63  ;;  %v1490_v20 = vld [vmem:[%s16643_s14 + $0x27e0] sm:$0xff] }
 0x283   : > { %v1743_v19 = vld [vmem:[%s16643_s14 + $0x2fc8] sm:$0xff]  ;;  %v4802_v21 = vadd.f32 %v4801_v9, %v1704_v4  ;;  %v1617_v22 = vld [vmem:[%s16643_s14 + $0x2bd8] sm:$0xff]  ;;  %v1832_v23 = vld [vmem:[%s16643_s14 + $0x3290] sm:$0xff]  ;;  %v4841_v24 = vadd.f32 %v4840_v12, %v1742_v7 }
 0x284   : > { %v1580_v25 = vld [vmem:[%s16643_s14 + $0x2ab0] sm:$0xff]  ;;  %v4674_v26 = vadd.f32 %v4673_v14, %v1578_v1  ;;  %v4584_v27 = vadd.f32 %v4583_v15, %v1489_v8  ;;  %v1706_v28 = vld [vmem:[%s16643_s14 + $0x2ea0] sm:$0xff]  ;;  %v4713_v29 = vadd.f32 %v4712_v17, %v1616_v10  ;;  %v4931_v30 = vadd.f32 %v4930_v18, %v1831_v11  ;;  %v1491_v32 = vld [vmem:[%s16643_s14 + $0x27e8] sm:$0xff] }
 0x285   : > { %v1744_v31 = vld [vmem:[%s16643_s14 + $0x2fd0] sm:$0xff]  ;;  %v4803_v33 = vadd.f32 %v4802_v21, %v1705_v16  ;;  %v1618_v34 = vld [vmem:[%s16643_s14 + $0x2be0] sm:$0xff]  ;;  %v1833_v35 = vld [vmem:[%s16643_s14 + $0x3298] sm:$0xff]  ;;  %v4842_v36 = vadd.f32 %v4841_v24, %v1743_v19 }
 0x286   : > { %v1581_v37 = vld [vmem:[%s16643_s14 + $0x2ab8] sm:$0xff]  ;;  %v4675_v38 = vadd.f32 %v4674_v26, %v1579_v13  ;;  %v4585_v39 = vadd.f32 %v4584_v27, %v1490_v20  ;;  %v1707_v40 = vld [vmem:[%s16643_s14 + $0x2ea8] sm:$0xff]  ;;  %v4714_v41 = vadd.f32 %v4713_v29, %v1617_v22  ;;  %v4932_v42 = vadd.f32 %v4931_v30, %v1832_v23  ;;  %v1492_v44 = vld [vmem:[%s16643_s14 + $0x27f0] sm:$0xff] }
 0x287   : > { %v1745_v43 = vld [vmem:[%s16643_s14 + $0x2fd8] sm:$0xff]  ;;  %v4804_v45 = vadd.f32 %v4803_v33, %v1706_v28  ;;  %v1619_v46 = vld [vmem:[%s16643_s14 + $0x2be8] sm:$0xff]  ;;  %v1834_v47 = vld [vmem:[%s16643_s14 + $0x32a0] sm:$0xff]  ;;  %v4843_v48 = vadd.f32 %v4842_v36, %v1744_v31 }
 0x288   : > { %v4676_v49 = vadd.f32 %v4675_v38, %v1580_v25  ;;  %v4586_v50 = vadd.f32 %v4585_v39, %v1491_v32  ;;  %v1708_v51 = vld [vmem:[%s16643_s14 + $0x2eb0] sm:$0xff]  ;;  %v4715_v52 = vadd.f32 %v4714_v41, %v1618_v34  ;;  %v4933_v53 = vadd.f32 %v4932_v42, %v1833_v35  ;;  %v1746_v54 = vld [vmem:[%s16643_s14 + $0x2fe0] sm:$0xff]  ;;  %v1493_v55 = vld [vmem:[%s16643_s14 + $0x27f8] sm:$0xff] }
 0x289   : > { %v4805_v56 = vadd.f32 %v4804_v45, %v1707_v40  ;;  %v1620_v57 = vld [vmem:[%s16643_s14 + $0x2bf0] sm:$0xff]  ;;  %v1835_v58 = vld [vmem:[%s16643_s14 + $0x32a8] sm:$0xff]  ;;  %v4844_v59 = vadd.f32 %v4843_v48, %v1745_v43  ;;  %v1494_v61 = vld [vmem:[%s16643_s14 + $0x2800] sm:$0xff] }
 0x28a   : > { %v4677_v60 = vadd.f32 %v4676_v49, %v1581_v37  ;;  %v4587_v62 = vadd.f32 %v4586_v50, %v1492_v44  ;;  %v1709_v63 = vld [vmem:[%s16643_s14 + $0x2eb8] sm:$0xff]  ;;  %v4716_v0 = vadd.f32 %v4715_v52, %v1619_v46  ;;  %v4934_v1 = vadd.f32 %v4933_v53, %v1834_v47  ;;  %v1747_v2 = vld [vmem:[%s16643_s14 + $0x2fe8] sm:$0xff]  ;;  %v1836_v6 = vld [vmem:[%s16643_s14 + $0x32b0] sm:$0xff] }
 0x28b   : > { %v1495_v3 = vld [vmem:[%s16643_s14 + $0x2808] sm:$0xff]  ;;  %v4806_v4 = vadd.f32 %v4805_v56, %v1708_v51  ;;  %v1621_v5 = vld [vmem:[%s16643_s14 + $0x2bf8] sm:$0xff]  ;;  %v4845_v7 = vadd.f32 %v4844_v59, %v1746_v54  ;;  %v1710_v9 = vld [vmem:[%s16643_s14 + $0x2ec0] sm:$0xff] }
 0x28c   : > { %4678 = vadd.xlane.f32.xlu1 %v4677_v60  ;;  %v4588_v8 = vadd.f32 %v4587_v62, %v1493_v55  ;;  %v1622_v10 = vld [vmem:[%s16643_s14 + $0x2c00] sm:$0xff]  ;;  %v4717_v11 = vadd.f32 %v4716_v0, %v1620_v57  ;;  %v4935_v12 = vadd.f32 %v4934_v1, %v1835_v58  ;;  %v1748_v13 = vld [vmem:[%s16643_s14 + $0x2ff0] sm:$0xff]  ;;  %v1837_v16 = vld [vmem:[%s16643_s14 + $0x32b8] sm:$0xff] }
 0x28d   : > { %v1496_v14 = vld [vmem:[%s16643_s14 + $0x2810] sm:$0xff]  ;;  %v4807_v15 = vadd.f32 %v4806_v4, %v1709_v63  ;;  %v4846_v17 = vadd.f32 %v4845_v7, %v1747_v2  ;;  %v1962_v18 = vld [vmem:[%s16643_s14 + $0x36a0] sm:$0xff]  ;;  %v1963_v19 = vld [vmem:[%s16643_s14 + $0x36a8] sm:$0xff] }
 0x28e   : > { %v4589_v20 = vadd.f32 %v4588_v8, %v1494_v61  ;;  %v1711_v21 = vld [vmem:[%s16643_s14 + $0x2ec8] sm:$0xff]  ;;  %v4718_v22 = vadd.f32 %v4717_v11, %v1621_v5  ;;  %v4936_v23 = vadd.f32 %v4935_v12, %v1836_v6  ;;  %v1749_v24 = vld [vmem:[%s16643_s14 + $0x2ff8] sm:$0xff]  ;;  %v1964_v25 = vld [vmem:[%s16643_s14 + $0x36b0] sm:$0xff]  ;;  %v5065_v26 = vadd.f32 %v1963_v19, %v1962_v18 }
 0x28f   : > { %v4808_v27 = vadd.f32 %v4807_v15, %v1710_v9  ;;  %v1623_v28 = vld [vmem:[%s16643_s14 + $0x2c08] sm:$0xff]  ;;  %v1838_v29 = vld [vmem:[%s16643_s14 + $0x32c0] sm:$0xff]  ;;  %v4847_v30 = vadd.f32 %v4846_v17, %v1748_v13  ;;  %v1965_v31 = vld [vmem:[%s16643_s14 + $0x36b8] sm:$0xff] }
 0x290   : > { %v1497_v32 = vld [vmem:[%s16643_s14 + $0x2818] sm:$0xff]  ;;  %v4590_v33 = vadd.f32 %v4589_v20, %v1495_v3  ;;  %v1712_v34 = vld [vmem:[%s16643_s14 + $0x2ed0] sm:$0xff]  ;;  %v4719_v35 = vadd.f32 %v4718_v22, %v1622_v10  ;;  %v4937_v36 = vadd.f32 %v4936_v23, %v1837_v16  ;;  %v1750_v37 = vld [vmem:[%s16643_s14 + $0x3000] sm:$0xff]  ;;  %v5066_v38 = vadd.f32 %v5065_v26, %v1964_v25 }
 0x291   : > { %v4809_v39 = vadd.f32 %v4808_v27, %v1711_v21  ;;  %v1624_v40 = vld [vmem:[%s16643_s14 + $0x2c10] sm:$0xff]  ;;  %v1839_v41 = vld [vmem:[%s16643_s14 + $0x32c8] sm:$0xff]  ;;  %v4848_v42 = vadd.f32 %v4847_v30, %v1749_v24  ;;  %v1966_v43 = vld [vmem:[%s16643_s14 + $0x36c0] sm:$0xff] }
 0x292   : > { %v1498_v44 = vld [vmem:[%s16643_s14 + $0x2820] sm:$0xff]  ;;  %v4591_v45 = vadd.f32 %v4590_v33, %v1496_v14  ;;  %v1713_v46 = vld [vmem:[%s16643_s14 + $0x2ed8] sm:$0xff]  ;;  %v4720_v47 = vadd.f32 %v4719_v35, %v1623_v28  ;;  %v4938_v48 = vadd.f32 %v4937_v36, %v1838_v29  ;;  %v1751_v49 = vld [vmem:[%s16643_s14 + $0x3008] sm:$0xff]  ;;  %v5067_v50 = vadd.f32 %v5066_v38, %v1965_v31 }
 0x293   : > { %v4810_v51 = vadd.f32 %v4809_v39, %v1712_v34  ;;  %v1625_v52 = vld [vmem:[%s16643_s14 + $0x2c18] sm:$0xff]  ;;  %v1840_v53 = vld [vmem:[%s16643_s14 + $0x32d0] sm:$0xff]  ;;  %v4849_v54 = vadd.f32 %v4848_v42, %v1750_v37  ;;  %v1967_v55 = vld [vmem:[%s16643_s14 + $0x36c8] sm:$0xff] }
 0x294   : > { %v1499_v56 = vld [vmem:[%s16643_s14 + $0x2828] sm:$0xff]  ;;  %v4592_v57 = vadd.f32 %v4591_v45, %v1497_v32  ;;  %v1714_v58 = vld [vmem:[%s16643_s14 + $0x2ee0] sm:$0xff]  ;;  %v4721_v59 = vadd.f32 %v4720_v47, %v1624_v40  ;;  %v4939_v60 = vadd.f32 %v4938_v48, %v1839_v41  ;;  %v1752_v61 = vld [vmem:[%s16643_s14 + $0x3010] sm:$0xff]  ;;  %v5068_v62 = vadd.f32 %v5067_v50, %v1966_v43 }
 0x295   : > { %v4811_v63 = vadd.f32 %v4810_v51, %v1713_v46  ;;  %v1626_v0 = vld [vmem:[%s16643_s14 + $0x2c20] sm:$0xff]  ;;  %v1841_v1 = vld [vmem:[%s16643_s14 + $0x32d8] sm:$0xff]  ;;  %v4850_v2 = vadd.f32 %v4849_v54, %v1751_v49  ;;  %v1968_v3 = vld [vmem:[%s16643_s14 + $0x36d0] sm:$0xff] }
 0x296   : > { %v1500_v4 = vld [vmem:[%s16643_s14 + $0x2830] sm:$0xff]  ;;  %v4593_v5 = vadd.f32 %v4592_v57, %v1498_v44  ;;  %v1715_v6 = vld [vmem:[%s16643_s14 + $0x2ee8] sm:$0xff]  ;;  %v4722_v7 = vadd.f32 %v4721_v59, %v1625_v52  ;;  %v4940_v8 = vadd.f32 %v4939_v60, %v1840_v53  ;;  %v1753_v9 = vld [vmem:[%s16643_s14 + $0x3018] sm:$0xff]  ;;  %v5069_v10 = vadd.f32 %v5068_v62, %v1967_v55 }
 0x297   : > { %v4812_v11 = vadd.f32 %v4811_v63, %v1714_v58  ;;  %v1627_v12 = vld [vmem:[%s16643_s14 + $0x2c28] sm:$0xff]  ;;  %v1842_v13 = vld [vmem:[%s16643_s14 + $0x32e0] sm:$0xff]  ;;  %v4851_v14 = vadd.f32 %v4850_v2, %v1752_v61  ;;  %v1969_v15 = vld [vmem:[%s16643_s14 + $0x36d8] sm:$0xff] }
 0x298   : > { %v1501_v16 = vld [vmem:[%s16643_s14 + $0x2838] sm:$0xff]  ;;  %v4594_v17 = vadd.f32 %v4593_v5, %v1499_v56  ;;  %v1716_v18 = vld [vmem:[%s16643_s14 + $0x2ef0] sm:$0xff]  ;;  %v4723_v19 = vadd.f32 %v4722_v7, %v1626_v0  ;;  %v4941_v20 = vadd.f32 %v4940_v8, %v1841_v1  ;;  %v1754_v21 = vld [vmem:[%s16643_s14 + $0x3020] sm:$0xff]  ;;  %v5070_v22 = vadd.f32 %v5069_v10, %v1968_v3 }
 0x299   : > { %v4813_v23 = vadd.f32 %v4812_v11, %v1715_v6  ;;  %v1628_v24 = vld [vmem:[%s16643_s14 + $0x2c30] sm:$0xff]  ;;  %v1843_v25 = vld [vmem:[%s16643_s14 + $0x32e8] sm:$0xff]  ;;  %v4852_v26 = vadd.f32 %v4851_v14, %v1753_v9  ;;  %v1970_v27 = vld [vmem:[%s16643_s14 + $0x36e0] sm:$0xff] }
 0x29a   : > { %v1502_v28 = vld [vmem:[%s16643_s14 + $0x2840] sm:$0xff]  ;;  %v4595_v29 = vadd.f32 %v4594_v17, %v1500_v4  ;;  %v1717_v30 = vld [vmem:[%s16643_s14 + $0x2ef8] sm:$0xff]  ;;  %v4724_v31 = vadd.f32 %v4723_v19, %v1627_v12  ;;  %v4942_v32 = vadd.f32 %v4941_v20, %v1842_v13  ;;  %v1755_v33 = vld [vmem:[%s16643_s14 + $0x3028] sm:$0xff]  ;;  %v5071_v34 = vadd.f32 %v5070_v22, %v1969_v15 }
 0x29b   : > { %v4814_v35 = vadd.f32 %v4813_v23, %v1716_v18  ;;  %v1629_v36 = vld [vmem:[%s16643_s14 + $0x2c38] sm:$0xff]  ;;  %v1844_v37 = vld [vmem:[%s16643_s14 + $0x32f0] sm:$0xff]  ;;  %v4853_v38 = vadd.f32 %v4852_v26, %v1754_v21  ;;  %v1971_v39 = vld [vmem:[%s16643_s14 + $0x36e8] sm:$0xff] }
 0x29c   : > { %v1503_v40 = vld [vmem:[%s16643_s14 + $0x2848] sm:$0xff]  ;;  %v4596_v41 = vadd.f32 %v4595_v29, %v1501_v16  ;;  %v1718_v42 = vld [vmem:[%s16643_s14 + $0x2f00] sm:$0xff]  ;;  %v4725_v43 = vadd.f32 %v4724_v31, %v1628_v24  ;;  %v4943_v44 = vadd.f32 %v4942_v32, %v1843_v25  ;;  %v1756_v45 = vld [vmem:[%s16643_s14 + $0x3030] sm:$0xff]  ;;  %v5072_v46 = vadd.f32 %v5071_v34, %v1970_v27 }
 0x29d   : > { %v4815_v47 = vadd.f32 %v4814_v35, %v1717_v30  ;;  %v1630_v48 = vld [vmem:[%s16643_s14 + $0x2c40] sm:$0xff]  ;;  %v1845_v49 = vld [vmem:[%s16643_s14 + $0x32f8] sm:$0xff]  ;;  %v4854_v50 = vadd.f32 %v4853_v38, %v1755_v33  ;;  %v1972_v51 = vld [vmem:[%s16643_s14 + $0x36f0] sm:$0xff] }
 0x29e   : > { %v1504_v52 = vld [vmem:[%s16643_s14 + $0x2850] sm:$0xff]  ;;  %v4597_v53 = vadd.f32 %v4596_v41, %v1502_v28  ;;  %v1719_v54 = vld [vmem:[%s16643_s14 + $0x2f08] sm:$0xff]  ;;  %v4726_v55 = vadd.f32 %v4725_v43, %v1629_v36  ;;  %v4944_v56 = vadd.f32 %v4943_v44, %v1844_v37  ;;  %v1757_v57 = vld [vmem:[%s16643_s14 + $0x3038] sm:$0xff]  ;;  %v5073_v58 = vadd.f32 %v5072_v46, %v1971_v39 }
 0x29f   : > { %v4816_v59 = vadd.f32 %v4815_v47, %v1718_v42  ;;  %v1631_v60 = vld [vmem:[%s16643_s14 + $0x2c48] sm:$0xff]  ;;  %v1846_v61 = vld [vmem:[%s16643_s14 + $0x3300] sm:$0xff]  ;;  %v4855_v62 = vadd.f32 %v4854_v50, %v1756_v45  ;;  %v1973_v63 = vld [vmem:[%s16643_s14 + $0x36f8] sm:$0xff] }
 0x2a0   : > { %v1505_v0 = vld [vmem:[%s16643_s14 + $0x2858] sm:$0xff]  ;;  %v4598_v1 = vadd.f32 %v4597_v53, %v1503_v40  ;;  %v1720_v2 = vld [vmem:[%s16643_s14 + $0x2f10] sm:$0xff]  ;;  %v4727_v3 = vadd.f32 %v4726_v55, %v1630_v48  ;;  %v4945_v4 = vadd.f32 %v4944_v56, %v1845_v49  ;;  %v1758_v5 = vld [vmem:[%s16643_s14 + $0x3040] sm:$0xff]  ;;  %v5074_v6 = vadd.f32 %v5073_v58, %v1972_v51 }
 0x2a1   : > { %v4817_v7 = vadd.f32 %v4816_v59, %v1719_v54  ;;  %v1632_v8 = vld [vmem:[%s16643_s14 + $0x2c50] sm:$0xff]  ;;  %v1847_v9 = vld [vmem:[%s16643_s14 + $0x3308] sm:$0xff]  ;;  %v4856_v10 = vadd.f32 %v4855_v62, %v1757_v57  ;;  %v1974_v11 = vld [vmem:[%s16643_s14 + $0x3700] sm:$0xff] }
 0x2a2   : > { %v4599_v12 = vadd.f32 %v4598_v1, %v1504_v52  ;;  %v1721_v13 = vld [vmem:[%s16643_s14 + $0x2f18] sm:$0xff]  ;;  %v1722_v14 = vld [vmem:[%s16643_s14 + $0x2f20] sm:$0xff]  ;;  %v4728_v15 = vadd.f32 %v4727_v3, %v1631_v60  ;;  %v4946_v16 = vadd.f32 %v4945_v4, %v1846_v61  ;;  %v1759_v17 = vld [vmem:[%s16643_s14 + $0x3048] sm:$0xff]  ;;  %v5075_v18 = vadd.f32 %v5074_v6, %v1973_v63 }
 0x2a3   : > { %v4818_v19 = vadd.f32 %v4817_v7, %v1720_v2  ;;  %v1633_v20 = vld [vmem:[%s16643_s14 + $0x2c58] sm:$0xff]  ;;  %v1848_v21 = vld [vmem:[%s16643_s14 + $0x3310] sm:$0xff]  ;;  %v4857_v22 = vadd.f32 %v4856_v10, %v1758_v5  ;;  %v1975_v23 = vld [vmem:[%s16643_s14 + $0x3708] sm:$0xff] }
 0x2a4   : > { %v4600_v24 = vadd.f32 %v4599_v12, %v1505_v0  ;;  %v1723_v25 = vld [vmem:[%s16643_s14 + $0x2f28] sm:$0xff]  ;;  %v1634_v26 = vld [vmem:[%s16643_s14 + $0x2c60] sm:$0xff]  ;;  %v4729_v27 = vadd.f32 %v4728_v15, %v1632_v8  ;;  %v4947_v28 = vadd.f32 %v4946_v16, %v1847_v9  ;;  %v1760_v29 = vld [vmem:[%s16643_s14 + $0x3050] sm:$0xff]  ;;  %v5076_v30 = vadd.f32 %v5075_v18, %v1974_v11 }
 0x2a5   : > { %v4819_v31 = vadd.f32 %v4818_v19, %v1721_v13  ;;  %v1635_v32 = vld [vmem:[%s16643_s14 + $0x2c68] sm:$0xff]  ;;  %v1849_v33 = vld [vmem:[%s16643_s14 + $0x3318] sm:$0xff]  ;;  %v4858_v34 = vadd.f32 %v4857_v22, %v1759_v17  ;;  %v1976_v35 = vld [vmem:[%s16643_s14 + $0x3710] sm:$0xff] }
 0x2a6   : > { %4601 = vadd.xlane.f32.xlu0 %v4600_v24  ;;  %v4730_v36 = vadd.f32 %v4729_v27, %v1633_v20  ;;  %v1850_v37 = vld [vmem:[%s16643_s14 + $0x3320] sm:$0xff]  ;;  %v4948_v38 = vadd.f32 %v4947_v28, %v1848_v21  ;;  %v1761_v39 = vld [vmem:[%s16643_s14 + $0x3058] sm:$0xff]  ;;  %v5077_v40 = vadd.f32 %v5076_v30, %v1975_v23  ;;  %v1887_v45 = vld [vmem:[%s16643_s14 + $0x3448] sm:$0xff] }
 0x2a7   : > { %v1886_v41 = vld [vmem:[%s16643_s14 + $0x3440] sm:$0xff]  ;;  %v4820_v42 = vadd.f32 %v4819_v31, %v1722_v14  ;;  %v4859_v43 = vadd.f32 %v4858_v34, %v1760_v29  ;;  %v1977_v44 = vld [vmem:[%s16643_s14 + $0x3718] sm:$0xff]  ;;  %v1888_v46 = vld [vmem:[%s16643_s14 + $0x3450] sm:$0xff] }
 0x2a8   : > { %v1724_v47 = vld [vmem:[%s16643_s14 + $0x2f30] sm:$0xff]  ;;  %v4731_v49 = vadd.f32 %v4730_v36, %v1634_v26  ;;  %v4949_v50 = vadd.f32 %v4948_v38, %v1849_v33  ;;  %v1762_v51 = vld [vmem:[%s16643_s14 + $0x3060] sm:$0xff]  ;;  %v5078_v52 = vadd.f32 %v5077_v40, %v1976_v35  ;;  %v4988_v53 = vadd.f32 %v1887_v45, %v1886_v41  ;;  %v1851_v55 = vld [vmem:[%s16643_s14 + $0x3328] sm:$0xff] }
 0x2a9   : > { %v1636_v48 = vld [vmem:[%s16643_s14 + $0x2c70] sm:$0xff]  ;;  %v4821_v54 = vadd.f32 %v4820_v42, %v1723_v25  ;;  %v4860_v56 = vadd.f32 %v4859_v43, %v1761_v39  ;;  %v1978_v57 = vld [vmem:[%s16643_s14 + $0x3720] sm:$0xff]  ;;  %v1889_v58 = vld [vmem:[%s16643_s14 + $0x3458] sm:$0xff] }
 0x2aa   : > { %v1725_v59 = vld [vmem:[%s16643_s14 + $0x2f38] sm:$0xff]  ;;  %v4732_v61 = vadd.f32 %v4731_v49, %v1635_v32  ;;  %v4950_v62 = vadd.f32 %v4949_v50, %v1850_v37  ;;  %v1763_v63 = vld [vmem:[%s16643_s14 + $0x3068] sm:$0xff]  ;;  %v5079_v0 = vadd.f32 %v5078_v52, %v1977_v44  ;;  %v4989_v1 = vadd.f32 %v4988_v53, %v1888_v46  ;;  %v1852_v3 = vld [vmem:[%s16643_s14 + $0x3330] sm:$0xff] }
 0x2ab   : > { %v1637_v60 = vld [vmem:[%s16643_s14 + $0x2c78] sm:$0xff]  ;;  %v4822_v2 = vadd.f32 %v4821_v54, %v1724_v47  ;;  %v4861_v4 = vadd.f32 %v4860_v56, %v1762_v51  ;;  %v1979_v5 = vld [vmem:[%s16643_s14 + $0x3728] sm:$0xff]  ;;  %v1890_v6 = vld [vmem:[%s16643_s14 + $0x3460] sm:$0xff] }
 0x2ac   : > { %v1726_v7 = vld [vmem:[%s16643_s14 + $0x2f40] sm:$0xff]  ;;  %v4733_v9 = vadd.f32 %v4732_v61, %v1636_v48  ;;  %v4951_v10 = vadd.f32 %v4950_v62, %v1851_v55  ;;  %v1764_v11 = vld [vmem:[%s16643_s14 + $0x3070] sm:$0xff]  ;;  %v5080_v12 = vadd.f32 %v5079_v0, %v1978_v57  ;;  %v4990_v13 = vadd.f32 %v4989_v1, %v1889_v58  ;;  %v1853_v15 = vld [vmem:[%s16643_s14 + $0x3338] sm:$0xff] }
 0x2ad   : > { %v1638_v8 = vld [vmem:[%s16643_s14 + $0x2c80] sm:$0xff]  ;;  %v4823_v14 = vadd.f32 %v4822_v2, %v1725_v59  ;;  %v4862_v16 = vadd.f32 %v4861_v4, %v1763_v63  ;;  %v1980_v17 = vld [vmem:[%s16643_s14 + $0x3730] sm:$0xff]  ;;  %v1891_v18 = vld [vmem:[%s16643_s14 + $0x3468] sm:$0xff] }
 0x2ae   : > { %v1727_v19 = vld [vmem:[%s16643_s14 + $0x2f48] sm:$0xff]  ;;  %v4734_v21 = vadd.f32 %v4733_v9, %v1637_v60  ;;  %v4952_v22 = vadd.f32 %v4951_v10, %v1852_v3  ;;  %v1765_v23 = vld [vmem:[%s16643_s14 + $0x3078] sm:$0xff]  ;;  %v5081_v24 = vadd.f32 %v5080_v12, %v1979_v5  ;;  %v4991_v25 = vadd.f32 %v4990_v13, %v1890_v6  ;;  %v1854_v27 = vld [vmem:[%s16643_s14 + $0x3340] sm:$0xff] }
 0x2af   : > { %v1639_v20 = vld [vmem:[%s16643_s14 + $0x2c88] sm:$0xff]  ;;  %v4824_v26 = vadd.f32 %v4823_v14, %v1726_v7  ;;  %v4863_v28 = vadd.f32 %v4862_v16, %v1764_v11  ;;  %v1981_v29 = vld [vmem:[%s16643_s14 + $0x3738] sm:$0xff]  ;;  %v1892_v30 = vld [vmem:[%s16643_s14 + $0x3470] sm:$0xff] }
 0x2b0   : > { %v1728_v31 = vld [vmem:[%s16643_s14 + $0x2f50] sm:$0xff]  ;;  %v4735_v33 = vadd.f32 %v4734_v21, %v1638_v8  ;;  %v4953_v34 = vadd.f32 %v4952_v22, %v1853_v15  ;;  %v1766_v35 = vld [vmem:[%s16643_s14 + $0x3080] sm:$0xff]  ;;  %v5082_v36 = vadd.f32 %v5081_v24, %v1980_v17  ;;  %v4992_v37 = vadd.f32 %v4991_v25, %v1891_v18  ;;  %v1855_v39 = vld [vmem:[%s16643_s14 + $0x3348] sm:$0xff] }
 0x2b1   : > { %v1640_v32 = vld [vmem:[%s16643_s14 + $0x2c90] sm:$0xff]  ;;  %v4825_v38 = vadd.f32 %v4824_v26, %v1727_v19  ;;  %v4864_v40 = vadd.f32 %v4863_v28, %v1765_v23  ;;  %v1982_v41 = vld [vmem:[%s16643_s14 + $0x3740] sm:$0xff]  ;;  %v1893_v42 = vld [vmem:[%s16643_s14 + $0x3478] sm:$0xff] }
 0x2b2   : > { %v1729_v43 = vld [vmem:[%s16643_s14 + $0x2f58] sm:$0xff]  ;;  %v4736_v45 = vadd.f32 %v4735_v33, %v1639_v20  ;;  %v4954_v46 = vadd.f32 %v4953_v34, %v1854_v27  ;;  %v1767_v47 = vld [vmem:[%s16643_s14 + $0x3088] sm:$0xff]  ;;  %v5083_v48 = vadd.f32 %v5082_v36, %v1981_v29  ;;  %v4993_v49 = vadd.f32 %v4992_v37, %v1892_v30  ;;  %v1856_v51 = vld [vmem:[%s16643_s14 + $0x3350] sm:$0xff] }
 0x2b3   : > { %v1641_v44 = vld [vmem:[%s16643_s14 + $0x2c98] sm:$0xff]  ;;  %v4826_v50 = vadd.f32 %v4825_v38, %v1728_v31  ;;  %v4865_v52 = vadd.f32 %v4864_v40, %v1766_v35  ;;  %v1983_v53 = vld [vmem:[%s16643_s14 + $0x3748] sm:$0xff]  ;;  %v1894_v54 = vld [vmem:[%s16643_s14 + $0x3480] sm:$0xff] }
 0x2b4   : > { %v1730_v55 = vld [vmem:[%s16643_s14 + $0x2f60] sm:$0xff]  ;;  %v4737_v57 = vadd.f32 %v4736_v45, %v1640_v32  ;;  %v4955_v58 = vadd.f32 %v4954_v46, %v1855_v39  ;;  %v1768_v59 = vld [vmem:[%s16643_s14 + $0x3090] sm:$0xff]  ;;  %v5084_v60 = vadd.f32 %v5083_v48, %v1982_v41  ;;  %v4994_v61 = vadd.f32 %v4993_v49, %v1893_v42  ;;  %v1857_v63 = vld [vmem:[%s16643_s14 + $0x3358] sm:$0xff] }
 0x2b5   : > { %v1642_v56 = vld [vmem:[%s16643_s14 + $0x2ca0] sm:$0xff]  ;;  %v4827_v62 = vadd.f32 %v4826_v50, %v1729_v43  ;;  %v4866_v0 = vadd.f32 %v4865_v52, %v1767_v47  ;;  %v1984_v1 = vld [vmem:[%s16643_s14 + $0x3750] sm:$0xff]  ;;  %v1895_v2 = vld [vmem:[%s16643_s14 + $0x3488] sm:$0xff] }
 0x2b6   : > { %v1731_v3 = vld [vmem:[%s16643_s14 + $0x2f68] sm:$0xff]  ;;  %v4738_v5 = vadd.f32 %v4737_v57, %v1641_v44  ;;  %v4956_v6 = vadd.f32 %v4955_v58, %v1856_v51  ;;  %v1769_v7 = vld [vmem:[%s16643_s14 + $0x3098] sm:$0xff]  ;;  %v5085_v8 = vadd.f32 %v5084_v60, %v1983_v53  ;;  %v4995_v9 = vadd.f32 %v4994_v61, %v1894_v54  ;;  %v1858_v11 = vld [vmem:[%s16643_s14 + $0x3360] sm:$0xff] }
 0x2b7   : > { %v1643_v4 = vld [vmem:[%s16643_s14 + $0x2ca8] sm:$0xff]  ;;  %v4828_v10 = vadd.f32 %v4827_v62, %v1730_v55  ;;  %v4867_v12 = vadd.f32 %v4866_v0, %v1768_v59  ;;  %v1985_v13 = vld [vmem:[%s16643_s14 + $0x3758] sm:$0xff]  ;;  %v1896_v14 = vld [vmem:[%s16643_s14 + $0x3490] sm:$0xff] }
 0x2b8   : > { %v1732_v15 = vld [vmem:[%s16643_s14 + $0x2f70] sm:$0xff]  ;;  %v4739_v17 = vadd.f32 %v4738_v5, %v1642_v56  ;;  %v4957_v18 = vadd.f32 %v4956_v6, %v1857_v63  ;;  %v1770_v19 = vld [vmem:[%s16643_s14 + $0x30a0] sm:$0xff]  ;;  %v5086_v20 = vadd.f32 %v5085_v8, %v1984_v1  ;;  %v4996_v21 = vadd.f32 %v4995_v9, %v1895_v2  ;;  %v1859_v23 = vld [vmem:[%s16643_s14 + $0x3368] sm:$0xff] }
 0x2b9   : > { %v1644_v16 = vld [vmem:[%s16643_s14 + $0x2cb0] sm:$0xff]  ;;  %v4829_v22 = vadd.f32 %v4828_v10, %v1731_v3  ;;  %v4868_v24 = vadd.f32 %v4867_v12, %v1769_v7  ;;  %v1986_v25 = vld [vmem:[%s16643_s14 + $0x3760] sm:$0xff]  ;;  %v1897_v26 = vld [vmem:[%s16643_s14 + $0x3498] sm:$0xff] }
 0x2ba   : > { %v1733_v27 = vld [vmem:[%s16643_s14 + $0x2f78] sm:$0xff]  ;;  %v4740_v29 = vadd.f32 %v4739_v17, %v1643_v4  ;;  %v4958_v30 = vadd.f32 %v4957_v18, %v1858_v11  ;;  %v1771_v31 = vld [vmem:[%s16643_s14 + $0x30a8] sm:$0xff]  ;;  %v5087_v32 = vadd.f32 %v5086_v20, %v1985_v13  ;;  %v4997_v33 = vadd.f32 %v4996_v21, %v1896_v14  ;;  %v1860_v35 = vld [vmem:[%s16643_s14 + $0x3370] sm:$0xff] }
 0x2bb   : > { %v1645_v28 = vld [vmem:[%s16643_s14 + $0x2cb8] sm:$0xff]  ;;  %v4830_v34 = vadd.f32 %v4829_v22, %v1732_v15  ;;  %v4869_v36 = vadd.f32 %v4868_v24, %v1770_v19  ;;  %v1987_v37 = vld [vmem:[%s16643_s14 + $0x3768] sm:$0xff]  ;;  %v1898_v38 = vld [vmem:[%s16643_s14 + $0x34a0] sm:$0xff] }
 0x2bc   : > { %v1646_v39 = vld [vmem:[%s16643_s14 + $0x2cc0] sm:$0xff]  ;;  %v4741_v40 = vadd.f32 %v4740_v29, %v1644_v16  ;;  %v4959_v41 = vadd.f32 %v4958_v30, %v1859_v23  ;;  %v1772_v42 = vld [vmem:[%s16643_s14 + $0x30b0] sm:$0xff]  ;;  %v5088_v43 = vadd.f32 %v5087_v32, %v1986_v25  ;;  %v4998_v44 = vadd.f32 %v4997_v33, %v1897_v26  ;;  %v1861_v46 = vld [vmem:[%s16643_s14 + $0x3378] sm:$0xff] }
 0x2bd   : > { %v4831_v45 = vadd.f32 %v4830_v34, %v1733_v27  ;;  %v4870_v47 = vadd.f32 %v4869_v36, %v1771_v31  ;;  %v1988_v48 = vld [vmem:[%s16643_s14 + $0x3770] sm:$0xff]  ;;  %v1899_v49 = vld [vmem:[%s16643_s14 + $0x34a8] sm:$0xff]  ;;  %v1862_v52 = vld [vmem:[%s16643_s14 + $0x3380] sm:$0xff] }
 0x2be   : > { %v1647_v50 = vld [vmem:[%s16643_s14 + $0x2cc8] sm:$0xff]  ;;  %v4742_v51 = vadd.f32 %v4741_v40, %v1645_v28  ;;  %v4960_v53 = vadd.f32 %v4959_v41, %v1860_v35  ;;  %v1773_v54 = vld [vmem:[%s16643_s14 + $0x30b8] sm:$0xff]  ;;  %v5089_v55 = vadd.f32 %v5088_v43, %v1987_v37  ;;  %v4999_v56 = vadd.f32 %v4998_v44, %v1898_v38  ;;  %v1648_v57 = vld [vmem:[%s16643_s14 + $0x2cd0] sm:$0xff] }
 0x2bf   : > { %4832 = vadd.xlane.f32.xlu1 %v4831_v45  ;;  %v1774_v58 = vld [vmem:[%s16643_s14 + $0x30c0] sm:$0xff]  ;;  %v4871_v59 = vadd.f32 %v4870_v47, %v1772_v42  ;;  %v1989_v60 = vld [vmem:[%s16643_s14 + $0x3778] sm:$0xff]  ;;  %v1900_v61 = vld [vmem:[%s16643_s14 + $0x34b0] sm:$0xff] }
 0x2c0   : > { %v4743_v62 = vadd.f32 %v4742_v51, %v1646_v39  ;;  %v4961_v63 = vadd.f32 %v4960_v53, %v1861_v46  ;;  %v5090_v0 = vadd.f32 %v5089_v55, %v1988_v48  ;;  %v5000_v1 = vadd.f32 %v4999_v56, %v1899_v49  ;;  %v2114_v2 = vld [vmem:[%s16643_s14 + $0x3b60] sm:$0xff]  ;;  %v2115_v3 = vld [vmem:[%s16643_s14 + $0x3b68] sm:$0xff]  ;;  %v2116_v4 = vld [vmem:[%s16643_s14 + $0x3b70] sm:$0xff] }
 0x2c1   : > { %v1863_v5 = vld [vmem:[%s16643_s14 + $0x3388] sm:$0xff]  ;;  %v4872_v6 = vadd.f32 %v4871_v59, %v1773_v54  ;;  %v1990_v7 = vld [vmem:[%s16643_s14 + $0x3780] sm:$0xff]  ;;  %v1901_v8 = vld [vmem:[%s16643_s14 + $0x34b8] sm:$0xff]  ;;  %v5219_v9 = vadd.f32 %v2115_v3, %v2114_v2 }
 0x2c2   : > { %v1649_v10 = vld [vmem:[%s16643_s14 + $0x2cd8] sm:$0xff]  ;;  %v4744_v11 = vadd.f32 %v4743_v62, %v1647_v50  ;;  %v4962_v12 = vadd.f32 %v4961_v63, %v1862_v52  ;;  %v1775_v13 = vld [vmem:[%s16643_s14 + $0x30c8] sm:$0xff]  ;;  %v5091_v14 = vadd.f32 %v5090_v0, %v1989_v60  ;;  %v5001_v15 = vadd.f32 %v5000_v1, %v1900_v61  ;;  %v1864_v17 = vld [vmem:[%s16643_s14 + $0x3390] sm:$0xff] }
 0x2c3   : > { %v2117_v16 = vld [vmem:[%s16643_s14 + $0x3b78] sm:$0xff]  ;;  %v4873_v18 = vadd.f32 %v4872_v6, %v1774_v58  ;;  %v1991_v19 = vld [vmem:[%s16643_s14 + $0x3788] sm:$0xff]  ;;  %v1902_v20 = vld [vmem:[%s16643_s14 + $0x34c0] sm:$0xff]  ;;  %v5220_v21 = vadd.f32 %v5219_v9, %v2116_v4 }
 0x2c4   : > { %v1650_v22 = vld [vmem:[%s16643_s14 + $0x2ce0] sm:$0xff]  ;;  %v4745_v23 = vadd.f32 %v4744_v11, %v1648_v57  ;;  %v4963_v24 = vadd.f32 %v4962_v12, %v1863_v5  ;;  %v1776_v25 = vld [vmem:[%s16643_s14 + $0x30d0] sm:$0xff]  ;;  %v5092_v26 = vadd.f32 %v5091_v14, %v1990_v7  ;;  %v5002_v27 = vadd.f32 %v5001_v15, %v1901_v8  ;;  %v1865_v29 = vld [vmem:[%s16643_s14 + $0x3398] sm:$0xff] }
 0x2c5   : > { %v2118_v28 = vld [vmem:[%s16643_s14 + $0x3b80] sm:$0xff]  ;;  %v4874_v30 = vadd.f32 %v4873_v18, %v1775_v13  ;;  %v1992_v31 = vld [vmem:[%s16643_s14 + $0x3790] sm:$0xff]  ;;  %v1903_v32 = vld [vmem:[%s16643_s14 + $0x34c8] sm:$0xff]  ;;  %v5221_v33 = vadd.f32 %v5220_v21, %v2117_v16 }
 0x2c6   : > { %v1651_v34 = vld [vmem:[%s16643_s14 + $0x2ce8] sm:$0xff]  ;;  %v4746_v35 = vadd.f32 %v4745_v23, %v1649_v10  ;;  %v4964_v36 = vadd.f32 %v4963_v24, %v1864_v17  ;;  %v1777_v37 = vld [vmem:[%s16643_s14 + $0x30d8] sm:$0xff]  ;;  %v5093_v38 = vadd.f32 %v5092_v26, %v1991_v19  ;;  %v5003_v39 = vadd.f32 %v5002_v27, %v1902_v20  ;;  %v1866_v41 = vld [vmem:[%s16643_s14 + $0x33a0] sm:$0xff] }
 0x2c7   : > { %v2119_v40 = vld [vmem:[%s16643_s14 + $0x3b88] sm:$0xff]  ;;  %v4875_v42 = vadd.f32 %v4874_v30, %v1776_v25  ;;  %v1993_v43 = vld [vmem:[%s16643_s14 + $0x3798] sm:$0xff]  ;;  %v1904_v44 = vld [vmem:[%s16643_s14 + $0x34d0] sm:$0xff]  ;;  %v5222_v45 = vadd.f32 %v5221_v33, %v2118_v28 }
 0x2c8   : > { %v1652_v46 = vld [vmem:[%s16643_s14 + $0x2cf0] sm:$0xff]  ;;  %v4747_v47 = vadd.f32 %v4746_v35, %v1650_v22  ;;  %v4965_v48 = vadd.f32 %v4964_v36, %v1865_v29  ;;  %v1778_v49 = vld [vmem:[%s16643_s14 + $0x30e0] sm:$0xff]  ;;  %v5094_v50 = vadd.f32 %v5093_v38, %v1992_v31  ;;  %v5004_v51 = vadd.f32 %v5003_v39, %v1903_v32  ;;  %v1867_v53 = vld [vmem:[%s16643_s14 + $0x33a8] sm:$0xff] }
 0x2c9   : > { %v2120_v52 = vld [vmem:[%s16643_s14 + $0x3b90] sm:$0xff]  ;;  %v4876_v54 = vadd.f32 %v4875_v42, %v1777_v37  ;;  %v1994_v55 = vld [vmem:[%s16643_s14 + $0x37a0] sm:$0xff]  ;;  %v1905_v56 = vld [vmem:[%s16643_s14 + $0x34d8] sm:$0xff]  ;;  %v5223_v57 = vadd.f32 %v5222_v45, %v2119_v40 }
 0x2ca   : > { %v1653_v58 = vld [vmem:[%s16643_s14 + $0x2cf8] sm:$0xff]  ;;  %v4748_v59 = vadd.f32 %v4747_v47, %v1651_v34  ;;  %v4966_v60 = vadd.f32 %v4965_v48, %v1866_v41  ;;  %v1779_v61 = vld [vmem:[%s16643_s14 + $0x30e8] sm:$0xff]  ;;  %v5095_v62 = vadd.f32 %v5094_v50, %v1993_v43  ;;  %v5005_v63 = vadd.f32 %v5004_v51, %v1904_v44  ;;  %v1868_v1 = vld [vmem:[%s16643_s14 + $0x33b0] sm:$0xff] }
 0x2cb   : > { %v2121_v0 = vld [vmem:[%s16643_s14 + $0x3b98] sm:$0xff]  ;;  %v4877_v2 = vadd.f32 %v4876_v54, %v1778_v49  ;;  %v1995_v3 = vld [vmem:[%s16643_s14 + $0x37a8] sm:$0xff]  ;;  %v1906_v4 = vld [vmem:[%s16643_s14 + $0x34e0] sm:$0xff]  ;;  %v5224_v5 = vadd.f32 %v5223_v57, %v2120_v52 }
 0x2cc   : > { %v1654_v6 = vld [vmem:[%s16643_s14 + $0x2d00] sm:$0xff]  ;;  %v4749_v7 = vadd.f32 %v4748_v59, %v1652_v46  ;;  %v4967_v8 = vadd.f32 %v4966_v60, %v1867_v53  ;;  %v1780_v9 = vld [vmem:[%s16643_s14 + $0x30f0] sm:$0xff]  ;;  %v5096_v10 = vadd.f32 %v5095_v62, %v1994_v55  ;;  %v5006_v11 = vadd.f32 %v5005_v63, %v1905_v56  ;;  %v1869_v13 = vld [vmem:[%s16643_s14 + $0x33b8] sm:$0xff] }
 0x2cd   : > { %v2122_v12 = vld [vmem:[%s16643_s14 + $0x3ba0] sm:$0xff]  ;;  %v4878_v14 = vadd.f32 %v4877_v2, %v1779_v61  ;;  %v1996_v15 = vld [vmem:[%s16643_s14 + $0x37b0] sm:$0xff]  ;;  %v1907_v16 = vld [vmem:[%s16643_s14 + $0x34e8] sm:$0xff]  ;;  %v5225_v17 = vadd.f32 %v5224_v5, %v2121_v0 }
 0x2ce   : > { %v1655_v18 = vld [vmem:[%s16643_s14 + $0x2d08] sm:$0xff]  ;;  %v4750_v19 = vadd.f32 %v4749_v7, %v1653_v58  ;;  %v4968_v20 = vadd.f32 %v4967_v8, %v1868_v1  ;;  %v1781_v21 = vld [vmem:[%s16643_s14 + $0x30f8] sm:$0xff]  ;;  %v5097_v22 = vadd.f32 %v5096_v10, %v1995_v3  ;;  %v5007_v23 = vadd.f32 %v5006_v11, %v1906_v4  ;;  %v1870_v25 = vld [vmem:[%s16643_s14 + $0x33c0] sm:$0xff] }
 0x2cf   : > { %v2123_v24 = vld [vmem:[%s16643_s14 + $0x3ba8] sm:$0xff]  ;;  %v4879_v26 = vadd.f32 %v4878_v14, %v1780_v9  ;;  %v1997_v27 = vld [vmem:[%s16643_s14 + $0x37b8] sm:$0xff]  ;;  %v1908_v28 = vld [vmem:[%s16643_s14 + $0x34f0] sm:$0xff]  ;;  %v5226_v29 = vadd.f32 %v5225_v17, %v2122_v12 }
 0x2d0   : > { %v1656_v30 = vld [vmem:[%s16643_s14 + $0x2d10] sm:$0xff]  ;;  %v4751_v31 = vadd.f32 %v4750_v19, %v1654_v6  ;;  %v4969_v32 = vadd.f32 %v4968_v20, %v1869_v13  ;;  %v1782_v33 = vld [vmem:[%s16643_s14 + $0x3100] sm:$0xff]  ;;  %v5098_v34 = vadd.f32 %v5097_v22, %v1996_v15  ;;  %v5008_v35 = vadd.f32 %v5007_v23, %v1907_v16  ;;  %v1871_v37 = vld [vmem:[%s16643_s14 + $0x33c8] sm:$0xff] }
 0x2d1   : > { %v2124_v36 = vld [vmem:[%s16643_s14 + $0x3bb0] sm:$0xff]  ;;  %v4880_v38 = vadd.f32 %v4879_v26, %v1781_v21  ;;  %v1998_v39 = vld [vmem:[%s16643_s14 + $0x37c0] sm:$0xff]  ;;  %v1909_v40 = vld [vmem:[%s16643_s14 + $0x34f8] sm:$0xff]  ;;  %v5227_v41 = vadd.f32 %v5226_v29, %v2123_v24 }
 0x2d2   : > { %v1657_v42 = vld [vmem:[%s16643_s14 + $0x2d18] sm:$0xff]  ;;  %v4752_v43 = vadd.f32 %v4751_v31, %v1655_v18  ;;  %v4970_v44 = vadd.f32 %v4969_v32, %v1870_v25  ;;  %v1783_v45 = vld [vmem:[%s16643_s14 + $0x3108] sm:$0xff]  ;;  %v5099_v46 = vadd.f32 %v5098_v34, %v1997_v27  ;;  %v5009_v47 = vadd.f32 %v5008_v35, %v1908_v28  ;;  %v1872_v49 = vld [vmem:[%s16643_s14 + $0x33d0] sm:$0xff] }
 0x2d3   : > { %v2125_v48 = vld [vmem:[%s16643_s14 + $0x3bb8] sm:$0xff]  ;;  %v4881_v50 = vadd.f32 %v4880_v38, %v1782_v33  ;;  %v1999_v51 = vld [vmem:[%s16643_s14 + $0x37c8] sm:$0xff]  ;;  %v1910_v52 = vld [vmem:[%s16643_s14 + $0x3500] sm:$0xff]  ;;  %v5228_v53 = vadd.f32 %v5227_v41, %v2124_v36 }
 0x2d4   : > { %v4753_v54 = vadd.f32 %v4752_v43, %v1656_v30  ;;  %v4971_v55 = vadd.f32 %v4970_v44, %v1871_v37  ;;  %v1784_v56 = vld [vmem:[%s16643_s14 + $0x3110] sm:$0xff]  ;;  %v5100_v57 = vadd.f32 %v5099_v46, %v1998_v39  ;;  %v5010_v58 = vadd.f32 %v5009_v47, %v1909_v40  ;;  %v2126_v59 = vld [vmem:[%s16643_s14 + $0x3bc0] sm:$0xff]  ;;  %v1873_v60 = vld [vmem:[%s16643_s14 + $0x33d8] sm:$0xff] }
 0x2d5   : > { %v4882_v61 = vadd.f32 %v4881_v50, %v1783_v45  ;;  %v2000_v62 = vld [vmem:[%s16643_s14 + $0x37d0] sm:$0xff]  ;;  %v1911_v63 = vld [vmem:[%s16643_s14 + $0x3508] sm:$0xff]  ;;  %v5229_v0 = vadd.f32 %v5228_v53, %v2125_v48  ;;  %v1874_v2 = vld [vmem:[%s16643_s14 + $0x33e0] sm:$0xff] }
 0x2d6   : > { %v4754_v1 = vadd.f32 %v4753_v54, %v1657_v42  ;;  %v4972_v3 = vadd.f32 %v4971_v55, %v1872_v49  ;;  %v1785_v4 = vld [vmem:[%s16643_s14 + $0x3118] sm:$0xff]  ;;  %v5101_v5 = vadd.f32 %v5100_v57, %v1999_v51  ;;  %v5011_v6 = vadd.f32 %v5010_v58, %v1910_v52  ;;  %v2127_v7 = vld [vmem:[%s16643_s14 + $0x3bc8] sm:$0xff]  ;;  %v1912_v11 = vld [vmem:[%s16643_s14 + $0x3510] sm:$0xff] }
 0x2d7   : > { %v1875_v8 = vld [vmem:[%s16643_s14 + $0x33e8] sm:$0xff]  ;;  %v4883_v9 = vadd.f32 %v4882_v61, %v1784_v56  ;;  %v2001_v10 = vld [vmem:[%s16643_s14 + $0x37d8] sm:$0xff]  ;;  %v5230_v12 = vadd.f32 %v5229_v0, %v2126_v59  ;;  %v1786_v14 = vld [vmem:[%s16643_s14 + $0x3120] sm:$0xff] }
 0x2d8   : > { %4755 = vadd.xlane.f32.xlu0 %v4754_v1  ;;  %v4973_v13 = vadd.f32 %v4972_v3, %v1873_v60  ;;  %v2002_v15 = vld [vmem:[%s16643_s14 + $0x37e0] sm:$0xff]  ;;  %v5102_v16 = vadd.f32 %v5101_v5, %v2000_v62  ;;  %v5012_v17 = vadd.f32 %v5011_v6, %v1911_v63  ;;  %v2128_v18 = vld [vmem:[%s16643_s14 + $0x3bd0] sm:$0xff]  ;;  %v1913_v21 = vld [vmem:[%s16643_s14 + $0x3518] sm:$0xff] }
 0x2d9   : > { %v1876_v19 = vld [vmem:[%s16643_s14 + $0x33f0] sm:$0xff]  ;;  %v4884_v20 = vadd.f32 %v4883_v9, %v1785_v4  ;;  %v5231_v22 = vadd.f32 %v5230_v12, %v2127_v7  ;;  %v2038_v23 = vld [vmem:[%s16643_s14 + $0x3900] sm:$0xff]  ;;  %v2039_v24 = vld [vmem:[%s16643_s14 + $0x3908] sm:$0xff] }
 0x2da   : > { %v4974_v25 = vadd.f32 %v4973_v13, %v1874_v2  ;;  %v1787_v26 = vld [vmem:[%s16643_s14 + $0x3128] sm:$0xff]  ;;  %v5103_v27 = vadd.f32 %v5102_v16, %v2001_v10  ;;  %v5013_v28 = vadd.f32 %v5012_v17, %v1912_v11  ;;  %v2129_v29 = vld [vmem:[%s16643_s14 + $0x3bd8] sm:$0xff]  ;;  %v2040_v30 = vld [vmem:[%s16643_s14 + $0x3910] sm:$0xff]  ;;  %v5142_v31 = vadd.f32 %v2039_v24, %v2038_v23 }
 0x2db   : > { %v4885_v32 = vadd.f32 %v4884_v20, %v1786_v14  ;;  %v2003_v33 = vld [vmem:[%s16643_s14 + $0x37e8] sm:$0xff]  ;;  %v1914_v34 = vld [vmem:[%s16643_s14 + $0x3520] sm:$0xff]  ;;  %v5232_v35 = vadd.f32 %v5231_v22, %v2128_v18  ;;  %v2041_v36 = vld [vmem:[%s16643_s14 + $0x3918] sm:$0xff] }
 0x2dc   : > { %v1877_v37 = vld [vmem:[%s16643_s14 + $0x33f8] sm:$0xff]  ;;  %v4975_v38 = vadd.f32 %v4974_v25, %v1875_v8  ;;  %v1788_v39 = vld [vmem:[%s16643_s14 + $0x3130] sm:$0xff]  ;;  %v5104_v40 = vadd.f32 %v5103_v27, %v2002_v15  ;;  %v5014_v41 = vadd.f32 %v5013_v28, %v1913_v21  ;;  %v2130_v42 = vld [vmem:[%s16643_s14 + $0x3be0] sm:$0xff]  ;;  %v5143_v43 = vadd.f32 %v5142_v31, %v2040_v30 }
 0x2dd   : > { %v4886_v44 = vadd.f32 %v4885_v32, %v1787_v26  ;;  %v2004_v45 = vld [vmem:[%s16643_s14 + $0x37f0] sm:$0xff]  ;;  %v1915_v46 = vld [vmem:[%s16643_s14 + $0x3528] sm:$0xff]  ;;  %v5233_v47 = vadd.f32 %v5232_v35, %v2129_v29  ;;  %v2042_v48 = vld [vmem:[%s16643_s14 + $0x3920] sm:$0xff] }
 0x2de   : > { %v1878_v49 = vld [vmem:[%s16643_s14 + $0x3400] sm:$0xff]  ;;  %v4976_v50 = vadd.f32 %v4975_v38, %v1876_v19  ;;  %v1789_v51 = vld [vmem:[%s16643_s14 + $0x3138] sm:$0xff]  ;;  %v5105_v52 = vadd.f32 %v5104_v40, %v2003_v33  ;;  %v5015_v53 = vadd.f32 %v5014_v41, %v1914_v34  ;;  %v2131_v54 = vld [vmem:[%s16643_s14 + $0x3be8] sm:$0xff]  ;;  %v5144_v55 = vadd.f32 %v5143_v43, %v2041_v36 }
 0x2df   : > { %v4887_v56 = vadd.f32 %v4886_v44, %v1788_v39  ;;  %v2005_v57 = vld [vmem:[%s16643_s14 + $0x37f8] sm:$0xff]  ;;  %v1916_v58 = vld [vmem:[%s16643_s14 + $0x3530] sm:$0xff]  ;;  %v5234_v59 = vadd.f32 %v5233_v47, %v2130_v42  ;;  %v2043_v60 = vld [vmem:[%s16643_s14 + $0x3928] sm:$0xff] }
 0x2e0   : > { %v1879_v61 = vld [vmem:[%s16643_s14 + $0x3408] sm:$0xff]  ;;  %v4977_v62 = vadd.f32 %v4976_v50, %v1877_v37  ;;  %v1790_v63 = vld [vmem:[%s16643_s14 + $0x3140] sm:$0xff]  ;;  %v5106_v0 = vadd.f32 %v5105_v52, %v2004_v45  ;;  %v5016_v1 = vadd.f32 %v5015_v53, %v1915_v46  ;;  %v2132_v2 = vld [vmem:[%s16643_s14 + $0x3bf0] sm:$0xff]  ;;  %v5145_v3 = vadd.f32 %v5144_v55, %v2042_v48 }
 0x2e1   : > { %v4888_v4 = vadd.f32 %v4887_v56, %v1789_v51  ;;  %v2006_v5 = vld [vmem:[%s16643_s14 + $0x3800] sm:$0xff]  ;;  %v1917_v6 = vld [vmem:[%s16643_s14 + $0x3538] sm:$0xff]  ;;  %v5235_v7 = vadd.f32 %v5234_v59, %v2131_v54  ;;  %v2044_v8 = vld [vmem:[%s16643_s14 + $0x3930] sm:$0xff] }
 0x2e2   : > { %v1880_v9 = vld [vmem:[%s16643_s14 + $0x3410] sm:$0xff]  ;;  %v4978_v10 = vadd.f32 %v4977_v62, %v1878_v49  ;;  %v1791_v11 = vld [vmem:[%s16643_s14 + $0x3148] sm:$0xff]  ;;  %v5107_v12 = vadd.f32 %v5106_v0, %v2005_v57  ;;  %v5017_v13 = vadd.f32 %v5016_v1, %v1916_v58  ;;  %v2133_v14 = vld [vmem:[%s16643_s14 + $0x3bf8] sm:$0xff]  ;;  %v5146_v15 = vadd.f32 %v5145_v3, %v2043_v60 }
 0x2e3   : > { %v4889_v16 = vadd.f32 %v4888_v4, %v1790_v63  ;;  %v2007_v17 = vld [vmem:[%s16643_s14 + $0x3808] sm:$0xff]  ;;  %v1918_v18 = vld [vmem:[%s16643_s14 + $0x3540] sm:$0xff]  ;;  %v5236_v19 = vadd.f32 %v5235_v7, %v2132_v2  ;;  %v2045_v20 = vld [vmem:[%s16643_s14 + $0x3938] sm:$0xff] }
 0x2e4   : > { %v1881_v21 = vld [vmem:[%s16643_s14 + $0x3418] sm:$0xff]  ;;  %v4979_v22 = vadd.f32 %v4978_v10, %v1879_v61  ;;  %v1792_v23 = vld [vmem:[%s16643_s14 + $0x3150] sm:$0xff]  ;;  %v5108_v24 = vadd.f32 %v5107_v12, %v2006_v5  ;;  %v5018_v25 = vadd.f32 %v5017_v13, %v1917_v6  ;;  %v2134_v26 = vld [vmem:[%s16643_s14 + $0x3c00] sm:$0xff]  ;;  %v5147_v27 = vadd.f32 %v5146_v15, %v2044_v8 }
 0x2e5   : > { %v4890_v28 = vadd.f32 %v4889_v16, %v1791_v11  ;;  %v2008_v29 = vld [vmem:[%s16643_s14 + $0x3810] sm:$0xff]  ;;  %v1919_v30 = vld [vmem:[%s16643_s14 + $0x3548] sm:$0xff]  ;;  %v5237_v31 = vadd.f32 %v5236_v19, %v2133_v14  ;;  %v2046_v32 = vld [vmem:[%s16643_s14 + $0x3940] sm:$0xff] }
 0x2e6   : > { %v1882_v33 = vld [vmem:[%s16643_s14 + $0x3420] sm:$0xff]  ;;  %v4980_v34 = vadd.f32 %v4979_v22, %v1880_v9  ;;  %v1793_v35 = vld [vmem:[%s16643_s14 + $0x3158] sm:$0xff]  ;;  %v5109_v36 = vadd.f32 %v5108_v24, %v2007_v17  ;;  %v5019_v37 = vadd.f32 %v5018_v25, %v1918_v18  ;;  %v2135_v38 = vld [vmem:[%s16643_s14 + $0x3c08] sm:$0xff]  ;;  %v5148_v39 = vadd.f32 %v5147_v27, %v2045_v20 }
 0x2e7   : > { %v4891_v40 = vadd.f32 %v4890_v28, %v1792_v23  ;;  %v2009_v41 = vld [vmem:[%s16643_s14 + $0x3818] sm:$0xff]  ;;  %v1920_v42 = vld [vmem:[%s16643_s14 + $0x3550] sm:$0xff]  ;;  %v5238_v43 = vadd.f32 %v5237_v31, %v2134_v26  ;;  %v2047_v44 = vld [vmem:[%s16643_s14 + $0x3948] sm:$0xff] }
 0x2e8   : > { %v1883_v45 = vld [vmem:[%s16643_s14 + $0x3428] sm:$0xff]  ;;  %v4981_v46 = vadd.f32 %v4980_v34, %v1881_v21  ;;  %v1794_v47 = vld [vmem:[%s16643_s14 + $0x3160] sm:$0xff]  ;;  %v5110_v48 = vadd.f32 %v5109_v36, %v2008_v29  ;;  %v5020_v49 = vadd.f32 %v5019_v37, %v1919_v30  ;;  %v2136_v50 = vld [vmem:[%s16643_s14 + $0x3c10] sm:$0xff]  ;;  %v5149_v51 = vadd.f32 %v5148_v39, %v2046_v32 }
 0x2e9   : > { %v4892_v52 = vadd.f32 %v4891_v40, %v1793_v35  ;;  %v2010_v53 = vld [vmem:[%s16643_s14 + $0x3820] sm:$0xff]  ;;  %v1921_v54 = vld [vmem:[%s16643_s14 + $0x3558] sm:$0xff]  ;;  %v5239_v55 = vadd.f32 %v5238_v43, %v2135_v38  ;;  %v2048_v56 = vld [vmem:[%s16643_s14 + $0x3950] sm:$0xff] }
 0x2ea   : > { %v1884_v57 = vld [vmem:[%s16643_s14 + $0x3430] sm:$0xff]  ;;  %v4982_v58 = vadd.f32 %v4981_v46, %v1882_v33  ;;  %v1795_v59 = vld [vmem:[%s16643_s14 + $0x3168] sm:$0xff]  ;;  %v5111_v60 = vadd.f32 %v5110_v48, %v2009_v41  ;;  %v5021_v61 = vadd.f32 %v5020_v49, %v1920_v42  ;;  %v2137_v62 = vld [vmem:[%s16643_s14 + $0x3c18] sm:$0xff]  ;;  %v5150_v63 = vadd.f32 %v5149_v51, %v2047_v44 }
 0x2eb   : > { %v4893_v0 = vadd.f32 %v4892_v52, %v1794_v47  ;;  %v2011_v1 = vld [vmem:[%s16643_s14 + $0x3828] sm:$0xff]  ;;  %v1922_v2 = vld [vmem:[%s16643_s14 + $0x3560] sm:$0xff]  ;;  %v5240_v3 = vadd.f32 %v5239_v55, %v2136_v50  ;;  %v2049_v4 = vld [vmem:[%s16643_s14 + $0x3958] sm:$0xff] }
 0x2ec   : > { %v1885_v5 = vld [vmem:[%s16643_s14 + $0x3438] sm:$0xff]  ;;  %v4983_v6 = vadd.f32 %v4982_v58, %v1883_v45  ;;  %v1796_v7 = vld [vmem:[%s16643_s14 + $0x3170] sm:$0xff]  ;;  %v5112_v8 = vadd.f32 %v5111_v60, %v2010_v53  ;;  %v5022_v9 = vadd.f32 %v5021_v61, %v1921_v54  ;;  %v2138_v10 = vld [vmem:[%s16643_s14 + $0x3c20] sm:$0xff]  ;;  %v5151_v11 = vadd.f32 %v5150_v63, %v2048_v56 }
 0x2ed   : > { %v4894_v12 = vadd.f32 %v4893_v0, %v1795_v59  ;;  %v2012_v13 = vld [vmem:[%s16643_s14 + $0x3830] sm:$0xff]  ;;  %v1923_v14 = vld [vmem:[%s16643_s14 + $0x3568] sm:$0xff]  ;;  %v5241_v15 = vadd.f32 %v5240_v3, %v2137_v62  ;;  %v2050_v16 = vld [vmem:[%s16643_s14 + $0x3960] sm:$0xff] }
 0x2ee   : > { %v4984_v17 = vadd.f32 %v4983_v6, %v1884_v57  ;;  %v1797_v18 = vld [vmem:[%s16643_s14 + $0x3178] sm:$0xff]  ;;  %v1798_v19 = vld [vmem:[%s16643_s14 + $0x3180] sm:$0xff]  ;;  %v5113_v20 = vadd.f32 %v5112_v8, %v2011_v1  ;;  %v5023_v21 = vadd.f32 %v5022_v9, %v1922_v2  ;;  %v2139_v22 = vld [vmem:[%s16643_s14 + $0x3c28] sm:$0xff]  ;;  %v5152_v23 = vadd.f32 %v5151_v11, %v2049_v4 }
 0x2ef   : > { %v4895_v24 = vadd.f32 %v4894_v12, %v1796_v7  ;;  %v2013_v25 = vld [vmem:[%s16643_s14 + $0x3838] sm:$0xff]  ;;  %v1924_v26 = vld [vmem:[%s16643_s14 + $0x3570] sm:$0xff]  ;;  %v5242_v27 = vadd.f32 %v5241_v15, %v2138_v10  ;;  %v2051_v28 = vld [vmem:[%s16643_s14 + $0x3968] sm:$0xff] }
 0x2f0   : > { %v4985_v29 = vadd.f32 %v4984_v17, %v1885_v5  ;;  %v1799_v30 = vld [vmem:[%s16643_s14 + $0x3188] sm:$0xff]  ;;  %v2014_v31 = vld [vmem:[%s16643_s14 + $0x3840] sm:$0xff]  ;;  %v5114_v32 = vadd.f32 %v5113_v20, %v2012_v13  ;;  %v5024_v33 = vadd.f32 %v5023_v21, %v1923_v14  ;;  %v2140_v34 = vld [vmem:[%s16643_s14 + $0x3c30] sm:$0xff]  ;;  %v5153_v35 = vadd.f32 %v5152_v23, %v2050_v16 }
 0x2f1   : > { %v4896_v36 = vadd.f32 %v4895_v24, %v1797_v18  ;;  %v2015_v37 = vld [vmem:[%s16643_s14 + $0x3848] sm:$0xff]  ;;  %v1925_v38 = vld [vmem:[%s16643_s14 + $0x3578] sm:$0xff]  ;;  %v5243_v39 = vadd.f32 %v5242_v27, %v2139_v22  ;;  %v2052_v40 = vld [vmem:[%s16643_s14 + $0x3970] sm:$0xff] }
 0x2f2   : > { %4986 = vadd.xlane.f32.xlu1 %v4985_v29  ;;  %v5115_v41 = vadd.f32 %v5114_v32, %v2013_v25  ;;  %v1926_v42 = vld [vmem:[%s16643_s14 + $0x3580] sm:$0xff]  ;;  %v5025_v43 = vadd.f32 %v5024_v33, %v1924_v26  ;;  %v2141_v44 = vld [vmem:[%s16643_s14 + $0x3c38] sm:$0xff]  ;;  %v5154_v45 = vadd.f32 %v5153_v35, %v2051_v28  ;;  %v2267_v50 = vld [vmem:[%s16643_s14 + $0x4028] sm:$0xff] }
 0x2f3   : > { %v2266_v46 = vld [vmem:[%s16643_s14 + $0x4020] sm:$0xff]  ;;  %v4897_v47 = vadd.f32 %v4896_v36, %v1798_v19  ;;  %v5244_v48 = vadd.f32 %v5243_v39, %v2140_v34  ;;  %v2053_v49 = vld [vmem:[%s16643_s14 + $0x3978] sm:$0xff]  ;;  %v2268_v51 = vld [vmem:[%s16643_s14 + $0x4030] sm:$0xff] }
 0x2f4   : > { %v1800_v52 = vld [vmem:[%s16643_s14 + $0x3190] sm:$0xff]  ;;  %v5116_v54 = vadd.f32 %v5115_v41, %v2014_v31  ;;  %v5026_v55 = vadd.f32 %v5025_v43, %v1925_v38  ;;  %v2142_v56 = vld [vmem:[%s16643_s14 + $0x3c40] sm:$0xff]  ;;  %v5155_v57 = vadd.f32 %v5154_v45, %v2052_v40  ;;  %v5373_v58 = vadd.f32 %v2267_v50, %v2266_v46  ;;  %v1927_v60 = vld [vmem:[%s16643_s14 + $0x3588] sm:$0xff] }
 0x2f5   : > { %v2016_v53 = vld [vmem:[%s16643_s14 + $0x3850] sm:$0xff]  ;;  %v4898_v59 = vadd.f32 %v4897_v47, %v1799_v30  ;;  %v5245_v61 = vadd.f32 %v5244_v48, %v2141_v44  ;;  %v2054_v62 = vld [vmem:[%s16643_s14 + $0x3980] sm:$0xff]  ;;  %v2269_v63 = vld [vmem:[%s16643_s14 + $0x4038] sm:$0xff] }
 0x2f6   : > { %v1801_v0 = vld [vmem:[%s16643_s14 + $0x3198] sm:$0xff]  ;;  %v5117_v2 = vadd.f32 %v5116_v54, %v2015_v37  ;;  %v5027_v3 = vadd.f32 %v5026_v55, %v1926_v42  ;;  %v2143_v4 = vld [vmem:[%s16643_s14 + $0x3c48] sm:$0xff]  ;;  %v5156_v5 = vadd.f32 %v5155_v57, %v2053_v49  ;;  %v5374_v6 = vadd.f32 %v5373_v58, %v2268_v51  ;;  %v1928_v8 = vld [vmem:[%s16643_s14 + $0x3590] sm:$0xff] }
 0x2f7   : > { %v2017_v1 = vld [vmem:[%s16643_s14 + $0x3858] sm:$0xff]  ;;  %v4899_v7 = vadd.f32 %v4898_v59, %v1800_v52  ;;  %v5246_v9 = vadd.f32 %v5245_v61, %v2142_v56  ;;  %v2055_v10 = vld [vmem:[%s16643_s14 + $0x3988] sm:$0xff]  ;;  %v2270_v11 = vld [vmem:[%s16643_s14 + $0x4040] sm:$0xff] }
 0x2f8   : > { %v1802_v12 = vld [vmem:[%s16643_s14 + $0x31a0] sm:$0xff]  ;;  %v5118_v14 = vadd.f32 %v5117_v2, %v2016_v53  ;;  %v5028_v15 = vadd.f32 %v5027_v3, %v1927_v60  ;;  %v2144_v16 = vld [vmem:[%s16643_s14 + $0x3c50] sm:$0xff]  ;;  %v5157_v17 = vadd.f32 %v5156_v5, %v2054_v62  ;;  %v5375_v18 = vadd.f32 %v5374_v6, %v2269_v63  ;;  %v1929_v20 = vld [vmem:[%s16643_s14 + $0x3598] sm:$0xff] }
 0x2f9   : > { %v2018_v13 = vld [vmem:[%s16643_s14 + $0x3860] sm:$0xff]  ;;  %v4900_v19 = vadd.f32 %v4899_v7, %v1801_v0  ;;  %v5247_v21 = vadd.f32 %v5246_v9, %v2143_v4  ;;  %v2056_v22 = vld [vmem:[%s16643_s14 + $0x3990] sm:$0xff]  ;;  %v2271_v23 = vld [vmem:[%s16643_s14 + $0x4048] sm:$0xff] }
 0x2fa   : > { %v1803_v24 = vld [vmem:[%s16643_s14 + $0x31a8] sm:$0xff]  ;;  %v5119_v26 = vadd.f32 %v5118_v14, %v2017_v1  ;;  %v5029_v27 = vadd.f32 %v5028_v15, %v1928_v8  ;;  %v2145_v28 = vld [vmem:[%s16643_s14 + $0x3c58] sm:$0xff]  ;;  %v5158_v29 = vadd.f32 %v5157_v17, %v2055_v10  ;;  %v5376_v30 = vadd.f32 %v5375_v18, %v2270_v11  ;;  %v1930_v32 = vld [vmem:[%s16643_s14 + $0x35a0] sm:$0xff] }
 0x2fb   : > { %v2019_v25 = vld [vmem:[%s16643_s14 + $0x3868] sm:$0xff]  ;;  %v4901_v31 = vadd.f32 %v4900_v19, %v1802_v12  ;;  %v5248_v33 = vadd.f32 %v5247_v21, %v2144_v16  ;;  %v2057_v34 = vld [vmem:[%s16643_s14 + $0x3998] sm:$0xff]  ;;  %v2272_v35 = vld [vmem:[%s16643_s14 + $0x4050] sm:$0xff] }
 0x2fc   : > { %v1804_v36 = vld [vmem:[%s16643_s14 + $0x31b0] sm:$0xff]  ;;  %v5120_v38 = vadd.f32 %v5119_v26, %v2018_v13  ;;  %v5030_v39 = vadd.f32 %v5029_v27, %v1929_v20  ;;  %v2146_v40 = vld [vmem:[%s16643_s14 + $0x3c60] sm:$0xff]  ;;  %v5159_v41 = vadd.f32 %v5158_v29, %v2056_v22  ;;  %v5377_v42 = vadd.f32 %v5376_v30, %v2271_v23  ;;  %v1931_v44 = vld [vmem:[%s16643_s14 + $0x35a8] sm:$0xff] }
 0x2fd   : > { %v2020_v37 = vld [vmem:[%s16643_s14 + $0x3870] sm:$0xff]  ;;  %v4902_v43 = vadd.f32 %v4901_v31, %v1803_v24  ;;  %v5249_v45 = vadd.f32 %v5248_v33, %v2145_v28  ;;  %v2058_v46 = vld [vmem:[%s16643_s14 + $0x39a0] sm:$0xff]  ;;  %v2273_v47 = vld [vmem:[%s16643_s14 + $0x4058] sm:$0xff] }
 0x2fe   : > { %v1805_v48 = vld [vmem:[%s16643_s14 + $0x31b8] sm:$0xff]  ;;  %v5121_v50 = vadd.f32 %v5120_v38, %v2019_v25  ;;  %v5031_v51 = vadd.f32 %v5030_v39, %v1930_v32  ;;  %v2147_v52 = vld [vmem:[%s16643_s14 + $0x3c68] sm:$0xff]  ;;  %v5160_v53 = vadd.f32 %v5159_v41, %v2057_v34  ;;  %v5378_v54 = vadd.f32 %v5377_v42, %v2272_v35  ;;  %v1932_v56 = vld [vmem:[%s16643_s14 + $0x35b0] sm:$0xff] }
 0x2ff   : > { %v2021_v49 = vld [vmem:[%s16643_s14 + $0x3878] sm:$0xff]  ;;  %v4903_v55 = vadd.f32 %v4902_v43, %v1804_v36  ;;  %v5250_v57 = vadd.f32 %v5249_v45, %v2146_v40  ;;  %v2059_v58 = vld [vmem:[%s16643_s14 + $0x39a8] sm:$0xff]  ;;  %v2274_v59 = vld [vmem:[%s16643_s14 + $0x4060] sm:$0xff] }
 0x300   : > { %v1806_v60 = vld [vmem:[%s16643_s14 + $0x31c0] sm:$0xff]  ;;  %v5122_v62 = vadd.f32 %v5121_v50, %v2020_v37  ;;  %v5032_v63 = vadd.f32 %v5031_v51, %v1931_v44  ;;  %v2148_v0 = vld [vmem:[%s16643_s14 + $0x3c70] sm:$0xff]  ;;  %v5161_v1 = vadd.f32 %v5160_v53, %v2058_v46  ;;  %v5379_v2 = vadd.f32 %v5378_v54, %v2273_v47  ;;  %v1933_v4 = vld [vmem:[%s16643_s14 + $0x35b8] sm:$0xff] }
 0x301   : > { %v2022_v61 = vld [vmem:[%s16643_s14 + $0x3880] sm:$0xff]  ;;  %v4904_v3 = vadd.f32 %v4903_v55, %v1805_v48  ;;  %v5251_v5 = vadd.f32 %v5250_v57, %v2147_v52  ;;  %v2060_v6 = vld [vmem:[%s16643_s14 + $0x39b0] sm:$0xff]  ;;  %v2275_v7 = vld [vmem:[%s16643_s14 + $0x4068] sm:$0xff] }
 0x302   : > { %v1807_v8 = vld [vmem:[%s16643_s14 + $0x31c8] sm:$0xff]  ;;  %v5123_v10 = vadd.f32 %v5122_v62, %v2021_v49  ;;  %v5033_v11 = vadd.f32 %v5032_v63, %v1932_v56  ;;  %v2149_v12 = vld [vmem:[%s16643_s14 + $0x3c78] sm:$0xff]  ;;  %v5162_v13 = vadd.f32 %v5161_v1, %v2059_v58  ;;  %v5380_v14 = vadd.f32 %v5379_v2, %v2274_v59  ;;  %v1934_v16 = vld [vmem:[%s16643_s14 + $0x35c0] sm:$0xff] }
 0x303   : > { %v2023_v9 = vld [vmem:[%s16643_s14 + $0x3888] sm:$0xff]  ;;  %v4905_v15 = vadd.f32 %v4904_v3, %v1806_v60  ;;  %v5252_v17 = vadd.f32 %v5251_v5, %v2148_v0  ;;  %v2061_v18 = vld [vmem:[%s16643_s14 + $0x39b8] sm:$0xff]  ;;  %v2276_v19 = vld [vmem:[%s16643_s14 + $0x4070] sm:$0xff] }
 0x304   : > { %v1808_v20 = vld [vmem:[%s16643_s14 + $0x31d0] sm:$0xff]  ;;  %v5124_v22 = vadd.f32 %v5123_v10, %v2022_v61  ;;  %v5034_v23 = vadd.f32 %v5033_v11, %v1933_v4  ;;  %v2150_v24 = vld [vmem:[%s16643_s14 + $0x3c80] sm:$0xff]  ;;  %v5163_v25 = vadd.f32 %v5162_v13, %v2060_v6  ;;  %v5381_v26 = vadd.f32 %v5380_v14, %v2275_v7  ;;  %v1935_v28 = vld [vmem:[%s16643_s14 + $0x35c8] sm:$0xff] }
 0x305   : > { %v2024_v21 = vld [vmem:[%s16643_s14 + $0x3890] sm:$0xff]  ;;  %v4906_v27 = vadd.f32 %v4905_v15, %v1807_v8  ;;  %v5253_v29 = vadd.f32 %v5252_v17, %v2149_v12  ;;  %v2062_v30 = vld [vmem:[%s16643_s14 + $0x39c0] sm:$0xff]  ;;  %v2277_v31 = vld [vmem:[%s16643_s14 + $0x4078] sm:$0xff] }
 0x306   : > { %v1809_v32 = vld [vmem:[%s16643_s14 + $0x31d8] sm:$0xff]  ;;  %v5125_v34 = vadd.f32 %v5124_v22, %v2023_v9  ;;  %v5035_v35 = vadd.f32 %v5034_v23, %v1934_v16  ;;  %v2151_v36 = vld [vmem:[%s16643_s14 + $0x3c88] sm:$0xff]  ;;  %v5164_v37 = vadd.f32 %v5163_v25, %v2061_v18  ;;  %v5382_v38 = vadd.f32 %v5381_v26, %v2276_v19  ;;  %v1936_v40 = vld [vmem:[%s16643_s14 + $0x35d0] sm:$0xff] }
 0x307   : > { %v2025_v33 = vld [vmem:[%s16643_s14 + $0x3898] sm:$0xff]  ;;  %v4907_v39 = vadd.f32 %v4906_v27, %v1808_v20  ;;  %v5254_v41 = vadd.f32 %v5253_v29, %v2150_v24  ;;  %v2063_v42 = vld [vmem:[%s16643_s14 + $0x39c8] sm:$0xff]  ;;  %v2278_v43 = vld [vmem:[%s16643_s14 + $0x4080] sm:$0xff] }
 0x308   : > { %v2026_v44 = vld [vmem:[%s16643_s14 + $0x38a0] sm:$0xff]  ;;  %v5126_v45 = vadd.f32 %v5125_v34, %v2024_v21  ;;  %v5036_v46 = vadd.f32 %v5035_v35, %v1935_v28  ;;  %v2152_v47 = vld [vmem:[%s16643_s14 + $0x3c90] sm:$0xff]  ;;  %v5165_v48 = vadd.f32 %v5164_v37, %v2062_v30  ;;  %v5383_v49 = vadd.f32 %v5382_v38, %v2277_v31  ;;  %v1937_v51 = vld [vmem:[%s16643_s14 + $0x35d8] sm:$0xff] }
 0x309   : > { %v4908_v50 = vadd.f32 %v4907_v39, %v1809_v32  ;;  %v5255_v52 = vadd.f32 %v5254_v41, %v2151_v36  ;;  %v2064_v53 = vld [vmem:[%s16643_s14 + $0x39d0] sm:$0xff]  ;;  %v2279_v54 = vld [vmem:[%s16643_s14 + $0x4088] sm:$0xff]  ;;  %v1938_v57 = vld [vmem:[%s16643_s14 + $0x35e0] sm:$0xff] }
 0x30a   : > { %v2027_v55 = vld [vmem:[%s16643_s14 + $0x38a8] sm:$0xff]  ;;  %v5127_v56 = vadd.f32 %v5126_v45, %v2025_v33  ;;  %v5037_v58 = vadd.f32 %v5036_v46, %v1936_v40  ;;  %v2153_v59 = vld [vmem:[%s16643_s14 + $0x3c98] sm:$0xff]  ;;  %v5166_v60 = vadd.f32 %v5165_v48, %v2063_v42  ;;  %v5384_v61 = vadd.f32 %v5383_v49, %v2278_v43  ;;  %v2028_v62 = vld [vmem:[%s16643_s14 + $0x38b0] sm:$0xff] }
 0x30b   : > { %4909 = vadd.xlane.f32.xlu0 %v4908_v50  ;;  %v2154_v63 = vld [vmem:[%s16643_s14 + $0x3ca0] sm:$0xff]  ;;  %v5256_v0 = vadd.f32 %v5255_v52, %v2152_v47  ;;  %v2065_v1 = vld [vmem:[%s16643_s14 + $0x39d8] sm:$0xff]  ;;  %v2280_v2 = vld [vmem:[%s16643_s14 + $0x4090] sm:$0xff] }
 0x30c   : > { %v5128_v3 = vadd.f32 %v5127_v56, %v2026_v44  ;;  %v5038_v4 = vadd.f32 %v5037_v58, %v1937_v51  ;;  %v5167_v5 = vadd.f32 %v5166_v60, %v2064_v53  ;;  %v5385_v6 = vadd.f32 %v5384_v61, %v2279_v54  ;;  %v2190_v7 = vld [vmem:[%s16643_s14 + $0x3dc0] sm:$0xff]  ;;  %v2191_v8 = vld [vmem:[%s16643_s14 + $0x3dc8] sm:$0xff]  ;;  %v2192_v9 = vld [vmem:[%s16643_s14 + $0x3dd0] sm:$0xff] }
 0x30d   : > { %v1939_v10 = vld [vmem:[%s16643_s14 + $0x35e8] sm:$0xff]  ;;  %v5257_v11 = vadd.f32 %v5256_v0, %v2153_v59  ;;  %v2066_v12 = vld [vmem:[%s16643_s14 + $0x39e0] sm:$0xff]  ;;  %v2281_v13 = vld [vmem:[%s16643_s14 + $0x4098] sm:$0xff]  ;;  %v5296_v14 = vadd.f32 %v2191_v8, %v2190_v7 }
 0x30e   : > { %v2029_v15 = vld [vmem:[%s16643_s14 + $0x38b8] sm:$0xff]  ;;  %v5129_v16 = vadd.f32 %v5128_v3, %v2027_v55  ;;  %v5039_v17 = vadd.f32 %v5038_v4, %v1938_v57  ;;  %v2155_v18 = vld [vmem:[%s16643_s14 + $0x3ca8] sm:$0xff]  ;;  %v5168_v19 = vadd.f32 %v5167_v5, %v2065_v1  ;;  %v5386_v20 = vadd.f32 %v5385_v6, %v2280_v2  ;;  %v1940_v22 = vld [vmem:[%s16643_s14 + $0x35f0] sm:$0xff] }
 0x30f   : > { %v2193_v21 = vld [vmem:[%s16643_s14 + $0x3dd8] sm:$0xff]  ;;  %v5258_v23 = vadd.f32 %v5257_v11, %v2154_v63  ;;  %v2067_v24 = vld [vmem:[%s16643_s14 + $0x39e8] sm:$0xff]  ;;  %v2282_v25 = vld [vmem:[%s16643_s14 + $0x40a0] sm:$0xff]  ;;  %v5297_v26 = vadd.f32 %v5296_v14, %v2192_v9 }
 0x310   : > { %v2030_v27 = vld [vmem:[%s16643_s14 + $0x38c0] sm:$0xff]  ;;  %v5130_v28 = vadd.f32 %v5129_v16, %v2028_v62  ;;  %v5040_v29 = vadd.f32 %v5039_v17, %v1939_v10  ;;  %v2156_v30 = vld [vmem:[%s16643_s14 + $0x3cb0] sm:$0xff]  ;;  %v5169_v31 = vadd.f32 %v5168_v19, %v2066_v12  ;;  %v5387_v32 = vadd.f32 %v5386_v20, %v2281_v13  ;;  %v1941_v34 = vld [vmem:[%s16643_s14 + $0x35f8] sm:$0xff] }
 0x311   : > { %v2194_v33 = vld [vmem:[%s16643_s14 + $0x3de0] sm:$0xff]  ;;  %v5259_v35 = vadd.f32 %v5258_v23, %v2155_v18  ;;  %v2068_v36 = vld [vmem:[%s16643_s14 + $0x39f0] sm:$0xff]  ;;  %v2283_v37 = vld [vmem:[%s16643_s14 + $0x40a8] sm:$0xff]  ;;  %v5298_v38 = vadd.f32 %v5297_v26, %v2193_v21 }
 0x312   : > { %v2031_v39 = vld [vmem:[%s16643_s14 + $0x38c8] sm:$0xff]  ;;  %v5131_v40 = vadd.f32 %v5130_v28, %v2029_v15  ;;  %v5041_v41 = vadd.f32 %v5040_v29, %v1940_v22  ;;  %v2157_v42 = vld [vmem:[%s16643_s14 + $0x3cb8] sm:$0xff]  ;;  %v5170_v43 = vadd.f32 %v5169_v31, %v2067_v24  ;;  %v5388_v44 = vadd.f32 %v5387_v32, %v2282_v25  ;;  %v1942_v46 = vld [vmem:[%s16643_s14 + $0x3600] sm:$0xff] }
 0x313   : > { %v2195_v45 = vld [vmem:[%s16643_s14 + $0x3de8] sm:$0xff]  ;;  %v5260_v47 = vadd.f32 %v5259_v35, %v2156_v30  ;;  %v2069_v48 = vld [vmem:[%s16643_s14 + $0x39f8] sm:$0xff]  ;;  %v2284_v49 = vld [vmem:[%s16643_s14 + $0x40b0] sm:$0xff]  ;;  %v5299_v50 = vadd.f32 %v5298_v38, %v2194_v33 }
 0x314   : > { %v2032_v51 = vld [vmem:[%s16643_s14 + $0x38d0] sm:$0xff]  ;;  %v5132_v52 = vadd.f32 %v5131_v40, %v2030_v27  ;;  %v5042_v53 = vadd.f32 %v5041_v41, %v1941_v34  ;;  %v2158_v54 = vld [vmem:[%s16643_s14 + $0x3cc0] sm:$0xff]  ;;  %v5171_v55 = vadd.f32 %v5170_v43, %v2068_v36  ;;  %v5389_v56 = vadd.f32 %v5388_v44, %v2283_v37  ;;  %v1943_v58 = vld [vmem:[%s16643_s14 + $0x3608] sm:$0xff] }
 0x315   : > { %v2196_v57 = vld [vmem:[%s16643_s14 + $0x3df0] sm:$0xff]  ;;  %v5261_v59 = vadd.f32 %v5260_v47, %v2157_v42  ;;  %v2070_v60 = vld [vmem:[%s16643_s14 + $0x3a00] sm:$0xff]  ;;  %v2285_v61 = vld [vmem:[%s16643_s14 + $0x40b8] sm:$0xff]  ;;  %v5300_v62 = vadd.f32 %v5299_v50, %v2195_v45 }
 0x316   : > { %v2033_v63 = vld [vmem:[%s16643_s14 + $0x38d8] sm:$0xff]  ;;  %v5133_v0 = vadd.f32 %v5132_v52, %v2031_v39  ;;  %v5043_v1 = vadd.f32 %v5042_v53, %v1942_v46  ;;  %v2159_v2 = vld [vmem:[%s16643_s14 + $0x3cc8] sm:$0xff]  ;;  %v5172_v3 = vadd.f32 %v5171_v55, %v2069_v48  ;;  %v5390_v4 = vadd.f32 %v5389_v56, %v2284_v49  ;;  %v1944_v6 = vld [vmem:[%s16643_s14 + $0x3610] sm:$0xff] }
 0x317   : > { %v2197_v5 = vld [vmem:[%s16643_s14 + $0x3df8] sm:$0xff]  ;;  %v5262_v7 = vadd.f32 %v5261_v59, %v2158_v54  ;;  %v2071_v8 = vld [vmem:[%s16643_s14 + $0x3a08] sm:$0xff]  ;;  %v2286_v9 = vld [vmem:[%s16643_s14 + $0x40c0] sm:$0xff]  ;;  %v5301_v10 = vadd.f32 %v5300_v62, %v2196_v57 }
 0x318   : > { %v2034_v11 = vld [vmem:[%s16643_s14 + $0x38e0] sm:$0xff]  ;;  %v5134_v12 = vadd.f32 %v5133_v0, %v2032_v51  ;;  %v5044_v13 = vadd.f32 %v5043_v1, %v1943_v58  ;;  %v2160_v14 = vld [vmem:[%s16643_s14 + $0x3cd0] sm:$0xff]  ;;  %v5173_v15 = vadd.f32 %v5172_v3, %v2070_v60  ;;  %v5391_v16 = vadd.f32 %v5390_v4, %v2285_v61  ;;  %v1945_v18 = vld [vmem:[%s16643_s14 + $0x3618] sm:$0xff] }
 0x319   : > { %v2198_v17 = vld [vmem:[%s16643_s14 + $0x3e00] sm:$0xff]  ;;  %v5263_v19 = vadd.f32 %v5262_v7, %v2159_v2  ;;  %v2072_v20 = vld [vmem:[%s16643_s14 + $0x3a10] sm:$0xff]  ;;  %v2287_v21 = vld [vmem:[%s16643_s14 + $0x40c8] sm:$0xff]  ;;  %v5302_v22 = vadd.f32 %v5301_v10, %v2197_v5 }
 0x31a   : > { %v2035_v23 = vld [vmem:[%s16643_s14 + $0x38e8] sm:$0xff]  ;;  %v5135_v24 = vadd.f32 %v5134_v12, %v2033_v63  ;;  %v5045_v25 = vadd.f32 %v5044_v13, %v1944_v6  ;;  %v2161_v26 = vld [vmem:[%s16643_s14 + $0x3cd8] sm:$0xff]  ;;  %v5174_v27 = vadd.f32 %v5173_v15, %v2071_v8  ;;  %v5392_v28 = vadd.f32 %v5391_v16, %v2286_v9  ;;  %v1946_v30 = vld [vmem:[%s16643_s14 + $0x3620] sm:$0xff] }
 0x31b   : > { %v2199_v29 = vld [vmem:[%s16643_s14 + $0x3e08] sm:$0xff]  ;;  %v5264_v31 = vadd.f32 %v5263_v19, %v2160_v14  ;;  %v2073_v32 = vld [vmem:[%s16643_s14 + $0x3a18] sm:$0xff]  ;;  %v2288_v33 = vld [vmem:[%s16643_s14 + $0x40d0] sm:$0xff]  ;;  %v5303_v34 = vadd.f32 %v5302_v22, %v2198_v17 }
 0x31c   : > { %v2036_v35 = vld [vmem:[%s16643_s14 + $0x38f0] sm:$0xff]  ;;  %v5136_v36 = vadd.f32 %v5135_v24, %v2034_v11  ;;  %v5046_v37 = vadd.f32 %v5045_v25, %v1945_v18  ;;  %v2162_v38 = vld [vmem:[%s16643_s14 + $0x3ce0] sm:$0xff]  ;;  %v5175_v39 = vadd.f32 %v5174_v27, %v2072_v20  ;;  %v5393_v40 = vadd.f32 %v5392_v28, %v2287_v21  ;;  %v1947_v42 = vld [vmem:[%s16643_s14 + $0x3628] sm:$0xff] }
 0x31d   : > { %v2200_v41 = vld [vmem:[%s16643_s14 + $0x3e10] sm:$0xff]  ;;  %v5265_v43 = vadd.f32 %v5264_v31, %v2161_v26  ;;  %v2074_v44 = vld [vmem:[%s16643_s14 + $0x3a20] sm:$0xff]  ;;  %v2289_v45 = vld [vmem:[%s16643_s14 + $0x40d8] sm:$0xff]  ;;  %v5304_v46 = vadd.f32 %v5303_v34, %v2199_v29 }
 0x31e   : > { %v2037_v47 = vld [vmem:[%s16643_s14 + $0x38f8] sm:$0xff]  ;;  %v5137_v48 = vadd.f32 %v5136_v36, %v2035_v23  ;;  %v5047_v49 = vadd.f32 %v5046_v37, %v1946_v30  ;;  %v2163_v50 = vld [vmem:[%s16643_s14 + $0x3ce8] sm:$0xff]  ;;  %v5176_v51 = vadd.f32 %v5175_v39, %v2073_v32  ;;  %v5394_v52 = vadd.f32 %v5393_v40, %v2288_v33  ;;  %v1948_v54 = vld [vmem:[%s16643_s14 + $0x3630] sm:$0xff] }
 0x31f   : > { %v2201_v53 = vld [vmem:[%s16643_s14 + $0x3e18] sm:$0xff]  ;;  %v5266_v55 = vadd.f32 %v5265_v43, %v2162_v38  ;;  %v2075_v56 = vld [vmem:[%s16643_s14 + $0x3a28] sm:$0xff]  ;;  %v2290_v57 = vld [vmem:[%s16643_s14 + $0x40e0] sm:$0xff]  ;;  %v5305_v58 = vadd.f32 %v5304_v46, %v2200_v41 }
 0x320   : > { %v5138_v59 = vadd.f32 %v5137_v48, %v2036_v35  ;;  %v5048_v60 = vadd.f32 %v5047_v49, %v1947_v42  ;;  %v2164_v61 = vld [vmem:[%s16643_s14 + $0x3cf0] sm:$0xff]  ;;  %v5177_v62 = vadd.f32 %v5176_v51, %v2074_v44  ;;  %v5395_v63 = vadd.f32 %v5394_v52, %v2289_v45  ;;  %v2202_v0 = vld [vmem:[%s16643_s14 + $0x3e20] sm:$0xff]  ;;  %v1949_v1 = vld [vmem:[%s16643_s14 + $0x3638] sm:$0xff] }
 0x321   : > { %v5267_v2 = vadd.f32 %v5266_v55, %v2163_v50  ;;  %v2076_v3 = vld [vmem:[%s16643_s14 + $0x3a30] sm:$0xff]  ;;  %v2291_v4 = vld [vmem:[%s16643_s14 + $0x40e8] sm:$0xff]  ;;  %v5306_v5 = vadd.f32 %v5305_v58, %v2201_v53  ;;  %v1950_v7 = vld [vmem:[%s16643_s14 + $0x3640] sm:$0xff] }
 0x322   : > { %v5139_v6 = vadd.f32 %v5138_v59, %v2037_v47  ;;  %v5049_v8 = vadd.f32 %v5048_v60, %v1948_v54  ;;  %v2165_v9 = vld [vmem:[%s16643_s14 + $0x3cf8] sm:$0xff]  ;;  %v5178_v10 = vadd.f32 %v5177_v62, %v2075_v56  ;;  %v5396_v11 = vadd.f32 %v5395_v63, %v2290_v57  ;;  %v2203_v12 = vld [vmem:[%s16643_s14 + $0x3e28] sm:$0xff]  ;;  %v2292_v16 = vld [vmem:[%s16643_s14 + $0x40f0] sm:$0xff] }
 0x323   : > { %v1951_v13 = vld [vmem:[%s16643_s14 + $0x3648] sm:$0xff]  ;;  %v5268_v14 = vadd.f32 %v5267_v2, %v2164_v61  ;;  %v2077_v15 = vld [vmem:[%s16643_s14 + $0x3a38] sm:$0xff]  ;;  %v5307_v17 = vadd.f32 %v5306_v5, %v2202_v0  ;;  %v2166_v19 = vld [vmem:[%s16643_s14 + $0x3d00] sm:$0xff] }
 0x324   : > { %5140 = vadd.xlane.f32.xlu1 %v5139_v6  ;;  %v5050_v18 = vadd.f32 %v5049_v8, %v1949_v1  ;;  %v2078_v20 = vld [vmem:[%s16643_s14 + $0x3a40] sm:$0xff]  ;;  %v5179_v21 = vadd.f32 %v5178_v10, %v2076_v3  ;;  %v5397_v22 = vadd.f32 %v5396_v11, %v2291_v4  ;;  %v2204_v23 = vld [vmem:[%s16643_s14 + $0x3e30] sm:$0xff]  ;;  %v2293_v26 = vld [vmem:[%s16643_s14 + $0x40f8] sm:$0xff] }
 0x325   : > { %v1952_v24 = vld [vmem:[%s16643_s14 + $0x3650] sm:$0xff]  ;;  %v5269_v25 = vadd.f32 %v5268_v14, %v2165_v9  ;;  %v5308_v27 = vadd.f32 %v5307_v17, %v2203_v12  ;;  %v2418_v28 = vld [vmem:[%s16643_s14 + $0x44e0] sm:$0xff]  ;;  %v2419_v29 = vld [vmem:[%s16643_s14 + $0x44e8] sm:$0xff] }
 0x326   : > { %v5051_v30 = vadd.f32 %v5050_v18, %v1950_v7  ;;  %v2167_v31 = vld [vmem:[%s16643_s14 + $0x3d08] sm:$0xff]  ;;  %v5180_v32 = vadd.f32 %v5179_v21, %v2077_v15  ;;  %v5398_v33 = vadd.f32 %v5397_v22, %v2292_v16  ;;  %v2205_v34 = vld [vmem:[%s16643_s14 + $0x3e38] sm:$0xff]  ;;  %v2420_v35 = vld [vmem:[%s16643_s14 + $0x44f0] sm:$0xff]  ;;  %v5527_v36 = vadd.f32 %v2419_v29, %v2418_v28 }
 0x327   : > { %v5270_v37 = vadd.f32 %v5269_v25, %v2166_v19  ;;  %v2079_v38 = vld [vmem:[%s16643_s14 + $0x3a48] sm:$0xff]  ;;  %v2294_v39 = vld [vmem:[%s16643_s14 + $0x4100] sm:$0xff]  ;;  %v5309_v40 = vadd.f32 %v5308_v27, %v2204_v23  ;;  %v2421_v41 = vld [vmem:[%s16643_s14 + $0x44f8] sm:$0xff] }
 0x328   : > { %v1953_v42 = vld [vmem:[%s16643_s14 + $0x3658] sm:$0xff]  ;;  %v5052_v43 = vadd.f32 %v5051_v30, %v1951_v13  ;;  %v2168_v44 = vld [vmem:[%s16643_s14 + $0x3d10] sm:$0xff]  ;;  %v5181_v45 = vadd.f32 %v5180_v32, %v2078_v20  ;;  %v5399_v46 = vadd.f32 %v5398_v33, %v2293_v26  ;;  %v2206_v47 = vld [vmem:[%s16643_s14 + $0x3e40] sm:$0xff]  ;;  %v5528_v48 = vadd.f32 %v5527_v36, %v2420_v35 }
 0x329   : > { %v5271_v49 = vadd.f32 %v5270_v37, %v2167_v31  ;;  %v2080_v50 = vld [vmem:[%s16643_s14 + $0x3a50] sm:$0xff]  ;;  %v2295_v51 = vld [vmem:[%s16643_s14 + $0x4108] sm:$0xff]  ;;  %v5310_v52 = vadd.f32 %v5309_v40, %v2205_v34  ;;  %v2422_v53 = vld [vmem:[%s16643_s14 + $0x4500] sm:$0xff] }
 0x32a   : > { %v1954_v54 = vld [vmem:[%s16643_s14 + $0x3660] sm:$0xff]  ;;  %v5053_v55 = vadd.f32 %v5052_v43, %v1952_v24  ;;  %v2169_v56 = vld [vmem:[%s16643_s14 + $0x3d18] sm:$0xff]  ;;  %v5182_v57 = vadd.f32 %v5181_v45, %v2079_v38  ;;  %v5400_v58 = vadd.f32 %v5399_v46, %v2294_v39  ;;  %v2207_v59 = vld [vmem:[%s16643_s14 + $0x3e48] sm:$0xff]  ;;  %v5529_v60 = vadd.f32 %v5528_v48, %v2421_v41 }
 0x32b   : > { %v5272_v61 = vadd.f32 %v5271_v49, %v2168_v44  ;;  %v2081_v62 = vld [vmem:[%s16643_s14 + $0x3a58] sm:$0xff]  ;;  %v2296_v63 = vld [vmem:[%s16643_s14 + $0x4110] sm:$0xff]  ;;  %v5311_v0 = vadd.f32 %v5310_v52, %v2206_v47  ;;  %v2423_v1 = vld [vmem:[%s16643_s14 + $0x4508] sm:$0xff] }
 0x32c   : > { %v1955_v2 = vld [vmem:[%s16643_s14 + $0x3668] sm:$0xff]  ;;  %v5054_v3 = vadd.f32 %v5053_v55, %v1953_v42  ;;  %v2170_v4 = vld [vmem:[%s16643_s14 + $0x3d20] sm:$0xff]  ;;  %v5183_v5 = vadd.f32 %v5182_v57, %v2080_v50  ;;  %v5401_v6 = vadd.f32 %v5400_v58, %v2295_v51  ;;  %v2208_v7 = vld [vmem:[%s16643_s14 + $0x3e50] sm:$0xff]  ;;  %v5530_v8 = vadd.f32 %v5529_v60, %v2422_v53 }
 0x32d   : > { %v5273_v9 = vadd.f32 %v5272_v61, %v2169_v56  ;;  %v2082_v10 = vld [vmem:[%s16643_s14 + $0x3a60] sm:$0xff]  ;;  %v2297_v11 = vld [vmem:[%s16643_s14 + $0x4118] sm:$0xff]  ;;  %v5312_v12 = vadd.f32 %v5311_v0, %v2207_v59  ;;  %v2424_v13 = vld [vmem:[%s16643_s14 + $0x4510] sm:$0xff] }
 0x32e   : > { %v1956_v14 = vld [vmem:[%s16643_s14 + $0x3670] sm:$0xff]  ;;  %v5055_v15 = vadd.f32 %v5054_v3, %v1954_v54  ;;  %v2171_v16 = vld [vmem:[%s16643_s14 + $0x3d28] sm:$0xff]  ;;  %v5184_v17 = vadd.f32 %v5183_v5, %v2081_v62  ;;  %v5402_v18 = vadd.f32 %v5401_v6, %v2296_v63  ;;  %v2209_v19 = vld [vmem:[%s16643_s14 + $0x3e58] sm:$0xff]  ;;  %v5531_v20 = vadd.f32 %v5530_v8, %v2423_v1 }
 0x32f   : > { %v5274_v21 = vadd.f32 %v5273_v9, %v2170_v4  ;;  %v2083_v22 = vld [vmem:[%s16643_s14 + $0x3a68] sm:$0xff]  ;;  %v2298_v23 = vld [vmem:[%s16643_s14 + $0x4120] sm:$0xff]  ;;  %v5313_v24 = vadd.f32 %v5312_v12, %v2208_v7  ;;  %v2425_v25 = vld [vmem:[%s16643_s14 + $0x4518] sm:$0xff] }
 0x330   : > { %v1957_v26 = vld [vmem:[%s16643_s14 + $0x3678] sm:$0xff]  ;;  %v5056_v27 = vadd.f32 %v5055_v15, %v1955_v2  ;;  %v2172_v28 = vld [vmem:[%s16643_s14 + $0x3d30] sm:$0xff]  ;;  %v5185_v29 = vadd.f32 %v5184_v17, %v2082_v10  ;;  %v5403_v30 = vadd.f32 %v5402_v18, %v2297_v11  ;;  %v2210_v31 = vld [vmem:[%s16643_s14 + $0x3e60] sm:$0xff]  ;;  %v5532_v32 = vadd.f32 %v5531_v20, %v2424_v13 }
 0x331   : > { %v5275_v33 = vadd.f32 %v5274_v21, %v2171_v16  ;;  %v2084_v34 = vld [vmem:[%s16643_s14 + $0x3a70] sm:$0xff]  ;;  %v2299_v35 = vld [vmem:[%s16643_s14 + $0x4128] sm:$0xff]  ;;  %v5314_v36 = vadd.f32 %v5313_v24, %v2209_v19  ;;  %v2426_v37 = vld [vmem:[%s16643_s14 + $0x4520] sm:$0xff] }
 0x332   : > { %v1958_v38 = vld [vmem:[%s16643_s14 + $0x3680] sm:$0xff]  ;;  %v5057_v39 = vadd.f32 %v5056_v27, %v1956_v14  ;;  %v2173_v40 = vld [vmem:[%s16643_s14 + $0x3d38] sm:$0xff]  ;;  %v5186_v41 = vadd.f32 %v5185_v29, %v2083_v22  ;;  %v5404_v42 = vadd.f32 %v5403_v30, %v2298_v23  ;;  %v2211_v43 = vld [vmem:[%s16643_s14 + $0x3e68] sm:$0xff]  ;;  %v5533_v44 = vadd.f32 %v5532_v32, %v2425_v25 }
 0x333   : > { %v5276_v45 = vadd.f32 %v5275_v33, %v2172_v28  ;;  %v2085_v46 = vld [vmem:[%s16643_s14 + $0x3a78] sm:$0xff]  ;;  %v2300_v47 = vld [vmem:[%s16643_s14 + $0x4130] sm:$0xff]  ;;  %v5315_v48 = vadd.f32 %v5314_v36, %v2210_v31  ;;  %v2427_v49 = vld [vmem:[%s16643_s14 + $0x4528] sm:$0xff] }
 0x334   : > { %v1959_v50 = vld [vmem:[%s16643_s14 + $0x3688] sm:$0xff]  ;;  %v5058_v51 = vadd.f32 %v5057_v39, %v1957_v26  ;;  %v2174_v52 = vld [vmem:[%s16643_s14 + $0x3d40] sm:$0xff]  ;;  %v5187_v53 = vadd.f32 %v5186_v41, %v2084_v34  ;;  %v5405_v54 = vadd.f32 %v5404_v42, %v2299_v35  ;;  %v2212_v55 = vld [vmem:[%s16643_s14 + $0x3e70] sm:$0xff]  ;;  %v5534_v56 = vadd.f32 %v5533_v44, %v2426_v37 }
 0x335   : > { %v5277_v57 = vadd.f32 %v5276_v45, %v2173_v40  ;;  %v2086_v58 = vld [vmem:[%s16643_s14 + $0x3a80] sm:$0xff]  ;;  %v2301_v59 = vld [vmem:[%s16643_s14 + $0x4138] sm:$0xff]  ;;  %v5316_v60 = vadd.f32 %v5315_v48, %v2211_v43  ;;  %v2428_v61 = vld [vmem:[%s16643_s14 + $0x4530] sm:$0xff] }
 0x336   : > { %v1960_v62 = vld [vmem:[%s16643_s14 + $0x3690] sm:$0xff]  ;;  %v5059_v63 = vadd.f32 %v5058_v51, %v1958_v38  ;;  %v2175_v0 = vld [vmem:[%s16643_s14 + $0x3d48] sm:$0xff]  ;;  %v5188_v1 = vadd.f32 %v5187_v53, %v2085_v46  ;;  %v5406_v2 = vadd.f32 %v5405_v54, %v2300_v47  ;;  %v2213_v3 = vld [vmem:[%s16643_s14 + $0x3e78] sm:$0xff]  ;;  %v5535_v4 = vadd.f32 %v5534_v56, %v2427_v49 }
 0x337   : > { %v5278_v5 = vadd.f32 %v5277_v57, %v2174_v52  ;;  %v2087_v6 = vld [vmem:[%s16643_s14 + $0x3a88] sm:$0xff]  ;;  %v2302_v7 = vld [vmem:[%s16643_s14 + $0x4140] sm:$0xff]  ;;  %v5317_v8 = vadd.f32 %v5316_v60, %v2212_v55  ;;  %v2429_v9 = vld [vmem:[%s16643_s14 + $0x4538] sm:$0xff] }
 0x338   : > { %v1961_v10 = vld [vmem:[%s16643_s14 + $0x3698] sm:$0xff]  ;;  %v5060_v11 = vadd.f32 %v5059_v63, %v1959_v50  ;;  %v2176_v12 = vld [vmem:[%s16643_s14 + $0x3d50] sm:$0xff]  ;;  %v5189_v13 = vadd.f32 %v5188_v1, %v2086_v58  ;;  %v5407_v14 = vadd.f32 %v5406_v2, %v2301_v59  ;;  %v2214_v15 = vld [vmem:[%s16643_s14 + $0x3e80] sm:$0xff]  ;;  %v5536_v16 = vadd.f32 %v5535_v4, %v2428_v61 }
 0x339   : > { %v5279_v17 = vadd.f32 %v5278_v5, %v2175_v0  ;;  %v2088_v18 = vld [vmem:[%s16643_s14 + $0x3a90] sm:$0xff]  ;;  %v2303_v19 = vld [vmem:[%s16643_s14 + $0x4148] sm:$0xff]  ;;  %v5318_v20 = vadd.f32 %v5317_v8, %v2213_v3  ;;  %v2430_v21 = vld [vmem:[%s16643_s14 + $0x4540] sm:$0xff] }
 0x33a   : > { %v5061_v22 = vadd.f32 %v5060_v11, %v1960_v62  ;;  %v2177_v23 = vld [vmem:[%s16643_s14 + $0x3d58] sm:$0xff]  ;;  %v2178_v24 = vld [vmem:[%s16643_s14 + $0x3d60] sm:$0xff]  ;;  %v5190_v25 = vadd.f32 %v5189_v13, %v2087_v6  ;;  %v5408_v26 = vadd.f32 %v5407_v14, %v2302_v7  ;;  %v2215_v27 = vld [vmem:[%s16643_s14 + $0x3e88] sm:$0xff]  ;;  %v5537_v28 = vadd.f32 %v5536_v16, %v2429_v9 }
 0x33b   : > { %v5280_v29 = vadd.f32 %v5279_v17, %v2176_v12  ;;  %v2089_v30 = vld [vmem:[%s16643_s14 + $0x3a98] sm:$0xff]  ;;  %v2304_v31 = vld [vmem:[%s16643_s14 + $0x4150] sm:$0xff]  ;;  %v5319_v32 = vadd.f32 %v5318_v20, %v2214_v15  ;;  %v2431_v33 = vld [vmem:[%s16643_s14 + $0x4548] sm:$0xff] }
 0x33c   : > { %v5062_v34 = vadd.f32 %v5061_v22, %v1961_v10  ;;  %v2179_v35 = vld [vmem:[%s16643_s14 + $0x3d68] sm:$0xff]  ;;  %v2090_v36 = vld [vmem:[%s16643_s14 + $0x3aa0] sm:$0xff]  ;;  %v5191_v37 = vadd.f32 %v5190_v25, %v2088_v18  ;;  %v5409_v38 = vadd.f32 %v5408_v26, %v2303_v19  ;;  %v2216_v39 = vld [vmem:[%s16643_s14 + $0x3e90] sm:$0xff]  ;;  %v5538_v40 = vadd.f32 %v5537_v28, %v2430_v21 }
 0x33d   : > { %v5281_v41 = vadd.f32 %v5280_v29, %v2177_v23  ;;  %v2091_v42 = vld [vmem:[%s16643_s14 + $0x3aa8] sm:$0xff]  ;;  %v2305_v43 = vld [vmem:[%s16643_s14 + $0x4158] sm:$0xff]  ;;  %v5320_v44 = vadd.f32 %v5319_v32, %v2215_v27  ;;  %v2432_v45 = vld [vmem:[%s16643_s14 + $0x4550] sm:$0xff] }
 0x33e   : > { %5063 = vadd.xlane.f32.xlu0 %v5062_v34  ;;  %v5192_v46 = vadd.f32 %v5191_v37, %v2089_v30  ;;  %v2306_v47 = vld [vmem:[%s16643_s14 + $0x4160] sm:$0xff]  ;;  %v5410_v48 = vadd.f32 %v5409_v38, %v2304_v31  ;;  %v2217_v49 = vld [vmem:[%s16643_s14 + $0x3e98] sm:$0xff]  ;;  %v5539_v50 = vadd.f32 %v5538_v40, %v2431_v33  ;;  %v2343_v55 = vld [vmem:[%s16643_s14 + $0x4288] sm:$0xff] }
 0x33f   : > { %v2342_v51 = vld [vmem:[%s16643_s14 + $0x4280] sm:$0xff]  ;;  %v5282_v52 = vadd.f32 %v5281_v41, %v2178_v24  ;;  %v5321_v53 = vadd.f32 %v5320_v44, %v2216_v39  ;;  %v2433_v54 = vld [vmem:[%s16643_s14 + $0x4558] sm:$0xff]  ;;  %v2344_v56 = vld [vmem:[%s16643_s14 + $0x4290] sm:$0xff] }
 0x340   : > { %v2180_v57 = vld [vmem:[%s16643_s14 + $0x3d70] sm:$0xff]  ;;  %v5193_v59 = vadd.f32 %v5192_v46, %v2090_v36  ;;  %v5411_v60 = vadd.f32 %v5410_v48, %v2305_v43  ;;  %v2218_v61 = vld [vmem:[%s16643_s14 + $0x3ea0] sm:$0xff]  ;;  %v5540_v62 = vadd.f32 %v5539_v50, %v2432_v45  ;;  %v5450_v63 = vadd.f32 %v2343_v55, %v2342_v51  ;;  %v2307_v1 = vld [vmem:[%s16643_s14 + $0x4168] sm:$0xff] }
 0x341   : > { %v2092_v58 = vld [vmem:[%s16643_s14 + $0x3ab0] sm:$0xff]  ;;  %v5283_v0 = vadd.f32 %v5282_v52, %v2179_v35  ;;  %v5322_v2 = vadd.f32 %v5321_v53, %v2217_v49  ;;  %v2434_v3 = vld [vmem:[%s16643_s14 + $0x4560] sm:$0xff]  ;;  %v2345_v4 = vld [vmem:[%s16643_s14 + $0x4298] sm:$0xff] }
 0x342   : > { %v2181_v5 = vld [vmem:[%s16643_s14 + $0x3d78] sm:$0xff]  ;;  %v5194_v7 = vadd.f32 %v5193_v59, %v2091_v42  ;;  %v5412_v8 = vadd.f32 %v5411_v60, %v2306_v47  ;;  %v2219_v9 = vld [vmem:[%s16643_s14 + $0x3ea8] sm:$0xff]  ;;  %v5541_v10 = vadd.f32 %v5540_v62, %v2433_v54  ;;  %v5451_v11 = vadd.f32 %v5450_v63, %v2344_v56  ;;  %v2308_v13 = vld [vmem:[%s16643_s14 + $0x4170] sm:$0xff] }
 0x343   : > { %v2093_v6 = vld [vmem:[%s16643_s14 + $0x3ab8] sm:$0xff]  ;;  %v5284_v12 = vadd.f32 %v5283_v0, %v2180_v57  ;;  %v5323_v14 = vadd.f32 %v5322_v2, %v2218_v61  ;;  %v2435_v15 = vld [vmem:[%s16643_s14 + $0x4568] sm:$0xff]  ;;  %v2346_v16 = vld [vmem:[%s16643_s14 + $0x42a0] sm:$0xff] }
 0x344   : > { %v2182_v17 = vld [vmem:[%s16643_s14 + $0x3d80] sm:$0xff]  ;;  %v5195_v19 = vadd.f32 %v5194_v7, %v2092_v58  ;;  %v5413_v20 = vadd.f32 %v5412_v8, %v2307_v1  ;;  %v2220_v21 = vld [vmem:[%s16643_s14 + $0x3eb0] sm:$0xff]  ;;  %v5542_v22 = vadd.f32 %v5541_v10, %v2434_v3  ;;  %v5452_v23 = vadd.f32 %v5451_v11, %v2345_v4  ;;  %v2309_v25 = vld [vmem:[%s16643_s14 + $0x4178] sm:$0xff] }
 0x345   : > { %v2094_v18 = vld [vmem:[%s16643_s14 + $0x3ac0] sm:$0xff]  ;;  %v5285_v24 = vadd.f32 %v5284_v12, %v2181_v5  ;;  %v5324_v26 = vadd.f32 %v5323_v14, %v2219_v9  ;;  %v2436_v27 = vld [vmem:[%s16643_s14 + $0x4570] sm:$0xff]  ;;  %v2347_v28 = vld [vmem:[%s16643_s14 + $0x42a8] sm:$0xff] }
 0x346   : > { %v2183_v29 = vld [vmem:[%s16643_s14 + $0x3d88] sm:$0xff]  ;;  %v5196_v31 = vadd.f32 %v5195_v19, %v2093_v6  ;;  %v5414_v32 = vadd.f32 %v5413_v20, %v2308_v13  ;;  %v2221_v33 = vld [vmem:[%s16643_s14 + $0x3eb8] sm:$0xff]  ;;  %v5543_v34 = vadd.f32 %v5542_v22, %v2435_v15  ;;  %v5453_v35 = vadd.f32 %v5452_v23, %v2346_v16  ;;  %v2310_v37 = vld [vmem:[%s16643_s14 + $0x4180] sm:$0xff] }
 0x347   : > { %v2095_v30 = vld [vmem:[%s16643_s14 + $0x3ac8] sm:$0xff]  ;;  %v5286_v36 = vadd.f32 %v5285_v24, %v2182_v17  ;;  %v5325_v38 = vadd.f32 %v5324_v26, %v2220_v21  ;;  %v2437_v39 = vld [vmem:[%s16643_s14 + $0x4578] sm:$0xff]  ;;  %v2348_v40 = vld [vmem:[%s16643_s14 + $0x42b0] sm:$0xff] }
 0x348   : > { %v2184_v41 = vld [vmem:[%s16643_s14 + $0x3d90] sm:$0xff]  ;;  %v5197_v43 = vadd.f32 %v5196_v31, %v2094_v18  ;;  %v5415_v44 = vadd.f32 %v5414_v32, %v2309_v25  ;;  %v2222_v45 = vld [vmem:[%s16643_s14 + $0x3ec0] sm:$0xff]  ;;  %v5544_v46 = vadd.f32 %v5543_v34, %v2436_v27  ;;  %v5454_v47 = vadd.f32 %v5453_v35, %v2347_v28  ;;  %v2311_v49 = vld [vmem:[%s16643_s14 + $0x4188] sm:$0xff] }
 0x349   : > { %v2096_v42 = vld [vmem:[%s16643_s14 + $0x3ad0] sm:$0xff]  ;;  %v5287_v48 = vadd.f32 %v5286_v36, %v2183_v29  ;;  %v5326_v50 = vadd.f32 %v5325_v38, %v2221_v33  ;;  %v2438_v51 = vld [vmem:[%s16643_s14 + $0x4580] sm:$0xff]  ;;  %v2349_v52 = vld [vmem:[%s16643_s14 + $0x42b8] sm:$0xff] }
 0x34a   : > { %v2185_v53 = vld [vmem:[%s16643_s14 + $0x3d98] sm:$0xff]  ;;  %v5198_v55 = vadd.f32 %v5197_v43, %v2095_v30  ;;  %v5416_v56 = vadd.f32 %v5415_v44, %v2310_v37  ;;  %v2223_v57 = vld [vmem:[%s16643_s14 + $0x3ec8] sm:$0xff]  ;;  %v5545_v58 = vadd.f32 %v5544_v46, %v2437_v39  ;;  %v5455_v59 = vadd.f32 %v5454_v47, %v2348_v40  ;;  %v2312_v61 = vld [vmem:[%s16643_s14 + $0x4190] sm:$0xff] }
 0x34b   : > { %v2097_v54 = vld [vmem:[%s16643_s14 + $0x3ad8] sm:$0xff]  ;;  %v5288_v60 = vadd.f32 %v5287_v48, %v2184_v41  ;;  %v5327_v62 = vadd.f32 %v5326_v50, %v2222_v45  ;;  %v2439_v63 = vld [vmem:[%s16643_s14 + $0x4588] sm:$0xff]  ;;  %v2350_v0 = vld [vmem:[%s16643_s14 + $0x42c0] sm:$0xff] }
 0x34c   : > { %v2186_v1 = vld [vmem:[%s16643_s14 + $0x3da0] sm:$0xff]  ;;  %v5199_v3 = vadd.f32 %v5198_v55, %v2096_v42  ;;  %v5417_v4 = vadd.f32 %v5416_v56, %v2311_v49  ;;  %v2224_v5 = vld [vmem:[%s16643_s14 + $0x3ed0] sm:$0xff]  ;;  %v5546_v6 = vadd.f32 %v5545_v58, %v2438_v51  ;;  %v5456_v7 = vadd.f32 %v5455_v59, %v2349_v52  ;;  %v2313_v9 = vld [vmem:[%s16643_s14 + $0x4198] sm:$0xff] }
 0x34d   : > { %v2098_v2 = vld [vmem:[%s16643_s14 + $0x3ae0] sm:$0xff]  ;;  %v5289_v8 = vadd.f32 %v5288_v60, %v2185_v53  ;;  %v5328_v10 = vadd.f32 %v5327_v62, %v2223_v57  ;;  %v2440_v11 = vld [vmem:[%s16643_s14 + $0x4590] sm:$0xff]  ;;  %v2351_v12 = vld [vmem:[%s16643_s14 + $0x42c8] sm:$0xff] }
 0x34e   : > { %v2187_v13 = vld [vmem:[%s16643_s14 + $0x3da8] sm:$0xff]  ;;  %v5200_v15 = vadd.f32 %v5199_v3, %v2097_v54  ;;  %v5418_v16 = vadd.f32 %v5417_v4, %v2312_v61  ;;  %v2225_v17 = vld [vmem:[%s16643_s14 + $0x3ed8] sm:$0xff]  ;;  %v5547_v18 = vadd.f32 %v5546_v6, %v2439_v63  ;;  %v5457_v19 = vadd.f32 %v5456_v7, %v2350_v0  ;;  %v2314_v21 = vld [vmem:[%s16643_s14 + $0x41a0] sm:$0xff] }
 0x34f   : > { %v2099_v14 = vld [vmem:[%s16643_s14 + $0x3ae8] sm:$0xff]  ;;  %v5290_v20 = vadd.f32 %v5289_v8, %v2186_v1  ;;  %v5329_v22 = vadd.f32 %v5328_v10, %v2224_v5  ;;  %v2441_v23 = vld [vmem:[%s16643_s14 + $0x4598] sm:$0xff]  ;;  %v2352_v24 = vld [vmem:[%s16643_s14 + $0x42d0] sm:$0xff] }
 0x350   : > { %v2188_v25 = vld [vmem:[%s16643_s14 + $0x3db0] sm:$0xff]  ;;  %v5201_v27 = vadd.f32 %v5200_v15, %v2098_v2  ;;  %v5419_v28 = vadd.f32 %v5418_v16, %v2313_v9  ;;  %v2226_v29 = vld [vmem:[%s16643_s14 + $0x3ee0] sm:$0xff]  ;;  %v5548_v30 = vadd.f32 %v5547_v18, %v2440_v11  ;;  %v5458_v31 = vadd.f32 %v5457_v19, %v2351_v12  ;;  %v2315_v33 = vld [vmem:[%s16643_s14 + $0x41a8] sm:$0xff] }
 0x351   : > { %v2100_v26 = vld [vmem:[%s16643_s14 + $0x3af0] sm:$0xff]  ;;  %v5291_v32 = vadd.f32 %v5290_v20, %v2187_v13  ;;  %v5330_v34 = vadd.f32 %v5329_v22, %v2225_v17  ;;  %v2442_v35 = vld [vmem:[%s16643_s14 + $0x45a0] sm:$0xff]  ;;  %v2353_v36 = vld [vmem:[%s16643_s14 + $0x42d8] sm:$0xff] }
 0x352   : > { %v2189_v37 = vld [vmem:[%s16643_s14 + $0x3db8] sm:$0xff]  ;;  %v5202_v39 = vadd.f32 %v5201_v27, %v2099_v14  ;;  %v5420_v40 = vadd.f32 %v5419_v28, %v2314_v21  ;;  %v2227_v41 = vld [vmem:[%s16643_s14 + $0x3ee8] sm:$0xff]  ;;  %v5549_v42 = vadd.f32 %v5548_v30, %v2441_v23  ;;  %v5459_v43 = vadd.f32 %v5458_v31, %v2352_v24  ;;  %v2316_v45 = vld [vmem:[%s16643_s14 + $0x41b0] sm:$0xff] }
 0x353   : > { %v2101_v38 = vld [vmem:[%s16643_s14 + $0x3af8] sm:$0xff]  ;;  %v5292_v44 = vadd.f32 %v5291_v32, %v2188_v25  ;;  %v5331_v46 = vadd.f32 %v5330_v34, %v2226_v29  ;;  %v2443_v47 = vld [vmem:[%s16643_s14 + $0x45a8] sm:$0xff]  ;;  %v2354_v48 = vld [vmem:[%s16643_s14 + $0x42e0] sm:$0xff] }
 0x354   : > { %v2102_v49 = vld [vmem:[%s16643_s14 + $0x3b00] sm:$0xff]  ;;  %v5203_v50 = vadd.f32 %v5202_v39, %v2100_v26  ;;  %v5421_v51 = vadd.f32 %v5420_v40, %v2315_v33  ;;  %v2228_v52 = vld [vmem:[%s16643_s14 + $0x3ef0] sm:$0xff]  ;;  %v5550_v53 = vadd.f32 %v5549_v42, %v2442_v35  ;;  %v5460_v54 = vadd.f32 %v5459_v43, %v2353_v36  ;;  %v2317_v56 = vld [vmem:[%s16643_s14 + $0x41b8] sm:$0xff] }
 0x355   : > { %v5293_v55 = vadd.f32 %v5292_v44, %v2189_v37  ;;  %v5332_v57 = vadd.f32 %v5331_v46, %v2227_v41  ;;  %v2444_v58 = vld [vmem:[%s16643_s14 + $0x45b0] sm:$0xff]  ;;  %v2355_v59 = vld [vmem:[%s16643_s14 + $0x42e8] sm:$0xff]  ;;  %v2318_v62 = vld [vmem:[%s16643_s14 + $0x41c0] sm:$0xff] }
 0x356   : > { %v2103_v60 = vld [vmem:[%s16643_s14 + $0x3b08] sm:$0xff]  ;;  %v5204_v61 = vadd.f32 %v5203_v50, %v2101_v38  ;;  %v5422_v63 = vadd.f32 %v5421_v51, %v2316_v45  ;;  %v2229_v0 = vld [vmem:[%s16643_s14 + $0x3ef8] sm:$0xff]  ;;  %v5551_v1 = vadd.f32 %v5550_v53, %v2443_v47  ;;  %v5461_v2 = vadd.f32 %v5460_v54, %v2354_v48  ;;  %v2104_v3 = vld [vmem:[%s16643_s14 + $0x3b10] sm:$0xff] }
 0x357   : > { %5294 = vadd.xlane.f32.xlu1 %v5293_v55  ;;  %v2230_v4 = vld [vmem:[%s16643_s14 + $0x3f00] sm:$0xff]  ;;  %v5333_v5 = vadd.f32 %v5332_v57, %v2228_v52  ;;  %v2445_v6 = vld [vmem:[%s16643_s14 + $0x45b8] sm:$0xff]  ;;  %v2356_v7 = vld [vmem:[%s16643_s14 + $0x42f0] sm:$0xff] }
 0x358   : > { %v5205_v8 = vadd.f32 %v5204_v61, %v2102_v49  ;;  %v5423_v9 = vadd.f32 %v5422_v63, %v2317_v56  ;;  %v5552_v10 = vadd.f32 %v5551_v1, %v2444_v58  ;;  %v5462_v11 = vadd.f32 %v5461_v2, %v2355_v59  ;;  %v2570_v12 = vld [vmem:[%s16643_s14 + $0x49a0] sm:$0xff]  ;;  %v2571_v13 = vld [vmem:[%s16643_s14 + $0x49a8] sm:$0xff]  ;;  %v2572_v14 = vld [vmem:[%s16643_s14 + $0x49b0] sm:$0xff] }
 0x359   : > { %v2319_v15 = vld [vmem:[%s16643_s14 + $0x41c8] sm:$0xff]  ;;  %v5334_v16 = vadd.f32 %v5333_v5, %v2229_v0  ;;  %v2446_v17 = vld [vmem:[%s16643_s14 + $0x45c0] sm:$0xff]  ;;  %v2357_v18 = vld [vmem:[%s16643_s14 + $0x42f8] sm:$0xff]  ;;  %v5681_v19 = vadd.f32 %v2571_v13, %v2570_v12 }
 0x35a   : > { %v2105_v20 = vld [vmem:[%s16643_s14 + $0x3b18] sm:$0xff]  ;;  %v5206_v21 = vadd.f32 %v5205_v8, %v2103_v60  ;;  %v5424_v22 = vadd.f32 %v5423_v9, %v2318_v62  ;;  %v2231_v23 = vld [vmem:[%s16643_s14 + $0x3f08] sm:$0xff]  ;;  %v5553_v24 = vadd.f32 %v5552_v10, %v2445_v6  ;;  %v5463_v25 = vadd.f32 %v5462_v11, %v2356_v7  ;;  %v2320_v27 = vld [vmem:[%s16643_s14 + $0x41d0] sm:$0xff] }
 0x35b   : > { %v2573_v26 = vld [vmem:[%s16643_s14 + $0x49b8] sm:$0xff]  ;;  %v5335_v28 = vadd.f32 %v5334_v16, %v2230_v4  ;;  %v2447_v29 = vld [vmem:[%s16643_s14 + $0x45c8] sm:$0xff]  ;;  %v2358_v30 = vld [vmem:[%s16643_s14 + $0x4300] sm:$0xff]  ;;  %v5682_v31 = vadd.f32 %v5681_v19, %v2572_v14 }
 0x35c   : > { %v2106_v32 = vld [vmem:[%s16643_s14 + $0x3b20] sm:$0xff]  ;;  %v5207_v33 = vadd.f32 %v5206_v21, %v2104_v3  ;;  %v5425_v34 = vadd.f32 %v5424_v22, %v2319_v15  ;;  %v2232_v35 = vld [vmem:[%s16643_s14 + $0x3f10] sm:$0xff]  ;;  %v5554_v36 = vadd.f32 %v5553_v24, %v2446_v17  ;;  %v5464_v37 = vadd.f32 %v5463_v25, %v2357_v18  ;;  %v2321_v39 = vld [vmem:[%s16643_s14 + $0x41d8] sm:$0xff] }
 0x35d   : > { %v2574_v38 = vld [vmem:[%s16643_s14 + $0x49c0] sm:$0xff]  ;;  %v5336_v40 = vadd.f32 %v5335_v28, %v2231_v23  ;;  %v2448_v41 = vld [vmem:[%s16643_s14 + $0x45d0] sm:$0xff]  ;;  %v2359_v42 = vld [vmem:[%s16643_s14 + $0x4308] sm:$0xff]  ;;  %v5683_v43 = vadd.f32 %v5682_v31, %v2573_v26 }
 0x35e   : > { %v2107_v44 = vld [vmem:[%s16643_s14 + $0x3b28] sm:$0xff]  ;;  %v5208_v45 = vadd.f32 %v5207_v33, %v2105_v20  ;;  %v5426_v46 = vadd.f32 %v5425_v34, %v2320_v27  ;;  %v2233_v47 = vld [vmem:[%s16643_s14 + $0x3f18] sm:$0xff]  ;;  %v5555_v48 = vadd.f32 %v5554_v36, %v2447_v29  ;;  %v5465_v49 = vadd.f32 %v5464_v37, %v2358_v30  ;;  %v2322_v51 = vld [vmem:[%s16643_s14 + $0x41e0] sm:$0xff] }
 0x35f   : > { %v2575_v50 = vld [vmem:[%s16643_s14 + $0x49c8] sm:$0xff]  ;;  %v5337_v52 = vadd.f32 %v5336_v40, %v2232_v35  ;;  %v2449_v53 = vld [vmem:[%s16643_s14 + $0x45d8] sm:$0xff]  ;;  %v2360_v54 = vld [vmem:[%s16643_s14 + $0x4310] sm:$0xff]  ;;  %v5684_v55 = vadd.f32 %v5683_v43, %v2574_v38 }
 0x360   : > { %v2108_v56 = vld [vmem:[%s16643_s14 + $0x3b30] sm:$0xff]  ;;  %v5209_v57 = vadd.f32 %v5208_v45, %v2106_v32  ;;  %v5427_v58 = vadd.f32 %v5426_v46, %v2321_v39  ;;  %v2234_v59 = vld [vmem:[%s16643_s14 + $0x3f20] sm:$0xff]  ;;  %v5556_v60 = vadd.f32 %v5555_v48, %v2448_v41  ;;  %v5466_v61 = vadd.f32 %v5465_v49, %v2359_v42  ;;  %v2323_v63 = vld [vmem:[%s16643_s14 + $0x41e8] sm:$0xff] }
 0x361   : > { %v2576_v62 = vld [vmem:[%s16643_s14 + $0x49d0] sm:$0xff]  ;;  %v5338_v0 = vadd.f32 %v5337_v52, %v2233_v47  ;;  %v2450_v1 = vld [vmem:[%s16643_s14 + $0x45e0] sm:$0xff]  ;;  %v2361_v2 = vld [vmem:[%s16643_s14 + $0x4318] sm:$0xff]  ;;  %v5685_v3 = vadd.f32 %v5684_v55, %v2575_v50 }
 0x362   : > { %v2109_v4 = vld [vmem:[%s16643_s14 + $0x3b38] sm:$0xff]  ;;  %v5210_v5 = vadd.f32 %v5209_v57, %v2107_v44  ;;  %v5428_v6 = vadd.f32 %v5427_v58, %v2322_v51  ;;  %v2235_v7 = vld [vmem:[%s16643_s14 + $0x3f28] sm:$0xff]  ;;  %v5557_v8 = vadd.f32 %v5556_v60, %v2449_v53  ;;  %v5467_v9 = vadd.f32 %v5466_v61, %v2360_v54  ;;  %v2324_v11 = vld [vmem:[%s16643_s14 + $0x41f0] sm:$0xff] }
 0x363   : > { %v2577_v10 = vld [vmem:[%s16643_s14 + $0x49d8] sm:$0xff]  ;;  %v5339_v12 = vadd.f32 %v5338_v0, %v2234_v59  ;;  %v2451_v13 = vld [vmem:[%s16643_s14 + $0x45e8] sm:$0xff]  ;;  %v2362_v14 = vld [vmem:[%s16643_s14 + $0x4320] sm:$0xff]  ;;  %v5686_v15 = vadd.f32 %v5685_v3, %v2576_v62 }
 0x364   : > { %v2110_v16 = vld [vmem:[%s16643_s14 + $0x3b40] sm:$0xff]  ;;  %v5211_v17 = vadd.f32 %v5210_v5, %v2108_v56  ;;  %v5429_v18 = vadd.f32 %v5428_v6, %v2323_v63  ;;  %v2236_v19 = vld [vmem:[%s16643_s14 + $0x3f30] sm:$0xff]  ;;  %v5558_v20 = vadd.f32 %v5557_v8, %v2450_v1  ;;  %v5468_v21 = vadd.f32 %v5467_v9, %v2361_v2  ;;  %v2325_v23 = vld [vmem:[%s16643_s14 + $0x41f8] sm:$0xff] }
 0x365   : > { %v2578_v22 = vld [vmem:[%s16643_s14 + $0x49e0] sm:$0xff]  ;;  %v5340_v24 = vadd.f32 %v5339_v12, %v2235_v7  ;;  %v2452_v25 = vld [vmem:[%s16643_s14 + $0x45f0] sm:$0xff]  ;;  %v2363_v26 = vld [vmem:[%s16643_s14 + $0x4328] sm:$0xff]  ;;  %v5687_v27 = vadd.f32 %v5686_v15, %v2577_v10 }
 0x366   : > { %v2111_v28 = vld [vmem:[%s16643_s14 + $0x3b48] sm:$0xff]  ;;  %v5212_v29 = vadd.f32 %v5211_v17, %v2109_v4  ;;  %v5430_v30 = vadd.f32 %v5429_v18, %v2324_v11  ;;  %v2237_v31 = vld [vmem:[%s16643_s14 + $0x3f38] sm:$0xff]  ;;  %v5559_v32 = vadd.f32 %v5558_v20, %v2451_v13  ;;  %v5469_v33 = vadd.f32 %v5468_v21, %v2362_v14  ;;  %v2326_v35 = vld [vmem:[%s16643_s14 + $0x4200] sm:$0xff] }
 0x367   : > { %v2579_v34 = vld [vmem:[%s16643_s14 + $0x49e8] sm:$0xff]  ;;  %v5341_v36 = vadd.f32 %v5340_v24, %v2236_v19  ;;  %v2453_v37 = vld [vmem:[%s16643_s14 + $0x45f8] sm:$0xff]  ;;  %v2364_v38 = vld [vmem:[%s16643_s14 + $0x4330] sm:$0xff]  ;;  %v5688_v39 = vadd.f32 %v5687_v27, %v2578_v22 }
 0x368   : > { %v2112_v40 = vld [vmem:[%s16643_s14 + $0x3b50] sm:$0xff]  ;;  %v5213_v41 = vadd.f32 %v5212_v29, %v2110_v16  ;;  %v5431_v42 = vadd.f32 %v5430_v30, %v2325_v23  ;;  %v2238_v43 = vld [vmem:[%s16643_s14 + $0x3f40] sm:$0xff]  ;;  %v5560_v44 = vadd.f32 %v5559_v32, %v2452_v25  ;;  %v5470_v45 = vadd.f32 %v5469_v33, %v2363_v26  ;;  %v2327_v47 = vld [vmem:[%s16643_s14 + $0x4208] sm:$0xff] }
 0x369   : > { %v2580_v46 = vld [vmem:[%s16643_s14 + $0x49f0] sm:$0xff]  ;;  %v5342_v48 = vadd.f32 %v5341_v36, %v2237_v31  ;;  %v2454_v49 = vld [vmem:[%s16643_s14 + $0x4600] sm:$0xff]  ;;  %v2365_v50 = vld [vmem:[%s16643_s14 + $0x4338] sm:$0xff]  ;;  %v5689_v51 = vadd.f32 %v5688_v39, %v2579_v34 }
 0x36a   : > { %v2113_v52 = vld [vmem:[%s16643_s14 + $0x3b58] sm:$0xff]  ;;  %v5214_v53 = vadd.f32 %v5213_v41, %v2111_v28  ;;  %v5432_v54 = vadd.f32 %v5431_v42, %v2326_v35  ;;  %v2239_v55 = vld [vmem:[%s16643_s14 + $0x3f48] sm:$0xff]  ;;  %v5561_v56 = vadd.f32 %v5560_v44, %v2453_v37  ;;  %v5471_v57 = vadd.f32 %v5470_v45, %v2364_v38  ;;  %v2328_v59 = vld [vmem:[%s16643_s14 + $0x4210] sm:$0xff] }
 0x36b   : > { %v2581_v58 = vld [vmem:[%s16643_s14 + $0x49f8] sm:$0xff]  ;;  %v5343_v60 = vadd.f32 %v5342_v48, %v2238_v43  ;;  %v2455_v61 = vld [vmem:[%s16643_s14 + $0x4608] sm:$0xff]  ;;  %v2366_v62 = vld [vmem:[%s16643_s14 + $0x4340] sm:$0xff]  ;;  %v5690_v63 = vadd.f32 %v5689_v51, %v2580_v46 }
 0x36c   : > { %v5215_v0 = vadd.f32 %v5214_v53, %v2112_v40  ;;  %v5433_v1 = vadd.f32 %v5432_v54, %v2327_v47  ;;  %v2240_v2 = vld [vmem:[%s16643_s14 + $0x3f50] sm:$0xff]  ;;  %v5562_v3 = vadd.f32 %v5561_v56, %v2454_v49  ;;  %v5472_v4 = vadd.f32 %v5471_v57, %v2365_v50  ;;  %v2582_v5 = vld [vmem:[%s16643_s14 + $0x4a00] sm:$0xff]  ;;  %v2329_v6 = vld [vmem:[%s16643_s14 + $0x4218] sm:$0xff] }
 0x36d   : > { %v5344_v7 = vadd.f32 %v5343_v60, %v2239_v55  ;;  %v2456_v8 = vld [vmem:[%s16643_s14 + $0x4610] sm:$0xff]  ;;  %v2367_v9 = vld [vmem:[%s16643_s14 + $0x4348] sm:$0xff]  ;;  %v5691_v10 = vadd.f32 %v5690_v63, %v2581_v58  ;;  %v2330_v12 = vld [vmem:[%s16643_s14 + $0x4220] sm:$0xff] }
 0x36e   : > { %v5216_v11 = vadd.f32 %v5215_v0, %v2113_v52  ;;  %v5434_v13 = vadd.f32 %v5433_v1, %v2328_v59  ;;  %v2241_v14 = vld [vmem:[%s16643_s14 + $0x3f58] sm:$0xff]  ;;  %v5563_v15 = vadd.f32 %v5562_v3, %v2455_v61  ;;  %v5473_v16 = vadd.f32 %v5472_v4, %v2366_v62  ;;  %v2583_v17 = vld [vmem:[%s16643_s14 + $0x4a08] sm:$0xff]  ;;  %v2368_v21 = vld [vmem:[%s16643_s14 + $0x4350] sm:$0xff] }
 0x36f   : > { %v2331_v18 = vld [vmem:[%s16643_s14 + $0x4228] sm:$0xff]  ;;  %v5345_v19 = vadd.f32 %v5344_v7, %v2240_v2  ;;  %v2457_v20 = vld [vmem:[%s16643_s14 + $0x4618] sm:$0xff]  ;;  %v5692_v22 = vadd.f32 %v5691_v10, %v2582_v5  ;;  %v2242_v24 = vld [vmem:[%s16643_s14 + $0x3f60] sm:$0xff] }
 0x370   : > { %5217 = vadd.xlane.f32.xlu0 %v5216_v11  ;;  %v5435_v23 = vadd.f32 %v5434_v13, %v2329_v6  ;;  %v2458_v25 = vld [vmem:[%s16643_s14 + $0x4620] sm:$0xff]  ;;  %v5564_v26 = vadd.f32 %v5563_v15, %v2456_v8  ;;  %v5474_v27 = vadd.f32 %v5473_v16, %v2367_v9  ;;  %v2584_v28 = vld [vmem:[%s16643_s14 + $0x4a10] sm:$0xff]  ;;  %v2369_v31 = vld [vmem:[%s16643_s14 + $0x4358] sm:$0xff] }
 0x371   : > { %v2332_v29 = vld [vmem:[%s16643_s14 + $0x4230] sm:$0xff]  ;;  %v5346_v30 = vadd.f32 %v5345_v19, %v2241_v14  ;;  %v5693_v32 = vadd.f32 %v5692_v22, %v2583_v17  ;;  %v2494_v33 = vld [vmem:[%s16643_s14 + $0x4740] sm:$0xff]  ;;  %v2495_v34 = vld [vmem:[%s16643_s14 + $0x4748] sm:$0xff] }
 0x372   : > { %v5436_v35 = vadd.f32 %v5435_v23, %v2330_v12  ;;  %v2243_v36 = vld [vmem:[%s16643_s14 + $0x3f68] sm:$0xff]  ;;  %v5565_v37 = vadd.f32 %v5564_v26, %v2457_v20  ;;  %v5475_v38 = vadd.f32 %v5474_v27, %v2368_v21  ;;  %v2585_v39 = vld [vmem:[%s16643_s14 + $0x4a18] sm:$0xff]  ;;  %v2496_v40 = vld [vmem:[%s16643_s14 + $0x4750] sm:$0xff]  ;;  %v5604_v41 = vadd.f32 %v2495_v34, %v2494_v33 }
 0x373   : > { %v5347_v42 = vadd.f32 %v5346_v30, %v2242_v24  ;;  %v2459_v43 = vld [vmem:[%s16643_s14 + $0x4628] sm:$0xff]  ;;  %v2370_v44 = vld [vmem:[%s16643_s14 + $0x4360] sm:$0xff]  ;;  %v5694_v45 = vadd.f32 %v5693_v32, %v2584_v28  ;;  %v2497_v46 = vld [vmem:[%s16643_s14 + $0x4758] sm:$0xff] }
 0x374   : > { %v2333_v47 = vld [vmem:[%s16643_s14 + $0x4238] sm:$0xff]  ;;  %v5437_v48 = vadd.f32 %v5436_v35, %v2331_v18  ;;  %v2244_v49 = vld [vmem:[%s16643_s14 + $0x3f70] sm:$0xff]  ;;  %v5566_v50 = vadd.f32 %v5565_v37, %v2458_v25  ;;  %v5476_v51 = vadd.f32 %v5475_v38, %v2369_v31  ;;  %v2586_v52 = vld [vmem:[%s16643_s14 + $0x4a20] sm:$0xff]  ;;  %v5605_v53 = vadd.f32 %v5604_v41, %v2496_v40 }
 0x375   : > { %v5348_v54 = vadd.f32 %v5347_v42, %v2243_v36  ;;  %v2460_v55 = vld [vmem:[%s16643_s14 + $0x4630] sm:$0xff]  ;;  %v2371_v56 = vld [vmem:[%s16643_s14 + $0x4368] sm:$0xff]  ;;  %v5695_v57 = vadd.f32 %v5694_v45, %v2585_v39  ;;  %v2498_v58 = vld [vmem:[%s16643_s14 + $0x4760] sm:$0xff] }
 0x376   : > { %v2334_v59 = vld [vmem:[%s16643_s14 + $0x4240] sm:$0xff]  ;;  %v5438_v60 = vadd.f32 %v5437_v48, %v2332_v29  ;;  %v2245_v61 = vld [vmem:[%s16643_s14 + $0x3f78] sm:$0xff]  ;;  %v5567_v62 = vadd.f32 %v5566_v50, %v2459_v43  ;;  %v5477_v63 = vadd.f32 %v5476_v51, %v2370_v44  ;;  %v2587_v0 = vld [vmem:[%s16643_s14 + $0x4a28] sm:$0xff]  ;;  %v5606_v1 = vadd.f32 %v5605_v53, %v2497_v46 }
 0x377   : > { %v5349_v2 = vadd.f32 %v5348_v54, %v2244_v49  ;;  %v2461_v3 = vld [vmem:[%s16643_s14 + $0x4638] sm:$0xff]  ;;  %v2372_v4 = vld [vmem:[%s16643_s14 + $0x4370] sm:$0xff]  ;;  %v5696_v5 = vadd.f32 %v5695_v57, %v2586_v52  ;;  %v2499_v6 = vld [vmem:[%s16643_s14 + $0x4768] sm:$0xff] }
 0x378   : > { %v2335_v7 = vld [vmem:[%s16643_s14 + $0x4248] sm:$0xff]  ;;  %v5439_v8 = vadd.f32 %v5438_v60, %v2333_v47  ;;  %v2246_v9 = vld [vmem:[%s16643_s14 + $0x3f80] sm:$0xff]  ;;  %v5568_v10 = vadd.f32 %v5567_v62, %v2460_v55  ;;  %v5478_v11 = vadd.f32 %v5477_v63, %v2371_v56  ;;  %v2588_v12 = vld [vmem:[%s16643_s14 + $0x4a30] sm:$0xff]  ;;  %v5607_v13 = vadd.f32 %v5606_v1, %v2498_v58 }
 0x379   : > { %v5350_v14 = vadd.f32 %v5349_v2, %v2245_v61  ;;  %v2462_v15 = vld [vmem:[%s16643_s14 + $0x4640] sm:$0xff]  ;;  %v2373_v16 = vld [vmem:[%s16643_s14 + $0x4378] sm:$0xff]  ;;  %v5697_v17 = vadd.f32 %v5696_v5, %v2587_v0  ;;  %v2500_v18 = vld [vmem:[%s16643_s14 + $0x4770] sm:$0xff] }
 0x37a   : > { %v2336_v19 = vld [vmem:[%s16643_s14 + $0x4250] sm:$0xff]  ;;  %v5440_v20 = vadd.f32 %v5439_v8, %v2334_v59  ;;  %v2247_v21 = vld [vmem:[%s16643_s14 + $0x3f88] sm:$0xff]  ;;  %v5569_v22 = vadd.f32 %v5568_v10, %v2461_v3  ;;  %v5479_v23 = vadd.f32 %v5478_v11, %v2372_v4  ;;  %v2589_v24 = vld [vmem:[%s16643_s14 + $0x4a38] sm:$0xff]  ;;  %v5608_v25 = vadd.f32 %v5607_v13, %v2499_v6 }
 0x37b   : > { %v5351_v26 = vadd.f32 %v5350_v14, %v2246_v9  ;;  %v2463_v27 = vld [vmem:[%s16643_s14 + $0x4648] sm:$0xff]  ;;  %v2374_v28 = vld [vmem:[%s16643_s14 + $0x4380] sm:$0xff]  ;;  %v5698_v29 = vadd.f32 %v5697_v17, %v2588_v12  ;;  %v2501_v30 = vld [vmem:[%s16643_s14 + $0x4778] sm:$0xff] }
 0x37c   : > { %v2337_v31 = vld [vmem:[%s16643_s14 + $0x4258] sm:$0xff]  ;;  %v5441_v32 = vadd.f32 %v5440_v20, %v2335_v7  ;;  %v2248_v33 = vld [vmem:[%s16643_s14 + $0x3f90] sm:$0xff]  ;;  %v5570_v34 = vadd.f32 %v5569_v22, %v2462_v15  ;;  %v5480_v35 = vadd.f32 %v5479_v23, %v2373_v16  ;;  %v2590_v36 = vld [vmem:[%s16643_s14 + $0x4a40] sm:$0xff]  ;;  %v5609_v37 = vadd.f32 %v5608_v25, %v2500_v18 }
 0x37d   : > { %v5352_v38 = vadd.f32 %v5351_v26, %v2247_v21  ;;  %v2464_v39 = vld [vmem:[%s16643_s14 + $0x4650] sm:$0xff]  ;;  %v2375_v40 = vld [vmem:[%s16643_s14 + $0x4388] sm:$0xff]  ;;  %v5699_v41 = vadd.f32 %v5698_v29, %v2589_v24  ;;  %v2502_v42 = vld [vmem:[%s16643_s14 + $0x4780] sm:$0xff] }
 0x37e   : > { %v2338_v43 = vld [vmem:[%s16643_s14 + $0x4260] sm:$0xff]  ;;  %v5442_v44 = vadd.f32 %v5441_v32, %v2336_v19  ;;  %v2249_v45 = vld [vmem:[%s16643_s14 + $0x3f98] sm:$0xff]  ;;  %v5571_v46 = vadd.f32 %v5570_v34, %v2463_v27  ;;  %v5481_v47 = vadd.f32 %v5480_v35, %v2374_v28  ;;  %v2591_v48 = vld [vmem:[%s16643_s14 + $0x4a48] sm:$0xff]  ;;  %v5610_v49 = vadd.f32 %v5609_v37, %v2501_v30 }
 0x37f   : > { %v5353_v50 = vadd.f32 %v5352_v38, %v2248_v33  ;;  %v2465_v51 = vld [vmem:[%s16643_s14 + $0x4658] sm:$0xff]  ;;  %v2376_v52 = vld [vmem:[%s16643_s14 + $0x4390] sm:$0xff]  ;;  %v5700_v53 = vadd.f32 %v5699_v41, %v2590_v36  ;;  %v2503_v54 = vld [vmem:[%s16643_s14 + $0x4788] sm:$0xff] }
 0x380   : > { %v2339_v55 = vld [vmem:[%s16643_s14 + $0x4268] sm:$0xff]  ;;  %v5443_v56 = vadd.f32 %v5442_v44, %v2337_v31  ;;  %v2250_v57 = vld [vmem:[%s16643_s14 + $0x3fa0] sm:$0xff]  ;;  %v5572_v58 = vadd.f32 %v5571_v46, %v2464_v39  ;;  %v5482_v59 = vadd.f32 %v5481_v47, %v2375_v40  ;;  %v2592_v60 = vld [vmem:[%s16643_s14 + $0x4a50] sm:$0xff]  ;;  %v5611_v61 = vadd.f32 %v5610_v49, %v2502_v42 }
 0x381   : > { %v5354_v62 = vadd.f32 %v5353_v50, %v2249_v45  ;;  %v2466_v63 = vld [vmem:[%s16643_s14 + $0x4660] sm:$0xff]  ;;  %v2377_v0 = vld [vmem:[%s16643_s14 + $0x4398] sm:$0xff]  ;;  %v5701_v1 = vadd.f32 %v5700_v53, %v2591_v48  ;;  %v2504_v2 = vld [vmem:[%s16643_s14 + $0x4790] sm:$0xff] }
 0x382   : > { %v2340_v3 = vld [vmem:[%s16643_s14 + $0x4270] sm:$0xff]  ;;  %v5444_v4 = vadd.f32 %v5443_v56, %v2338_v43  ;;  %v2251_v5 = vld [vmem:[%s16643_s14 + $0x3fa8] sm:$0xff]  ;;  %v5573_v6 = vadd.f32 %v5572_v58, %v2465_v51  ;;  %v5483_v7 = vadd.f32 %v5482_v59, %v2376_v52  ;;  %v2593_v8 = vld [vmem:[%s16643_s14 + $0x4a58] sm:$0xff]  ;;  %v5612_v9 = vadd.f32 %v5611_v61, %v2503_v54 }
 0x383   : > { %v5355_v10 = vadd.f32 %v5354_v62, %v2250_v57  ;;  %v2467_v11 = vld [vmem:[%s16643_s14 + $0x4668] sm:$0xff]  ;;  %v2378_v12 = vld [vmem:[%s16643_s14 + $0x43a0] sm:$0xff]  ;;  %v5702_v13 = vadd.f32 %v5701_v1, %v2592_v60  ;;  %v2505_v14 = vld [vmem:[%s16643_s14 + $0x4798] sm:$0xff] }
 0x384   : > { %v2341_v15 = vld [vmem:[%s16643_s14 + $0x4278] sm:$0xff]  ;;  %v5445_v16 = vadd.f32 %v5444_v4, %v2339_v55  ;;  %v2252_v17 = vld [vmem:[%s16643_s14 + $0x3fb0] sm:$0xff]  ;;  %v5574_v18 = vadd.f32 %v5573_v6, %v2466_v63  ;;  %v5484_v19 = vadd.f32 %v5483_v7, %v2377_v0  ;;  %v2594_v20 = vld [vmem:[%s16643_s14 + $0x4a60] sm:$0xff]  ;;  %v5613_v21 = vadd.f32 %v5612_v9, %v2504_v2 }
 0x385   : > { %v5356_v22 = vadd.f32 %v5355_v10, %v2251_v5  ;;  %v2468_v23 = vld [vmem:[%s16643_s14 + $0x4670] sm:$0xff]  ;;  %v2379_v24 = vld [vmem:[%s16643_s14 + $0x43a8] sm:$0xff]  ;;  %v5703_v25 = vadd.f32 %v5702_v13, %v2593_v8  ;;  %v2506_v26 = vld [vmem:[%s16643_s14 + $0x47a0] sm:$0xff] }
 0x386   : > { %v5446_v27 = vadd.f32 %v5445_v16, %v2340_v3  ;;  %v2253_v28 = vld [vmem:[%s16643_s14 + $0x3fb8] sm:$0xff]  ;;  %v2254_v29 = vld [vmem:[%s16643_s14 + $0x3fc0] sm:$0xff]  ;;  %v5575_v30 = vadd.f32 %v5574_v18, %v2467_v11  ;;  %v5485_v31 = vadd.f32 %v5484_v19, %v2378_v12  ;;  %v2595_v32 = vld [vmem:[%s16643_s14 + $0x4a68] sm:$0xff]  ;;  %v5614_v33 = vadd.f32 %v5613_v21, %v2505_v14 }
 0x387   : > { %v5357_v34 = vadd.f32 %v5356_v22, %v2252_v17  ;;  %v2469_v35 = vld [vmem:[%s16643_s14 + $0x4678] sm:$0xff]  ;;  %v2380_v36 = vld [vmem:[%s16643_s14 + $0x43b0] sm:$0xff]  ;;  %v5704_v37 = vadd.f32 %v5703_v25, %v2594_v20  ;;  %v2507_v38 = vld [vmem:[%s16643_s14 + $0x47a8] sm:$0xff] }
 0x388   : > { %v5447_v39 = vadd.f32 %v5446_v27, %v2341_v15  ;;  %v2255_v40 = vld [vmem:[%s16643_s14 + $0x3fc8] sm:$0xff]  ;;  %v2470_v41 = vld [vmem:[%s16643_s14 + $0x4680] sm:$0xff]  ;;  %v5576_v42 = vadd.f32 %v5575_v30, %v2468_v23  ;;  %v5486_v43 = vadd.f32 %v5485_v31, %v2379_v24  ;;  %v2596_v44 = vld [vmem:[%s16643_s14 + $0x4a70] sm:$0xff]  ;;  %v5615_v45 = vadd.f32 %v5614_v33, %v2506_v26 }
 0x389   : > { %v5358_v46 = vadd.f32 %v5357_v34, %v2253_v28  ;;  %v2471_v47 = vld [vmem:[%s16643_s14 + $0x4688] sm:$0xff]  ;;  %v2381_v48 = vld [vmem:[%s16643_s14 + $0x43b8] sm:$0xff]  ;;  %v5705_v49 = vadd.f32 %v5704_v37, %v2595_v32  ;;  %v2508_v50 = vld [vmem:[%s16643_s14 + $0x47b0] sm:$0xff] }
 0x38a   : > { %5448 = vadd.xlane.f32.xlu1 %v5447_v39  ;;  %v5577_v51 = vadd.f32 %v5576_v42, %v2469_v35  ;;  %v2382_v52 = vld [vmem:[%s16643_s14 + $0x43c0] sm:$0xff]  ;;  %v5487_v53 = vadd.f32 %v5486_v43, %v2380_v36  ;;  %v2597_v54 = vld [vmem:[%s16643_s14 + $0x4a78] sm:$0xff]  ;;  %v5616_v55 = vadd.f32 %v5615_v45, %v2507_v38  ;;  %v2723_v60 = vld [vmem:[%s16643_s14 + $0x4e68] sm:$0xff] }
 0x38b   : > { %v2722_v56 = vld [vmem:[%s16643_s14 + $0x4e60] sm:$0xff]  ;;  %v5359_v57 = vadd.f32 %v5358_v46, %v2254_v29  ;;  %v5706_v58 = vadd.f32 %v5705_v49, %v2596_v44  ;;  %v2509_v59 = vld [vmem:[%s16643_s14 + $0x47b8] sm:$0xff]  ;;  %v2724_v61 = vld [vmem:[%s16643_s14 + $0x4e70] sm:$0xff] }
 0x38c   : > { %v2256_v62 = vld [vmem:[%s16643_s14 + $0x3fd0] sm:$0xff]  ;;  %v5578_v0 = vadd.f32 %v5577_v51, %v2470_v41  ;;  %v5488_v1 = vadd.f32 %v5487_v53, %v2381_v48  ;;  %v2598_v2 = vld [vmem:[%s16643_s14 + $0x4a80] sm:$0xff]  ;;  %v5617_v3 = vadd.f32 %v5616_v55, %v2508_v50  ;;  %v5835_v4 = vadd.f32 %v2723_v60, %v2722_v56  ;;  %v2383_v6 = vld [vmem:[%s16643_s14 + $0x43c8] sm:$0xff] }
 0x38d   : > { %v2472_v63 = vld [vmem:[%s16643_s14 + $0x4690] sm:$0xff]  ;;  %v5360_v5 = vadd.f32 %v5359_v57, %v2255_v40  ;;  %v5707_v7 = vadd.f32 %v5706_v58, %v2597_v54  ;;  %v2510_v8 = vld [vmem:[%s16643_s14 + $0x47c0] sm:$0xff]  ;;  %v2725_v9 = vld [vmem:[%s16643_s14 + $0x4e78] sm:$0xff] }
 0x38e   : > { %v2257_v10 = vld [vmem:[%s16643_s14 + $0x3fd8] sm:$0xff]  ;;  %v5579_v12 = vadd.f32 %v5578_v0, %v2471_v47  ;;  %v5489_v13 = vadd.f32 %v5488_v1, %v2382_v52  ;;  %v2599_v14 = vld [vmem:[%s16643_s14 + $0x4a88] sm:$0xff]  ;;  %v5618_v15 = vadd.f32 %v5617_v3, %v2509_v59  ;;  %v5836_v16 = vadd.f32 %v5835_v4, %v2724_v61  ;;  %v2384_v18 = vld [vmem:[%s16643_s14 + $0x43d0] sm:$0xff] }
 0x38f   : > { %v2473_v11 = vld [vmem:[%s16643_s14 + $0x4698] sm:$0xff]  ;;  %v5361_v17 = vadd.f32 %v5360_v5, %v2256_v62  ;;  %v5708_v19 = vadd.f32 %v5707_v7, %v2598_v2  ;;  %v2511_v20 = vld [vmem:[%s16643_s14 + $0x47c8] sm:$0xff]  ;;  %v2726_v21 = vld [vmem:[%s16643_s14 + $0x4e80] sm:$0xff] }
 0x390   : > { %v2258_v22 = vld [vmem:[%s16643_s14 + $0x3fe0] sm:$0xff]  ;;  %v5580_v24 = vadd.f32 %v5579_v12, %v2472_v63  ;;  %v5490_v25 = vadd.f32 %v5489_v13, %v2383_v6  ;;  %v2600_v26 = vld [vmem:[%s16643_s14 + $0x4a90] sm:$0xff]  ;;  %v5619_v27 = vadd.f32 %v5618_v15, %v2510_v8  ;;  %v5837_v28 = vadd.f32 %v5836_v16, %v2725_v9  ;;  %v2385_v30 = vld [vmem:[%s16643_s14 + $0x43d8] sm:$0xff] }
 0x391   : > { %v2474_v23 = vld [vmem:[%s16643_s14 + $0x46a0] sm:$0xff]  ;;  %v5362_v29 = vadd.f32 %v5361_v17, %v2257_v10  ;;  %v5709_v31 = vadd.f32 %v5708_v19, %v2599_v14  ;;  %v2512_v32 = vld [vmem:[%s16643_s14 + $0x47d0] sm:$0xff]  ;;  %v2727_v33 = vld [vmem:[%s16643_s14 + $0x4e88] sm:$0xff] }
 0x392   : > { %v2259_v34 = vld [vmem:[%s16643_s14 + $0x3fe8] sm:$0xff]  ;;  %v5581_v36 = vadd.f32 %v5580_v24, %v2473_v11  ;;  %v5491_v37 = vadd.f32 %v5490_v25, %v2384_v18  ;;  %v2601_v38 = vld [vmem:[%s16643_s14 + $0x4a98] sm:$0xff]  ;;  %v5620_v39 = vadd.f32 %v5619_v27, %v2511_v20  ;;  %v5838_v40 = vadd.f32 %v5837_v28, %v2726_v21  ;;  %v2386_v42 = vld [vmem:[%s16643_s14 + $0x43e0] sm:$0xff] }
 0x393   : > { %v2475_v35 = vld [vmem:[%s16643_s14 + $0x46a8] sm:$0xff]  ;;  %v5363_v41 = vadd.f32 %v5362_v29, %v2258_v22  ;;  %v5710_v43 = vadd.f32 %v5709_v31, %v2600_v26  ;;  %v2513_v44 = vld [vmem:[%s16643_s14 + $0x47d8] sm:$0xff]  ;;  %v2728_v45 = vld [vmem:[%s16643_s14 + $0x4e90] sm:$0xff] }
 0x394   : > { %v2260_v46 = vld [vmem:[%s16643_s14 + $0x3ff0] sm:$0xff]  ;;  %v5582_v48 = vadd.f32 %v5581_v36, %v2474_v23  ;;  %v5492_v49 = vadd.f32 %v5491_v37, %v2385_v30  ;;  %v2602_v50 = vld [vmem:[%s16643_s14 + $0x4aa0] sm:$0xff]  ;;  %v5621_v51 = vadd.f32 %v5620_v39, %v2512_v32  ;;  %v5839_v52 = vadd.f32 %v5838_v40, %v2727_v33  ;;  %v2387_v54 = vld [vmem:[%s16643_s14 + $0x43e8] sm:$0xff] }
 0x395   : > { %v2476_v47 = vld [vmem:[%s16643_s14 + $0x46b0] sm:$0xff]  ;;  %v5364_v53 = vadd.f32 %v5363_v41, %v2259_v34  ;;  %v5711_v55 = vadd.f32 %v5710_v43, %v2601_v38  ;;  %v2514_v56 = vld [vmem:[%s16643_s14 + $0x47e0] sm:$0xff]  ;;  %v2729_v57 = vld [vmem:[%s16643_s14 + $0x4e98] sm:$0xff] }
 0x396   : > { %v2261_v58 = vld [vmem:[%s16643_s14 + $0x3ff8] sm:$0xff]  ;;  %v5583_v60 = vadd.f32 %v5582_v48, %v2475_v35  ;;  %v5493_v61 = vadd.f32 %v5492_v49, %v2386_v42  ;;  %v2603_v62 = vld [vmem:[%s16643_s14 + $0x4aa8] sm:$0xff]  ;;  %v5622_v63 = vadd.f32 %v5621_v51, %v2513_v44  ;;  %v5840_v0 = vadd.f32 %v5839_v52, %v2728_v45  ;;  %v2388_v2 = vld [vmem:[%s16643_s14 + $0x43f0] sm:$0xff] }
 0x397   : > { %v2477_v59 = vld [vmem:[%s16643_s14 + $0x46b8] sm:$0xff]  ;;  %v5365_v1 = vadd.f32 %v5364_v53, %v2260_v46  ;;  %v5712_v3 = vadd.f32 %v5711_v55, %v2602_v50  ;;  %v2515_v4 = vld [vmem:[%s16643_s14 + $0x47e8] sm:$0xff]  ;;  %v2730_v5 = vld [vmem:[%s16643_s14 + $0x4ea0] sm:$0xff] }
 0x398   : > { %v2262_v6 = vld [vmem:[%s16643_s14 + $0x4000] sm:$0xff]  ;;  %v5584_v8 = vadd.f32 %v5583_v60, %v2476_v47  ;;  %v5494_v9 = vadd.f32 %v5493_v61, %v2387_v54  ;;  %v2604_v10 = vld [vmem:[%s16643_s14 + $0x4ab0] sm:$0xff]  ;;  %v5623_v11 = vadd.f32 %v5622_v63, %v2514_v56  ;;  %v5841_v12 = vadd.f32 %v5840_v0, %v2729_v57  ;;  %v2389_v14 = vld [vmem:[%s16643_s14 + $0x43f8] sm:$0xff] }
 0x399   : > { %v2478_v7 = vld [vmem:[%s16643_s14 + $0x46c0] sm:$0xff]  ;;  %v5366_v13 = vadd.f32 %v5365_v1, %v2261_v58  ;;  %v5713_v15 = vadd.f32 %v5712_v3, %v2603_v62  ;;  %v2516_v16 = vld [vmem:[%s16643_s14 + $0x47f0] sm:$0xff]  ;;  %v2731_v17 = vld [vmem:[%s16643_s14 + $0x4ea8] sm:$0xff] }
 0x39a   : > { %v2263_v18 = vld [vmem:[%s16643_s14 + $0x4008] sm:$0xff]  ;;  %v5585_v20 = vadd.f32 %v5584_v8, %v2477_v59  ;;  %v5495_v21 = vadd.f32 %v5494_v9, %v2388_v2  ;;  %v2605_v22 = vld [vmem:[%s16643_s14 + $0x4ab8] sm:$0xff]  ;;  %v5624_v23 = vadd.f32 %v5623_v11, %v2515_v4  ;;  %v5842_v24 = vadd.f32 %v5841_v12, %v2730_v5  ;;  %v2390_v26 = vld [vmem:[%s16643_s14 + $0x4400] sm:$0xff] }
 0x39b   : > { %v2479_v19 = vld [vmem:[%s16643_s14 + $0x46c8] sm:$0xff]  ;;  %v5367_v25 = vadd.f32 %v5366_v13, %v2262_v6  ;;  %v5714_v27 = vadd.f32 %v5713_v15, %v2604_v10  ;;  %v2517_v28 = vld [vmem:[%s16643_s14 + $0x47f8] sm:$0xff]  ;;  %v2732_v29 = vld [vmem:[%s16643_s14 + $0x4eb0] sm:$0xff] }
 0x39c   : > { %v2264_v30 = vld [vmem:[%s16643_s14 + $0x4010] sm:$0xff]  ;;  %v5586_v32 = vadd.f32 %v5585_v20, %v2478_v7  ;;  %v5496_v33 = vadd.f32 %v5495_v21, %v2389_v14  ;;  %v2606_v34 = vld [vmem:[%s16643_s14 + $0x4ac0] sm:$0xff]  ;;  %v5625_v35 = vadd.f32 %v5624_v23, %v2516_v16  ;;  %v5843_v36 = vadd.f32 %v5842_v24, %v2731_v17  ;;  %v2391_v38 = vld [vmem:[%s16643_s14 + $0x4408] sm:$0xff] }
 0x39d   : > { %v2480_v31 = vld [vmem:[%s16643_s14 + $0x46d0] sm:$0xff]  ;;  %v5368_v37 = vadd.f32 %v5367_v25, %v2263_v18  ;;  %v5715_v39 = vadd.f32 %v5714_v27, %v2605_v22  ;;  %v2518_v40 = vld [vmem:[%s16643_s14 + $0x4800] sm:$0xff]  ;;  %v2733_v41 = vld [vmem:[%s16643_s14 + $0x4eb8] sm:$0xff] }
 0x39e   : > { %v2265_v42 = vld [vmem:[%s16643_s14 + $0x4018] sm:$0xff]  ;;  %v5587_v44 = vadd.f32 %v5586_v32, %v2479_v19  ;;  %v5497_v45 = vadd.f32 %v5496_v33, %v2390_v26  ;;  %v2607_v46 = vld [vmem:[%s16643_s14 + $0x4ac8] sm:$0xff]  ;;  %v5626_v47 = vadd.f32 %v5625_v35, %v2517_v28  ;;  %v5844_v48 = vadd.f32 %v5843_v36, %v2732_v29  ;;  %v2392_v50 = vld [vmem:[%s16643_s14 + $0x4410] sm:$0xff] }
 0x39f   : > { %v2481_v43 = vld [vmem:[%s16643_s14 + $0x46d8] sm:$0xff]  ;;  %v5369_v49 = vadd.f32 %v5368_v37, %v2264_v30  ;;  %v5716_v51 = vadd.f32 %v5715_v39, %v2606_v34  ;;  %v2519_v52 = vld [vmem:[%s16643_s14 + $0x4808] sm:$0xff]  ;;  %v2734_v53 = vld [vmem:[%s16643_s14 + $0x4ec0] sm:$0xff] }
 0x3a0   : > { %v2482_v54 = vld [vmem:[%s16643_s14 + $0x46e0] sm:$0xff]  ;;  %v5588_v55 = vadd.f32 %v5587_v44, %v2480_v31  ;;  %v5498_v56 = vadd.f32 %v5497_v45, %v2391_v38  ;;  %v2608_v57 = vld [vmem:[%s16643_s14 + $0x4ad0] sm:$0xff]  ;;  %v5627_v58 = vadd.f32 %v5626_v47, %v2518_v40  ;;  %v5845_v59 = vadd.f32 %v5844_v48, %v2733_v41  ;;  %v2393_v61 = vld [vmem:[%s16643_s14 + $0x4418] sm:$0xff] }
 0x3a1   : > { %v5370_v60 = vadd.f32 %v5369_v49, %v2265_v42  ;;  %v5717_v62 = vadd.f32 %v5716_v51, %v2607_v46  ;;  %v2520_v63 = vld [vmem:[%s16643_s14 + $0x4810] sm:$0xff]  ;;  %v2735_v0 = vld [vmem:[%s16643_s14 + $0x4ec8] sm:$0xff]  ;;  %v2394_v3 = vld [vmem:[%s16643_s14 + $0x4420] sm:$0xff] }
 0x3a2   : > { %v2483_v1 = vld [vmem:[%s16643_s14 + $0x46e8] sm:$0xff]  ;;  %v5589_v2 = vadd.f32 %v5588_v55, %v2481_v43  ;;  %v5499_v4 = vadd.f32 %v5498_v56, %v2392_v50  ;;  %v2609_v5 = vld [vmem:[%s16643_s14 + $0x4ad8] sm:$0xff]  ;;  %v5628_v6 = vadd.f32 %v5627_v58, %v2519_v52  ;;  %v5846_v7 = vadd.f32 %v5845_v59, %v2734_v53  ;;  %v2484_v8 = vld [vmem:[%s16643_s14 + $0x46f0] sm:$0xff] }
 0x3a3   : > { %5371 = vadd.xlane.f32.xlu0 %v5370_v60  ;;  %v2610_v9 = vld [vmem:[%s16643_s14 + $0x4ae0] sm:$0xff]  ;;  %v5718_v10 = vadd.f32 %v5717_v62, %v2608_v57  ;;  %v2521_v11 = vld [vmem:[%s16643_s14 + $0x4818] sm:$0xff]  ;;  %v2736_v12 = vld [vmem:[%s16643_s14 + $0x4ed0] sm:$0xff] }
 0x3a4   : > { %v5590_v13 = vadd.f32 %v5589_v2, %v2482_v54  ;;  %v5500_v14 = vadd.f32 %v5499_v4, %v2393_v61  ;;  %v5629_v15 = vadd.f32 %v5628_v6, %v2520_v63  ;;  %v5847_v16 = vadd.f32 %v5846_v7, %v2735_v0  ;;  %v2646_v17 = vld [vmem:[%s16643_s14 + $0x4c00] sm:$0xff]  ;;  %v2647_v18 = vld [vmem:[%s16643_s14 + $0x4c08] sm:$0xff]  ;;  %v2648_v19 = vld [vmem:[%s16643_s14 + $0x4c10] sm:$0xff] }
 0x3a5   : > { %v2395_v20 = vld [vmem:[%s16643_s14 + $0x4428] sm:$0xff]  ;;  %v5719_v21 = vadd.f32 %v5718_v10, %v2609_v5  ;;  %v2522_v22 = vld [vmem:[%s16643_s14 + $0x4820] sm:$0xff]  ;;  %v2737_v23 = vld [vmem:[%s16643_s14 + $0x4ed8] sm:$0xff]  ;;  %v5758_v24 = vadd.f32 %v2647_v18, %v2646_v17 }
 0x3a6   : > { %v2485_v25 = vld [vmem:[%s16643_s14 + $0x46f8] sm:$0xff]  ;;  %v5591_v26 = vadd.f32 %v5590_v13, %v2483_v1  ;;  %v5501_v27 = vadd.f32 %v5500_v14, %v2394_v3  ;;  %v2611_v28 = vld [vmem:[%s16643_s14 + $0x4ae8] sm:$0xff]  ;;  %v5630_v29 = vadd.f32 %v5629_v15, %v2521_v11  ;;  %v5848_v30 = vadd.f32 %v5847_v16, %v2736_v12  ;;  %v2396_v32 = vld [vmem:[%s16643_s14 + $0x4430] sm:$0xff] }
 0x3a7   : > { %v2649_v31 = vld [vmem:[%s16643_s14 + $0x4c18] sm:$0xff]  ;;  %v5720_v33 = vadd.f32 %v5719_v21, %v2610_v9  ;;  %v2523_v34 = vld [vmem:[%s16643_s14 + $0x4828] sm:$0xff]  ;;  %v2738_v35 = vld [vmem:[%s16643_s14 + $0x4ee0] sm:$0xff]  ;;  %v5759_v36 = vadd.f32 %v5758_v24, %v2648_v19 }
 0x3a8   : > { %v2486_v37 = vld [vmem:[%s16643_s14 + $0x4700] sm:$0xff]  ;;  %v5592_v38 = vadd.f32 %v5591_v26, %v2484_v8  ;;  %v5502_v39 = vadd.f32 %v5501_v27, %v2395_v20  ;;  %v2612_v40 = vld [vmem:[%s16643_s14 + $0x4af0] sm:$0xff]  ;;  %v5631_v41 = vadd.f32 %v5630_v29, %v2522_v22  ;;  %v5849_v42 = vadd.f32 %v5848_v30, %v2737_v23  ;;  %v2397_v44 = vld [vmem:[%s16643_s14 + $0x4438] sm:$0xff] }
 0x3a9   : > { %v2650_v43 = vld [vmem:[%s16643_s14 + $0x4c20] sm:$0xff]  ;;  %v5721_v45 = vadd.f32 %v5720_v33, %v2611_v28  ;;  %v2524_v46 = vld [vmem:[%s16643_s14 + $0x4830] sm:$0xff]  ;;  %v2739_v47 = vld [vmem:[%s16643_s14 + $0x4ee8] sm:$0xff]  ;;  %v5760_v48 = vadd.f32 %v5759_v36, %v2649_v31 }
 0x3aa   : > { %v2487_v49 = vld [vmem:[%s16643_s14 + $0x4708] sm:$0xff]  ;;  %v5593_v50 = vadd.f32 %v5592_v38, %v2485_v25  ;;  %v5503_v51 = vadd.f32 %v5502_v39, %v2396_v32  ;;  %v2613_v52 = vld [vmem:[%s16643_s14 + $0x4af8] sm:$0xff]  ;;  %v5632_v53 = vadd.f32 %v5631_v41, %v2523_v34  ;;  %v5850_v54 = vadd.f32 %v5849_v42, %v2738_v35  ;;  %v2398_v56 = vld [vmem:[%s16643_s14 + $0x4440] sm:$0xff] }
 0x3ab   : > { %v2651_v55 = vld [vmem:[%s16643_s14 + $0x4c28] sm:$0xff]  ;;  %v5722_v57 = vadd.f32 %v5721_v45, %v2612_v40  ;;  %v2525_v58 = vld [vmem:[%s16643_s14 + $0x4838] sm:$0xff]  ;;  %v2740_v59 = vld [vmem:[%s16643_s14 + $0x4ef0] sm:$0xff]  ;;  %v5761_v60 = vadd.f32 %v5760_v48, %v2650_v43 }
 0x3ac   : > { %v2488_v61 = vld [vmem:[%s16643_s14 + $0x4710] sm:$0xff]  ;;  %v5594_v62 = vadd.f32 %v5593_v50, %v2486_v37  ;;  %v5504_v63 = vadd.f32 %v5503_v51, %v2397_v44  ;;  %v2614_v0 = vld [vmem:[%s16643_s14 + $0x4b00] sm:$0xff]  ;;  %v5633_v1 = vadd.f32 %v5632_v53, %v2524_v46  ;;  %v5851_v2 = vadd.f32 %v5850_v54, %v2739_v47  ;;  %v2399_v4 = vld [vmem:[%s16643_s14 + $0x4448] sm:$0xff] }
 0x3ad   : > { %v2652_v3 = vld [vmem:[%s16643_s14 + $0x4c30] sm:$0xff]  ;;  %v5723_v5 = vadd.f32 %v5722_v57, %v2613_v52  ;;  %v2526_v6 = vld [vmem:[%s16643_s14 + $0x4840] sm:$0xff]  ;;  %v2741_v7 = vld [vmem:[%s16643_s14 + $0x4ef8] sm:$0xff]  ;;  %v5762_v8 = vadd.f32 %v5761_v60, %v2651_v55 }
 0x3ae   : > { %v2489_v9 = vld [vmem:[%s16643_s14 + $0x4718] sm:$0xff]  ;;  %v5595_v10 = vadd.f32 %v5594_v62, %v2487_v49  ;;  %v5505_v11 = vadd.f32 %v5504_v63, %v2398_v56  ;;  %v2615_v12 = vld [vmem:[%s16643_s14 + $0x4b08] sm:$0xff]  ;;  %v5634_v13 = vadd.f32 %v5633_v1, %v2525_v58  ;;  %v5852_v14 = vadd.f32 %v5851_v2, %v2740_v59  ;;  %v2400_v16 = vld [vmem:[%s16643_s14 + $0x4450] sm:$0xff] }
 0x3af   : > { %v2653_v15 = vld [vmem:[%s16643_s14 + $0x4c38] sm:$0xff]  ;;  %v5724_v17 = vadd.f32 %v5723_v5, %v2614_v0  ;;  %v2527_v18 = vld [vmem:[%s16643_s14 + $0x4848] sm:$0xff]  ;;  %v2742_v19 = vld [vmem:[%s16643_s14 + $0x4f00] sm:$0xff]  ;;  %v5763_v20 = vadd.f32 %v5762_v8, %v2652_v3 }
 0x3b0   : > { %v2490_v21 = vld [vmem:[%s16643_s14 + $0x4720] sm:$0xff]  ;;  %v5596_v22 = vadd.f32 %v5595_v10, %v2488_v61  ;;  %v5506_v23 = vadd.f32 %v5505_v11, %v2399_v4  ;;  %v2616_v24 = vld [vmem:[%s16643_s14 + $0x4b10] sm:$0xff]  ;;  %v5635_v25 = vadd.f32 %v5634_v13, %v2526_v6  ;;  %v5853_v26 = vadd.f32 %v5852_v14, %v2741_v7  ;;  %v2401_v28 = vld [vmem:[%s16643_s14 + $0x4458] sm:$0xff] }
 0x3b1   : > { %v2654_v27 = vld [vmem:[%s16643_s14 + $0x4c40] sm:$0xff]  ;;  %v5725_v29 = vadd.f32 %v5724_v17, %v2615_v12  ;;  %v2528_v30 = vld [vmem:[%s16643_s14 + $0x4850] sm:$0xff]  ;;  %v2743_v31 = vld [vmem:[%s16643_s14 + $0x4f08] sm:$0xff]  ;;  %v5764_v32 = vadd.f32 %v5763_v20, %v2653_v15 }
 0x3b2   : > { %v2491_v33 = vld [vmem:[%s16643_s14 + $0x4728] sm:$0xff]  ;;  %v5597_v34 = vadd.f32 %v5596_v22, %v2489_v9  ;;  %v5507_v35 = vadd.f32 %v5506_v23, %v2400_v16  ;;  %v2617_v36 = vld [vmem:[%s16643_s14 + $0x4b18] sm:$0xff]  ;;  %v5636_v37 = vadd.f32 %v5635_v25, %v2527_v18  ;;  %v5854_v38 = vadd.f32 %v5853_v26, %v2742_v19  ;;  %v2402_v40 = vld [vmem:[%s16643_s14 + $0x4460] sm:$0xff] }
 0x3b3   : > { %v2655_v39 = vld [vmem:[%s16643_s14 + $0x4c48] sm:$0xff]  ;;  %v5726_v41 = vadd.f32 %v5725_v29, %v2616_v24  ;;  %v2529_v42 = vld [vmem:[%s16643_s14 + $0x4858] sm:$0xff]  ;;  %v2744_v43 = vld [vmem:[%s16643_s14 + $0x4f10] sm:$0xff]  ;;  %v5765_v44 = vadd.f32 %v5764_v32, %v2654_v27 }
 0x3b4   : > { %v2492_v45 = vld [vmem:[%s16643_s14 + $0x4730] sm:$0xff]  ;;  %v5598_v46 = vadd.f32 %v5597_v34, %v2490_v21  ;;  %v5508_v47 = vadd.f32 %v5507_v35, %v2401_v28  ;;  %v2618_v48 = vld [vmem:[%s16643_s14 + $0x4b20] sm:$0xff]  ;;  %v5637_v49 = vadd.f32 %v5636_v37, %v2528_v30  ;;  %v5855_v50 = vadd.f32 %v5854_v38, %v2743_v31  ;;  %v2403_v52 = vld [vmem:[%s16643_s14 + $0x4468] sm:$0xff] }
 0x3b5   : > { %v2656_v51 = vld [vmem:[%s16643_s14 + $0x4c50] sm:$0xff]  ;;  %v5727_v53 = vadd.f32 %v5726_v41, %v2617_v36  ;;  %v2530_v54 = vld [vmem:[%s16643_s14 + $0x4860] sm:$0xff]  ;;  %v2745_v55 = vld [vmem:[%s16643_s14 + $0x4f18] sm:$0xff]  ;;  %v5766_v56 = vadd.f32 %v5765_v44, %v2655_v39 }
 0x3b6   : > { %v2493_v57 = vld [vmem:[%s16643_s14 + $0x4738] sm:$0xff]  ;;  %v5599_v58 = vadd.f32 %v5598_v46, %v2491_v33  ;;  %v5509_v59 = vadd.f32 %v5508_v47, %v2402_v40  ;;  %v2619_v60 = vld [vmem:[%s16643_s14 + $0x4b28] sm:$0xff]  ;;  %v5638_v61 = vadd.f32 %v5637_v49, %v2529_v42  ;;  %v5856_v62 = vadd.f32 %v5855_v50, %v2744_v43  ;;  %v2404_v0 = vld [vmem:[%s16643_s14 + $0x4470] sm:$0xff] }
 0x3b7   : > { %v2657_v63 = vld [vmem:[%s16643_s14 + $0x4c58] sm:$0xff]  ;;  %v5728_v1 = vadd.f32 %v5727_v53, %v2618_v48  ;;  %v2531_v2 = vld [vmem:[%s16643_s14 + $0x4868] sm:$0xff]  ;;  %v2746_v3 = vld [vmem:[%s16643_s14 + $0x4f20] sm:$0xff]  ;;  %v5767_v4 = vadd.f32 %v5766_v56, %v2656_v51 }
 0x3b8   : > { %v5600_v5 = vadd.f32 %v5599_v58, %v2492_v45  ;;  %v5510_v6 = vadd.f32 %v5509_v59, %v2403_v52  ;;  %v2620_v7 = vld [vmem:[%s16643_s14 + $0x4b30] sm:$0xff]  ;;  %v5639_v8 = vadd.f32 %v5638_v61, %v2530_v54  ;;  %v5857_v9 = vadd.f32 %v5856_v62, %v2745_v55  ;;  %v2658_v10 = vld [vmem:[%s16643_s14 + $0x4c60] sm:$0xff]  ;;  %v2405_v11 = vld [vmem:[%s16643_s14 + $0x4478] sm:$0xff] }
 0x3b9   : > { %v5729_v12 = vadd.f32 %v5728_v1, %v2619_v60  ;;  %v2532_v13 = vld [vmem:[%s16643_s14 + $0x4870] sm:$0xff]  ;;  %v2747_v14 = vld [vmem:[%s16643_s14 + $0x4f28] sm:$0xff]  ;;  %v5768_v15 = vadd.f32 %v5767_v4, %v2657_v63  ;;  %v2406_v17 = vld [vmem:[%s16643_s14 + $0x4480] sm:$0xff] }
 0x3ba   : > { %v5601_v16 = vadd.f32 %v5600_v5, %v2493_v57  ;;  %v5511_v18 = vadd.f32 %v5510_v6, %v2404_v0  ;;  %v2621_v19 = vld [vmem:[%s16643_s14 + $0x4b38] sm:$0xff]  ;;  %v5640_v20 = vadd.f32 %v5639_v8, %v2531_v2  ;;  %v5858_v21 = vadd.f32 %v5857_v9, %v2746_v3  ;;  %v2659_v22 = vld [vmem:[%s16643_s14 + $0x4c68] sm:$0xff]  ;;  %v2748_v26 = vld [vmem:[%s16643_s14 + $0x4f30] sm:$0xff] }
 0x3bb   : > { %v2407_v23 = vld [vmem:[%s16643_s14 + $0x4488] sm:$0xff]  ;;  %v5730_v24 = vadd.f32 %v5729_v12, %v2620_v7  ;;  %v2533_v25 = vld [vmem:[%s16643_s14 + $0x4878] sm:$0xff]  ;;  %v5769_v27 = vadd.f32 %v5768_v15, %v2658_v10  ;;  %v2622_v29 = vld [vmem:[%s16643_s14 + $0x4b40] sm:$0xff] }
 0x3bc   : > { %5602 = vadd.xlane.f32.xlu1 %v5601_v16  ;;  %v5512_v28 = vadd.f32 %v5511_v18, %v2405_v11  ;;  %v2534_v30 = vld [vmem:[%s16643_s14 + $0x4880] sm:$0xff]  ;;  %v5641_v31 = vadd.f32 %v5640_v20, %v2532_v13  ;;  %v5859_v32 = vadd.f32 %v5858_v21, %v2747_v14  ;;  %v2660_v33 = vld [vmem:[%s16643_s14 + $0x4c70] sm:$0xff]  ;;  %v2749_v36 = vld [vmem:[%s16643_s14 + $0x4f38] sm:$0xff] }
 0x3bd   : > { %v2408_v34 = vld [vmem:[%s16643_s14 + $0x4490] sm:$0xff]  ;;  %v5731_v35 = vadd.f32 %v5730_v24, %v2621_v19  ;;  %v5770_v37 = vadd.f32 %v5769_v27, %v2659_v22  ;;  %v2874_v38 = vld [vmem:[%s16643_s14 + $0x5320] sm:$0xff]  ;;  %v2875_v39 = vld [vmem:[%s16643_s14 + $0x5328] sm:$0xff] }
 0x3be   : > { %v5513_v40 = vadd.f32 %v5512_v28, %v2406_v17  ;;  %v2623_v41 = vld [vmem:[%s16643_s14 + $0x4b48] sm:$0xff]  ;;  %v5642_v42 = vadd.f32 %v5641_v31, %v2533_v25  ;;  %v5860_v43 = vadd.f32 %v5859_v32, %v2748_v26  ;;  %v2661_v44 = vld [vmem:[%s16643_s14 + $0x4c78] sm:$0xff]  ;;  %v2876_v45 = vld [vmem:[%s16643_s14 + $0x5330] sm:$0xff]  ;;  %v5989_v46 = vadd.f32 %v2875_v39, %v2874_v38 }
 0x3bf   : > { %v5732_v47 = vadd.f32 %v5731_v35, %v2622_v29  ;;  %v2535_v48 = vld [vmem:[%s16643_s14 + $0x4888] sm:$0xff]  ;;  %v2750_v49 = vld [vmem:[%s16643_s14 + $0x4f40] sm:$0xff]  ;;  %v5771_v50 = vadd.f32 %v5770_v37, %v2660_v33  ;;  %v2877_v51 = vld [vmem:[%s16643_s14 + $0x5338] sm:$0xff] }
 0x3c0   : > { %v2409_v52 = vld [vmem:[%s16643_s14 + $0x4498] sm:$0xff]  ;;  %v5514_v53 = vadd.f32 %v5513_v40, %v2407_v23  ;;  %v2624_v54 = vld [vmem:[%s16643_s14 + $0x4b50] sm:$0xff]  ;;  %v5643_v55 = vadd.f32 %v5642_v42, %v2534_v30  ;;  %v5861_v56 = vadd.f32 %v5860_v43, %v2749_v36  ;;  %v2662_v57 = vld [vmem:[%s16643_s14 + $0x4c80] sm:$0xff]  ;;  %v5990_v58 = vadd.f32 %v5989_v46, %v2876_v45 }
 0x3c1   : > { %v5733_v59 = vadd.f32 %v5732_v47, %v2623_v41  ;;  %v2536_v60 = vld [vmem:[%s16643_s14 + $0x4890] sm:$0xff]  ;;  %v2751_v61 = vld [vmem:[%s16643_s14 + $0x4f48] sm:$0xff]  ;;  %v5772_v62 = vadd.f32 %v5771_v50, %v2661_v44  ;;  %v2878_v63 = vld [vmem:[%s16643_s14 + $0x5340] sm:$0xff] }
 0x3c2   : > { %v2410_v0 = vld [vmem:[%s16643_s14 + $0x44a0] sm:$0xff]  ;;  %v5515_v1 = vadd.f32 %v5514_v53, %v2408_v34  ;;  %v2625_v2 = vld [vmem:[%s16643_s14 + $0x4b58] sm:$0xff]  ;;  %v5644_v3 = vadd.f32 %v5643_v55, %v2535_v48  ;;  %v5862_v4 = vadd.f32 %v5861_v56, %v2750_v49  ;;  %v2663_v5 = vld [vmem:[%s16643_s14 + $0x4c88] sm:$0xff]  ;;  %v5991_v6 = vadd.f32 %v5990_v58, %v2877_v51 }
 0x3c3   : > { %v5734_v7 = vadd.f32 %v5733_v59, %v2624_v54  ;;  %v2537_v8 = vld [vmem:[%s16643_s14 + $0x4898] sm:$0xff]  ;;  %v2752_v9 = vld [vmem:[%s16643_s14 + $0x4f50] sm:$0xff]  ;;  %v5773_v10 = vadd.f32 %v5772_v62, %v2662_v57  ;;  %v2879_v11 = vld [vmem:[%s16643_s14 + $0x5348] sm:$0xff] }
 0x3c4   : > { %v2411_v12 = vld [vmem:[%s16643_s14 + $0x44a8] sm:$0xff]  ;;  %v5516_v13 = vadd.f32 %v5515_v1, %v2409_v52  ;;  %v2626_v14 = vld [vmem:[%s16643_s14 + $0x4b60] sm:$0xff]  ;;  %v5645_v15 = vadd.f32 %v5644_v3, %v2536_v60  ;;  %v5863_v16 = vadd.f32 %v5862_v4, %v2751_v61  ;;  %v2664_v17 = vld [vmem:[%s16643_s14 + $0x4c90] sm:$0xff]  ;;  %v5992_v18 = vadd.f32 %v5991_v6, %v2878_v63 }
 0x3c5   : > { %v5735_v19 = vadd.f32 %v5734_v7, %v2625_v2  ;;  %v2538_v20 = vld [vmem:[%s16643_s14 + $0x48a0] sm:$0xff]  ;;  %v2753_v21 = vld [vmem:[%s16643_s14 + $0x4f58] sm:$0xff]  ;;  %v5774_v22 = vadd.f32 %v5773_v10, %v2663_v5  ;;  %v2880_v23 = vld [vmem:[%s16643_s14 + $0x5350] sm:$0xff] }
 0x3c6   : > { %v2412_v24 = vld [vmem:[%s16643_s14 + $0x44b0] sm:$0xff]  ;;  %v5517_v25 = vadd.f32 %v5516_v13, %v2410_v0  ;;  %v2627_v26 = vld [vmem:[%s16643_s14 + $0x4b68] sm:$0xff]  ;;  %v5646_v27 = vadd.f32 %v5645_v15, %v2537_v8  ;;  %v5864_v28 = vadd.f32 %v5863_v16, %v2752_v9  ;;  %v2665_v29 = vld [vmem:[%s16643_s14 + $0x4c98] sm:$0xff]  ;;  %v5993_v30 = vadd.f32 %v5992_v18, %v2879_v11 }
 0x3c7   : > { %v5736_v31 = vadd.f32 %v5735_v19, %v2626_v14  ;;  %v2539_v32 = vld [vmem:[%s16643_s14 + $0x48a8] sm:$0xff]  ;;  %v2754_v33 = vld [vmem:[%s16643_s14 + $0x4f60] sm:$0xff]  ;;  %v5775_v34 = vadd.f32 %v5774_v22, %v2664_v17  ;;  %v2881_v35 = vld [vmem:[%s16643_s14 + $0x5358] sm:$0xff] }
 0x3c8   : > { %v2413_v36 = vld [vmem:[%s16643_s14 + $0x44b8] sm:$0xff]  ;;  %v5518_v37 = vadd.f32 %v5517_v25, %v2411_v12  ;;  %v2628_v38 = vld [vmem:[%s16643_s14 + $0x4b70] sm:$0xff]  ;;  %v5647_v39 = vadd.f32 %v5646_v27, %v2538_v20  ;;  %v5865_v40 = vadd.f32 %v5864_v28, %v2753_v21  ;;  %v2666_v41 = vld [vmem:[%s16643_s14 + $0x4ca0] sm:$0xff]  ;;  %v5994_v42 = vadd.f32 %v5993_v30, %v2880_v23 }
 0x3c9   : > { %v5737_v43 = vadd.f32 %v5736_v31, %v2627_v26  ;;  %v2540_v44 = vld [vmem:[%s16643_s14 + $0x48b0] sm:$0xff]  ;;  %v2755_v45 = vld [vmem:[%s16643_s14 + $0x4f68] sm:$0xff]  ;;  %v5776_v46 = vadd.f32 %v5775_v34, %v2665_v29  ;;  %v2882_v47 = vld [vmem:[%s16643_s14 + $0x5360] sm:$0xff] }
 0x3ca   : > { %v2414_v48 = vld [vmem:[%s16643_s14 + $0x44c0] sm:$0xff]  ;;  %v5519_v49 = vadd.f32 %v5518_v37, %v2412_v24  ;;  %v2629_v50 = vld [vmem:[%s16643_s14 + $0x4b78] sm:$0xff]  ;;  %v5648_v51 = vadd.f32 %v5647_v39, %v2539_v32  ;;  %v5866_v52 = vadd.f32 %v5865_v40, %v2754_v33  ;;  %v2667_v53 = vld [vmem:[%s16643_s14 + $0x4ca8] sm:$0xff]  ;;  %v5995_v54 = vadd.f32 %v5994_v42, %v2881_v35 }
 0x3cb   : > { %v5738_v55 = vadd.f32 %v5737_v43, %v2628_v38  ;;  %v2541_v56 = vld [vmem:[%s16643_s14 + $0x48b8] sm:$0xff]  ;;  %v2756_v57 = vld [vmem:[%s16643_s14 + $0x4f70] sm:$0xff]  ;;  %v5777_v58 = vadd.f32 %v5776_v46, %v2666_v41  ;;  %v2883_v59 = vld [vmem:[%s16643_s14 + $0x5368] sm:$0xff] }
 0x3cc   : > { %v2415_v60 = vld [vmem:[%s16643_s14 + $0x44c8] sm:$0xff]  ;;  %v5520_v61 = vadd.f32 %v5519_v49, %v2413_v36  ;;  %v2630_v62 = vld [vmem:[%s16643_s14 + $0x4b80] sm:$0xff]  ;;  %v5649_v63 = vadd.f32 %v5648_v51, %v2540_v44  ;;  %v5867_v0 = vadd.f32 %v5866_v52, %v2755_v45  ;;  %v2668_v1 = vld [vmem:[%s16643_s14 + $0x4cb0] sm:$0xff]  ;;  %v5996_v2 = vadd.f32 %v5995_v54, %v2882_v47 }
 0x3cd   : > { %v5739_v3 = vadd.f32 %v5738_v55, %v2629_v50  ;;  %v2542_v4 = vld [vmem:[%s16643_s14 + $0x48c0] sm:$0xff]  ;;  %v2757_v5 = vld [vmem:[%s16643_s14 + $0x4f78] sm:$0xff]  ;;  %v5778_v6 = vadd.f32 %v5777_v58, %v2667_v53  ;;  %v2884_v7 = vld [vmem:[%s16643_s14 + $0x5370] sm:$0xff] }
 0x3ce   : > { %v2416_v8 = vld [vmem:[%s16643_s14 + $0x44d0] sm:$0xff]  ;;  %v5521_v9 = vadd.f32 %v5520_v61, %v2414_v48  ;;  %v2631_v10 = vld [vmem:[%s16643_s14 + $0x4b88] sm:$0xff]  ;;  %v5650_v11 = vadd.f32 %v5649_v63, %v2541_v56  ;;  %v5868_v12 = vadd.f32 %v5867_v0, %v2756_v57  ;;  %v2669_v13 = vld [vmem:[%s16643_s14 + $0x4cb8] sm:$0xff]  ;;  %v5997_v14 = vadd.f32 %v5996_v2, %v2883_v59 }
 0x3cf   : > { %v5740_v15 = vadd.f32 %v5739_v3, %v2630_v62  ;;  %v2543_v16 = vld [vmem:[%s16643_s14 + $0x48c8] sm:$0xff]  ;;  %v2758_v17 = vld [vmem:[%s16643_s14 + $0x4f80] sm:$0xff]  ;;  %v5779_v18 = vadd.f32 %v5778_v6, %v2668_v1  ;;  %v2885_v19 = vld [vmem:[%s16643_s14 + $0x5378] sm:$0xff] }
 0x3d0   : > { %v2417_v20 = vld [vmem:[%s16643_s14 + $0x44d8] sm:$0xff]  ;;  %v5522_v21 = vadd.f32 %v5521_v9, %v2415_v60  ;;  %v2632_v22 = vld [vmem:[%s16643_s14 + $0x4b90] sm:$0xff]  ;;  %v5651_v23 = vadd.f32 %v5650_v11, %v2542_v4  ;;  %v5869_v24 = vadd.f32 %v5868_v12, %v2757_v5  ;;  %v2670_v25 = vld [vmem:[%s16643_s14 + $0x4cc0] sm:$0xff]  ;;  %v5998_v26 = vadd.f32 %v5997_v14, %v2884_v7 }
 0x3d1   : > { %v5741_v27 = vadd.f32 %v5740_v15, %v2631_v10  ;;  %v2544_v28 = vld [vmem:[%s16643_s14 + $0x48d0] sm:$0xff]  ;;  %v2759_v29 = vld [vmem:[%s16643_s14 + $0x4f88] sm:$0xff]  ;;  %v5780_v30 = vadd.f32 %v5779_v18, %v2669_v13  ;;  %v2886_v31 = vld [vmem:[%s16643_s14 + $0x5380] sm:$0xff] }
 0x3d2   : > { %v5523_v32 = vadd.f32 %v5522_v21, %v2416_v8  ;;  %v2633_v33 = vld [vmem:[%s16643_s14 + $0x4b98] sm:$0xff]  ;;  %v2634_v34 = vld [vmem:[%s16643_s14 + $0x4ba0] sm:$0xff]  ;;  %v5652_v35 = vadd.f32 %v5651_v23, %v2543_v16  ;;  %v5870_v36 = vadd.f32 %v5869_v24, %v2758_v17  ;;  %v2671_v37 = vld [vmem:[%s16643_s14 + $0x4cc8] sm:$0xff]  ;;  %v5999_v38 = vadd.f32 %v5998_v26, %v2885_v19 }
 0x3d3   : > { %v5742_v39 = vadd.f32 %v5741_v27, %v2632_v22  ;;  %v2545_v40 = vld [vmem:[%s16643_s14 + $0x48d8] sm:$0xff]  ;;  %v2760_v41 = vld [vmem:[%s16643_s14 + $0x4f90] sm:$0xff]  ;;  %v5781_v42 = vadd.f32 %v5780_v30, %v2670_v25  ;;  %v2887_v43 = vld [vmem:[%s16643_s14 + $0x5388] sm:$0xff] }
 0x3d4   : > { %v5524_v44 = vadd.f32 %v5523_v32, %v2417_v20  ;;  %v2635_v45 = vld [vmem:[%s16643_s14 + $0x4ba8] sm:$0xff]  ;;  %v2546_v46 = vld [vmem:[%s16643_s14 + $0x48e0] sm:$0xff]  ;;  %v5653_v47 = vadd.f32 %v5652_v35, %v2544_v28  ;;  %v5871_v48 = vadd.f32 %v5870_v36, %v2759_v29  ;;  %v2672_v49 = vld [vmem:[%s16643_s14 + $0x4cd0] sm:$0xff]  ;;  %v6000_v50 = vadd.f32 %v5999_v38, %v2886_v31 }
 0x3d5   : > { %v5743_v51 = vadd.f32 %v5742_v39, %v2633_v33  ;;  %v2547_v52 = vld [vmem:[%s16643_s14 + $0x48e8] sm:$0xff]  ;;  %v2761_v53 = vld [vmem:[%s16643_s14 + $0x4f98] sm:$0xff]  ;;  %v5782_v54 = vadd.f32 %v5781_v42, %v2671_v37  ;;  %v2888_v55 = vld [vmem:[%s16643_s14 + $0x5390] sm:$0xff] }
 0x3d6   : > { %5525 = vadd.xlane.f32.xlu0 %v5524_v44  ;;  %v5654_v56 = vadd.f32 %v5653_v47, %v2545_v40  ;;  %v2762_v57 = vld [vmem:[%s16643_s14 + $0x4fa0] sm:$0xff]  ;;  %v5872_v58 = vadd.f32 %v5871_v48, %v2760_v41  ;;  %v2673_v59 = vld [vmem:[%s16643_s14 + $0x4cd8] sm:$0xff]  ;;  %v6001_v60 = vadd.f32 %v6000_v50, %v2887_v43  ;;  %v2799_v1 = vld [vmem:[%s16643_s14 + $0x50c8] sm:$0xff] }
 0x3d7   : > { %v2798_v61 = vld [vmem:[%s16643_s14 + $0x50c0] sm:$0xff]  ;;  %v5744_v62 = vadd.f32 %v5743_v51, %v2634_v34  ;;  %v5783_v63 = vadd.f32 %v5782_v54, %v2672_v49  ;;  %v2889_v0 = vld [vmem:[%s16643_s14 + $0x5398] sm:$0xff]  ;;  %v2800_v2 = vld [vmem:[%s16643_s14 + $0x50d0] sm:$0xff] }
 0x3d8   : > { %v2636_v3 = vld [vmem:[%s16643_s14 + $0x4bb0] sm:$0xff]  ;;  %v5655_v5 = vadd.f32 %v5654_v56, %v2546_v46  ;;  %v5873_v6 = vadd.f32 %v5872_v58, %v2761_v53  ;;  %v2674_v7 = vld [vmem:[%s16643_s14 + $0x4ce0] sm:$0xff]  ;;  %v6002_v8 = vadd.f32 %v6001_v60, %v2888_v55  ;;  %v5912_v9 = vadd.f32 %v2799_v1, %v2798_v61  ;;  %v2763_v11 = vld [vmem:[%s16643_s14 + $0x4fa8] sm:$0xff] }
 0x3d9   : > { %v2548_v4 = vld [vmem:[%s16643_s14 + $0x48f0] sm:$0xff]  ;;  %v5745_v10 = vadd.f32 %v5744_v62, %v2635_v45  ;;  %v5784_v12 = vadd.f32 %v5783_v63, %v2673_v59  ;;  %v2890_v13 = vld [vmem:[%s16643_s14 + $0x53a0] sm:$0xff]  ;;  %v2801_v14 = vld [vmem:[%s16643_s14 + $0x50d8] sm:$0xff] }
 0x3da   : > { %v2637_v15 = vld [vmem:[%s16643_s14 + $0x4bb8] sm:$0xff]  ;;  %v5656_v17 = vadd.f32 %v5655_v5, %v2547_v52  ;;  %v5874_v18 = vadd.f32 %v5873_v6, %v2762_v57  ;;  %v2675_v19 = vld [vmem:[%s16643_s14 + $0x4ce8] sm:$0xff]  ;;  %v6003_v20 = vadd.f32 %v6002_v8, %v2889_v0  ;;  %v5913_v21 = vadd.f32 %v5912_v9, %v2800_v2  ;;  %v2764_v23 = vld [vmem:[%s16643_s14 + $0x4fb0] sm:$0xff] }
 0x3db   : > { %v2549_v16 = vld [vmem:[%s16643_s14 + $0x48f8] sm:$0xff]  ;;  %v5746_v22 = vadd.f32 %v5745_v10, %v2636_v3  ;;  %v5785_v24 = vadd.f32 %v5784_v12, %v2674_v7  ;;  %v2891_v25 = vld [vmem:[%s16643_s14 + $0x53a8] sm:$0xff]  ;;  %v2802_v26 = vld [vmem:[%s16643_s14 + $0x50e0] sm:$0xff] }
 0x3dc   : > { %v2638_v27 = vld [vmem:[%s16643_s14 + $0x4bc0] sm:$0xff]  ;;  %v5657_v29 = vadd.f32 %v5656_v17, %v2548_v4  ;;  %v5875_v30 = vadd.f32 %v5874_v18, %v2763_v11  ;;  %v2676_v31 = vld [vmem:[%s16643_s14 + $0x4cf0] sm:$0xff]  ;;  %v6004_v32 = vadd.f32 %v6003_v20, %v2890_v13  ;;  %v5914_v33 = vadd.f32 %v5913_v21, %v2801_v14  ;;  %v2765_v35 = vld [vmem:[%s16643_s14 + $0x4fb8] sm:$0xff] }
 0x3dd   : > { %v2550_v28 = vld [vmem:[%s16643_s14 + $0x4900] sm:$0xff]  ;;  %v5747_v34 = vadd.f32 %v5746_v22, %v2637_v15  ;;  %v5786_v36 = vadd.f32 %v5785_v24, %v2675_v19  ;;  %v2892_v37 = vld [vmem:[%s16643_s14 + $0x53b0] sm:$0xff]  ;;  %v2803_v38 = vld [vmem:[%s16643_s14 + $0x50e8] sm:$0xff] }
 0x3de   : > { %v2639_v39 = vld [vmem:[%s16643_s14 + $0x4bc8] sm:$0xff]  ;;  %v5658_v41 = vadd.f32 %v5657_v29, %v2549_v16  ;;  %v5876_v42 = vadd.f32 %v5875_v30, %v2764_v23  ;;  %v2677_v43 = vld [vmem:[%s16643_s14 + $0x4cf8] sm:$0xff]  ;;  %v6005_v44 = vadd.f32 %v6004_v32, %v2891_v25  ;;  %v5915_v45 = vadd.f32 %v5914_v33, %v2802_v26  ;;  %v2766_v47 = vld [vmem:[%s16643_s14 + $0x4fc0] sm:$0xff] }
 0x3df   : > { %v2551_v40 = vld [vmem:[%s16643_s14 + $0x4908] sm:$0xff]  ;;  %v5748_v46 = vadd.f32 %v5747_v34, %v2638_v27  ;;  %v5787_v48 = vadd.f32 %v5786_v36, %v2676_v31  ;;  %v2893_v49 = vld [vmem:[%s16643_s14 + $0x53b8] sm:$0xff]  ;;  %v2804_v50 = vld [vmem:[%s16643_s14 + $0x50f0] sm:$0xff] }
 0x3e0   : > { %v2640_v51 = vld [vmem:[%s16643_s14 + $0x4bd0] sm:$0xff]  ;;  %v5659_v53 = vadd.f32 %v5658_v41, %v2550_v28  ;;  %v5877_v54 = vadd.f32 %v5876_v42, %v2765_v35  ;;  %v2678_v55 = vld [vmem:[%s16643_s14 + $0x4d00] sm:$0xff]  ;;  %v6006_v56 = vadd.f32 %v6005_v44, %v2892_v37  ;;  %v5916_v57 = vadd.f32 %v5915_v45, %v2803_v38  ;;  %v2767_v59 = vld [vmem:[%s16643_s14 + $0x4fc8] sm:$0xff] }
 0x3e1   : > { %v2552_v52 = vld [vmem:[%s16643_s14 + $0x4910] sm:$0xff]  ;;  %v5749_v58 = vadd.f32 %v5748_v46, %v2639_v39  ;;  %v5788_v60 = vadd.f32 %v5787_v48, %v2677_v43  ;;  %v2894_v61 = vld [vmem:[%s16643_s14 + $0x53c0] sm:$0xff]  ;;  %v2805_v62 = vld [vmem:[%s16643_s14 + $0x50f8] sm:$0xff] }
 0x3e2   : > { %v2641_v63 = vld [vmem:[%s16643_s14 + $0x4bd8] sm:$0xff]  ;;  %v5660_v1 = vadd.f32 %v5659_v53, %v2551_v40  ;;  %v5878_v2 = vadd.f32 %v5877_v54, %v2766_v47  ;;  %v2679_v3 = vld [vmem:[%s16643_s14 + $0x4d08] sm:$0xff]  ;;  %v6007_v4 = vadd.f32 %v6006_v56, %v2893_v49  ;;  %v5917_v5 = vadd.f32 %v5916_v57, %v2804_v50  ;;  %v2768_v7 = vld [vmem:[%s16643_s14 + $0x4fd0] sm:$0xff] }
 0x3e3   : > { %v2553_v0 = vld [vmem:[%s16643_s14 + $0x4918] sm:$0xff]  ;;  %v5750_v6 = vadd.f32 %v5749_v58, %v2640_v51  ;;  %v5789_v8 = vadd.f32 %v5788_v60, %v2678_v55  ;;  %v2895_v9 = vld [vmem:[%s16643_s14 + $0x53c8] sm:$0xff]  ;;  %v2806_v10 = vld [vmem:[%s16643_s14 + $0x5100] sm:$0xff] }
 0x3e4   : > { %v2642_v11 = vld [vmem:[%s16643_s14 + $0x4be0] sm:$0xff]  ;;  %v5661_v13 = vadd.f32 %v5660_v1, %v2552_v52  ;;  %v5879_v14 = vadd.f32 %v5878_v2, %v2767_v59  ;;  %v2680_v15 = vld [vmem:[%s16643_s14 + $0x4d10] sm:$0xff]  ;;  %v6008_v16 = vadd.f32 %v6007_v4, %v2894_v61  ;;  %v5918_v17 = vadd.f32 %v5917_v5, %v2805_v62  ;;  %v2769_v19 = vld [vmem:[%s16643_s14 + $0x4fd8] sm:$0xff] }
 0x3e5   : > { %v2554_v12 = vld [vmem:[%s16643_s14 + $0x4920] sm:$0xff]  ;;  %v5751_v18 = vadd.f32 %v5750_v6, %v2641_v63  ;;  %v5790_v20 = vadd.f32 %v5789_v8, %v2679_v3  ;;  %v2896_v21 = vld [vmem:[%s16643_s14 + $0x53d0] sm:$0xff]  ;;  %v2807_v22 = vld [vmem:[%s16643_s14 + $0x5108] sm:$0xff] }
 0x3e6   : > { %v2643_v23 = vld [vmem:[%s16643_s14 + $0x4be8] sm:$0xff]  ;;  %v5662_v25 = vadd.f32 %v5661_v13, %v2553_v0  ;;  %v5880_v26 = vadd.f32 %v5879_v14, %v2768_v7  ;;  %v2681_v27 = vld [vmem:[%s16643_s14 + $0x4d18] sm:$0xff]  ;;  %v6009_v28 = vadd.f32 %v6008_v16, %v2895_v9  ;;  %v5919_v29 = vadd.f32 %v5918_v17, %v2806_v10  ;;  %v2770_v31 = vld [vmem:[%s16643_s14 + $0x4fe0] sm:$0xff] }
 0x3e7   : > { %v2555_v24 = vld [vmem:[%s16643_s14 + $0x4928] sm:$0xff]  ;;  %v5752_v30 = vadd.f32 %v5751_v18, %v2642_v11  ;;  %v5791_v32 = vadd.f32 %v5790_v20, %v2680_v15  ;;  %v2897_v33 = vld [vmem:[%s16643_s14 + $0x53d8] sm:$0xff]  ;;  %v2808_v34 = vld [vmem:[%s16643_s14 + $0x5110] sm:$0xff] }
 0x3e8   : > { %v2644_v35 = vld [vmem:[%s16643_s14 + $0x4bf0] sm:$0xff]  ;;  %v5663_v37 = vadd.f32 %v5662_v25, %v2554_v12  ;;  %v5881_v38 = vadd.f32 %v5880_v26, %v2769_v19  ;;  %v2682_v39 = vld [vmem:[%s16643_s14 + $0x4d20] sm:$0xff]  ;;  %v6010_v40 = vadd.f32 %v6009_v28, %v2896_v21  ;;  %v5920_v41 = vadd.f32 %v5919_v29, %v2807_v22  ;;  %v2771_v43 = vld [vmem:[%s16643_s14 + $0x4fe8] sm:$0xff] }
 0x3e9   : > { %v2556_v36 = vld [vmem:[%s16643_s14 + $0x4930] sm:$0xff]  ;;  %v5753_v42 = vadd.f32 %v5752_v30, %v2643_v23  ;;  %v5792_v44 = vadd.f32 %v5791_v32, %v2681_v27  ;;  %v2898_v45 = vld [vmem:[%s16643_s14 + $0x53e0] sm:$0xff]  ;;  %v2809_v46 = vld [vmem:[%s16643_s14 + $0x5118] sm:$0xff] }
 0x3ea   : > { %v2645_v47 = vld [vmem:[%s16643_s14 + $0x4bf8] sm:$0xff]  ;;  %v5664_v49 = vadd.f32 %v5663_v37, %v2555_v24  ;;  %v5882_v50 = vadd.f32 %v5881_v38, %v2770_v31  ;;  %v2683_v51 = vld [vmem:[%s16643_s14 + $0x4d28] sm:$0xff]  ;;  %v6011_v52 = vadd.f32 %v6010_v40, %v2897_v33  ;;  %v5921_v53 = vadd.f32 %v5920_v41, %v2808_v34  ;;  %v2772_v55 = vld [vmem:[%s16643_s14 + $0x4ff0] sm:$0xff] }
 0x3eb   : > { %v2557_v48 = vld [vmem:[%s16643_s14 + $0x4938] sm:$0xff]  ;;  %v5754_v54 = vadd.f32 %v5753_v42, %v2644_v35  ;;  %v5793_v56 = vadd.f32 %v5792_v44, %v2682_v39  ;;  %v2899_v57 = vld [vmem:[%s16643_s14 + $0x53e8] sm:$0xff]  ;;  %v2810_v58 = vld [vmem:[%s16643_s14 + $0x5120] sm:$0xff] }
 0x3ec   : > { %v2558_v59 = vld [vmem:[%s16643_s14 + $0x4940] sm:$0xff]  ;;  %v5665_v60 = vadd.f32 %v5664_v49, %v2556_v36  ;;  %v5883_v61 = vadd.f32 %v5882_v50, %v2771_v43  ;;  %v2684_v62 = vld [vmem:[%s16643_s14 + $0x4d30] sm:$0xff]  ;;  %v6012_v63 = vadd.f32 %v6011_v52, %v2898_v45  ;;  %v5922_v0 = vadd.f32 %v5921_v53, %v2809_v46  ;;  %v2773_v2 = vld [vmem:[%s16643_s14 + $0x4ff8] sm:$0xff] }
 0x3ed   : > { %v5755_v1 = vadd.f32 %v5754_v54, %v2645_v47  ;;  %v5794_v3 = vadd.f32 %v5793_v56, %v2683_v51  ;;  %v2900_v4 = vld [vmem:[%s16643_s14 + $0x53f0] sm:$0xff]  ;;  %v2811_v5 = vld [vmem:[%s16643_s14 + $0x5128] sm:$0xff]  ;;  %v2774_v8 = vld [vmem:[%s16643_s14 + $0x5000] sm:$0xff] }
 0x3ee   : > { %v2559_v6 = vld [vmem:[%s16643_s14 + $0x4948] sm:$0xff]  ;;  %v5666_v7 = vadd.f32 %v5665_v60, %v2557_v48  ;;  %v5884_v9 = vadd.f32 %v5883_v61, %v2772_v55  ;;  %v2685_v10 = vld [vmem:[%s16643_s14 + $0x4d38] sm:$0xff]  ;;  %v6013_v11 = vadd.f32 %v6012_v63, %v2899_v57  ;;  %v5923_v12 = vadd.f32 %v5922_v0, %v2810_v58  ;;  %v2560_v13 = vld [vmem:[%s16643_s14 + $0x4950] sm:$0xff] }
 0x3ef   : > { %5756 = vadd.xlane.f32.xlu1 %v5755_v1  ;;  %v2686_v14 = vld [vmem:[%s16643_s14 + $0x4d40] sm:$0xff]  ;;  %v5795_v15 = vadd.f32 %v5794_v3, %v2684_v62  ;;  %v2901_v16 = vld [vmem:[%s16643_s14 + $0x53f8] sm:$0xff]  ;;  %v2812_v17 = vld [vmem:[%s16643_s14 + $0x5130] sm:$0xff] }
 0x3f0   : > { %v5667_v18 = vadd.f32 %v5666_v7, %v2558_v59  ;;  %v5885_v19 = vadd.f32 %v5884_v9, %v2773_v2  ;;  %v6014_v20 = vadd.f32 %v6013_v11, %v2900_v4  ;;  %v5924_v21 = vadd.f32 %v5923_v12, %v2811_v5  ;;  %v3026_v22 = vld [vmem:[%s16643_s14 + $0x57e0] sm:$0xff]  ;;  %v3027_v23 = vld [vmem:[%s16643_s14 + $0x57e8] sm:$0xff]  ;;  %v3028_v24 = vld [vmem:[%s16643_s14 + $0x57f0] sm:$0xff] }
 0x3f1   : > { %v2775_v25 = vld [vmem:[%s16643_s14 + $0x5008] sm:$0xff]  ;;  %v5796_v26 = vadd.f32 %v5795_v15, %v2685_v10  ;;  %v2902_v27 = vld [vmem:[%s16643_s14 + $0x5400] sm:$0xff]  ;;  %v2813_v28 = vld [vmem:[%s16643_s14 + $0x5138] sm:$0xff]  ;;  %v6143_v29 = vadd.f32 %v3027_v23, %v3026_v22 }
 0x3f2   : > { %v2561_v30 = vld [vmem:[%s16643_s14 + $0x4958] sm:$0xff]  ;;  %v5668_v31 = vadd.f32 %v5667_v18, %v2559_v6  ;;  %v5886_v32 = vadd.f32 %v5885_v19, %v2774_v8  ;;  %v2687_v33 = vld [vmem:[%s16643_s14 + $0x4d48] sm:$0xff]  ;;  %v6015_v34 = vadd.f32 %v6014_v20, %v2901_v16  ;;  %v5925_v35 = vadd.f32 %v5924_v21, %v2812_v17  ;;  %v2776_v37 = vld [vmem:[%s16643_s14 + $0x5010] sm:$0xff] }
 0x3f3   : > { %v3029_v36 = vld [vmem:[%s16643_s14 + $0x57f8] sm:$0xff]  ;;  %v5797_v38 = vadd.f32 %v5796_v26, %v2686_v14  ;;  %v2903_v39 = vld [vmem:[%s16643_s14 + $0x5408] sm:$0xff]  ;;  %v2814_v40 = vld [vmem:[%s16643_s14 + $0x5140] sm:$0xff]  ;;  %v6144_v41 = vadd.f32 %v6143_v29, %v3028_v24 }
 0x3f4   : > { %v2562_v42 = vld [vmem:[%s16643_s14 + $0x4960] sm:$0xff]  ;;  %v5669_v43 = vadd.f32 %v5668_v31, %v2560_v13  ;;  %v5887_v44 = vadd.f32 %v5886_v32, %v2775_v25  ;;  %v2688_v45 = vld [vmem:[%s16643_s14 + $0x4d50] sm:$0xff]  ;;  %v6016_v46 = vadd.f32 %v6015_v34, %v2902_v27  ;;  %v5926_v47 = vadd.f32 %v5925_v35, %v2813_v28  ;;  %v2777_v49 = vld [vmem:[%s16643_s14 + $0x5018] sm:$0xff] }
 0x3f5   : > { %v3030_v48 = vld [vmem:[%s16643_s14 + $0x5800] sm:$0xff]  ;;  %v5798_v50 = vadd.f32 %v5797_v38, %v2687_v33  ;;  %v2904_v51 = vld [vmem:[%s16643_s14 + $0x5410] sm:$0xff]  ;;  %v2815_v52 = vld [vmem:[%s16643_s14 + $0x5148] sm:$0xff]  ;;  %v6145_v53 = vadd.f32 %v6144_v41, %v3029_v36 }
 0x3f6   : > { %v2563_v54 = vld [vmem:[%s16643_s14 + $0x4968] sm:$0xff]  ;;  %v5670_v55 = vadd.f32 %v5669_v43, %v2561_v30  ;;  %v5888_v56 = vadd.f32 %v5887_v44, %v2776_v37  ;;  %v2689_v57 = vld [vmem:[%s16643_s14 + $0x4d58] sm:$0xff]  ;;  %v6017_v58 = vadd.f32 %v6016_v46, %v2903_v39  ;;  %v5927_v59 = vadd.f32 %v5926_v47, %v2814_v40  ;;  %v2778_v61 = vld [vmem:[%s16643_s14 + $0x5020] sm:$0xff] }
 0x3f7   : > { %v3031_v60 = vld [vmem:[%s16643_s14 + $0x5808] sm:$0xff]  ;;  %v5799_v62 = vadd.f32 %v5798_v50, %v2688_v45  ;;  %v2905_v63 = vld [vmem:[%s16643_s14 + $0x5418] sm:$0xff]  ;;  %v2816_v0 = vld [vmem:[%s16643_s14 + $0x5150] sm:$0xff]  ;;  %v6146_v1 = vadd.f32 %v6145_v53, %v3030_v48 }
 0x3f8   : > { %v2564_v2 = vld [vmem:[%s16643_s14 + $0x4970] sm:$0xff]  ;;  %v5671_v3 = vadd.f32 %v5670_v55, %v2562_v42  ;;  %v5889_v4 = vadd.f32 %v5888_v56, %v2777_v49  ;;  %v2690_v5 = vld [vmem:[%s16643_s14 + $0x4d60] sm:$0xff]  ;;  %v6018_v6 = vadd.f32 %v6017_v58, %v2904_v51  ;;  %v5928_v7 = vadd.f32 %v5927_v59, %v2815_v52  ;;  %v2779_v9 = vld [vmem:[%s16643_s14 + $0x5028] sm:$0xff] }
 0x3f9   : > { %v3032_v8 = vld [vmem:[%s16643_s14 + $0x5810] sm:$0xff]  ;;  %v5800_v10 = vadd.f32 %v5799_v62, %v2689_v57  ;;  %v2906_v11 = vld [vmem:[%s16643_s14 + $0x5420] sm:$0xff]  ;;  %v2817_v12 = vld [vmem:[%s16643_s14 + $0x5158] sm:$0xff]  ;;  %v6147_v13 = vadd.f32 %v6146_v1, %v3031_v60 }
 0x3fa   : > { %v2565_v14 = vld [vmem:[%s16643_s14 + $0x4978] sm:$0xff]  ;;  %v5672_v15 = vadd.f32 %v5671_v3, %v2563_v54  ;;  %v5890_v16 = vadd.f32 %v5889_v4, %v2778_v61  ;;  %v2691_v17 = vld [vmem:[%s16643_s14 + $0x4d68] sm:$0xff]  ;;  %v6019_v18 = vadd.f32 %v6018_v6, %v2905_v63  ;;  %v5929_v19 = vadd.f32 %v5928_v7, %v2816_v0  ;;  %v2780_v21 = vld [vmem:[%s16643_s14 + $0x5030] sm:$0xff] }
 0x3fb   : > { %v3033_v20 = vld [vmem:[%s16643_s14 + $0x5818] sm:$0xff]  ;;  %v5801_v22 = vadd.f32 %v5800_v10, %v2690_v5  ;;  %v2907_v23 = vld [vmem:[%s16643_s14 + $0x5428] sm:$0xff]  ;;  %v2818_v24 = vld [vmem:[%s16643_s14 + $0x5160] sm:$0xff]  ;;  %v6148_v25 = vadd.f32 %v6147_v13, %v3032_v8 }
 0x3fc   : > { %v2566_v26 = vld [vmem:[%s16643_s14 + $0x4980] sm:$0xff]  ;;  %v5673_v27 = vadd.f32 %v5672_v15, %v2564_v2  ;;  %v5891_v28 = vadd.f32 %v5890_v16, %v2779_v9  ;;  %v2692_v29 = vld [vmem:[%s16643_s14 + $0x4d70] sm:$0xff]  ;;  %v6020_v30 = vadd.f32 %v6019_v18, %v2906_v11  ;;  %v5930_v31 = vadd.f32 %v5929_v19, %v2817_v12  ;;  %v2781_v33 = vld [vmem:[%s16643_s14 + $0x5038] sm:$0xff] }
 0x3fd   : > { %v3034_v32 = vld [vmem:[%s16643_s14 + $0x5820] sm:$0xff]  ;;  %v5802_v34 = vadd.f32 %v5801_v22, %v2691_v17  ;;  %v2908_v35 = vld [vmem:[%s16643_s14 + $0x5430] sm:$0xff]  ;;  %v2819_v36 = vld [vmem:[%s16643_s14 + $0x5168] sm:$0xff]  ;;  %v6149_v37 = vadd.f32 %v6148_v25, %v3033_v20 }
 0x3fe   : > { %v2567_v38 = vld [vmem:[%s16643_s14 + $0x4988] sm:$0xff]  ;;  %v5674_v39 = vadd.f32 %v5673_v27, %v2565_v14  ;;  %v5892_v40 = vadd.f32 %v5891_v28, %v2780_v21  ;;  %v2693_v41 = vld [vmem:[%s16643_s14 + $0x4d78] sm:$0xff]  ;;  %v6021_v42 = vadd.f32 %v6020_v30, %v2907_v23  ;;  %v5931_v43 = vadd.f32 %v5930_v31, %v2818_v24  ;;  %v2782_v45 = vld [vmem:[%s16643_s14 + $0x5040] sm:$0xff] }
 0x3ff   : > { %v3035_v44 = vld [vmem:[%s16643_s14 + $0x5828] sm:$0xff]  ;;  %v5803_v46 = vadd.f32 %v5802_v34, %v2692_v29  ;;  %v2909_v47 = vld [vmem:[%s16643_s14 + $0x5438] sm:$0xff]  ;;  %v2820_v48 = vld [vmem:[%s16643_s14 + $0x5170] sm:$0xff]  ;;  %v6150_v49 = vadd.f32 %v6149_v37, %v3034_v32 }
 0x400   : > { %v2568_v50 = vld [vmem:[%s16643_s14 + $0x4990] sm:$0xff]  ;;  %v5675_v51 = vadd.f32 %v5674_v39, %v2566_v26  ;;  %v5893_v52 = vadd.f32 %v5892_v40, %v2781_v33  ;;  %v2694_v53 = vld [vmem:[%s16643_s14 + $0x4d80] sm:$0xff]  ;;  %v6022_v54 = vadd.f32 %v6021_v42, %v2908_v35  ;;  %v5932_v55 = vadd.f32 %v5931_v43, %v2819_v36  ;;  %v2783_v57 = vld [vmem:[%s16643_s14 + $0x5048] sm:$0xff] }
 0x401   : > { %v3036_v56 = vld [vmem:[%s16643_s14 + $0x5830] sm:$0xff]  ;;  %v5804_v58 = vadd.f32 %v5803_v46, %v2693_v41  ;;  %v2910_v59 = vld [vmem:[%s16643_s14 + $0x5440] sm:$0xff]  ;;  %v2821_v60 = vld [vmem:[%s16643_s14 + $0x5178] sm:$0xff]  ;;  %v6151_v61 = vadd.f32 %v6150_v49, %v3035_v44 }
 0x402   : > { %v2569_v62 = vld [vmem:[%s16643_s14 + $0x4998] sm:$0xff]  ;;  %v5676_v63 = vadd.f32 %v5675_v51, %v2567_v38  ;;  %v5894_v0 = vadd.f32 %v5893_v52, %v2782_v45  ;;  %v2695_v1 = vld [vmem:[%s16643_s14 + $0x4d88] sm:$0xff]  ;;  %v6023_v2 = vadd.f32 %v6022_v54, %v2909_v47  ;;  %v5933_v3 = vadd.f32 %v5932_v55, %v2820_v48  ;;  %v2784_v5 = vld [vmem:[%s16643_s14 + $0x5050] sm:$0xff] }
 0x403   : > { %v3037_v4 = vld [vmem:[%s16643_s14 + $0x5838] sm:$0xff]  ;;  %v5805_v6 = vadd.f32 %v5804_v58, %v2694_v53  ;;  %v2911_v7 = vld [vmem:[%s16643_s14 + $0x5448] sm:$0xff]  ;;  %v2822_v8 = vld [vmem:[%s16643_s14 + $0x5180] sm:$0xff]  ;;  %v6152_v9 = vadd.f32 %v6151_v61, %v3036_v56 }
 0x404   : > { %v5677_v10 = vadd.f32 %v5676_v63, %v2568_v50  ;;  %v5895_v11 = vadd.f32 %v5894_v0, %v2783_v57  ;;  %v2696_v12 = vld [vmem:[%s16643_s14 + $0x4d90] sm:$0xff]  ;;  %v6024_v13 = vadd.f32 %v6023_v2, %v2910_v59  ;;  %v5934_v14 = vadd.f32 %v5933_v3, %v2821_v60  ;;  %v3038_v15 = vld [vmem:[%s16643_s14 + $0x5840] sm:$0xff]  ;;  %v2785_v16 = vld [vmem:[%s16643_s14 + $0x5058] sm:$0xff] }
 0x405   : > { %v5806_v17 = vadd.f32 %v5805_v6, %v2695_v1  ;;  %v2912_v18 = vld [vmem:[%s16643_s14 + $0x5450] sm:$0xff]  ;;  %v2823_v19 = vld [vmem:[%s16643_s14 + $0x5188] sm:$0xff]  ;;  %v6153_v20 = vadd.f32 %v6152_v9, %v3037_v4  ;;  %v2786_v22 = vld [vmem:[%s16643_s14 + $0x5060] sm:$0xff] }
 0x406   : > { %v5678_v21 = vadd.f32 %v5677_v10, %v2569_v62  ;;  %v5896_v23 = vadd.f32 %v5895_v11, %v2784_v5  ;;  %v2697_v24 = vld [vmem:[%s16643_s14 + $0x4d98] sm:$0xff]  ;;  %v6025_v25 = vadd.f32 %v6024_v13, %v2911_v7  ;;  %v5935_v26 = vadd.f32 %v5934_v14, %v2822_v8  ;;  %v3039_v27 = vld [vmem:[%s16643_s14 + $0x5848] sm:$0xff]  ;;  %v2824_v31 = vld [vmem:[%s16643_s14 + $0x5190] sm:$0xff] }
 0x407   : > { %v2787_v28 = vld [vmem:[%s16643_s14 + $0x5068] sm:$0xff]  ;;  %v5807_v29 = vadd.f32 %v5806_v17, %v2696_v12  ;;  %v2913_v30 = vld [vmem:[%s16643_s14 + $0x5458] sm:$0xff]  ;;  %v6154_v32 = vadd.f32 %v6153_v20, %v3038_v15  ;;  %v2698_v34 = vld [vmem:[%s16643_s14 + $0x4da0] sm:$0xff] }
 0x408   : > { %5679 = vadd.xlane.f32.xlu0 %v5678_v21  ;;  %v5897_v33 = vadd.f32 %v5896_v23, %v2785_v16  ;;  %v2914_v35 = vld [vmem:[%s16643_s14 + $0x5460] sm:$0xff]  ;;  %v6026_v36 = vadd.f32 %v6025_v25, %v2912_v18  ;;  %v5936_v37 = vadd.f32 %v5935_v26, %v2823_v19  ;;  %v3040_v38 = vld [vmem:[%s16643_s14 + $0x5850] sm:$0xff]  ;;  %v2825_v41 = vld [vmem:[%s16643_s14 + $0x5198] sm:$0xff] }
 0x409   : > { %v2788_v39 = vld [vmem:[%s16643_s14 + $0x5070] sm:$0xff]  ;;  %v5808_v40 = vadd.f32 %v5807_v29, %v2697_v24  ;;  %v6155_v42 = vadd.f32 %v6154_v32, %v3039_v27  ;;  %v2950_v43 = vld [vmem:[%s16643_s14 + $0x5580] sm:$0xff]  ;;  %v2951_v44 = vld [vmem:[%s16643_s14 + $0x5588] sm:$0xff] }
 0x40a   : > { %v5898_v45 = vadd.f32 %v5897_v33, %v2786_v22  ;;  %v2699_v46 = vld [vmem:[%s16643_s14 + $0x4da8] sm:$0xff]  ;;  %v6027_v47 = vadd.f32 %v6026_v36, %v2913_v30  ;;  %v5937_v48 = vadd.f32 %v5936_v37, %v2824_v31  ;;  %v3041_v49 = vld [vmem:[%s16643_s14 + $0x5858] sm:$0xff]  ;;  %v2952_v50 = vld [vmem:[%s16643_s14 + $0x5590] sm:$0xff]  ;;  %v6066_v51 = vadd.f32 %v2951_v44, %v2950_v43 }
 0x40b   : > { %v5809_v52 = vadd.f32 %v5808_v40, %v2698_v34  ;;  %v2915_v53 = vld [vmem:[%s16643_s14 + $0x5468] sm:$0xff]  ;;  %v2826_v54 = vld [vmem:[%s16643_s14 + $0x51a0] sm:$0xff]  ;;  %v6156_v55 = vadd.f32 %v6155_v42, %v3040_v38  ;;  %v2953_v56 = vld [vmem:[%s16643_s14 + $0x5598] sm:$0xff] }
 0x40c   : > { %v2789_v57 = vld [vmem:[%s16643_s14 + $0x5078] sm:$0xff]  ;;  %v5899_v58 = vadd.f32 %v5898_v45, %v2787_v28  ;;  %v2700_v59 = vld [vmem:[%s16643_s14 + $0x4db0] sm:$0xff]  ;;  %v6028_v60 = vadd.f32 %v6027_v47, %v2914_v35  ;;  %v5938_v61 = vadd.f32 %v5937_v48, %v2825_v41  ;;  %v3042_v62 = vld [vmem:[%s16643_s14 + $0x5860] sm:$0xff]  ;;  %v6067_v63 = vadd.f32 %v6066_v51, %v2952_v50 }
 0x40d   : > { %v5810_v0 = vadd.f32 %v5809_v52, %v2699_v46  ;;  %v2916_v1 = vld [vmem:[%s16643_s14 + $0x5470] sm:$0xff]  ;;  %v2827_v2 = vld [vmem:[%s16643_s14 + $0x51a8] sm:$0xff]  ;;  %v6157_v3 = vadd.f32 %v6156_v55, %v3041_v49  ;;  %v2954_v4 = vld [vmem:[%s16643_s14 + $0x55a0] sm:$0xff] }
 0x40e   : > { %v2790_v5 = vld [vmem:[%s16643_s14 + $0x5080] sm:$0xff]  ;;  %v5900_v6 = vadd.f32 %v5899_v58, %v2788_v39  ;;  %v2701_v7 = vld [vmem:[%s16643_s14 + $0x4db8] sm:$0xff]  ;;  %v6029_v8 = vadd.f32 %v6028_v60, %v2915_v53  ;;  %v5939_v9 = vadd.f32 %v5938_v61, %v2826_v54  ;;  %v3043_v10 = vld [vmem:[%s16643_s14 + $0x5868] sm:$0xff]  ;;  %v6068_v11 = vadd.f32 %v6067_v63, %v2953_v56 }
 0x40f   : > { %v5811_v12 = vadd.f32 %v5810_v0, %v2700_v59  ;;  %v2917_v13 = vld [vmem:[%s16643_s14 + $0x5478] sm:$0xff]  ;;  %v2828_v14 = vld [vmem:[%s16643_s14 + $0x51b0] sm:$0xff]  ;;  %v6158_v15 = vadd.f32 %v6157_v3, %v3042_v62  ;;  %v2955_v16 = vld [vmem:[%s16643_s14 + $0x55a8] sm:$0xff] }
 0x410   : > { %v2791_v17 = vld [vmem:[%s16643_s14 + $0x5088] sm:$0xff]  ;;  %v5901_v18 = vadd.f32 %v5900_v6, %v2789_v57  ;;  %v2702_v19 = vld [vmem:[%s16643_s14 + $0x4dc0] sm:$0xff]  ;;  %v6030_v20 = vadd.f32 %v6029_v8, %v2916_v1  ;;  %v5940_v21 = vadd.f32 %v5939_v9, %v2827_v2  ;;  %v3044_v22 = vld [vmem:[%s16643_s14 + $0x5870] sm:$0xff]  ;;  %v6069_v23 = vadd.f32 %v6068_v11, %v2954_v4 }
 0x411   : > { %v5812_v24 = vadd.f32 %v5811_v12, %v2701_v7  ;;  %v2918_v25 = vld [vmem:[%s16643_s14 + $0x5480] sm:$0xff]  ;;  %v2829_v26 = vld [vmem:[%s16643_s14 + $0x51b8] sm:$0xff]  ;;  %v6159_v27 = vadd.f32 %v6158_v15, %v3043_v10  ;;  %v2956_v28 = vld [vmem:[%s16643_s14 + $0x55b0] sm:$0xff] }
 0x412   : > { %v2792_v29 = vld [vmem:[%s16643_s14 + $0x5090] sm:$0xff]  ;;  %v5902_v30 = vadd.f32 %v5901_v18, %v2790_v5  ;;  %v2703_v31 = vld [vmem:[%s16643_s14 + $0x4dc8] sm:$0xff]  ;;  %v6031_v32 = vadd.f32 %v6030_v20, %v2917_v13  ;;  %v5941_v33 = vadd.f32 %v5940_v21, %v2828_v14  ;;  %v3045_v34 = vld [vmem:[%s16643_s14 + $0x5878] sm:$0xff]  ;;  %v6070_v35 = vadd.f32 %v6069_v23, %v2955_v16 }
 0x413   : > { %v5813_v36 = vadd.f32 %v5812_v24, %v2702_v19  ;;  %v2919_v37 = vld [vmem:[%s16643_s14 + $0x5488] sm:$0xff]  ;;  %v2830_v38 = vld [vmem:[%s16643_s14 + $0x51c0] sm:$0xff]  ;;  %v6160_v39 = vadd.f32 %v6159_v27, %v3044_v22  ;;  %v2957_v40 = vld [vmem:[%s16643_s14 + $0x55b8] sm:$0xff] }
 0x414   : > { %v2793_v41 = vld [vmem:[%s16643_s14 + $0x5098] sm:$0xff]  ;;  %v5903_v42 = vadd.f32 %v5902_v30, %v2791_v17  ;;  %v2704_v43 = vld [vmem:[%s16643_s14 + $0x4dd0] sm:$0xff]  ;;  %v6032_v44 = vadd.f32 %v6031_v32, %v2918_v25  ;;  %v5942_v45 = vadd.f32 %v5941_v33, %v2829_v26  ;;  %v3046_v46 = vld [vmem:[%s16643_s14 + $0x5880] sm:$0xff]  ;;  %v6071_v47 = vadd.f32 %v6070_v35, %v2956_v28 }
 0x415   : > { %v5814_v48 = vadd.f32 %v5813_v36, %v2703_v31  ;;  %v2920_v49 = vld [vmem:[%s16643_s14 + $0x5490] sm:$0xff]  ;;  %v2831_v50 = vld [vmem:[%s16643_s14 + $0x51c8] sm:$0xff]  ;;  %v6161_v51 = vadd.f32 %v6160_v39, %v3045_v34  ;;  %v2958_v52 = vld [vmem:[%s16643_s14 + $0x55c0] sm:$0xff] }
 0x416   : > { %v2794_v53 = vld [vmem:[%s16643_s14 + $0x50a0] sm:$0xff]  ;;  %v5904_v54 = vadd.f32 %v5903_v42, %v2792_v29  ;;  %v2705_v55 = vld [vmem:[%s16643_s14 + $0x4dd8] sm:$0xff]  ;;  %v6033_v56 = vadd.f32 %v6032_v44, %v2919_v37  ;;  %v5943_v57 = vadd.f32 %v5942_v45, %v2830_v38  ;;  %v3047_v58 = vld [vmem:[%s16643_s14 + $0x5888] sm:$0xff]  ;;  %v6072_v59 = vadd.f32 %v6071_v47, %v2957_v40 }
 0x417   : > { %v5815_v60 = vadd.f32 %v5814_v48, %v2704_v43  ;;  %v2921_v61 = vld [vmem:[%s16643_s14 + $0x5498] sm:$0xff]  ;;  %v2832_v62 = vld [vmem:[%s16643_s14 + $0x51d0] sm:$0xff]  ;;  %v6162_v63 = vadd.f32 %v6161_v51, %v3046_v46  ;;  %v2959_v0 = vld [vmem:[%s16643_s14 + $0x55c8] sm:$0xff] }
 0x418   : > { %v2795_v1 = vld [vmem:[%s16643_s14 + $0x50a8] sm:$0xff]  ;;  %v5905_v2 = vadd.f32 %v5904_v54, %v2793_v41  ;;  %v2706_v3 = vld [vmem:[%s16643_s14 + $0x4de0] sm:$0xff]  ;;  %v6034_v4 = vadd.f32 %v6033_v56, %v2920_v49  ;;  %v5944_v5 = vadd.f32 %v5943_v57, %v2831_v50  ;;  %v3048_v6 = vld [vmem:[%s16643_s14 + $0x5890] sm:$0xff]  ;;  %v6073_v7 = vadd.f32 %v6072_v59, %v2958_v52 }
 0x419   : > { %v5816_v8 = vadd.f32 %v5815_v60, %v2705_v55  ;;  %v2922_v9 = vld [vmem:[%s16643_s14 + $0x54a0] sm:$0xff]  ;;  %v2833_v10 = vld [vmem:[%s16643_s14 + $0x51d8] sm:$0xff]  ;;  %v6163_v11 = vadd.f32 %v6162_v63, %v3047_v58  ;;  %v2960_v12 = vld [vmem:[%s16643_s14 + $0x55d0] sm:$0xff] }
 0x41a   : > { %v2796_v13 = vld [vmem:[%s16643_s14 + $0x50b0] sm:$0xff]  ;;  %v5906_v14 = vadd.f32 %v5905_v2, %v2794_v53  ;;  %v2707_v15 = vld [vmem:[%s16643_s14 + $0x4de8] sm:$0xff]  ;;  %v6035_v16 = vadd.f32 %v6034_v4, %v2921_v61  ;;  %v5945_v17 = vadd.f32 %v5944_v5, %v2832_v62  ;;  %v3049_v18 = vld [vmem:[%s16643_s14 + $0x5898] sm:$0xff]  ;;  %v6074_v19 = vadd.f32 %v6073_v7, %v2959_v0 }
 0x41b   : > { %v5817_v20 = vadd.f32 %v5816_v8, %v2706_v3  ;;  %v2923_v21 = vld [vmem:[%s16643_s14 + $0x54a8] sm:$0xff]  ;;  %v2834_v22 = vld [vmem:[%s16643_s14 + $0x51e0] sm:$0xff]  ;;  %v6164_v23 = vadd.f32 %v6163_v11, %v3048_v6  ;;  %v2961_v24 = vld [vmem:[%s16643_s14 + $0x55d8] sm:$0xff] }
 0x41c   : > { %v2797_v25 = vld [vmem:[%s16643_s14 + $0x50b8] sm:$0xff]  ;;  %v5907_v26 = vadd.f32 %v5906_v14, %v2795_v1  ;;  %v2708_v27 = vld [vmem:[%s16643_s14 + $0x4df0] sm:$0xff]  ;;  %v6036_v28 = vadd.f32 %v6035_v16, %v2922_v9  ;;  %v5946_v29 = vadd.f32 %v5945_v17, %v2833_v10  ;;  %v3050_v30 = vld [vmem:[%s16643_s14 + $0x58a0] sm:$0xff]  ;;  %v6075_v31 = vadd.f32 %v6074_v19, %v2960_v12 }
 0x41d   : > { %v5818_v32 = vadd.f32 %v5817_v20, %v2707_v15  ;;  %v2924_v33 = vld [vmem:[%s16643_s14 + $0x54b0] sm:$0xff]  ;;  %v2835_v34 = vld [vmem:[%s16643_s14 + $0x51e8] sm:$0xff]  ;;  %v6165_v35 = vadd.f32 %v6164_v23, %v3049_v18  ;;  %v2962_v36 = vld [vmem:[%s16643_s14 + $0x55e0] sm:$0xff] }
 0x41e   : > { %v5908_v37 = vadd.f32 %v5907_v26, %v2796_v13  ;;  %v2709_v38 = vld [vmem:[%s16643_s14 + $0x4df8] sm:$0xff]  ;;  %v2710_v39 = vld [vmem:[%s16643_s14 + $0x4e00] sm:$0xff]  ;;  %v6037_v40 = vadd.f32 %v6036_v28, %v2923_v21  ;;  %v5947_v41 = vadd.f32 %v5946_v29, %v2834_v22  ;;  %v3051_v42 = vld [vmem:[%s16643_s14 + $0x58a8] sm:$0xff]  ;;  %v6076_v43 = vadd.f32 %v6075_v31, %v2961_v24 }
 0x41f   : > { %v5819_v44 = vadd.f32 %v5818_v32, %v2708_v27  ;;  %v2925_v45 = vld [vmem:[%s16643_s14 + $0x54b8] sm:$0xff]  ;;  %v2836_v46 = vld [vmem:[%s16643_s14 + $0x51f0] sm:$0xff]  ;;  %v6166_v47 = vadd.f32 %v6165_v35, %v3050_v30  ;;  %v2963_v48 = vld [vmem:[%s16643_s14 + $0x55e8] sm:$0xff] }
 0x420   : > { %v5909_v49 = vadd.f32 %v5908_v37, %v2797_v25  ;;  %v2711_v50 = vld [vmem:[%s16643_s14 + $0x4e08] sm:$0xff]  ;;  %v2926_v51 = vld [vmem:[%s16643_s14 + $0x54c0] sm:$0xff]  ;;  %v6038_v52 = vadd.f32 %v6037_v40, %v2924_v33  ;;  %v5948_v53 = vadd.f32 %v5947_v41, %v2835_v34  ;;  %v3052_v54 = vld [vmem:[%s16643_s14 + $0x58b0] sm:$0xff]  ;;  %v6077_v55 = vadd.f32 %v6076_v43, %v2962_v36 }
 0x421   : > { %v5820_v56 = vadd.f32 %v5819_v44, %v2709_v38  ;;  %v2927_v57 = vld [vmem:[%s16643_s14 + $0x54c8] sm:$0xff]  ;;  %v2837_v58 = vld [vmem:[%s16643_s14 + $0x51f8] sm:$0xff]  ;;  %v6167_v59 = vadd.f32 %v6166_v47, %v3051_v42  ;;  %v2964_v60 = vld [vmem:[%s16643_s14 + $0x55f0] sm:$0xff] }
 0x422   : > { %5910 = vadd.xlane.f32.xlu1 %v5909_v49  ;;  %v6039_v61 = vadd.f32 %v6038_v52, %v2925_v45  ;;  %v2838_v62 = vld [vmem:[%s16643_s14 + $0x5200] sm:$0xff]  ;;  %v5949_v63 = vadd.f32 %v5948_v53, %v2836_v46  ;;  %v3053_v0 = vld [vmem:[%s16643_s14 + $0x58b8] sm:$0xff]  ;;  %v6078_v1 = vadd.f32 %v6077_v55, %v2963_v48  ;;  %v3179_v6 = vld [vmem:[%s16643_s14 + $0x5ca8] sm:$0xff] }
 0x423   : > { %v3178_v2 = vld [vmem:[%s16643_s14 + $0x5ca0] sm:$0xff]  ;;  %v5821_v3 = vadd.f32 %v5820_v56, %v2710_v39  ;;  %v6168_v4 = vadd.f32 %v6167_v59, %v3052_v54  ;;  %v2965_v5 = vld [vmem:[%s16643_s14 + $0x55f8] sm:$0xff]  ;;  %v3180_v7 = vld [vmem:[%s16643_s14 + $0x5cb0] sm:$0xff] }
 0x424   : > { %v2712_v8 = vld [vmem:[%s16643_s14 + $0x4e10] sm:$0xff]  ;;  %v6040_v10 = vadd.f32 %v6039_v61, %v2926_v51  ;;  %v5950_v11 = vadd.f32 %v5949_v63, %v2837_v58  ;;  %v3054_v12 = vld [vmem:[%s16643_s14 + $0x58c0] sm:$0xff]  ;;  %v6079_v13 = vadd.f32 %v6078_v1, %v2964_v60  ;;  %v6297_v14 = vadd.f32 %v3179_v6, %v3178_v2  ;;  %v2839_v16 = vld [vmem:[%s16643_s14 + $0x5208] sm:$0xff] }
 0x425   : > { %v2928_v9 = vld [vmem:[%s16643_s14 + $0x54d0] sm:$0xff]  ;;  %v5822_v15 = vadd.f32 %v5821_v3, %v2711_v50  ;;  %v6169_v17 = vadd.f32 %v6168_v4, %v3053_v0  ;;  %v2966_v18 = vld [vmem:[%s16643_s14 + $0x5600] sm:$0xff]  ;;  %v3181_v19 = vld [vmem:[%s16643_s14 + $0x5cb8] sm:$0xff] }
 0x426   : > { %v2713_v20 = vld [vmem:[%s16643_s14 + $0x4e18] sm:$0xff]  ;;  %v6041_v22 = vadd.f32 %v6040_v10, %v2927_v57  ;;  %v5951_v23 = vadd.f32 %v5950_v11, %v2838_v62  ;;  %v3055_v24 = vld [vmem:[%s16643_s14 + $0x58c8] sm:$0xff]  ;;  %v6080_v25 = vadd.f32 %v6079_v13, %v2965_v5  ;;  %v6298_v26 = vadd.f32 %v6297_v14, %v3180_v7  ;;  %v2840_v28 = vld [vmem:[%s16643_s14 + $0x5210] sm:$0xff] }
 0x427   : > { %v2929_v21 = vld [vmem:[%s16643_s14 + $0x54d8] sm:$0xff]  ;;  %v5823_v27 = vadd.f32 %v5822_v15, %v2712_v8  ;;  %v6170_v29 = vadd.f32 %v6169_v17, %v3054_v12  ;;  %v2967_v30 = vld [vmem:[%s16643_s14 + $0x5608] sm:$0xff]  ;;  %v3182_v31 = vld [vmem:[%s16643_s14 + $0x5cc0] sm:$0xff] }
 0x428   : > { %v2714_v32 = vld [vmem:[%s16643_s14 + $0x4e20] sm:$0xff]  ;;  %v6042_v34 = vadd.f32 %v6041_v22, %v2928_v9  ;;  %v5952_v35 = vadd.f32 %v5951_v23, %v2839_v16  ;;  %v3056_v36 = vld [vmem:[%s16643_s14 + $0x58d0] sm:$0xff]  ;;  %v6081_v37 = vadd.f32 %v6080_v25, %v2966_v18  ;;  %v6299_v38 = vadd.f32 %v6298_v26, %v3181_v19  ;;  %v2841_v40 = vld [vmem:[%s16643_s14 + $0x5218] sm:$0xff] }
 0x429   : > { %v2930_v33 = vld [vmem:[%s16643_s14 + $0x54e0] sm:$0xff]  ;;  %v5824_v39 = vadd.f32 %v5823_v27, %v2713_v20  ;;  %v6171_v41 = vadd.f32 %v6170_v29, %v3055_v24  ;;  %v2968_v42 = vld [vmem:[%s16643_s14 + $0x5610] sm:$0xff]  ;;  %v3183_v43 = vld [vmem:[%s16643_s14 + $0x5cc8] sm:$0xff] }
 0x42a   : > { %v2715_v44 = vld [vmem:[%s16643_s14 + $0x4e28] sm:$0xff]  ;;  %v6043_v46 = vadd.f32 %v6042_v34, %v2929_v21  ;;  %v5953_v47 = vadd.f32 %v5952_v35, %v2840_v28  ;;  %v3057_v48 = vld [vmem:[%s16643_s14 + $0x58d8] sm:$0xff]  ;;  %v6082_v49 = vadd.f32 %v6081_v37, %v2967_v30  ;;  %v6300_v50 = vadd.f32 %v6299_v38, %v3182_v31  ;;  %v2842_v52 = vld [vmem:[%s16643_s14 + $0x5220] sm:$0xff] }
 0x42b   : > { %v2931_v45 = vld [vmem:[%s16643_s14 + $0x54e8] sm:$0xff]  ;;  %v5825_v51 = vadd.f32 %v5824_v39, %v2714_v32  ;;  %v6172_v53 = vadd.f32 %v6171_v41, %v3056_v36  ;;  %v2969_v54 = vld [vmem:[%s16643_s14 + $0x5618] sm:$0xff]  ;;  %v3184_v55 = vld [vmem:[%s16643_s14 + $0x5cd0] sm:$0xff] }
 0x42c   : > { %v2716_v56 = vld [vmem:[%s16643_s14 + $0x4e30] sm:$0xff]  ;;  %v6044_v58 = vadd.f32 %v6043_v46, %v2930_v33  ;;  %v5954_v59 = vadd.f32 %v5953_v47, %v2841_v40  ;;  %v3058_v60 = vld [vmem:[%s16643_s14 + $0x58e0] sm:$0xff]  ;;  %v6083_v61 = vadd.f32 %v6082_v49, %v2968_v42  ;;  %v6301_v62 = vadd.f32 %v6300_v50, %v3183_v43  ;;  %v2843_v0 = vld [vmem:[%s16643_s14 + $0x5228] sm:$0xff] }
 0x42d   : > { %v2932_v57 = vld [vmem:[%s16643_s14 + $0x54f0] sm:$0xff]  ;;  %v5826_v63 = vadd.f32 %v5825_v51, %v2715_v44  ;;  %v6173_v1 = vadd.f32 %v6172_v53, %v3057_v48  ;;  %v2970_v2 = vld [vmem:[%s16643_s14 + $0x5620] sm:$0xff]  ;;  %v3185_v3 = vld [vmem:[%s16643_s14 + $0x5cd8] sm:$0xff] }
 0x42e   : > { %v2717_v4 = vld [vmem:[%s16643_s14 + $0x4e38] sm:$0xff]  ;;  %v6045_v6 = vadd.f32 %v6044_v58, %v2931_v45  ;;  %v5955_v7 = vadd.f32 %v5954_v59, %v2842_v52  ;;  %v3059_v8 = vld [vmem:[%s16643_s14 + $0x58e8] sm:$0xff]  ;;  %v6084_v9 = vadd.f32 %v6083_v61, %v2969_v54  ;;  %v6302_v10 = vadd.f32 %v6301_v62, %v3184_v55  ;;  %v2844_v12 = vld [vmem:[%s16643_s14 + $0x5230] sm:$0xff] }
 0x42f   : > { %v2933_v5 = vld [vmem:[%s16643_s14 + $0x54f8] sm:$0xff]  ;;  %v5827_v11 = vadd.f32 %v5826_v63, %v2716_v56  ;;  %v6174_v13 = vadd.f32 %v6173_v1, %v3058_v60  ;;  %v2971_v14 = vld [vmem:[%s16643_s14 + $0x5628] sm:$0xff]  ;;  %v3186_v15 = vld [vmem:[%s16643_s14 + $0x5ce0] sm:$0xff] }
 0x430   : > { %v2718_v16 = vld [vmem:[%s16643_s14 + $0x4e40] sm:$0xff]  ;;  %v6046_v18 = vadd.f32 %v6045_v6, %v2932_v57  ;;  %v5956_v19 = vadd.f32 %v5955_v7, %v2843_v0  ;;  %v3060_v20 = vld [vmem:[%s16643_s14 + $0x58f0] sm:$0xff]  ;;  %v6085_v21 = vadd.f32 %v6084_v9, %v2970_v2  ;;  %v6303_v22 = vadd.f32 %v6302_v10, %v3185_v3  ;;  %v2845_v24 = vld [vmem:[%s16643_s14 + $0x5238] sm:$0xff] }
 0x431   : > { %v2934_v17 = vld [vmem:[%s16643_s14 + $0x5500] sm:$0xff]  ;;  %v5828_v23 = vadd.f32 %v5827_v11, %v2717_v4  ;;  %v6175_v25 = vadd.f32 %v6174_v13, %v3059_v8  ;;  %v2972_v26 = vld [vmem:[%s16643_s14 + $0x5630] sm:$0xff]  ;;  %v3187_v27 = vld [vmem:[%s16643_s14 + $0x5ce8] sm:$0xff] }
 0x432   : > { %v2719_v28 = vld [vmem:[%s16643_s14 + $0x4e48] sm:$0xff]  ;;  %v6047_v30 = vadd.f32 %v6046_v18, %v2933_v5  ;;  %v5957_v31 = vadd.f32 %v5956_v19, %v2844_v12  ;;  %v3061_v32 = vld [vmem:[%s16643_s14 + $0x58f8] sm:$0xff]  ;;  %v6086_v33 = vadd.f32 %v6085_v21, %v2971_v14  ;;  %v6304_v34 = vadd.f32 %v6303_v22, %v3186_v15  ;;  %v2846_v36 = vld [vmem:[%s16643_s14 + $0x5240] sm:$0xff] }
 0x433   : > { %v2935_v29 = vld [vmem:[%s16643_s14 + $0x5508] sm:$0xff]  ;;  %v5829_v35 = vadd.f32 %v5828_v23, %v2718_v16  ;;  %v6176_v37 = vadd.f32 %v6175_v25, %v3060_v20  ;;  %v2973_v38 = vld [vmem:[%s16643_s14 + $0x5638] sm:$0xff]  ;;  %v3188_v39 = vld [vmem:[%s16643_s14 + $0x5cf0] sm:$0xff] }
 0x434   : > { %v2720_v40 = vld [vmem:[%s16643_s14 + $0x4e50] sm:$0xff]  ;;  %v6048_v42 = vadd.f32 %v6047_v30, %v2934_v17  ;;  %v5958_v43 = vadd.f32 %v5957_v31, %v2845_v24  ;;  %v3062_v44 = vld [vmem:[%s16643_s14 + $0x5900] sm:$0xff]  ;;  %v6087_v45 = vadd.f32 %v6086_v33, %v2972_v26  ;;  %v6305_v46 = vadd.f32 %v6304_v34, %v3187_v27  ;;  %v2847_v48 = vld [vmem:[%s16643_s14 + $0x5248] sm:$0xff] }
 0x435   : > { %v2936_v41 = vld [vmem:[%s16643_s14 + $0x5510] sm:$0xff]  ;;  %v5830_v47 = vadd.f32 %v5829_v35, %v2719_v28  ;;  %v6177_v49 = vadd.f32 %v6176_v37, %v3061_v32  ;;  %v2974_v50 = vld [vmem:[%s16643_s14 + $0x5640] sm:$0xff]  ;;  %v3189_v51 = vld [vmem:[%s16643_s14 + $0x5cf8] sm:$0xff] }
 0x436   : > { %v2721_v52 = vld [vmem:[%s16643_s14 + $0x4e58] sm:$0xff]  ;;  %v6049_v54 = vadd.f32 %v6048_v42, %v2935_v29  ;;  %v5959_v55 = vadd.f32 %v5958_v43, %v2846_v36  ;;  %v3063_v56 = vld [vmem:[%s16643_s14 + $0x5908] sm:$0xff]  ;;  %v6088_v57 = vadd.f32 %v6087_v45, %v2973_v38  ;;  %v6306_v58 = vadd.f32 %v6305_v46, %v3188_v39  ;;  %v2848_v60 = vld [vmem:[%s16643_s14 + $0x5250] sm:$0xff] }
 0x437   : > { %v2937_v53 = vld [vmem:[%s16643_s14 + $0x5518] sm:$0xff]  ;;  %v5831_v59 = vadd.f32 %v5830_v47, %v2720_v40  ;;  %v6178_v61 = vadd.f32 %v6177_v49, %v3062_v44  ;;  %v2975_v62 = vld [vmem:[%s16643_s14 + $0x5648] sm:$0xff]  ;;  %v3190_v63 = vld [vmem:[%s16643_s14 + $0x5d00] sm:$0xff] }
 0x438   : > { %v2938_v0 = vld [vmem:[%s16643_s14 + $0x5520] sm:$0xff]  ;;  %v6050_v1 = vadd.f32 %v6049_v54, %v2936_v41  ;;  %v5960_v2 = vadd.f32 %v5959_v55, %v2847_v48  ;;  %v3064_v3 = vld [vmem:[%s16643_s14 + $0x5910] sm:$0xff]  ;;  %v6089_v4 = vadd.f32 %v6088_v57, %v2974_v50  ;;  %v6307_v5 = vadd.f32 %v6306_v58, %v3189_v51  ;;  %v2849_v7 = vld [vmem:[%s16643_s14 + $0x5258] sm:$0xff] }
 0x439   : > { %v5832_v6 = vadd.f32 %v5831_v59, %v2721_v52  ;;  %v6179_v8 = vadd.f32 %v6178_v61, %v3063_v56  ;;  %v2976_v9 = vld [vmem:[%s16643_s14 + $0x5650] sm:$0xff]  ;;  %v3191_v10 = vld [vmem:[%s16643_s14 + $0x5d08] sm:$0xff]  ;;  %v2850_v13 = vld [vmem:[%s16643_s14 + $0x5260] sm:$0xff] }
 0x43a   : > { %v2939_v11 = vld [vmem:[%s16643_s14 + $0x5528] sm:$0xff]  ;;  %v6051_v12 = vadd.f32 %v6050_v1, %v2937_v53  ;;  %v5961_v14 = vadd.f32 %v5960_v2, %v2848_v60  ;;  %v3065_v15 = vld [vmem:[%s16643_s14 + $0x5918] sm:$0xff]  ;;  %v6090_v16 = vadd.f32 %v6089_v4, %v2975_v62  ;;  %v6308_v17 = vadd.f32 %v6307_v5, %v3190_v63  ;;  %v2940_v18 = vld [vmem:[%s16643_s14 + $0x5530] sm:$0xff] }
 0x43b   : > { %5833 = vadd.xlane.f32.xlu0 %v5832_v6  ;;  %v3066_v19 = vld [vmem:[%s16643_s14 + $0x5920] sm:$0xff]  ;;  %v6180_v20 = vadd.f32 %v6179_v8, %v3064_v3  ;;  %v2977_v21 = vld [vmem:[%s16643_s14 + $0x5658] sm:$0xff]  ;;  %v3192_v22 = vld [vmem:[%s16643_s14 + $0x5d10] sm:$0xff] }
 0x43c   : > { %v6052_v23 = vadd.f32 %v6051_v12, %v2938_v0  ;;  %v5962_v24 = vadd.f32 %v5961_v14, %v2849_v7  ;;  %v6091_v25 = vadd.f32 %v6090_v16, %v2976_v9  ;;  %v6309_v26 = vadd.f32 %v6308_v17, %v3191_v10  ;;  %v3102_v27 = vld [vmem:[%s16643_s14 + $0x5a40] sm:$0xff]  ;;  %v3103_v28 = vld [vmem:[%s16643_s14 + $0x5a48] sm:$0xff]  ;;  %v3104_v29 = vld [vmem:[%s16643_s14 + $0x5a50] sm:$0xff] }
 0x43d   : > { %v2851_v30 = vld [vmem:[%s16643_s14 + $0x5268] sm:$0xff]  ;;  %v6181_v31 = vadd.f32 %v6180_v20, %v3065_v15  ;;  %v2978_v32 = vld [vmem:[%s16643_s14 + $0x5660] sm:$0xff]  ;;  %v3193_v33 = vld [vmem:[%s16643_s14 + $0x5d18] sm:$0xff]  ;;  %v6220_v34 = vadd.f32 %v3103_v28, %v3102_v27 }
 0x43e   : > { %v2941_v35 = vld [vmem:[%s16643_s14 + $0x5538] sm:$0xff]  ;;  %v6053_v36 = vadd.f32 %v6052_v23, %v2939_v11  ;;  %v5963_v37 = vadd.f32 %v5962_v24, %v2850_v13  ;;  %v3067_v38 = vld [vmem:[%s16643_s14 + $0x5928] sm:$0xff]  ;;  %v6092_v39 = vadd.f32 %v6091_v25, %v2977_v21  ;;  %v6310_v40 = vadd.f32 %v6309_v26, %v3192_v22  ;;  %v2852_v42 = vld [vmem:[%s16643_s14 + $0x5270] sm:$0xff] }
 0x43f   : > { %v3105_v41 = vld [vmem:[%s16643_s14 + $0x5a58] sm:$0xff]  ;;  %v6182_v43 = vadd.f32 %v6181_v31, %v3066_v19  ;;  %v2979_v44 = vld [vmem:[%s16643_s14 + $0x5668] sm:$0xff]  ;;  %v3194_v45 = vld [vmem:[%s16643_s14 + $0x5d20] sm:$0xff]  ;;  %v6221_v46 = vadd.f32 %v6220_v34, %v3104_v29 }
 0x440   : > { %v2942_v47 = vld [vmem:[%s16643_s14 + $0x5540] sm:$0xff]  ;;  %v6054_v48 = vadd.f32 %v6053_v36, %v2940_v18  ;;  %v5964_v49 = vadd.f32 %v5963_v37, %v2851_v30  ;;  %v3068_v50 = vld [vmem:[%s16643_s14 + $0x5930] sm:$0xff]  ;;  %v6093_v51 = vadd.f32 %v6092_v39, %v2978_v32  ;;  %v6311_v52 = vadd.f32 %v6310_v40, %v3193_v33  ;;  %v2853_v54 = vld [vmem:[%s16643_s14 + $0x5278] sm:$0xff] }
 0x441   : > { %v3106_v53 = vld [vmem:[%s16643_s14 + $0x5a60] sm:$0xff]  ;;  %v6183_v55 = vadd.f32 %v6182_v43, %v3067_v38  ;;  %v2980_v56 = vld [vmem:[%s16643_s14 + $0x5670] sm:$0xff]  ;;  %v3195_v57 = vld [vmem:[%s16643_s14 + $0x5d28] sm:$0xff]  ;;  %v6222_v58 = vadd.f32 %v6221_v46, %v3105_v41 }
 0x442   : > { %v2943_v59 = vld [vmem:[%s16643_s14 + $0x5548] sm:$0xff]  ;;  %v6055_v60 = vadd.f32 %v6054_v48, %v2941_v35  ;;  %v5965_v61 = vadd.f32 %v5964_v49, %v2852_v42  ;;  %v3069_v62 = vld [vmem:[%s16643_s14 + $0x5938] sm:$0xff]  ;;  %v6094_v63 = vadd.f32 %v6093_v51, %v2979_v44  ;;  %v6312_v0 = vadd.f32 %v6311_v52, %v3194_v45  ;;  %v2854_v2 = vld [vmem:[%s16643_s14 + $0x5280] sm:$0xff] }
 0x443   : > { %v3107_v1 = vld [vmem:[%s16643_s14 + $0x5a68] sm:$0xff]  ;;  %v6184_v3 = vadd.f32 %v6183_v55, %v3068_v50  ;;  %v2981_v4 = vld [vmem:[%s16643_s14 + $0x5678] sm:$0xff]  ;;  %v3196_v5 = vld [vmem:[%s16643_s14 + $0x5d30] sm:$0xff]  ;;  %v6223_v6 = vadd.f32 %v6222_v58, %v3106_v53 }
 0x444   : > { %v2944_v7 = vld [vmem:[%s16643_s14 + $0x5550] sm:$0xff]  ;;  %v6056_v8 = vadd.f32 %v6055_v60, %v2942_v47  ;;  %v5966_v9 = vadd.f32 %v5965_v61, %v2853_v54  ;;  %v3070_v10 = vld [vmem:[%s16643_s14 + $0x5940] sm:$0xff]  ;;  %v6095_v11 = vadd.f32 %v6094_v63, %v2980_v56  ;;  %v6313_v12 = vadd.f32 %v6312_v0, %v3195_v57  ;;  %v2855_v14 = vld [vmem:[%s16643_s14 + $0x5288] sm:$0xff] }
 0x445   : > { %v3108_v13 = vld [vmem:[%s16643_s14 + $0x5a70] sm:$0xff]  ;;  %v6185_v15 = vadd.f32 %v6184_v3, %v3069_v62  ;;  %v2982_v16 = vld [vmem:[%s16643_s14 + $0x5680] sm:$0xff]  ;;  %v3197_v17 = vld [vmem:[%s16643_s14 + $0x5d38] sm:$0xff]  ;;  %v6224_v18 = vadd.f32 %v6223_v6, %v3107_v1 }
 0x446   : > { %v2945_v19 = vld [vmem:[%s16643_s14 + $0x5558] sm:$0xff]  ;;  %v6057_v20 = vadd.f32 %v6056_v8, %v2943_v59  ;;  %v5967_v21 = vadd.f32 %v5966_v9, %v2854_v2  ;;  %v3071_v22 = vld [vmem:[%s16643_s14 + $0x5948] sm:$0xff]  ;;  %v6096_v23 = vadd.f32 %v6095_v11, %v2981_v4  ;;  %v6314_v24 = vadd.f32 %v6313_v12, %v3196_v5  ;;  %v2856_v26 = vld [vmem:[%s16643_s14 + $0x5290] sm:$0xff] }
 0x447   : > { %v3109_v25 = vld [vmem:[%s16643_s14 + $0x5a78] sm:$0xff]  ;;  %v6186_v27 = vadd.f32 %v6185_v15, %v3070_v10  ;;  %v2983_v28 = vld [vmem:[%s16643_s14 + $0x5688] sm:$0xff]  ;;  %v3198_v29 = vld [vmem:[%s16643_s14 + $0x5d40] sm:$0xff]  ;;  %v6225_v30 = vadd.f32 %v6224_v18, %v3108_v13 }
 0x448   : > { %v2946_v31 = vld [vmem:[%s16643_s14 + $0x5560] sm:$0xff]  ;;  %v6058_v32 = vadd.f32 %v6057_v20, %v2944_v7  ;;  %v5968_v33 = vadd.f32 %v5967_v21, %v2855_v14  ;;  %v3072_v34 = vld [vmem:[%s16643_s14 + $0x5950] sm:$0xff]  ;;  %v6097_v35 = vadd.f32 %v6096_v23, %v2982_v16  ;;  %v6315_v36 = vadd.f32 %v6314_v24, %v3197_v17  ;;  %v2857_v38 = vld [vmem:[%s16643_s14 + $0x5298] sm:$0xff] }
 0x449   : > { %v3110_v37 = vld [vmem:[%s16643_s14 + $0x5a80] sm:$0xff]  ;;  %v6187_v39 = vadd.f32 %v6186_v27, %v3071_v22  ;;  %v2984_v40 = vld [vmem:[%s16643_s14 + $0x5690] sm:$0xff]  ;;  %v3199_v41 = vld [vmem:[%s16643_s14 + $0x5d48] sm:$0xff]  ;;  %v6226_v42 = vadd.f32 %v6225_v30, %v3109_v25 }
 0x44a   : > { %v2947_v43 = vld [vmem:[%s16643_s14 + $0x5568] sm:$0xff]  ;;  %v6059_v44 = vadd.f32 %v6058_v32, %v2945_v19  ;;  %v5969_v45 = vadd.f32 %v5968_v33, %v2856_v26  ;;  %v3073_v46 = vld [vmem:[%s16643_s14 + $0x5958] sm:$0xff]  ;;  %v6098_v47 = vadd.f32 %v6097_v35, %v2983_v28  ;;  %v6316_v48 = vadd.f32 %v6315_v36, %v3198_v29  ;;  %v2858_v50 = vld [vmem:[%s16643_s14 + $0x52a0] sm:$0xff] }
 0x44b   : > { %v3111_v49 = vld [vmem:[%s16643_s14 + $0x5a88] sm:$0xff]  ;;  %v6188_v51 = vadd.f32 %v6187_v39, %v3072_v34  ;;  %v2985_v52 = vld [vmem:[%s16643_s14 + $0x5698] sm:$0xff]  ;;  %v3200_v53 = vld [vmem:[%s16643_s14 + $0x5d50] sm:$0xff]  ;;  %v6227_v54 = vadd.f32 %v6226_v42, %v3110_v37 }
 0x44c   : > { %v2948_v55 = vld [vmem:[%s16643_s14 + $0x5570] sm:$0xff]  ;;  %v6060_v56 = vadd.f32 %v6059_v44, %v2946_v31  ;;  %v5970_v57 = vadd.f32 %v5969_v45, %v2857_v38  ;;  %v3074_v58 = vld [vmem:[%s16643_s14 + $0x5960] sm:$0xff]  ;;  %v6099_v59 = vadd.f32 %v6098_v47, %v2984_v40  ;;  %v6317_v60 = vadd.f32 %v6316_v48, %v3199_v41  ;;  %v2859_v62 = vld [vmem:[%s16643_s14 + $0x52a8] sm:$0xff] }
 0x44d   : > { %v3112_v61 = vld [vmem:[%s16643_s14 + $0x5a90] sm:$0xff]  ;;  %v6189_v63 = vadd.f32 %v6188_v51, %v3073_v46  ;;  %v2986_v0 = vld [vmem:[%s16643_s14 + $0x56a0] sm:$0xff]  ;;  %v3201_v1 = vld [vmem:[%s16643_s14 + $0x5d58] sm:$0xff]  ;;  %v6228_v2 = vadd.f32 %v6227_v54, %v3111_v49 }
 0x44e   : > { %v2949_v3 = vld [vmem:[%s16643_s14 + $0x5578] sm:$0xff]  ;;  %v6061_v4 = vadd.f32 %v6060_v56, %v2947_v43  ;;  %v5971_v5 = vadd.f32 %v5970_v57, %v2858_v50  ;;  %v3075_v6 = vld [vmem:[%s16643_s14 + $0x5968] sm:$0xff]  ;;  %v6100_v7 = vadd.f32 %v6099_v59, %v2985_v52  ;;  %v6318_v8 = vadd.f32 %v6317_v60, %v3200_v53  ;;  %v2860_v10 = vld [vmem:[%s16643_s14 + $0x52b0] sm:$0xff] }
 0x44f   : > { %v3113_v9 = vld [vmem:[%s16643_s14 + $0x5a98] sm:$0xff]  ;;  %v6190_v11 = vadd.f32 %v6189_v63, %v3074_v58  ;;  %v2987_v12 = vld [vmem:[%s16643_s14 + $0x56a8] sm:$0xff]  ;;  %v3202_v13 = vld [vmem:[%s16643_s14 + $0x5d60] sm:$0xff]  ;;  %v6229_v14 = vadd.f32 %v6228_v2, %v3112_v61 }
 0x450   : > { %v6062_v15 = vadd.f32 %v6061_v4, %v2948_v55  ;;  %v5972_v16 = vadd.f32 %v5971_v5, %v2859_v62  ;;  %v3076_v17 = vld [vmem:[%s16643_s14 + $0x5970] sm:$0xff]  ;;  %v6101_v18 = vadd.f32 %v6100_v7, %v2986_v0  ;;  %v6319_v19 = vadd.f32 %v6318_v8, %v3201_v1  ;;  %v3114_v20 = vld [vmem:[%s16643_s14 + $0x5aa0] sm:$0xff]  ;;  %v2861_v21 = vld [vmem:[%s16643_s14 + $0x52b8] sm:$0xff] }
 0x451   : > { %v6191_v22 = vadd.f32 %v6190_v11, %v3075_v6  ;;  %v2988_v23 = vld [vmem:[%s16643_s14 + $0x56b0] sm:$0xff]  ;;  %v3203_v24 = vld [vmem:[%s16643_s14 + $0x5d68] sm:$0xff]  ;;  %v6230_v25 = vadd.f32 %v6229_v14, %v3113_v9  ;;  %v3077_v28 = vld [vmem:[%s16643_s14 + $0x5978] sm:$0xff] }
 0x452   : > { %v6063_v26 = vadd.f32 %v6062_v15, %v2949_v3  ;;  %v5973_v27 = vadd.f32 %v5972_v16, %v2860_v10  ;;  %v6102_v29 = vadd.f32 %v6101_v18, %v2987_v12  ;;  %v6320_v30 = vadd.f32 %v6319_v19, %v3202_v13  ;;  %v3115_v31 = vld [vmem:[%s16643_s14 + $0x5aa8] sm:$0xff]  ;;  %v2862_v32 = vld [vmem:[%s16643_s14 + $0x52c0] sm:$0xff]  ;;  %v2989_v34 = vld [vmem:[%s16643_s14 + $0x56b8] sm:$0xff] }
 0x453   : > { %v6192_v33 = vadd.f32 %v6191_v22, %v3076_v17  ;;  %v3204_v35 = vld [vmem:[%s16643_s14 + $0x5d70] sm:$0xff]  ;;  %v6231_v36 = vadd.f32 %v6230_v25, %v3114_v20  ;;  %v3078_v38 = vld [vmem:[%s16643_s14 + $0x5980] sm:$0xff]  ;;  %v2863_v42 = vld [vmem:[%s16643_s14 + $0x52c8] sm:$0xff] }
 0x454   : > { %6064 = vadd.xlane.f32.xlu1 %v6063_v26  ;;  %v5974_v37 = vadd.f32 %v5973_v27, %v2861_v21  ;;  %v6103_v39 = vadd.f32 %v6102_v29, %v2988_v23  ;;  %v6321_v40 = vadd.f32 %v6320_v30, %v3203_v24  ;;  %v3116_v41 = vld [vmem:[%s16643_s14 + $0x5ab0] sm:$0xff]  ;;  %v2990_v44 = vld [vmem:[%s16643_s14 + $0x56c0] sm:$0xff]  ;;  %v3205_v45 = vld [vmem:[%s16643_s14 + $0x5d78] sm:$0xff] }
 0x455   : > { %v6193_v43 = vadd.f32 %v6192_v33, %v3077_v28  ;;  %v6232_v46 = vadd.f32 %v6231_v36, %v3115_v31  ;;  %v3079_v48 = vld [vmem:[%s16643_s14 + $0x5988] sm:$0xff]  ;;  %v3117_v51 = vld [vmem:[%s16643_s14 + $0x5ab8] sm:$0xff]  ;;  %v2864_v52 = vld [vmem:[%s16643_s14 + $0x52d0] sm:$0xff] }
 0x456   : > { %v5975_v47 = vadd.f32 %v5974_v37, %v2862_v32  ;;  %v6104_v49 = vadd.f32 %v6103_v39, %v2989_v34  ;;  %v6322_v50 = vadd.f32 %v6321_v40, %v3204_v35  ;;  %v2991_v54 = vld [vmem:[%s16643_s14 + $0x56c8] sm:$0xff]  ;;  %v3206_v55 = vld [vmem:[%s16643_s14 + $0x5d80] sm:$0xff]  ;;  %v3080_v58 = vld [vmem:[%s16643_s14 + $0x5990] sm:$0xff] }
 0x457   : > { %v6194_v53 = vadd.f32 %v6193_v43, %v3078_v38  ;;  %v6233_v56 = vadd.f32 %v6232_v46, %v3116_v41  ;;  %v3118_v61 = vld [vmem:[%s16643_s14 + $0x5ac0] sm:$0xff]  ;;  %v2865_v62 = vld [vmem:[%s16643_s14 + $0x52d8] sm:$0xff]  ;;  %v2992_v0 = vld [vmem:[%s16643_s14 + $0x56d0] sm:$0xff] }
 0x458   : > { %v5976_v57 = vadd.f32 %v5975_v47, %v2863_v42  ;;  %v6105_v59 = vadd.f32 %v6104_v49, %v2990_v44  ;;  %v6323_v60 = vadd.f32 %v6322_v50, %v3205_v45  ;;  %v3207_v1 = vld [vmem:[%s16643_s14 + $0x5d88] sm:$0xff]  ;;  %v3081_v4 = vld [vmem:[%s16643_s14 + $0x5998] sm:$0xff]  ;;  %v2866_v8 = vld [vmem:[%s16643_s14 + $0x52e0] sm:$0xff] }
 0x459   : > { %v6195_v63 = vadd.f32 %v6194_v53, %v3079_v48  ;;  %v6234_v2 = vadd.f32 %v6233_v56, %v3117_v51  ;;  %v3119_v7 = vld [vmem:[%s16643_s14 + $0x5ac8] sm:$0xff]  ;;  %v2993_v10 = vld [vmem:[%s16643_s14 + $0x56d8] sm:$0xff]  ;;  %v3208_v11 = vld [vmem:[%s16643_s14 + $0x5d90] sm:$0xff] }
 0x45a   : > { %v5977_v3 = vadd.f32 %v5976_v57, %v2864_v52  ;;  %v6106_v5 = vadd.f32 %v6105_v59, %v2991_v54  ;;  %v6324_v6 = vadd.f32 %v6323_v60, %v3206_v55  ;;  %v3082_v14 = vld [vmem:[%s16643_s14 + $0x59a0] sm:$0xff]  ;;  %v3120_v17 = vld [vmem:[%s16643_s14 + $0x5ad0] sm:$0xff]  ;;  %v2867_v18 = vld [vmem:[%s16643_s14 + $0x52e8] sm:$0xff] }
 0x45b   : > { %v6196_v9 = vadd.f32 %v6195_v63, %v3080_v58  ;;  %v6235_v12 = vadd.f32 %v6234_v2, %v3118_v61  ;;  %v2994_v20 = vld [vmem:[%s16643_s14 + $0x56e0] sm:$0xff]  ;;  %v3209_v21 = vld [vmem:[%s16643_s14 + $0x5d98] sm:$0xff]  ;;  %v3083_v24 = vld [vmem:[%s16643_s14 + $0x59a8] sm:$0xff] }
 0x45c   : > { %v5978_v13 = vadd.f32 %v5977_v3, %v2865_v62  ;;  %v6107_v15 = vadd.f32 %v6106_v5, %v2992_v0  ;;  %v6325_v16 = vadd.f32 %v6324_v6, %v3207_v1  ;;  %v3121_v27 = vld [vmem:[%s16643_s14 + $0x5ad8] sm:$0xff]  ;;  %v2868_v28 = vld [vmem:[%s16643_s14 + $0x52f0] sm:$0xff]  ;;  %v2995_v30 = vld [vmem:[%s16643_s14 + $0x56e8] sm:$0xff] }
 0x45d   : > { %v6197_v19 = vadd.f32 %v6196_v9, %v3081_v4  ;;  %v6236_v22 = vadd.f32 %v6235_v12, %v3119_v7  ;;  %v3210_v31 = vld [vmem:[%s16643_s14 + $0x5da0] sm:$0xff]  ;;  %v3084_v34 = vld [vmem:[%s16643_s14 + $0x59b0] sm:$0xff]  ;;  %v2869_v38 = vld [vmem:[%s16643_s14 + $0x52f8] sm:$0xff] }
 0x45e   : > { %v5979_v23 = vadd.f32 %v5978_v13, %v2866_v8  ;;  %v6108_v25 = vadd.f32 %v6107_v15, %v2993_v10  ;;  %v6326_v26 = vadd.f32 %v6325_v16, %v3208_v11  ;;  %v3122_v37 = vld [vmem:[%s16643_s14 + $0x5ae0] sm:$0xff]  ;;  %v2996_v40 = vld [vmem:[%s16643_s14 + $0x56f0] sm:$0xff]  ;;  %v3211_v41 = vld [vmem:[%s16643_s14 + $0x5da8] sm:$0xff] }
 0x45f   : > { %v6198_v29 = vadd.f32 %v6197_v19, %v3082_v14  ;;  %v6237_v32 = vadd.f32 %v6236_v22, %v3120_v17  ;;  %v3085_v44 = vld [vmem:[%s16643_s14 + $0x59b8] sm:$0xff]  ;;  %v3123_v47 = vld [vmem:[%s16643_s14 + $0x5ae8] sm:$0xff]  ;;  %v2870_v48 = vld [vmem:[%s16643_s14 + $0x5300] sm:$0xff] }
 0x460   : > { %v5980_v33 = vadd.f32 %v5979_v23, %v2867_v18  ;;  %v6109_v35 = vadd.f32 %v6108_v25, %v2994_v20  ;;  %v6327_v36 = vadd.f32 %v6326_v26, %v3209_v21  ;;  %v2997_v50 = vld [vmem:[%s16643_s14 + $0x56f8] sm:$0xff]  ;;  %v3212_v51 = vld [vmem:[%s16643_s14 + $0x5db0] sm:$0xff]  ;;  %v3086_v54 = vld [vmem:[%s16643_s14 + $0x59c0] sm:$0xff] }
 0x461   : > { %v6199_v39 = vadd.f32 %v6198_v29, %v3083_v24  ;;  %v6238_v42 = vadd.f32 %v6237_v32, %v3121_v27  ;;  %v3124_v57 = vld [vmem:[%s16643_s14 + $0x5af0] sm:$0xff]  ;;  %v2871_v58 = vld [vmem:[%s16643_s14 + $0x5308] sm:$0xff]  ;;  %v2998_v60 = vld [vmem:[%s16643_s14 + $0x5700] sm:$0xff] }
 0x462   : > { %v5981_v43 = vadd.f32 %v5980_v33, %v2868_v28  ;;  %v6110_v45 = vadd.f32 %v6109_v35, %v2995_v30  ;;  %v6328_v46 = vadd.f32 %v6327_v36, %v3210_v31  ;;  %v3213_v61 = vld [vmem:[%s16643_s14 + $0x5db8] sm:$0xff]  ;;  %v3087_v0 = vld [vmem:[%s16643_s14 + $0x59c8] sm:$0xff]  ;;  %v2872_v4 = vld [vmem:[%s16643_s14 + $0x5310] sm:$0xff] }
 0x463   : > { %v6200_v49 = vadd.f32 %v6199_v39, %v3084_v34  ;;  %v6239_v52 = vadd.f32 %v6238_v42, %v3122_v37  ;;  %v3125_v3 = vld [vmem:[%s16643_s14 + $0x5af8] sm:$0xff]  ;;  %v2999_v6 = vld [vmem:[%s16643_s14 + $0x5708] sm:$0xff]  ;;  %v3214_v7 = vld [vmem:[%s16643_s14 + $0x5dc0] sm:$0xff] }
 0x464   : > { %v5982_v53 = vadd.f32 %v5981_v43, %v2869_v38  ;;  %v6111_v55 = vadd.f32 %v6110_v45, %v2996_v40  ;;  %v6329_v56 = vadd.f32 %v6328_v46, %v3211_v41  ;;  %v3088_v10 = vld [vmem:[%s16643_s14 + $0x59d0] sm:$0xff]  ;;  %v3126_v13 = vld [vmem:[%s16643_s14 + $0x5b00] sm:$0xff]  ;;  %v2873_v14 = vld [vmem:[%s16643_s14 + $0x5318] sm:$0xff] }
 0x465   : > { %v6201_v59 = vadd.f32 %v6200_v49, %v3085_v44  ;;  %v6240_v62 = vadd.f32 %v6239_v52, %v3123_v47  ;;  %v3000_v16 = vld [vmem:[%s16643_s14 + $0x5710] sm:$0xff]  ;;  %v3215_v17 = vld [vmem:[%s16643_s14 + $0x5dc8] sm:$0xff]  ;;  %v3089_v20 = vld [vmem:[%s16643_s14 + $0x59d8] sm:$0xff] }
 0x466   : > { %v5983_v63 = vadd.f32 %v5982_v53, %v2870_v48  ;;  %v6112_v1 = vadd.f32 %v6111_v55, %v2997_v50  ;;  %v6330_v2 = vadd.f32 %v6329_v56, %v3212_v51  ;;  %v3127_v23 = vld [vmem:[%s16643_s14 + $0x5b08] sm:$0xff]  ;;  %v3001_v25 = vld [vmem:[%s16643_s14 + $0x5718] sm:$0xff]  ;;  %v3216_v26 = vld [vmem:[%s16643_s14 + $0x5dd0] sm:$0xff] }
 0x467   : > { %v6202_v5 = vadd.f32 %v6201_v59, %v3086_v54  ;;  %v6241_v8 = vadd.f32 %v6240_v62, %v3124_v57  ;;  %v3090_v29 = vld [vmem:[%s16643_s14 + $0x59e0] sm:$0xff]  ;;  %v3128_v32 = vld [vmem:[%s16643_s14 + $0x5b10] sm:$0xff]  ;;  %v3217_v35 = vld [vmem:[%s16643_s14 + $0x5dd8] sm:$0xff]  ;;  %v19628_v57 = vpop.xlane.xlu1 %3523 }
 0x468   : > { %v5984_v9 = vadd.f32 %v5983_v63, %v2871_v58  ;;  %v6113_v11 = vadd.f32 %v6112_v1, %v2998_v60  ;;  %v6331_v12 = vadd.f32 %v6330_v2, %v3213_v61  ;;  %v3002_v34 = vld [vmem:[%s16643_s14 + $0x5720] sm:$0xff]  ;;  %v3091_v37 = vld [vmem:[%s16643_s14 + $0x59e8] sm:$0xff]  ;;  %v3129_v40 = vld [vmem:[%s16643_s14 + $0x5b18] sm:$0xff]  ;;  %v19630_v58 = vpop.xlane.xlu0 %3369 }
 0x469   : > { %v6203_v15 = vadd.f32 %v6202_v5, %v3087_v0  ;;  %v6242_v18 = vadd.f32 %v6241_v8, %v3125_v3  ;;  %v3003_v42 = vld [vmem:[%s16643_s14 + $0x5728] sm:$0xff]  ;;  %v3218_v43 = vld [vmem:[%s16643_s14 + $0x5de0] sm:$0xff]  ;;  %v3092_v45 = vld [vmem:[%s16643_s14 + $0x59f0] sm:$0xff] }
 0x46a   : > { %v5985_v19 = vadd.f32 %v5984_v9, %v2872_v4  ;;  %v6114_v21 = vadd.f32 %v6113_v11, %v2999_v6  ;;  %v6332_v22 = vadd.f32 %v6331_v12, %v3214_v7  ;;  %v3130_v48 = vld [vmem:[%s16643_s14 + $0x5b20] sm:$0xff]  ;;  %v3004_v50 = vld [vmem:[%s16643_s14 + $0x5730] sm:$0xff]  ;;  %v3219_v51 = vld [vmem:[%s16643_s14 + $0x5de8] sm:$0xff] }
 0x46b   : > { %v6204_v24 = vadd.f32 %v6203_v15, %v3088_v10  ;;  %v6243_v27 = vadd.f32 %v6242_v18, %v3126_v13  ;;  %v3093_v53 = vld [vmem:[%s16643_s14 + $0x59f8] sm:$0xff]  ;;  %v3131_v56 = vld [vmem:[%s16643_s14 + $0x5b28] sm:$0xff]  ;;  %v3220_v61 = vld [vmem:[%s16643_s14 + $0x5df0] sm:$0xff] }
 0x46c   : > { %v5986_v28 = vadd.f32 %v5985_v19, %v2873_v14  ;;  %v6115_v30 = vadd.f32 %v6114_v21, %v3000_v16  ;;  %v6333_v31 = vadd.f32 %v6332_v22, %v3215_v17  ;;  %v3005_v60 = vld [vmem:[%s16643_s14 + $0x5738] sm:$0xff]  ;;  %v3094_v63 = vld [vmem:[%s16643_s14 + $0x5a00] sm:$0xff]  ;;  %v3132_v2 = vld [vmem:[%s16643_s14 + $0x5b30] sm:$0xff]  ;;  %v19644_v19 = vpop.xlane.xlu1 %3600 }
 0x46d   : > { %v6205_v33 = vadd.f32 %v6204_v24, %v3089_v20  ;;  %v6244_v36 = vadd.f32 %v6243_v27, %v3127_v23  ;;  %v3006_v4 = vld [vmem:[%s16643_s14 + $0x5740] sm:$0xff]  ;;  %v3221_v5 = vld [vmem:[%s16643_s14 + $0x5df8] sm:$0xff]  ;;  %v3095_v7 = vld [vmem:[%s16643_s14 + $0x5a08] sm:$0xff]  ;;  %v19646_v20 = vpop.xlane.xlu0 %3446 }
 0x46e   : > { %5987 = vadd.xlane.f32.xlu0 %v5986_v28  ;;  %v6116_v38 = vadd.f32 %v6115_v30, %v3001_v25  ;;  %v6334_v39 = vadd.f32 %v6333_v31, %v3216_v26  ;;  %v3133_v10 = vld [vmem:[%s16643_s14 + $0x5b38] sm:$0xff]  ;;  %v3007_v12 = vld [vmem:[%s16643_s14 + $0x5748] sm:$0xff]  ;;  %v3222_v13 = vld [vmem:[%s16643_s14 + $0x5e00] sm:$0xff] }
 0x46f   : > { %v6206_v41 = vadd.f32 %v6205_v33, %v3090_v29  ;;  %v6245_v44 = vadd.f32 %v6244_v36, %v3128_v32  ;;  %v3096_v15 = vld [vmem:[%s16643_s14 + $0x5a10] sm:$0xff]  ;;  %v3134_v18 = vld [vmem:[%s16643_s14 + $0x5b40] sm:$0xff]  ;;  %v3223_v23 = vld [vmem:[%s16643_s14 + $0x5e08] sm:$0xff] }
 0x470   : > { %v6117_v46 = vadd.f32 %v6116_v38, %v3002_v34  ;;  %v6335_v47 = vadd.f32 %v6334_v39, %v3217_v35  ;;  %v3008_v22 = vld [vmem:[%s16643_s14 + $0x5750] sm:$0xff]  ;;  %v3097_v25 = vld [vmem:[%s16643_s14 + $0x5a18] sm:$0xff]  ;;  %v3135_v28 = vld [vmem:[%s16643_s14 + $0x5b48] sm:$0xff] }
 0x471   : > { %v6207_v49 = vadd.f32 %v6206_v41, %v3091_v37  ;;  %v6246_v52 = vadd.f32 %v6245_v44, %v3129_v40  ;;  %v3009_v30 = vld [vmem:[%s16643_s14 + $0x5758] sm:$0xff]  ;;  %v3224_v31 = vld [vmem:[%s16643_s14 + $0x5e10] sm:$0xff]  ;;  %v3098_v33 = vld [vmem:[%s16643_s14 + $0x5a20] sm:$0xff] }
 0x472   : > { %v6118_v54 = vadd.f32 %v6117_v46, %v3003_v42  ;;  %v6336_v55 = vadd.f32 %v6335_v47, %v3218_v43  ;;  %v3136_v36 = vld [vmem:[%s16643_s14 + $0x5b50] sm:$0xff]  ;;  %v3010_v38 = vld [vmem:[%s16643_s14 + $0x5760] sm:$0xff]  ;;  %v3225_v39 = vld [vmem:[%s16643_s14 + $0x5e18] sm:$0xff]  ;;  %v19662_v46 = vpop.xlane.xlu0 %3677 }
 0x473   : > { %v6208_v59 = vadd.f32 %v6207_v49, %v3092_v45  ;;  %v6247_v62 = vadd.f32 %v6246_v52, %v3130_v48  ;;  %v3099_v41 = vld [vmem:[%s16643_s14 + $0x5a28] sm:$0xff]  ;;  %v3137_v44 = vld [vmem:[%s16643_s14 + $0x5b58] sm:$0xff]  ;;  %v19660_v45 = vpop.xlane.xlu1 %3754  ;;  %v3226_v49 = vld [vmem:[%s16643_s14 + $0x5e20] sm:$0xff] }
 0x474   : > { %v6119_v0 = vadd.f32 %v6118_v54, %v3004_v50  ;;  %v6337_v1 = vadd.f32 %v6336_v55, %v3219_v51  ;;  %v3011_v48 = vld [vmem:[%s16643_s14 + $0x5768] sm:$0xff]  ;;  %v3100_v51 = vld [vmem:[%s16643_s14 + $0x5a30] sm:$0xff]  ;;  %v3138_v54 = vld [vmem:[%s16643_s14 + $0x5b60] sm:$0xff] }
 0x475   : > { %v6209_v3 = vadd.f32 %v6208_v59, %v3093_v53  ;;  %v6248_v6 = vadd.f32 %v6247_v62, %v3131_v56  ;;  %v3012_v56 = vld [vmem:[%s16643_s14 + $0x5770] sm:$0xff]  ;;  %v3227_v59 = vld [vmem:[%s16643_s14 + $0x5e28] sm:$0xff] }
 0x476   : > { %v6120_v8 = vadd.f32 %v6119_v0, %v3005_v60  ;;  %v6338_v9 = vadd.f32 %v6337_v1, %v3220_v61  ;;  %v3101_v61 = vld [vmem:[%s16643_s14 + $0x5a38] sm:$0xff]  ;;  %v3139_v0 = vld [vmem:[%s16643_s14 + $0x5b68] sm:$0xff] }
 0x477   : > { %v6210_v11 = vadd.f32 %v6209_v3, %v3094_v63  ;;  %v6249_v14 = vadd.f32 %v6248_v6, %v3132_v2  ;;  %v3013_v2 = vld [vmem:[%s16643_s14 + $0x5778] sm:$0xff]  ;;  %v3228_v3 = vld [vmem:[%s16643_s14 + $0x5e30] sm:$0xff] }
 0x478   : > { %v6121_v16 = vadd.f32 %v6120_v8, %v3006_v4  ;;  %v6339_v17 = vadd.f32 %v6338_v9, %v3221_v5  ;;  %v19675_v8 = vpop.xlane.xlu1 %3908  ;;  %v19677_v9 = vpop.xlane.xlu0 %3831 }
 0x479   : > { %v6211_v21 = vadd.f32 %v6210_v11, %v3095_v7  ;;  %v6250_v24 = vadd.f32 %v6249_v14, %v3133_v10  ;;  %v3140_v7 = vld [vmem:[%s16643_s14 + $0x5b70] sm:$0xff]  ;;  %v3014_v11 = vld [vmem:[%s16643_s14 + $0x5780] sm:$0xff] }
 0x47a   : > { %v6122_v26 = vadd.f32 %v6121_v16, %v3007_v12  ;;  %v6340_v27 = vadd.f32 %v6339_v17, %v3222_v13  ;;  %v3229_v12 = vld [vmem:[%s16643_s14 + $0x5e38] sm:$0xff]  ;;  %v3015_v17 = vld [vmem:[%s16643_s14 + $0x5788] sm:$0xff] }
 0x47b   : > { %v6212_v29 = vadd.f32 %v6211_v21, %v3096_v15  ;;  %v6251_v32 = vadd.f32 %v6250_v24, %v3134_v18  ;;  %v3141_v16 = vld [vmem:[%s16643_s14 + $0x5b78] sm:$0xff]  ;;  %v3230_v18 = vld [vmem:[%s16643_s14 + $0x5e40] sm:$0xff] }
 0x47c   : > { %v6123_v34 = vadd.f32 %v6122_v26, %v3008_v22  ;;  %v6341_v35 = vadd.f32 %v6340_v27, %v3223_v23  ;;  %v3142_v24 = vld [vmem:[%s16643_s14 + $0x5b80] sm:$0xff]  ;;  %v3231_v26 = vld [vmem:[%s16643_s14 + $0x5e48] sm:$0xff] }
 0x47d   : > { %v6213_v37 = vadd.f32 %v6212_v29, %v3097_v25  ;;  %v6252_v40 = vadd.f32 %v6251_v32, %v3135_v28  ;;  %v3016_v25 = vld [vmem:[%s16643_s14 + $0x5790] sm:$0xff]  ;;  %v19690_v32 = vpop.xlane.xlu0 %3985 }
 0x47e   : > { %v6124_v42 = vadd.f32 %v6123_v34, %v3009_v30  ;;  %v6342_v43 = vadd.f32 %v6341_v35, %v3224_v31  ;;  %v3143_v30 = vld [vmem:[%s16643_s14 + $0x5b88] sm:$0xff]  ;;  %v19688_v31 = vpop.xlane.xlu1 %4062  ;;  %v3232_v34 = vld [vmem:[%s16643_s14 + $0x5e50] sm:$0xff] }
 0x47f   : > { %v6214_v47 = vadd.f32 %v6213_v37, %v3098_v33  ;;  %v6253_v50 = vadd.f32 %v6252_v40, %v3136_v36  ;;  %v3017_v33 = vld [vmem:[%s16643_s14 + $0x5798] sm:$0xff] }
 0x480   : > { %v6125_v52 = vadd.f32 %v6124_v42, %v3010_v38  ;;  %v6343_v53 = vadd.f32 %v6342_v43, %v3225_v39  ;;  %v3144_v38 = vld [vmem:[%s16643_s14 + $0x5b90] sm:$0xff]  ;;  %v3018_v39 = vld [vmem:[%s16643_s14 + $0x57a0] sm:$0xff]  ;;  %v3233_v40 = vld [vmem:[%s16643_s14 + $0x5e58] sm:$0xff] }
 0x481   : > { %v6215_v55 = vadd.f32 %v6214_v47, %v3099_v41  ;;  %v6254_v60 = vadd.f32 %v6253_v50, %v3137_v44  ;;  %v3145_v44 = vld [vmem:[%s16643_s14 + $0x5b98] sm:$0xff]  ;;  %v3019_v47 = vld [vmem:[%s16643_s14 + $0x57a8] sm:$0xff] }
 0x482   : > { %v6126_v62 = vadd.f32 %v6125_v52, %v3011_v48  ;;  %v6344_v63 = vadd.f32 %v6343_v53, %v3226_v49  ;;  %v3234_v48 = vld [vmem:[%s16643_s14 + $0x5e60] sm:$0xff]  ;;  %v19701_v53 = vpop.xlane.xlu1 %4216 }
 0x483   : > { %v6216_v1 = vadd.f32 %v6215_v55, %v3100_v51  ;;  %v6255_v4 = vadd.f32 %v6254_v60, %v3138_v54  ;;  %v3146_v52 = vld [vmem:[%s16643_s14 + $0x5ba0] sm:$0xff]  ;;  %v19703_v54 = vpop.xlane.xlu0 %4139  ;;  %v3020_v55 = vld [vmem:[%s16643_s14 + $0x57b0] sm:$0xff] }
 0x484   : > { %v6127_v5 = vadd.f32 %v6126_v62, %v3012_v56  ;;  %v6345_v6 = vadd.f32 %v6344_v63, %v3227_v59  ;;  %v3235_v56 = vld [vmem:[%s16643_s14 + $0x5e68] sm:$0xff]  ;;  %v3021_v63 = vld [vmem:[%s16643_s14 + $0x57b8] sm:$0xff] }
 0x485   : > { %v6217_v10 = vadd.f32 %v6216_v1, %v3101_v61  ;;  %v6256_v13 = vadd.f32 %v6255_v4, %v3139_v0  ;;  %v3147_v62 = vld [vmem:[%s16643_s14 + $0x5ba8] sm:$0xff]  ;;  %v3236_v0 = vld [vmem:[%s16643_s14 + $0x5e70] sm:$0xff] }
 0x486   : > { %v6128_v14 = vadd.f32 %v6127_v5, %v3013_v2  ;;  %v6346_v15 = vadd.f32 %v6345_v6, %v3228_v3  ;;  %v3148_v4 = vld [vmem:[%s16643_s14 + $0x5bb0] sm:$0xff]  ;;  %v3254_v5 = vld [vmem:[#allocation2] sm:$0xff] }
 0x487   : > { %6218 = vadd.xlane.f32.xlu1 %v6217_v10  ;;  %v6257_v21 = vadd.f32 %v6256_v13, %v3140_v7  ;;  %v3256_v6 = vld [vmem:[#allocation2 + $0x10] sm:$0xff]  ;;  %v3022_v7 = vld [vmem:[%s16643_s14 + $0x57c0] sm:$0xff]  ;;  %v3237_v10 = vld [vmem:[%s16643_s14 + $0x5e78] sm:$0xff] }
 0x488   : > { %v6129_v22 = vadd.f32 %v6128_v14, %v3014_v11  ;;  %v6347_v23 = vadd.f32 %v6346_v15, %v3229_v12  ;;  %v6374_v12 = vadd.f32 %v19630_v58, %v3254_v5  ;;  %v6376_v13 = vadd.f32 %v19628_v57, %v3256_v6  ;;  %v3244_v6 = vld [vmem:[%s16643_s14 + $0x5eb0] sm:$0xff] }
 0x489   : > { %v6258_v27 = vadd.f32 %v6257_v21, %v3141_v16  ;;  %v3149_v16 = vld [vmem:[%s16643_s14 + $0x5bb8] sm:$0xff]  ;;  %v3023_v21 = vld [vmem:[%s16643_s14 + $0x57c8] sm:$0xff] }
 0x48a   : > { %v6130_v28 = vadd.f32 %v6129_v22, %v3015_v17  ;;  %v6348_v29 = vadd.f32 %v6347_v23, %v3230_v18  ;;  %v19716_v17 = vpop.xlane.xlu1 %4370  ;;  %v19718_v18 = vpop.xlane.xlu0 %4293  ;;  %v3238_v22 = vld [vmem:[%s16643_s14 + $0x5e80] sm:$0xff]  ;;  %6415 = vst.msk [vmem:[#allocation2] sm:$0xff] %vm6414_vm1, %v6374_v12  ;;  %6417 = vst.msk [vmem:[#allocation2 + $0x10] sm:$0xff] %vm6414_vm1, %v6376_v13  ;;  %v3263_v12 = vld [vmem:[#allocation2 + $0x48] sm:$0xff] }
 0x48b   : > { %v6259_v35 = vadd.f32 %v6258_v27, %v3142_v24  ;;  %v3150_v24 = vld [vmem:[%s16643_s14 + $0x5bc0] sm:$0xff]  ;;  %v3024_v27 = vld [vmem:[%s16643_s14 + $0x57d0] sm:$0xff] }
 0x48c   : > { %v6131_v36 = vadd.f32 %v6130_v28, %v3016_v25  ;;  %v6349_v37 = vadd.f32 %v6348_v29, %v3231_v26  ;;  %v3255_v25 = vld [vmem:[#allocation2 + $0x8] sm:$0xff]  ;;  %v3257_v26 = vld [vmem:[#allocation2 + $0x18] sm:$0xff] }
 0x48d   : > { %v6260_v41 = vadd.f32 %v6259_v35, %v3143_v30  ;;  %v3239_v28 = vld [vmem:[%s16643_s14 + $0x5e88] sm:$0xff]  ;;  %v6375_v30 = vadd.f32 %v19646_v20, %v3255_v25 }
 0x48e   : > { %v6132_v42 = vadd.f32 %v6131_v36, %v3017_v33  ;;  %v6350_v43 = vadd.f32 %v6349_v37, %v3232_v34  ;;  %v6377_v33 = vadd.f32 %v19644_v19, %v3257_v26  ;;  %v3151_v36 = vld [vmem:[%s16643_s14 + $0x5bc8] sm:$0xff]  ;;  %v3025_v37 = vld [vmem:[%s16643_s14 + $0x57d8] sm:$0xff]  ;;  %v19737_v20 = vpop.xlane.xlu0 %4447  ;;  %v3258_v19 = vld [vmem:[#allocation2 + $0x20] sm:$0xff] }
 0x48f   : > { %v6261_v49 = vadd.f32 %v6260_v41, %v3144_v38  ;;  %v3240_v38 = vld [vmem:[%s16643_s14 + $0x5e90] sm:$0xff]  ;;  %6416 = vst.msk [vmem:[#allocation2 + $0x8] sm:$0xff] %vm6414_vm1, %v6375_v30  ;;  %v3247_v26 = vld [vmem:[%s16643_s14 + $0x5ec8] sm:$0xff] }
 0x490   : > { %v6133_v50 = vadd.f32 %v6132_v42, %v3018_v39  ;;  %v6351_v51 = vadd.f32 %v6350_v43, %v3233_v40  ;;  %6418 = vst.msk [vmem:[#allocation2 + $0x18] sm:$0xff] %vm6414_vm1, %v6377_v33  ;;  %v3152_v42 = vld [vmem:[%s16643_s14 + $0x5bd0] sm:$0xff]  ;;  %v19735_v43 = vpop.xlane.xlu1 %4524  ;;  %v3159_v33 = vld [vmem:[%s16643_s14 + $0x5c08] sm:$0xff] }
 0x491   : > { %v6262_v59 = vadd.f32 %v6261_v49, %v3145_v44  ;;  %v3259_v44 = vld [vmem:[#allocation2 + $0x28] sm:$0xff]  ;;  %v6378_v49 = vadd.f32 %v19662_v46, %v3258_v19  ;;  %v3161_v19 = vld [vmem:[%s16643_s14 + $0x5c18] sm:$0xff] }
 0x492   : > { %v6134_v60 = vadd.f32 %v6133_v50, %v3019_v47  ;;  %v6352_v61 = vadd.f32 %v6351_v51, %v3234_v48  ;;  %v3241_v47 = vld [vmem:[%s16643_s14 + $0x5e98] sm:$0xff]  ;;  %v6379_v50 = vadd.f32 %v19660_v45, %v3259_v44  ;;  %v3243_v46 = vld [vmem:[%s16643_s14 + $0x5ea8] sm:$0xff]  ;;  %v19753_v5 = vpop.xlane.xlu0 %4601 }
 0x493   : > { %v6263_v1 = vadd.f32 %v6262_v59, %v3146_v52  ;;  %6419 = vst.msk [vmem:[#allocation2 + $0x20] sm:$0xff] %vm6414_vm1, %v6378_v49 }
 0x494   : > { %v6135_v2 = vadd.f32 %v6134_v60, %v3020_v55  ;;  %v6353_v3 = vadd.f32 %v6352_v61, %v3235_v56  ;;  %v3153_v55 = vld [vmem:[%s16643_s14 + $0x5bd8] sm:$0xff]  ;;  %v3242_v56 = vld [vmem:[%s16643_s14 + $0x5ea0] sm:$0xff]  ;;  %6420 = vst.msk [vmem:[#allocation2 + $0x28] sm:$0xff] %vm6414_vm1, %v6379_v50 }
 0x495   : > { %v6264_v11 = vadd.f32 %v6263_v1, %v3147_v62  ;;  %v3154_v61 = vld [vmem:[%s16643_s14 + $0x5be0] sm:$0xff]  ;;  %v3260_v62 = vld [vmem:[#allocation2 + $0x30] sm:$0xff] }
 0x496   : > { %v6136_v14 = vadd.f32 %v6135_v2, %v3021_v63  ;;  %v6354_v15 = vadd.f32 %v6353_v3, %v3236_v0  ;;  %v3261_v63 = vld [vmem:[#allocation2 + $0x38] sm:$0xff]  ;;  %v6380_v0 = vadd.f32 %v19677_v9, %v3260_v62  ;;  %v3155_v3 = vld [vmem:[%s16643_s14 + $0x5be8] sm:$0xff]  ;;  %v3262_v9 = vld [vmem:[#allocation2 + $0x40] sm:$0xff]  ;;  %v19769_v25 = vpop.xlane.xlu0 %4755 }
 0x497   : > { %v6265_v23 = vadd.f32 %v6264_v11, %v3148_v4  ;;  %v6381_v1 = vadd.f32 %v19675_v8, %v3261_v63  ;;  %v19751_v4 = vpop.xlane.xlu1 %4678  ;;  %v3156_v11 = vld [vmem:[%s16643_s14 + $0x5bf0] sm:$0xff]  ;;  %v3245_v8 = vld [vmem:[%s16643_s14 + $0x5eb8] sm:$0xff] }
 0x498   : > { %v6137_v57 = vadd.f32 %v6136_v14, %v3022_v7  ;;  %v6355_v58 = vadd.f32 %v6354_v15, %v3237_v10  ;;  %6421 = vst.msk [vmem:[#allocation2 + $0x30] sm:$0xff] %vm6414_vm1, %v6380_v0  ;;  %v6382_v14 = vadd.f32 %v19690_v32, %v3262_v9  ;;  %v6383_v15 = vadd.f32 %v19688_v31, %v3263_v12  ;;  %v3264_v32 = vld [vmem:[#allocation2 + $0x50] sm:$0xff]  ;;  %v3265_v31 = vld [vmem:[#allocation2 + $0x58] sm:$0xff] }
 0x499   : > { %v6266_v29 = vadd.f32 %v6265_v23, %v3149_v16  ;;  %6422 = vst.msk [vmem:[#allocation2 + $0x38] sm:$0xff] %vm6414_vm1, %v6381_v1  ;;  %v3252_v62 = vld [vmem:[%s16643_s14 + $0x5ef0] sm:$0xff] }
 0x49a   : > { %v6138_v34 = vadd.f32 %v6137_v57, %v3023_v21  ;;  %v6356_v35 = vadd.f32 %v6355_v58, %v3238_v22  ;;  %v3157_v21 = vld [vmem:[%s16643_s14 + $0x5bf8] sm:$0xff]  ;;  %v3246_v22 = vld [vmem:[%s16643_s14 + $0x5ec0] sm:$0xff]  ;;  %6423 = vst.msk [vmem:[#allocation2 + $0x40] sm:$0xff] %vm6414_vm1, %v6382_v14  ;;  %6424 = vst.msk [vmem:[#allocation2 + $0x48] sm:$0xff] %vm6414_vm1, %v6383_v15 }
 0x49b   : > { %v6267_v39 = vadd.f32 %v6266_v29, %v3150_v24  ;;  %v3158_v58 = vld [vmem:[%s16643_s14 + $0x5c00] sm:$0xff]  ;;  %v19767_v24 = vpop.xlane.xlu1 %4832  ;;  %v6385_v29 = vadd.f32 %v19701_v53, %v3265_v31  ;;  %v3273_v14 = vld [vmem:[#allocation2 + $0x98] sm:$0xff] }
 0x49c   : > { %v6139_v40 = vadd.f32 %v6138_v34, %v3024_v27  ;;  %v6357_v41 = vadd.f32 %v6356_v35, %v3239_v28  ;;  %v6384_v28 = vadd.f32 %v19703_v54, %v3264_v32  ;;  %v3248_v34 = vld [vmem:[%s16643_s14 + $0x5ed0] sm:$0xff]  ;;  %v3275_v32 = vld [vmem:[#allocation2 + $0xa8] sm:$0xff] }
 0x49d   : > { %v6268_v48 = vadd.f32 %v6267_v39, %v3151_v36  ;;  %6426 = vst.msk [vmem:[#allocation2 + $0x58] sm:$0xff] %vm6414_vm1, %v6385_v29  ;;  %v3267_v39 = vld [vmem:[#allocation2 + $0x68] sm:$0xff] }
 0x49e   : > { %v6140_v51 = vadd.f32 %v6139_v40, %v3025_v37  ;;  %v6358_v52 = vadd.f32 %v6357_v41, %v3240_v38  ;;  %6425 = vst.msk [vmem:[#allocation2 + $0x50] sm:$0xff] %vm6414_vm1, %v6384_v28  ;;  %v3160_v37 = vld [vmem:[%s16643_s14 + $0x5c10] sm:$0xff]  ;;  %v3266_v38 = vld [vmem:[#allocation2 + $0x60] sm:$0xff]  ;;  %v3249_v40 = vld [vmem:[%s16643_s14 + $0x5ed8] sm:$0xff]  ;;  %v6387_v41 = vadd.f32 %v19716_v17, %v3267_v39 }
 0x49f   : > { %v6269_v59 = vadd.f32 %v6268_v48, %v3152_v42  ;;  %v6386_v53 = vadd.f32 %v19718_v18, %v3266_v38  ;;  %v4987_v44 = vpop.xlane.xlu1 %4986  ;;  %v3250_v48 = vld [vmem:[%s16643_s14 + $0x5ee0] sm:$0xff]  ;;  %v3251_v18 = vld [vmem:[%s16643_s14 + $0x5ee8] sm:$0xff] }
 0x4a0   : > { %6141 = vadd.xlane.f32.xlu0 %v6140_v51  ;;  %v6359_v60 = vadd.f32 %v6358_v52, %v3241_v47  ;;  %v4910_v47 = vpop.xlane.xlu0 %4909  ;;  %6428 = vst.msk [vmem:[#allocation2 + $0x68] sm:$0xff] %vm6414_vm1, %v6387_v41  ;;  %v3162_v51 = vld [vmem:[%s16643_s14 + $0x5c20] sm:$0xff]  ;;  %v3268_v52 = vld [vmem:[#allocation2 + $0x70] sm:$0xff]  ;;  %v3171_v38 = vld [vmem:[%s16643_s14 + $0x5c68] sm:$0xff] }
 0x4a1   : > { %v6270_v45 = vadd.f32 %v6269_v59, %v3153_v55  ;;  %6427 = vst.msk [vmem:[#allocation2 + $0x60] sm:$0xff] %vm6414_vm1, %v6386_v53  ;;  %v3269_v55 = vld [vmem:[#allocation2 + $0x78] sm:$0xff]  ;;  %v3170_v28 = vld [vmem:[%s16643_s14 + $0x5c60] sm:$0xff]  ;;  %v3279_v53 = vld [vmem:[#allocation2 + $0xc8] sm:$0xff] }
 0x4a2   : > { %v6360_v2 = vadd.f32 %v6359_v60, %v3242_v56  ;;  %v6388_v56 = vadd.f32 %v19737_v20, %v3268_v52  ;;  %v6389_v59 = vadd.f32 %v19735_v43, %v3269_v55  ;;  %v3281_v52 = vld [vmem:[#allocation2 + $0xd8] sm:$0xff] }
 0x4a3   : > { %v6271_v7 = vadd.f32 %v6270_v45, %v3154_v61  ;;  %v3163_v61 = vld [vmem:[%s16643_s14 + $0x5c28] sm:$0xff]  ;;  %v3164_v45 = vld [vmem:[%s16643_s14 + $0x5c30] sm:$0xff]  ;;  %v5141_v0 = vpop.xlane.xlu1 %5140 }
 0x4a4   : > { %v6361_v10 = vadd.f32 %v6360_v2, %v3243_v46  ;;  %6429 = vst.msk [vmem:[#allocation2 + $0x70] sm:$0xff] %vm6414_vm1, %v6388_v56  ;;  %6430 = vst.msk [vmem:[#allocation2 + $0x78] sm:$0xff] %vm6414_vm1, %v6389_v59  ;;  %v5064_v1 = vpop.xlane.xlu0 %5063  ;;  %v3270_v2 = vld [vmem:[#allocation2 + $0x80] sm:$0xff]  ;;  %v3175_v56 = vld [vmem:[%s16643_s14 + $0x5c88] sm:$0xff] }
 0x4a5   : > { %v6272_v13 = vadd.f32 %v6271_v7, %v3155_v3  ;;  %v3271_v3 = vld [vmem:[#allocation2 + $0x88] sm:$0xff]  ;;  %v6390_v43 = vadd.f32 %v19753_v5, %v3270_v2  ;;  %v6393_v5 = vadd.f32 %v19767_v24, %v3273_v14  ;;  %v3177_v2 = vld [vmem:[%s16643_s14 + $0x5c98] sm:$0xff] }
 0x4a6   : > { %v6362_v16 = vadd.f32 %v6361_v10, %v3244_v6  ;;  %v3253_v6 = vld [vmem:[%s16643_s14 + $0x5ef8] sm:$0xff]  ;;  %v6391_v7 = vadd.f32 %v19751_v4, %v3271_v3  ;;  %v3167_v4 = vld [vmem:[%s16643_s14 + $0x5c48] sm:$0xff] }
 0x4a7   : > { %v6273_v23 = vadd.f32 %v6272_v13, %v3156_v11  ;;  %v3165_v11 = vld [vmem:[%s16643_s14 + $0x5c38] sm:$0xff]  ;;  %6431 = vst.msk [vmem:[#allocation2 + $0x80] sm:$0xff] %vm6414_vm1, %v6390_v43  ;;  %v3272_v13 = vld [vmem:[#allocation2 + $0x90] sm:$0xff]  ;;  %6434 = vst.msk [vmem:[#allocation2 + $0x98] sm:$0xff] %vm6414_vm1, %v6393_v5 }
 0x4a8   : > { %v6363_v57 = vadd.f32 %v6362_v16, %v3245_v8  ;;  %6432 = vst.msk [vmem:[#allocation2 + $0x88] sm:$0xff] %vm6414_vm1, %v6391_v7  ;;  %v3166_v8 = vld [vmem:[%s16643_s14 + $0x5c40] sm:$0xff]  ;;  %v6392_v16 = vadd.f32 %v19769_v25, %v3272_v13  ;;  %v3169_v25 = vld [vmem:[%s16643_s14 + $0x5c58] sm:$0xff] }
 0x4a9   : > { %v6274_v27 = vadd.f32 %v6273_v23, %v3157_v21  ;;  %v5295_v21 = vpop.xlane.xlu1 %5294 }
 0x4aa   : > { %v6364_v30 = vadd.f32 %v6363_v57, %v3246_v22  ;;  %v5218_v22 = vpop.xlane.xlu0 %5217  ;;  %6433 = vst.msk [vmem:[#allocation2 + $0x90] sm:$0xff] %vm6414_vm1, %v6392_v16  ;;  %v3168_v57 = vld [vmem:[%s16643_s14 + $0x5c50] sm:$0xff] }
 0x4ab   : > { %v6275_v35 = vadd.f32 %v6274_v27, %v3158_v58  ;;  %v3274_v58 = vld [vmem:[#allocation2 + $0xa0] sm:$0xff]  ;;  %v6395_v27 = vadd.f32 %v4987_v44, %v3275_v32  ;;  %v3173_v44 = vld [vmem:[%s16643_s14 + $0x5c78] sm:$0xff] }
 0x4ac   : > { %v6365_v36 = vadd.f32 %v6364_v30, %v3247_v26  ;;  %v6394_v26 = vadd.f32 %v4910_v47, %v3274_v58  ;;  %v3290_v32 = vld [vmem:[#allocation2 + $0x120] sm:$0xff] }
 0x4ad   : > { %v6276_v54 = vadd.f32 %v6275_v35, %v3159_v33  ;;  %6436 = vst.msk [vmem:[#allocation2 + $0xa8] sm:$0xff] %vm6414_vm1, %v6395_v27  ;;  %v5449_v29 = vpop.xlane.xlu1 %5448  ;;  %v3276_v33 = vld [vmem:[#allocation2 + $0xb0] sm:$0xff]  ;;  %v3293_v27 = vld [vmem:[#allocation2 + $0x138] sm:$0xff] }
 0x4ae   : > { %v6366_v42 = vadd.f32 %v6365_v36, %v3248_v34  ;;  %6435 = vst.msk [vmem:[#allocation2 + $0xa0] sm:$0xff] %vm6414_vm1, %v6394_v26  ;;  %v5372_v30 = vpop.xlane.xlu0 %5371  ;;  %v3277_v34 = vld [vmem:[#allocation2 + $0xb8] sm:$0xff]  ;;  %v6396_v36 = vadd.f32 %v5064_v1, %v3276_v33 }
 0x4af   : > { %v6277_v49 = vadd.f32 %v6276_v54, %v3160_v37  ;;  %v6397_v37 = vadd.f32 %v5141_v0, %v3277_v34  ;;  %v3278_v54 = vld [vmem:[#allocation2 + $0xc0] sm:$0xff] }
 0x4b0   : > { %v6367_v50 = vadd.f32 %v6366_v42, %v3249_v40  ;;  %6437 = vst.msk [vmem:[#allocation2 + $0xb0] sm:$0xff] %vm6414_vm1, %v6396_v36  ;;  %v3172_v40 = vld [vmem:[%s16643_s14 + $0x5c70] sm:$0xff]  ;;  %v6398_v42 = vadd.f32 %v5218_v22, %v3278_v54 }
 0x4b1   : > { %v6278_v17 = vadd.f32 %v6277_v49, %v3161_v19  ;;  %6438 = vst.msk [vmem:[#allocation2 + $0xb8] sm:$0xff] %vm6414_vm1, %v6397_v37  ;;  %v6399_v19 = vadd.f32 %v5295_v21, %v3279_v53  ;;  %v5603_v47 = vpop.xlane.xlu1 %5602 }
 0x4b2   : > { %v6368_v60 = vadd.f32 %v6367_v50, %v3250_v48  ;;  %v5526_v48 = vpop.xlane.xlu0 %5525  ;;  %6439 = vst.msk [vmem:[#allocation2 + $0xc0] sm:$0xff] %vm6414_vm1, %v6398_v42  ;;  %v3174_v50 = vld [vmem:[%s16643_s14 + $0x5c80] sm:$0xff] }
 0x4b3   : > { %v6279_v63 = vadd.f32 %v6278_v17, %v3162_v51  ;;  %6440 = vst.msk [vmem:[#allocation2 + $0xc8] sm:$0xff] %vm6414_vm1, %v6399_v19  ;;  %v3280_v51 = vld [vmem:[#allocation2 + $0xd0] sm:$0xff]  ;;  %v6401_v17 = vadd.f32 %v5449_v29, %v3281_v52 }
 0x4b4   : > { %v6369_v46 = vadd.f32 %v6368_v60, %v3251_v18  ;;  %v6400_v18 = vadd.f32 %v5372_v30, %v3280_v51  ;;  %v3176_v60 = vld [vmem:[%s16643_s14 + $0x5c90] sm:$0xff] }
 0x4b5   : > { %v6280_v20 = vadd.f32 %v6279_v63, %v3163_v61  ;;  %6442 = vst.msk [vmem:[#allocation2 + $0xd8] sm:$0xff] %vm6414_vm1, %v6401_v17  ;;  %v5757_v61 = vpop.xlane.xlu1 %5756  ;;  %v3282_v63 = vld [vmem:[#allocation2 + $0xe0] sm:$0xff] }
 0x4b6   : > { %v6370_v10 = vadd.f32 %v6369_v46, %v3252_v62  ;;  %6441 = vst.msk [vmem:[#allocation2 + $0xd0] sm:$0xff] %vm6414_vm1, %v6400_v18  ;;  %v5680_v62 = vpop.xlane.xlu0 %5679  ;;  %v3283_v46 = vld [vmem:[#allocation2 + $0xe8] sm:$0xff]  ;;  %v6402_v0 = vadd.f32 %v5526_v48, %v3282_v63 }
 0x4b7   : > { %v6281_v9 = vadd.f32 %v6280_v20, %v3164_v45  ;;  %v6403_v1 = vadd.f32 %v5603_v47, %v3283_v46  ;;  %v3285_v20 = vld [vmem:[#allocation2 + $0xf8] sm:$0xff] }
 0x4b8   : > { %v6371_v12 = vadd.f32 %v6370_v10, %v3253_v6  ;;  %6443 = vst.msk [vmem:[#allocation2 + $0xe0] sm:$0xff] %vm6414_vm1, %v6402_v0  ;;  %v3284_v6 = vld [vmem:[#allocation2 + $0xf0] sm:$0xff]  ;;  %v6405_v10 = vadd.f32 %v5757_v61, %v3285_v20 }
 0x4b9   : > { %v6282_v15 = vadd.f32 %v6281_v9, %v3165_v11  ;;  %6444 = vst.msk [vmem:[#allocation2 + $0xe8] sm:$0xff] %vm6414_vm1, %v6403_v1  ;;  %v6404_v7 = vadd.f32 %v5680_v62, %v3284_v6  ;;  %v5911_v11 = vpop.xlane.xlu1 %5910 }
 0x4ba   : > { %6372 = vadd.xlane.f32.xlu1 %v6371_v12  ;;  %6446 = vst.msk [vmem:[#allocation2 + $0xf8] sm:$0xff] %vm6414_vm1, %v6405_v10  ;;  %v3286_v12 = vld [vmem:[#allocation2 + $0x100] sm:$0xff] }
 0x4bb   : > { %v6283_v23 = vadd.f32 %v6282_v15, %v3166_v8  ;;  %6445 = vst.msk [vmem:[#allocation2 + $0xf0] sm:$0xff] %vm6414_vm1, %v6404_v7  ;;  %v3287_v8 = vld [vmem:[#allocation2 + $0x108] sm:$0xff]  ;;  %v3289_v15 = vld [vmem:[#allocation2 + $0x118] sm:$0xff] }
 0x4bc   : > { %v6407_v14 = vadd.f32 %v5911_v11, %v3287_v8 }
 0x4bd   : > { %v6284_v31 = vadd.f32 %v6283_v23, %v3167_v4  ;;  %v3288_v4 = vld [vmem:[#allocation2 + $0x110] sm:$0xff]  ;;  %v3291_v23 = vld [vmem:[#allocation2 + $0x128] sm:$0xff] }
 0x4be   : > { %6448 = vst.msk [vmem:[#allocation2 + $0x108] sm:$0xff] %vm6414_vm1, %v6407_v14 }
 0x4bf   : > { %v6285_v24 = vadd.f32 %v6284_v31, %v3168_v57 }
 0x4c1   : > { %v6286_v35 = vadd.f32 %v6285_v24, %v3169_v25 }
 0x4c3   : > { %v6287_v39 = vadd.f32 %v6286_v35, %v3170_v28  ;;  %v3292_v28 = vld [vmem:[#allocation2 + $0x130] sm:$0xff] }
 0x4c5   : > { %v6288_v41 = vadd.f32 %v6287_v39, %v3171_v38 }
 0x4c7   : > { %v6289_v49 = vadd.f32 %v6288_v41, %v3172_v40 }
 0x4c8   : > { %v5834_v9 = vpop.xlane.xlu0 %5833 }
 0x4c9   : > { %v6290_v55 = vadd.f32 %v6289_v49, %v3173_v44  ;;  %v6406_v13 = vadd.f32 %v5834_v9, %v3286_v12 }
 0x4cb   : > { %v6291_v59 = vadd.f32 %v6290_v55, %v3174_v50  ;;  %6447 = vst.msk [vmem:[#allocation2 + $0x100] sm:$0xff] %vm6414_vm1, %v6406_v13 }
 0x4cd   : > { %v6292_v45 = vadd.f32 %v6291_v59, %v3175_v56 }
 0x4cf   : > { %v6293_v3 = vadd.f32 %v6292_v45, %v3176_v60 }
 0x4d1   : > { %v6294_v43 = vadd.f32 %v6293_v3, %v3177_v2 }
 0x4d3   : > { %6295 = vadd.xlane.f32.xlu0 %v6294_v43 }
 0x4e1   : > { %v6065_v16 = vpop.xlane.xlu1 %6064 }
 0x4e2   : > { %v6409_v5 = vadd.f32 %v6065_v16, %v3289_v15 }
 0x4e4   : > { %6450 = vst.msk [vmem:[#allocation2 + $0x118] sm:$0xff] %vm6414_vm1, %v6409_v5 }
 0x4fb   : > { %v5988_v21 = vpop.xlane.xlu0 %5987 }
 0x4fc   : > { %v6408_v22 = vadd.f32 %v5988_v21, %v3288_v4 }
 0x4fe   : > { %6449 = vst.msk [vmem:[#allocation2 + $0x110] sm:$0xff] %vm6414_vm1, %v6408_v22 }
 0x514   : > { %v6219_v57 = vpop.xlane.xlu1 %6218 }
 0x515   : > { %v6411_v58 = vadd.f32 %v6219_v57, %v3291_v23 }
 0x517   : > { %6452 = vst.msk [vmem:[#allocation2 + $0x128] sm:$0xff] %vm6414_vm1, %v6411_v58 }
 0x52d   : > { %v6142_v31 = vpop.xlane.xlu0 %6141 }
 0x52e   : > { %v6410_v26 = vadd.f32 %v6142_v31, %v3290_v32 }
 0x530   : > { %6451 = vst.msk [vmem:[#allocation2 + $0x120] sm:$0xff] %vm6414_vm1, %v6410_v26 }
 0x547   : > { %v6373_v25 = vpop.xlane.xlu1 %6372 }
 0x548   : > { %v6413_v24 = vadd.f32 %v6373_v25, %v3293_v27 }
 0x54a   : > { %6454 = vst.msk [vmem:[#allocation2 + $0x138] sm:$0xff] %vm6414_vm1, %v6413_v24 }
 0x560   : > { %v6296_v29 = vpop.xlane.xlu0 %6295 }
 0x561   : > { %v6412_v30 = vadd.f32 %v6296_v29, %v3292_v28 }
 0x563   : > { %6453 = vst.msk [vmem:[#allocation2 + $0x130] sm:$0xff] %vm6414_vm1, %v6412_v30 }
 0x564 PF: > { %p16212_p0 = scmp.ne.s32.totalorder %s16457_s12, 2 }
 0x565   : > { %v6459_v33 = vld [vmem:[%s16643_s14] sm:$0xff] (!%p16212_p0)  ;;  %v6460_v34 = vld [vmem:[%s16643_s14 + $0x8] sm:$0xff] (!%p16212_p0)  ;;  %v6461_v35 = vld [vmem:[%s16643_s14 + $0x10] sm:$0xff] (!%p16212_p0)  ;;  %v9499_v36 = vlaneseq (!%p16212_p0)  ;;  %vm15852_vm3 = vcmask (!%p16212_p0), 7168  }
 0x566   : > { %6458 = sbr.rel (%p16212_p0) target bundleno = 1757 (0x6dd), region = 40  ;;  %v6462_v37 = vld [vmem:[%s16643_s14 + $0x18] sm:$0xff] (!%p16212_p0)  ;;  %v12732_v38 = vadd.f32 (!%p16212_p0), %v6460_v34, %v6459_v33  ;;  %v6611_v39 = vld [vmem:[%s16643_s14 + $0x4c0] sm:$0xff] (!%p16212_p0)  ;;  %v6612_v53 = vld [vmem:[%s16643_s14 + $0x4c8] sm:$0xff] (!%p16212_p0) }
 0x567   : > { %v6463_v40 = vld [vmem:[%s16643_s14 + $0x20] sm:$0xff] (!%p16212_p0)  ;;  %v9500_v54 = vand.u32 (!%p16212_p0), 127, %v9499_v36  ;;  %v6613_v41 = vld [vmem:[%s16643_s14 + $0x4d0] sm:$0xff] (!%p16212_p0)  ;;  %v6614_v42 = vld [vmem:[%s16643_s14 + $0x4d8] sm:$0xff] (!%p16212_p0)  ;;  %v12886_v47 = vadd.f32 (!%p16212_p0), %v6612_v53, %v6611_v39  ;;  %vm16098_vm4 = vcmp.lt.s32.totalorder (!%p16212_p0), %v9499_v36, 320 }
 0x568   : > { %v12733_v19 = vadd.f32 (!%p16212_p0), %v12732_v38, %v6461_v35  ;;  %v6615_v44 = vld [vmem:[%s16643_s14 + $0x4e0] sm:$0xff] (!%p16212_p0)  ;;  %v6536_v49 = vld [vmem:[%s16643_s14 + $0x268] sm:$0xff] (!%p16212_p0)  ;;  %v6537_v51 = vld [vmem:[%s16643_s14 + $0x270] sm:$0xff] (!%p16212_p0) }
 0x569   : > { %v6535_v48 = vld [vmem:[%s16643_s14 + $0x260] sm:$0xff] (!%p16212_p0)  ;;  %v19851_v50 = vadd.s32 (!%p16212_p0), 512, %v9500_v54  ;;  %v6538_v52 = vld [vmem:[%s16643_s14 + $0x278] sm:$0xff] (!%p16212_p0)  ;;  %v12887_v56 = vadd.f32 (!%p16212_p0), %v12886_v47, %v6613_v41  ;;  %v6688_v60 = vld [vmem:[%s16643_s14 + $0x728] sm:$0xff] (!%p16212_p0) }
 0x56a   : > { %v6539_v55 = vld [vmem:[%s16643_s14 + $0x280] sm:$0xff] (!%p16212_p0)  ;;  %v12809_v18 = vadd.f32 (!%p16212_p0), %v6536_v49, %v6535_v48  ;;  %v12734_v17 = vadd.f32 (!%p16212_p0), %v12733_v19, %v6462_v37  ;;  %v6689_v61 = vld [vmem:[%s16643_s14 + $0x730] sm:$0xff] (!%p16212_p0)  ;;  %v6690_v6 = vld [vmem:[%s16643_s14 + $0x738] sm:$0xff] (!%p16212_p0) }
 0x56b   : > { %v6687_v59 = vld [vmem:[%s16643_s14 + $0x720] sm:$0xff] (!%p16212_p0)  ;;  %vm9580_vm2 = vcmp.lt.s32.totalorder (!%p16212_p0), %v19851_v50, 544  ;;  %v12888_v2 = vadd.f32 (!%p16212_p0), %v12887_v56, %v6614_v42  ;;  %v6764_v20 = vld [vmem:[%s16643_s14 + $0x988] sm:$0xff] (!%p16212_p0)  ;;  %v6765_v43 = vld [vmem:[%s16643_s14 + $0x990] sm:$0xff] (!%p16212_p0) }
 0x56c   : > { %v12810_v62 = vadd.f32 (!%p16212_p0), %v12809_v18, %v6537_v51  ;;  %v6691_v63 = vld [vmem:[%s16643_s14 + $0x740] sm:$0xff] (!%p16212_p0)  ;;  %v12963_v46 = vadd.f32 (!%p16212_p0), %v6688_v60, %v6687_v59  ;;  %v9656_v0 = vsel (!%p16212_p0), %vm9580_vm2, %v6463_v40, 0.0  ;;  %v9808_v1 = vsel (!%p16212_p0), %vm9580_vm2, %v6615_v44, 0.0  ;;  %v6766_v9 = vld [vmem:[%s16643_s14 + $0x998] sm:$0xff] (!%p16212_p0)  ;;  %v6840_v13 = vld [vmem:[%s16643_s14 + $0xbe8] sm:$0xff] (!%p16212_p0) }
 0x56d   : > { %v6763_v45 = vld [vmem:[%s16643_s14 + $0x980] sm:$0xff]  ;;  %v9732_v3 = vsel %vm9580_vm2, %v6539_v55, 0.0  ;;  %v12735_v7 = vadd.f32 %v12734_v17, %v9656_v0  ;;  %v12889_v14 = vadd.f32 %v12888_v2, %v9808_v1  ;;  %v9884_v15 = vsel %vm9580_vm2, %v6691_v63, 0.0  ;;  %v6841_v5 = vld [vmem:[%s16643_s14 + $0xbf0] sm:$0xff]  ;;  %v6842_v4 = vld [vmem:[%s16643_s14 + $0xbf8] sm:$0xff] }
 0x56e   : > { %v12811_v10 = vadd.f32 %v12810_v62, %v6538_v52  ;;  %v12964_v11 = vadd.f32 %v12963_v46, %v6689_v61  ;;  %v6767_v12 = vld [vmem:[%s16643_s14 + $0x9a0] sm:$0xff]  ;;  %v13040_v16 = vadd.f32 %v6764_v20, %v6763_v45  ;;  %v6916_v32 = vld [vmem:[%s16643_s14 + $0xe48] sm:$0xff]  ;;  %v6917_v31 = vld [vmem:[%s16643_s14 + $0xe50] sm:$0xff] }
 0x56f   : > { %v6839_v8 = vld [vmem:[%s16643_s14 + $0xbe0] sm:$0xff]  ;;  %12807 = vadd.xlane.f32.xlu0 %v12735_v7  ;;  %12961 = vadd.xlane.f32.xlu1 %v12889_v14  ;;  %v9960_v30 = vsel %vm9580_vm2, %v6767_v12, 0.0  ;;  %v6918_v34 = vld [vmem:[%s16643_s14 + $0xe58] sm:$0xff]  ;;  %v6992_v35 = vld [vmem:[%s16643_s14 + $0x10a8] sm:$0xff] }
 0x570   : > { %v6843_v21 = vld [vmem:[%s16643_s14 + $0xc00] sm:$0xff]  ;;  %v13117_v22 = vadd.f32 %v6840_v13, %v6839_v8  ;;  %v12812_v23 = vadd.f32 %v12811_v10, %v9732_v3  ;;  %v12965_v57 = vadd.f32 %v12964_v11, %v6690_v6  ;;  %v13041_v26 = vadd.f32 %v13040_v16, %v6765_v43  ;;  %v6993_v37 = vld [vmem:[%s16643_s14 + $0x10b0] sm:$0xff]  ;;  %v7068_v42 = vld [vmem:[%s16643_s14 + $0x1308] sm:$0xff] }
 0x571   : > { %v6915_v58 = vld [vmem:[%s16643_s14 + $0xe40] sm:$0xff]  ;;  %v10036_v33 = vsel %vm9580_vm2, %v6843_v21, 0.0  ;;  %v6994_v44 = vld [vmem:[%s16643_s14 + $0x10b8] sm:$0xff]  ;;  %v7069_v47 = vld [vmem:[%s16643_s14 + $0x1310] sm:$0xff] }
 0x572   : > { %v13118_v27 = vadd.f32 %v13117_v22, %v6841_v5  ;;  %v6919_v25 = vld [vmem:[%s16643_s14 + $0xe60] sm:$0xff]  ;;  %v13194_v24 = vadd.f32 %v6916_v32, %v6915_v58  ;;  %v12966_v29 = vadd.f32 %v12965_v57, %v9884_v15  ;;  %v13042_v38 = vadd.f32 %v13041_v26, %v6766_v9  ;;  %v7070_v48 = vld [vmem:[%s16643_s14 + $0x1318] sm:$0xff]  ;;  %v7144_v56 = vld [vmem:[%s16643_s14 + $0x1568] sm:$0xff] }
 0x573   : > { %v6991_v28 = vld [vmem:[%s16643_s14 + $0x10a0] sm:$0xff]  ;;  %12884 = vadd.xlane.f32.xlu0 %v12812_v23  ;;  %v10112_v19 = vsel %vm9580_vm2, %v6919_v25, 0.0  ;;  %v7145_v59 = vld [vmem:[%s16643_s14 + $0x1570] sm:$0xff]  ;;  %v7146_v63 = vld [vmem:[%s16643_s14 + $0x1578] sm:$0xff] }
 0x574   : > { %v13119_v39 = vadd.f32 %v13118_v27, %v6842_v4  ;;  %v13195_v40 = vadd.f32 %v13194_v24, %v6917_v31  ;;  %v6995_v54 = vld [vmem:[%s16643_s14 + $0x10c0] sm:$0xff]  ;;  %v13271_v53 = vadd.f32 %v6992_v35, %v6991_v28  ;;  %13038 = vadd.xlane.f32.xlu1 %v12966_v29  ;;  %v13043_v51 = vadd.f32 %v13042_v38, %v9960_v30  ;;  %v7220_v2 = vld [vmem:[%s16643_s14 + $0x17c8] sm:$0xff]  ;;  %v7221_v3 = vld [vmem:[%s16643_s14 + $0x17d0] sm:$0xff] }
 0x575   : > { %v7067_v41 = vld [vmem:[%s16643_s14 + $0x1300] sm:$0xff]  ;;  %v10188_v60 = vsel %vm9580_vm2, %v6995_v54, 0.0  ;;  %v7222_v7 = vld [vmem:[%s16643_s14 + $0x17d8] sm:$0xff]  ;;  %v7296_v9 = vld [vmem:[%s16643_s14 + $0x1a28] sm:$0xff] }
 0x576   : > { %v13348_v49 = vadd.f32 %v7068_v42, %v7067_v41  ;;  %v13120_v52 = vadd.f32 %v13119_v39, %v10036_v33  ;;  %v13196_v55 = vadd.f32 %v13195_v40, %v6918_v34  ;;  %v13272_v18 = vadd.f32 %v13271_v53, %v6993_v37  ;;  %v7143_v17 = vld [vmem:[%s16643_s14 + $0x1560] sm:$0xff]  ;;  %v7297_v14 = vld [vmem:[%s16643_s14 + $0x1a30] sm:$0xff]  ;;  %v7298_v15 = vld [vmem:[%s16643_s14 + $0x1a38] sm:$0xff] }
 0x577   : > { %v7071_v61 = vld [vmem:[%s16643_s14 + $0x1320] sm:$0xff]  ;;  %v13425_v46 = vadd.f32 %v7144_v56, %v7143_v17  ;;  %13115 = vadd.xlane.f32.xlu0 %v13043_v51  ;;  %v7676_v23 = vld [vmem:[%s16643_s14 + $0x2608] sm:$0xff]  ;;  %v7677_v57 = vld [vmem:[%s16643_s14 + $0x2610] sm:$0xff] }
 0x578   : > { %v13349_v62 = vadd.f32 %v13348_v49, %v7069_v47  ;;  %v7219_v45 = vld [vmem:[%s16643_s14 + $0x17c0] sm:$0xff]  ;;  %v13273_v0 = vadd.f32 %v13272_v18, %v6994_v44  ;;  %v13197_v6 = vadd.f32 %v13196_v55, %v10112_v19  ;;  %13192 = vadd.xlane.f32.xlu1 %v13120_v52  ;;  %v10264_v8 = vsel %vm9580_vm2, %v7071_v61, 0.0  ;;  %v7678_v28 = vld [vmem:[%s16643_s14 + $0x2618] sm:$0xff]  ;;  %v7752_v29 = vld [vmem:[%s16643_s14 + $0x2868] sm:$0xff] }
 0x579   : > { %v7147_v1 = vld [vmem:[%s16643_s14 + $0x1580] sm:$0xff]  ;;  %v13426_v43 = vadd.f32 %v13425_v46, %v7145_v59  ;;  %v13502_v10 = vadd.f32 %v7220_v2, %v7219_v45  ;;  %v7753_v30 = vld [vmem:[%s16643_s14 + $0x2870] sm:$0xff]  ;;  %v7828_v40 = vld [vmem:[%s16643_s14 + $0x2ac8] sm:$0xff] }
 0x57a   : > { %v13350_v20 = vadd.f32 %v13349_v62, %v7070_v48  ;;  %v7295_v11 = vld [vmem:[%s16643_s14 + $0x1a20] sm:$0xff]  ;;  %v13274_v12 = vadd.f32 %v13273_v0, %v10188_v60  ;;  %v10340_v5 = vsel %vm9580_vm2, %v7147_v1, 0.0  ;;  %v7754_v53 = vld [vmem:[%s16643_s14 + $0x2878] sm:$0xff]  ;;  %v7829_v42 = vld [vmem:[%s16643_s14 + $0x2ad0] sm:$0xff] }
 0x57b   : > { %v7223_v13 = vld [vmem:[%s16643_s14 + $0x17e0] sm:$0xff]  ;;  %v13579_v16 = vadd.f32 %v7296_v9, %v7295_v11  ;;  %v13427_v4 = vadd.f32 %v13426_v43, %v7146_v63  ;;  %v13503_v21 = vadd.f32 %v13502_v10, %v7221_v3  ;;  %13269 = vadd.xlane.f32.xlu0 %v13197_v6  ;;  %v7904_v48 = vld [vmem:[%s16643_s14 + $0x2d28] sm:$0xff]  ;;  %v7905_v49 = vld [vmem:[%s16643_s14 + $0x2d30] sm:$0xff] }
 0x57c   : > { %v7675_v22 = vld [vmem:[%s16643_s14 + $0x2600] sm:$0xff]  ;;  %v13351_v27 = vadd.f32 %v13350_v20, %v10264_v8  ;;  %v10416_v25 = vsel %vm9580_vm2, %v7223_v13, 0.0  ;;  %13346 = vadd.xlane.f32.xlu1 %v13274_v12  ;;  %v7830_v55 = vld [vmem:[%s16643_s14 + $0x2ad8] sm:$0xff]  ;;  %v7980_v63 = vld [vmem:[%s16643_s14 + $0x2f88] sm:$0xff] }
 0x57d   : > { %v7299_v58 = vld [vmem:[%s16643_s14 + $0x1a40] sm:$0xff]  ;;  %v13580_v32 = vadd.f32 %v13579_v16, %v7297_v14  ;;  %v13964_v31 = vadd.f32 %v7676_v23, %v7675_v22  ;;  %v13504_v24 = vadd.f32 %v13503_v21, %v7222_v7  ;;  %v13428_v33 = vadd.f32 %v13427_v4, %v10340_v5  ;;  %v7981_v46 = vld [vmem:[%s16643_s14 + $0x2f90] sm:$0xff]  ;;  %v7906_v0 = vld [vmem:[%s16643_s14 + $0x2d38] sm:$0xff] }
 0x57e   : > { %v7751_v26 = vld [vmem:[%s16643_s14 + $0x2860] sm:$0xff]  ;;  %v10492_v54 = vsel %vm9580_vm2, %v7299_v58, 0.0  ;;  %v8056_v6 = vld [vmem:[%s16643_s14 + $0x31e8] sm:$0xff]  ;;  %v8057_v43 = vld [vmem:[%s16643_s14 + $0x31f0] sm:$0xff] }
 0x57f   : > { %v13581_v34 = vadd.f32 %v13580_v32, %v7298_v15  ;;  %v7679_v35 = vld [vmem:[%s16643_s14 + $0x2620] sm:$0xff]  ;;  %v13965_v37 = vadd.f32 %v13964_v31, %v7677_v57  ;;  %v14041_v38 = vadd.f32 %v7752_v29, %v7751_v26  ;;  %13423 = vadd.xlane.f32.xlu0 %v13351_v27  ;;  %v13505_v51 = vadd.f32 %v13504_v24, %v10416_v25  ;;  %v7982_v12 = vld [vmem:[%s16643_s14 + $0x2f98] sm:$0xff]  ;;  %v8132_v14 = vld [vmem:[%s16643_s14 + $0x3448] sm:$0xff] }
 0x580   : > { %v7827_v39 = vld [vmem:[%s16643_s14 + $0x2ac0] sm:$0xff]  ;;  %13500 = vadd.xlane.f32.xlu1 %v13428_v33  ;;  %v10872_v60 = vsel %vm9580_vm2, %v7679_v35, 0.0  ;;  %v8133_v21 = vld [vmem:[%s16643_s14 + $0x3450] sm:$0xff]  ;;  %v8058_v58 = vld [vmem:[%s16643_s14 + $0x31f8] sm:$0xff] }
 0x581   : > { %v7755_v41 = vld [vmem:[%s16643_s14 + $0x2880] sm:$0xff]  ;;  %v14118_v19 = vadd.f32 %v7828_v40, %v7827_v39  ;;  %v14042_v44 = vadd.f32 %v14041_v38, %v7753_v30  ;;  %v13966_v52 = vadd.f32 %v13965_v37, %v7678_v28  ;;  %v13582_v59 = vadd.f32 %v13581_v34, %v10492_v54  ;;  %v8208_v32 = vld [vmem:[%s16643_s14 + $0x36a8] sm:$0xff]  ;;  %v8209_v31 = vld [vmem:[%s16643_s14 + $0x36b0] sm:$0xff] }
 0x582   : > { %v7903_v47 = vld [vmem:[%s16643_s14 + $0x2d20] sm:$0xff]  ;;  %v10948_v45 = vsel %vm9580_vm2, %v7755_v41, 0.0  ;;  %v8284_v24 = vld [vmem:[%s16643_s14 + $0x3908] sm:$0xff]  ;;  %v8134_v30 = vld [vmem:[%s16643_s14 + $0x3458] sm:$0xff] }
 0x583   : > { %v14119_v18 = vadd.f32 %v14118_v19, %v7829_v42  ;;  %v14195_v17 = vadd.f32 %v7904_v48, %v7903_v47  ;;  %v7979_v56 = vld [vmem:[%s16643_s14 + $0x2f80] sm:$0xff]  ;;  %v14043_v61 = vadd.f32 %v14042_v44, %v7754_v53  ;;  %13577 = vadd.xlane.f32.xlu0 %v13505_v51  ;;  %v13967_v10 = vadd.f32 %v13966_v52, %v10872_v60  ;;  %v8285_v54 = vld [vmem:[%s16643_s14 + $0x3910] sm:$0xff]  ;;  %v8360_v41 = vld [vmem:[%s16643_s14 + $0x3b68] sm:$0xff] }
 0x584   : > { %v7831_v62 = vld [vmem:[%s16643_s14 + $0x2ae0] sm:$0xff]  ;;  %v14272_v2 = vadd.f32 %v7980_v63, %v7979_v56  ;;  %13654 = vadd.xlane.f32.xlu1 %v13582_v59  ;;  %v8210_v19 = vld [vmem:[%s16643_s14 + $0x36b8] sm:$0xff]  ;;  %v8361_v44 = vld [vmem:[%s16643_s14 + $0x3b70] sm:$0xff] }
 0x585   : > { %v14196_v1 = vadd.f32 %v14195_v17, %v7905_v49  ;;  %v8055_v3 = vld [vmem:[%s16643_s14 + $0x31e0] sm:$0xff]  ;;  %v11024_v11 = vsel %vm9580_vm2, %v7831_v62, 0.0  ;;  %v14120_v9 = vadd.f32 %v14119_v18, %v7830_v55  ;;  %v14044_v15 = vadd.f32 %v14043_v61, %v10948_v45  ;;  %v8892_v52 = vld [vmem:[%s16643_s14 + $0x4c08] sm:$0xff]  ;;  %v8362_v45 = vld [vmem:[%s16643_s14 + $0x3b78] sm:$0xff] }
 0x586   : > { %v7907_v20 = vld [vmem:[%s16643_s14 + $0x2d40] sm:$0xff]  ;;  %v14349_v7 = vadd.f32 %v8056_v6, %v8055_v3  ;;  %v14273_v8 = vadd.f32 %v14272_v2, %v7981_v46  ;;  %v8436_v61 = vld [vmem:[%s16643_s14 + $0x3dc8] sm:$0xff]  ;;  %v8286_v46 = vld [vmem:[%s16643_s14 + $0x3918] sm:$0xff] }
 0x587   : > { %v8131_v13 = vld [vmem:[%s16643_s14 + $0x3440] sm:$0xff]  ;;  %v14197_v16 = vadd.f32 %v14196_v1, %v7906_v0  ;;  %v11100_v57 = vsel %vm9580_vm2, %v7907_v20, 0.0  ;;  %14039 = vadd.xlane.f32.xlu0 %v13967_v10  ;;  %v14121_v28 = vadd.f32 %v14120_v9, %v11024_v11  ;;  %v8893_v1 = vld [vmem:[%s16643_s14 + $0x4c10] sm:$0xff] }
 0x588   : > { %v7983_v5 = vld [vmem:[%s16643_s14 + $0x2fa0] sm:$0xff]  ;;  %v14350_v4 = vadd.f32 %v14349_v7, %v8057_v43  ;;  %v14426_v22 = vadd.f32 %v8132_v14, %v8131_v13  ;;  %v14274_v29 = vadd.f32 %v14273_v8, %v7982_v12  ;;  %14116 = vadd.xlane.f32.xlu1 %v14044_v15  ;;  %v8437_v6 = vld [vmem:[%s16643_s14 + $0x3dd0] sm:$0xff]  ;;  %v8968_v43 = vld [vmem:[%s16643_s14 + $0x4e68] sm:$0xff] }
 0x589   : > { %v8207_v23 = vld [vmem:[%s16643_s14 + $0x36a0] sm:$0xff]  ;;  %v14198_v37 = vadd.f32 %v14197_v16, %v11100_v57  ;;  %v11176_v38 = vsel %vm9580_vm2, %v7983_v5, 0.0  ;;  %v8894_v8 = vld [vmem:[%s16643_s14 + $0x4c18] sm:$0xff]  ;;  %v8512_v16 = vld [vmem:[%s16643_s14 + $0x4028] sm:$0xff] }
 0x58a   : > { %v8059_v26 = vld [vmem:[%s16643_s14 + $0x3200] sm:$0xff]  ;;  %v14503_v27 = vadd.f32 %v8208_v32, %v8207_v23  ;;  %v14427_v34 = vadd.f32 %v14426_v22, %v8133_v21  ;;  %v14351_v39 = vadd.f32 %v14350_v4, %v8058_v58  ;;  %v14275_v55 = vadd.f32 %v14274_v29, %v11176_v38  ;;  %v8969_v22 = vld [vmem:[%s16643_s14 + $0x4e70] sm:$0xff]  ;;  %v9044_v58 = vld [vmem:[%s16643_s14 + $0x50c8] sm:$0xff] }
 0x58b   : > { %v8283_v25 = vld [vmem:[%s16643_s14 + $0x3900] sm:$0xff]  ;;  %v11252_v42 = vsel %vm9580_vm2, %v8059_v26, 0.0  ;;  %14193 = vadd.xlane.f32.xlu0 %v14121_v28  ;;  %v8513_v26 = vld [vmem:[%s16643_s14 + $0x4030] sm:$0xff]  ;;  %v7372_v28 = vld [vmem:[%s16643_s14 + $0x1c88] sm:$0xff] }
 0x58c   : > { %v8135_v33 = vld [vmem:[%s16643_s14 + $0x3460] sm:$0xff]  ;;  %v14580_v35 = vadd.f32 %v8284_v24, %v8283_v25  ;;  %v14504_v40 = vadd.f32 %v14503_v27, %v8209_v31  ;;  %v14428_v18 = vadd.f32 %v14427_v34, %v8134_v30  ;;  %14270 = vadd.xlane.f32.xlu1 %v14198_v37  ;;  %v14352_v62 = vadd.f32 %v14351_v39, %v11252_v42  ;;  %v8438_v31 = vld [vmem:[%s16643_s14 + $0x3dd8] sm:$0xff] }
 0x58d   : > { %v8359_v53 = vld [vmem:[%s16643_s14 + $0x3b60] sm:$0xff]  ;;  %v11328_v49 = vsel %vm9580_vm2, %v8135_v33, 0.0  ;;  %v8970_v33 = vld [vmem:[%s16643_s14 + $0x4e78] sm:$0xff] }
 0x58e   : > { %v14657_v47 = vadd.f32 %v8360_v41, %v8359_v53  ;;  %v8891_v48 = vld [vmem:[%s16643_s14 + $0x4c00] sm:$0xff]  ;;  %v14581_v56 = vadd.f32 %v14580_v35, %v8285_v54  ;;  %v14505_v63 = vadd.f32 %v14504_v40, %v8210_v19  ;;  %v14429_v9 = vadd.f32 %v14428_v18, %v11328_v49  ;;  %v8514_v37 = vld [vmem:[%s16643_s14 + $0x4038] sm:$0xff]  ;;  %v9045_v53 = vld [vmem:[%s16643_s14 + $0x50d0] sm:$0xff] }
 0x58f   : > { %v8211_v51 = vld [vmem:[%s16643_s14 + $0x36c0] sm:$0xff]  ;;  %v15196_v59 = vadd.f32 %v8892_v52, %v8891_v48  ;;  %14347 = vadd.xlane.f32.xlu0 %v14275_v55  ;;  %v8588_v19 = vld [vmem:[%s16643_s14 + $0x4288] sm:$0xff] }
 0x590   : > { %v8287_v17 = vld [vmem:[%s16643_s14 + $0x3920] sm:$0xff]  ;;  %v14658_v0 = vadd.f32 %v14657_v47, %v8361_v44  ;;  %v11404_v3 = vsel %vm9580_vm2, %v8211_v51, 0.0  ;;  %v14582_v12 = vadd.f32 %v14581_v56, %v8286_v46  ;;  %14424 = vadd.xlane.f32.xlu1 %v14352_v62  ;;  %v7373_v47 = vld [vmem:[%s16643_s14 + $0x1c90] sm:$0xff]  ;;  %v9120_v49 = vld [vmem:[%s16643_s14 + $0x5328] sm:$0xff] }
 0x591   : > { %v8435_v60 = vld [vmem:[%s16643_s14 + $0x3dc0] sm:$0xff]  ;;  %v11480_v7 = vsel %vm9580_vm2, %v8287_v17, 0.0  ;;  %v15197_v14 = vadd.f32 %v15196_v59, %v8893_v1  ;;  %v14506_v5 = vadd.f32 %v14505_v63, %v11404_v3  ;;  %v9046_v17 = vld [vmem:[%s16643_s14 + $0x50d8] sm:$0xff] }
 0x592   : > { %v14734_v2 = vadd.f32 %v8436_v61, %v8435_v60  ;;  %v8967_v20 = vld [vmem:[%s16643_s14 + $0x4e60] sm:$0xff]  ;;  %v14659_v4 = vadd.f32 %v14658_v0, %v8362_v45  ;;  %v14583_v29 = vadd.f32 %v14582_v12, %v11480_v7  ;;  %v7374_v60 = vld [vmem:[%s16643_s14 + $0x1c98] sm:$0xff]  ;;  %v8589_v45 = vld [vmem:[%s16643_s14 + $0x4290] sm:$0xff] }
 0x593   : > { %v8363_v10 = vld [vmem:[%s16643_s14 + $0x3b80] sm:$0xff]  ;;  %v15273_v15 = vadd.f32 %v8968_v43, %v8967_v20  ;;  %14501 = vadd.xlane.f32.xlu0 %v14429_v9  ;;  %v15198_v30 = vadd.f32 %v15197_v14, %v8894_v8  ;;  %v8664_v43 = vld [vmem:[%s16643_s14 + $0x44e8] sm:$0xff]  ;;  %v8590_v12 = vld [vmem:[%s16643_s14 + $0x4298] sm:$0xff] }
 0x594   : > { %v8511_v11 = vld [vmem:[%s16643_s14 + $0x4020] sm:$0xff]  ;;  %v14735_v21 = vadd.f32 %v14734_v2, %v8437_v6  ;;  %v11556_v32 = vsel %vm9580_vm2, %v8363_v10, 0.0  ;;  %14578 = vadd.xlane.f32.xlu1 %v14506_v5  ;;  %v7448_v2 = vld [vmem:[%s16643_s14 + $0x1ee8] sm:$0xff]  ;;  %v9121_v6 = vld [vmem:[%s16643_s14 + $0x5330] sm:$0xff] }
 0x595   : > { %v8895_v13 = vld [vmem:[%s16643_s14 + $0x4c20] sm:$0xff]  ;;  %v14811_v23 = vadd.f32 %v8512_v16, %v8511_v11  ;;  %v15274_v35 = vadd.f32 %v15273_v15, %v8969_v22  ;;  %v14660_v39 = vadd.f32 %v14659_v4, %v11556_v32  ;;  %v9122_v14 = vld [vmem:[%s16643_s14 + $0x5338] sm:$0xff]  ;;  %v8665_v32 = vld [vmem:[%s16643_s14 + $0x44f0] sm:$0xff] }
 0x596   : > { %v9043_v57 = vld [vmem:[%s16643_s14 + $0x50c0] sm:$0xff]  ;;  %v12088_v27 = vsel %vm9580_vm2, %v8895_v13, 0.0  ;;  %v14736_v40 = vadd.f32 %v14735_v21, %v8438_v31  ;;  %v7449_v21 = vld [vmem:[%s16643_s14 + $0x1ef0] sm:$0xff] }
 0x597   : > { %v8439_v25 = vld [vmem:[%s16643_s14 + $0x3de0] sm:$0xff]  ;;  %v15350_v38 = vadd.f32 %v9044_v58, %v9043_v57  ;;  %v14812_v54 = vadd.f32 %v14811_v23, %v8513_v26  ;;  %14655 = vadd.xlane.f32.xlu0 %v14583_v29  ;;  %v15199_v55 = vadd.f32 %v15198_v30, %v12088_v27  ;;  %v15275_v18 = vadd.f32 %v15274_v35, %v8970_v33  ;;  %v9196_v57 = vld [vmem:[%s16643_s14 + $0x5588] sm:$0xff]  ;;  %v7450_v29 = vld [vmem:[%s16643_s14 + $0x1ef8] sm:$0xff] }
 0x598   : > { %v7371_v24 = vld [vmem:[%s16643_s14 + $0x1c80] sm:$0xff]  ;;  %v11632_v44 = vsel %vm9580_vm2, %v8439_v25, 0.0  ;;  %14732 = vadd.xlane.f32.xlu1 %v14660_v39  ;;  %v7524_v26 = vld [vmem:[%s16643_s14 + $0x2148] sm:$0xff] }
 0x599   : > { %v8971_v34 = vld [vmem:[%s16643_s14 + $0x4e80] sm:$0xff]  ;;  %v13656_v41 = vadd.f32 %v7372_v28, %v7371_v24  ;;  %v15351_v59 = vadd.f32 %v15350_v38, %v9045_v53  ;;  %v14737_v62 = vadd.f32 %v14736_v40, %v11632_v44  ;;  %v14813_v63 = vadd.f32 %v14812_v54, %v8514_v37  ;;  %v9197_v40 = vld [vmem:[%s16643_s14 + $0x5590] sm:$0xff] }
 0x59a   : > { %v8587_v42 = vld [vmem:[%s16643_s14 + $0x4280] sm:$0xff]  ;;  %v12164_v51 = vsel %vm9580_vm2, %v8971_v34, 0.0  ;;  %v8666_v34 = vld [vmem:[%s16643_s14 + $0x44f8] sm:$0xff] }
 0x59b   : > { %v9119_v48 = vld [vmem:[%s16643_s14 + $0x5320] sm:$0xff]  ;;  %v14888_v61 = vadd.f32 %v8588_v19, %v8587_v42  ;;  %v13657_v46 = vadd.f32 %v13656_v41, %v7373_v47  ;;  %15271 = vadd.xlane.f32.xlu0 %v15199_v55  ;;  %v15276_v11 = vadd.f32 %v15275_v18, %v12164_v51  ;;  %v15352_v9 = vadd.f32 %v15351_v59, %v9046_v17  ;;  %v8740_v41 = vld [vmem:[%s16643_s14 + $0x4748] sm:$0xff]  ;;  %v7525_v19 = vld [vmem:[%s16643_s14 + $0x2150] sm:$0xff] }
 0x59c   : > { %v8515_v52 = vld [vmem:[%s16643_s14 + $0x4040] sm:$0xff]  ;;  %v15427_v0 = vadd.f32 %v9120_v49, %v9119_v48  ;;  %14809 = vadd.xlane.f32.xlu1 %v14737_v62  ;;  %v9272_v47 = vld [vmem:[%s16643_s14 + $0x57e8] sm:$0xff]  ;;  %v9198_v55 = vld [vmem:[%s16643_s14 + $0x5598] sm:$0xff] }
 0x59d   : > { %v9047_v56 = vld [vmem:[%s16643_s14 + $0x50e0] sm:$0xff]  ;;  %v11708_v3 = vsel %vm9580_vm2, %v8515_v52, 0.0  ;;  %v14889_v13 = vadd.f32 %v14888_v61, %v8589_v45  ;;  %v13658_v5 = vadd.f32 %v13657_v46, %v7374_v60  ;;  %v7600_v45 = vld [vmem:[%s16643_s14 + $0x23a8] sm:$0xff] }
 0x59e   : > { %v7447_v1 = vld [vmem:[%s16643_s14 + $0x1ee0] sm:$0xff]  ;;  %v12240_v7 = vsel %vm9580_vm2, %v9047_v56, 0.0  ;;  %v14814_v16 = vadd.f32 %v14813_v63, %v11708_v3  ;;  %v15428_v4 = vadd.f32 %v15427_v0, %v9121_v6  ;;  %v7526_v56 = vld [vmem:[%s16643_s14 + $0x2158] sm:$0xff]  ;;  %v8741_v63 = vld [vmem:[%s16643_s14 + $0x4750] sm:$0xff] }
 0x59f   : > { %v8663_v20 = vld [vmem:[%s16643_s14 + $0x44e0] sm:$0xff]  ;;  %v13733_v15 = vadd.f32 %v7448_v2, %v7447_v1  ;;  %15348 = vadd.xlane.f32.xlu0 %v15276_v11  ;;  %v15353_v24 = vadd.f32 %v15352_v9, %v12240_v7  ;;  %v14890_v28 = vadd.f32 %v14889_v13, %v8590_v12  ;;  %v9273_v2 = vld [vmem:[%s16643_s14 + $0x57f0] sm:$0xff]  ;;  %v8816_v6 = vld [vmem:[%s16643_s14 + $0x49a8] sm:$0xff] }
 0x5a0   : > { %v7375_v10 = vld [vmem:[%s16643_s14 + $0x1ca0] sm:$0xff]  ;;  %v14965_v22 = vadd.f32 %v8664_v43, %v8663_v20  ;;  %14886 = vadd.xlane.f32.xlu1 %v14814_v16  ;;  %v15429_v38 = vadd.f32 %v15428_v4, %v9122_v14  ;;  %v8742_v11 = vld [vmem:[%s16643_s14 + $0x4758] sm:$0xff] }
 0x5a1   : > { %v8591_v8 = vld [vmem:[%s16643_s14 + $0x42a0] sm:$0xff]  ;;  %v10568_v58 = vsel %vm9580_vm2, %v7375_v10, 0.0  ;;  %v13734_v33 = vadd.f32 %v13733_v15, %v7449_v21  ;;  %v9274_v16 = vld [vmem:[%s16643_s14 + $0x57f8] sm:$0xff] }
 0x5a2   : > { %v9195_v23 = vld [vmem:[%s16643_s14 + $0x5580] sm:$0xff]  ;;  %v11784_v27 = vsel %vm9580_vm2, %v8591_v8, 0.0  ;;  %v13659_v37 = vadd.f32 %v13658_v5, %v10568_v58  ;;  %v14966_v39 = vadd.f32 %v14965_v22, %v8665_v32  ;;  %v7601_v8 = vld [vmem:[%s16643_s14 + $0x23b0] sm:$0xff]  ;;  %v9348_v22 = vld [vmem:[%s16643_s14 + $0x5a48] sm:$0xff] }
 0x5a3   : > { %v7523_v31 = vld [vmem:[%s16643_s14 + $0x2140] sm:$0xff]  ;;  %v15504_v35 = vadd.f32 %v9196_v57, %v9195_v23  ;;  %15425 = vadd.xlane.f32.xlu0 %v15353_v24  ;;  %v14891_v51 = vadd.f32 %v14890_v28, %v11784_v27  ;;  %v13735_v52 = vadd.f32 %v13734_v33, %v7450_v29  ;;  %v8817_v57 = vld [vmem:[%s16643_s14 + $0x49b0] sm:$0xff]  ;;  %v9424_v32 = vld [vmem:[%s16643_s14 + $0x5ca8] sm:$0xff] }
 0x5a4   : > { %v9123_v25 = vld [vmem:[%s16643_s14 + $0x5340] sm:$0xff]  ;;  %v13810_v54 = vadd.f32 %v7524_v26, %v7523_v31  ;;  %13731 = vadd.xlane.f32.xlu1 %v13659_v37  ;;  %v14967_v61 = vadd.f32 %v14966_v39, %v8666_v34 }
 0x5a5   : > { %v7451_v30 = vld [vmem:[%s16643_s14 + $0x1f00] sm:$0xff]  ;;  %v12316_v42 = vsel %vm9580_vm2, %v9123_v25, 0.0  ;;  %v15505_v17 = vadd.f32 %v15504_v35, %v9197_v40  ;;  %v9349_v35 = vld [vmem:[%s16643_s14 + $0x5a50] sm:$0xff]  ;;  %v8818_v40 = vld [vmem:[%s16643_s14 + $0x49b8] sm:$0xff] }
 0x5a6   : > { %v8739_v53 = vld [vmem:[%s16643_s14 + $0x4740] sm:$0xff]  ;;  %v10644_v48 = vsel %vm9580_vm2, %v7451_v30, 0.0  ;;  %v15430_v60 = vadd.f32 %v15429_v38, %v12316_v42  ;;  %v13811_v62 = vadd.f32 %v13810_v54, %v7525_v19  ;;  %v7602_v30 = vld [vmem:[%s16643_s14 + $0x23b8] sm:$0xff]  ;;  %v9425_v54 = vld [vmem:[%s16643_s14 + $0x5cb0] sm:$0xff] }
 0x5a7   : > { %v9271_v44 = vld [vmem:[%s16643_s14 + $0x57e0] sm:$0xff]  ;;  %v15042_v59 = vadd.f32 %v8740_v41, %v8739_v53  ;;  %14963 = vadd.xlane.f32.xlu0 %v14891_v51  ;;  %v13736_v7 = vadd.f32 %v13735_v52, %v10644_v48  ;;  %v15506_v10 = vadd.f32 %v15505_v17, %v9198_v55 }
 0x5a8   : > { %v8667_v49 = vld [vmem:[%s16643_s14 + $0x4500] sm:$0xff]  ;;  %v15581_v0 = vadd.f32 %v9272_v47, %v9271_v44  ;;  %15502 = vadd.xlane.f32.xlu1 %v15430_v60  ;;  %v13812_v15 = vadd.f32 %v13811_v62, %v7526_v56 }
 0x5a9   : > { %v9199_v18 = vld [vmem:[%s16643_s14 + $0x55a0] sm:$0xff]  ;;  %v11860_v1 = vsel %vm9580_vm2, %v8667_v49, 0.0  ;;  %v15043_v12 = vadd.f32 %v15042_v59, %v8741_v63  ;;  %v9350_v49 = vld [vmem:[%s16643_s14 + $0x5a58] sm:$0xff] }
 0x5aa   : > { %v7599_v46 = vld [vmem:[%s16643_s14 + $0x23a0] sm:$0xff]  ;;  %v12392_v20 = vsel %vm9580_vm2, %v9199_v18, 0.0  ;;  %v14968_v14 = vadd.f32 %v14967_v61, %v11860_v1  ;;  %v15582_v5 = vadd.f32 %v15581_v0, %v9273_v2  ;;  %v9426_v18 = vld [vmem:[%s16643_s14 + $0x5cb8] sm:$0xff]  ;;  %v12694_v1 = vld [vmem:[#allocation2 + $0x10] sm:$0xff] }
 0x5ab   : > { %v8815_v3 = vld [vmem:[%s16643_s14 + $0x49a0] sm:$0xff]  ;;  %v13887_v13 = vadd.f32 %v7600_v45, %v7599_v46  ;;  %13808 = vadd.xlane.f32.xlu0 %v13736_v7  ;;  %v15507_v27 = vadd.f32 %v15506_v10, %v12392_v20  ;;  %v15044_v25 = vadd.f32 %v15043_v12, %v8742_v11  ;;  %v12695_v7 = vld [vmem:[#allocation2 + $0x18] sm:$0xff] }
 0x5ac   : > { %v7527_v43 = vld [vmem:[%s16643_s14 + $0x2160] sm:$0xff]  ;;  %v15119_v4 = vadd.f32 %v8816_v6, %v8815_v3  ;;  %15040 = vadd.xlane.f32.xlu1 %v14968_v14  ;;  %v15583_v33 = vadd.f32 %v15582_v5, %v9274_v16  ;;  %v12698_v5 = vld [vmem:[#allocation2 + $0x30] sm:$0xff] }
 0x5ad   : > { %v8743_v9 = vld [vmem:[%s16643_s14 + $0x4760] sm:$0xff]  ;;  %v10720_v23 = vsel %vm9580_vm2, %v7527_v43, 0.0  ;;  %v13888_v24 = vadd.f32 %v13887_v13, %v7601_v8  ;;  %v12693_v43 = vld [vmem:[#allocation2 + $0x8] sm:$0xff] }
 0x5ae   : > { %v9347_v21 = vld [vmem:[%s16643_s14 + $0x5a40] sm:$0xff]  ;;  %v11936_v31 = vsel %vm9580_vm2, %v8743_v9, 0.0  ;;  %v13813_v29 = vadd.f32 %v13812_v15, %v10720_v23  ;;  %v15120_v34 = vadd.f32 %v15119_v4, %v8817_v57  ;;  %v12697_v8 = vld [vmem:[#allocation2 + $0x28] sm:$0xff] }
 0x5af   : > { %v9423_v58 = vld [vmem:[%s16643_s14 + $0x5ca0] sm:$0xff]  ;;  %v15658_v28 = vadd.f32 %v9348_v22, %v9347_v21  ;;  %15579 = vadd.xlane.f32.xlu0 %v15507_v27  ;;  %v15045_v41 = vadd.f32 %v15044_v25, %v11936_v31  ;;  %v13889_v42 = vadd.f32 %v13888_v24, %v7602_v30  ;;  %v12699_v22 = vld [vmem:[#allocation2 + $0x38] sm:$0xff]  ;;  %v12701_v25 = vld [vmem:[#allocation2 + $0x48] sm:$0xff] }
 0x5b0   : > { %v9275_v26 = vld [vmem:[%s16643_s14 + $0x5800] sm:$0xff]  ;;  %v15735_v37 = vadd.f32 %v9424_v32, %v9423_v58  ;;  %13885 = vadd.xlane.f32.xlu1 %v13813_v29  ;;  %v15121_v48 = vadd.f32 %v15120_v34, %v8818_v40  ;;  %v12702_v34 = vld [vmem:[#allocation2 + $0x50] sm:$0xff] }
 0x5b1   : > { %v7603_v38 = vld [vmem:[%s16643_s14 + $0x23c0] sm:$0xff]  ;;  %v12468_v39 = vsel %vm9580_vm2, %v9275_v26, 0.0  ;;  %v15659_v19 = vadd.f32 %v15658_v28, %v9349_v35 }
 0x5b2   : > { %v8819_v53 = vld [vmem:[%s16643_s14 + $0x49c0] sm:$0xff]  ;;  %v10796_v44 = vsel %vm9580_vm2, %v7603_v38, 0.0  ;;  %v15584_v47 = vadd.f32 %v15583_v33, %v12468_v39  ;;  %v15736_v51 = vadd.f32 %v15735_v37, %v9425_v54  ;;  %v12703_v37 = vld [vmem:[#allocation2 + $0x58] sm:$0xff] }
 0x5b3   : > { %v12012_v52 = vsel %vm9580_vm2, %v8819_v53, 0.0  ;;  %v9351_v55 = vld [vmem:[%s16643_s14 + $0x5a60] sm:$0xff]  ;;  %15117 = vadd.xlane.f32.xlu0 %v15045_v41  ;;  %v13890_v56 = vadd.f32 %v13889_v42, %v10796_v44  ;;  %v15660_v59 = vadd.f32 %v15659_v19, %v9350_v49  ;;  %v12709_v19 = vld [vmem:[#allocation2 + $0x88] sm:$0xff] }
 0x5b4   : > { %v9427_v17 = vld [vmem:[%s16643_s14 + $0x5cc0] sm:$0xff]  ;;  %15656 = vadd.xlane.f32.xlu1 %v15584_v47  ;;  %v15122_v60 = vadd.f32 %v15121_v48, %v12012_v52  ;;  %v12544_v61 = vsel %vm9580_vm2, %v9351_v55, 0.0  ;;  %v15737_v62 = vadd.f32 %v15736_v51, %v9426_v18  ;;  %v12710_v52 = vld [vmem:[#allocation2 + $0x90] sm:$0xff]  ;;  %v12711_v18 = vld [vmem:[#allocation2 + $0x98] sm:$0xff] }
 0x5b5   : > { %v12620_v63 = vsel %vm9580_vm2, %v9427_v17, 0.0  ;;  %v15661_v46 = vadd.f32 %v15660_v59, %v12544_v61  ;;  %v12692_v0 = vld [vmem:[#allocation2] sm:$0xff] }
 0x5b6   : > { %v15738_v45 = vadd.f32 %v15737_v62, %v12620_v63  ;;  %v12696_v12 = vld [vmem:[#allocation2 + $0x20] sm:$0xff] }
 0x5b7   : > { %13962 = vadd.xlane.f32.xlu0 %v13890_v56  ;;  %v12700_v31 = vld [vmem:[#allocation2 + $0x40] sm:$0xff] }
 0x5b8   : > { %15194 = vadd.xlane.f32.xlu1 %v15122_v60  ;;  %v12708_v41 = vld [vmem:[#allocation2 + $0x80] sm:$0xff] }
 0x5b9   : > { %v12712_v62 = vld [vmem:[#allocation2 + $0xa0] sm:$0xff] }
 0x5bb   : > { %15733 = vadd.xlane.f32.xlu0 %v15661_v46  ;;  %v12713_v46 = vld [vmem:[#allocation2 + $0xa8] sm:$0xff] }
 0x5bc   : > { %15810 = vadd.xlane.f32.xlu1 %v15738_v45 }
 0x5fc   : > { %v12808_v2 = vpop.xlane.xlu0 %12807  ;;  %v12962_v6 = vpop.xlane.xlu1 %12961 }
 0x5fd   : > { %v15812_v3 = vadd.f32 %v12808_v2, %v12692_v0  ;;  %v15814_v20 = vadd.f32 %v12962_v6, %v12694_v1  ;;  %v12714_v6 = vld [vmem:[#allocation2 + $0xb0] sm:$0xff] }
 0x5ff   : > { %15853 = vst.msk [vmem:[#allocation2] sm:$0xff] %vm15852_vm3, %v15812_v3  ;;  %15855 = vst.msk [vmem:[#allocation2 + $0x10] sm:$0xff] %vm15852_vm3, %v15814_v20 }
 0x600   : > { %v12885_v50 = vpop.xlane.xlu0 %12884 }
 0x601   : > { %v15813_v10 = vadd.f32 %v12885_v50, %v12693_v43  ;;  %v13039_v11 = vpop.xlane.xlu1 %13038  ;;  %v12715_v50 = vld [vmem:[#allocation2 + $0xb8] sm:$0xff] }
 0x602   : > { %v15815_v9 = vadd.f32 %v13039_v11, %v12695_v7 }
 0x603   : > { %15854 = vst.msk [vmem:[#allocation2 + $0x8] sm:$0xff] %vm15852_vm3, %v15813_v10 }
 0x604   : > { %15856 = vst.msk [vmem:[#allocation2 + $0x18] sm:$0xff] %vm15852_vm3, %v15815_v9  ;;  %v13116_v13 = vpop.xlane.xlu0 %13115 }
 0x605   : > { %v15816_v14 = vadd.f32 %v13116_v13, %v12696_v12  ;;  %v13193_v15 = vpop.xlane.xlu1 %13192 }
 0x606   : > { %v15817_v16 = vadd.f32 %v13193_v15, %v12697_v8  ;;  %v15893_v4 = vld [vmem:[#allocation2] sm:$0xff]  ;;  %v15895_v28 = vld [vmem:[#allocation2 + $0x10] sm:$0xff] }
 0x607   : > { %15857 = vst.msk [vmem:[#allocation2 + $0x20] sm:$0xff] %vm15852_vm3, %v15816_v14  ;;  %v15933_v21 = vmul.f32 5e-05, %v15893_v4  ;;  %v15935_v35 = vmul.f32 5e-05, %v15895_v28  ;;  %v12716_v15 = vld [vmem:[#allocation2 + $0xc0] sm:$0xff] }
 0x608   : > { %15858 = vst.msk [vmem:[#allocation2 + $0x28] sm:$0xff] %vm15852_vm3, %v15817_v16  ;;  %v13270_v23 = vpop.xlane.xlu0 %13269 }
 0x609   : > { %v15818_v57 = vadd.f32 %v13270_v23, %v12698_v5  ;;  %15973 = vxpose.xlu0.b32.start [1/16] (narrow) %v15933_v21, 8  ;;  %v13347_v58 = vpop.xlane.xlu1 %13346  ;;  %v12717_v5 = vld [vmem:[#allocation2 + $0xc8] sm:$0xff] }
 0x60a   : > { %v15819_v32 = vadd.f32 %v13347_v58, %v12699_v22  ;;  %v15894_v26 = vld [vmem:[#allocation2 + $0x8] sm:$0xff] }
 0x60b   : > { %15859 = vst.msk [vmem:[#allocation2 + $0x30] sm:$0xff] %vm15852_vm3, %v15818_v57  ;;  %v15934_v27 = vmul.f32 5e-05, %v15894_v26  ;;  %v15896_v39 = vld [vmem:[#allocation2 + $0x18] sm:$0xff] }
 0x60c   : > { %15860 = vst.msk [vmem:[#allocation2 + $0x38] sm:$0xff] %vm15852_vm3, %v15819_v32  ;;  %v13424_v24 = vpop.xlane.xlu0 %13423  ;;  %v15936_v42 = vmul.f32 5e-05, %v15896_v39  ;;  %v12724_v32 = vld [vmem:[#allocation2 + $0x100] sm:$0xff] }
 0x60d   : > { %v15820_v29 = vadd.f32 %v13424_v24, %v12700_v31  ;;  %15974 = vxpose.xlu0.b32.cont [2/16] (narrow) %v15934_v27, 8  ;;  %v13501_v30 = vpop.xlane.xlu1 %13500  ;;  %v12718_v27 = vld [vmem:[#allocation2 + $0xd0] sm:$0xff] }
 0x60e   : > { %v15821_v33 = vadd.f32 %v13501_v30, %v12701_v25  ;;  %v15897_v47 = vld [vmem:[#allocation2 + $0x20] sm:$0xff] }
 0x60f   : > { %15861 = vst.msk [vmem:[#allocation2 + $0x40] sm:$0xff] %vm15852_vm3, %v15820_v29  ;;  %v15937_v55 = vmul.f32 5e-05, %v15897_v47  ;;  %v15898_v56 = vld [vmem:[#allocation2 + $0x28] sm:$0xff] }
 0x610   : > { %15862 = vst.msk [vmem:[#allocation2 + $0x48] sm:$0xff] %vm15852_vm3, %v15821_v33  ;;  %v13578_v38 = vpop.xlane.xlu0 %13577  ;;  %v15938_v63 = vmul.f32 5e-05, %v15898_v56  ;;  %v12720_v56 = vld [vmem:[#allocation2 + $0xe0] sm:$0xff] }
 0x611   : > { %v15822_v40 = vadd.f32 %v13578_v38, %v12702_v34  ;;  %15975 = vxpose.xlu0.b32.cont [3/16] (narrow) %v15935_v35, 8  ;;  %v13655_v54 = vpop.xlane.xlu1 %13654  ;;  %v12725_v34 = vld [vmem:[#allocation2 + $0x108] sm:$0xff]  ;;  %v12719_v38 = vld [vmem:[#allocation2 + $0xd8] sm:$0xff] }
 0x612   : > { %v15823_v53 = vadd.f32 %v13655_v54, %v12703_v37  ;;  %v15899_v0 = vld [vmem:[#allocation2 + $0x30] sm:$0xff] }
 0x613   : > { %15863 = vst.msk [vmem:[#allocation2 + $0x50] sm:$0xff] %vm15852_vm3, %v15822_v40  ;;  %v15939_v43 = vmul.f32 5e-05, %v15899_v0  ;;  %v15900_v9 = vld [vmem:[#allocation2 + $0x38] sm:$0xff] }
 0x614   : > { %15864 = vst.msk [vmem:[#allocation2 + $0x58] sm:$0xff] %vm15852_vm3, %v15823_v53  ;;  %v14040_v44 = vpop.xlane.xlu0 %14039  ;;  %v15940_v16 = vmul.f32 5e-05, %v15900_v9  ;;  %v12706_v9 = vld [vmem:[#allocation2 + $0x70] sm:$0xff] }
 0x615   : > { %v15828_v48 = vadd.f32 %v14040_v44, %v12708_v41  ;;  %15976 = vxpose.xlu0.b32.cont [4/16] (narrow) %v15936_v42, 8  ;;  %v14117_v49 = vpop.xlane.xlu1 %14116 }
 0x616   : > { %v15829_v51 = vadd.f32 %v14117_v49, %v12709_v19  ;;  %v15901_v21 = vld [vmem:[#allocation2 + $0x40] sm:$0xff]  ;;  %v12726_v19 = vld [vmem:[#allocation2 + $0x110] sm:$0xff] }
 0x617   : > { %15869 = vst.msk [vmem:[#allocation2 + $0x80] sm:$0xff] %vm15852_vm3, %v15828_v48  ;;  %v15941_v31 = vmul.f32 5e-05, %v15901_v21  ;;  %v15902_v24 = vld [vmem:[#allocation2 + $0x48] sm:$0xff]  ;;  %v12704_v48 = vld [vmem:[#allocation2 + $0x60] sm:$0xff] }
 0x618   : > { %15870 = vst.msk [vmem:[#allocation2 + $0x88] sm:$0xff] %vm15852_vm3, %v15829_v51  ;;  %v14194_v17 = vpop.xlane.xlu0 %14193  ;;  %v15942_v35 = vmul.f32 5e-05, %v15902_v24 }
 0x619   : > { %v15830_v59 = vadd.f32 %v14194_v17, %v12710_v52  ;;  %15977 = vxpose.xlu0.b32.cont [5/16] (narrow) %v15937_v55, 8  ;;  %v14271_v60 = vpop.xlane.xlu1 %14270 }
 0x61a   : > { %v15831_v61 = vadd.f32 %v14271_v60, %v12711_v18  ;;  %v15903_v40 = vld [vmem:[#allocation2 + $0x50] sm:$0xff] }
 0x61b   : > { %15871 = vst.msk [vmem:[#allocation2 + $0x90] sm:$0xff] %vm15852_vm3, %v15830_v59  ;;  %v15943_v44 = vmul.f32 5e-05, %v15903_v40  ;;  %v15904_v51 = vld [vmem:[#allocation2 + $0x58] sm:$0xff] }
 0x61c   : > { %15872 = vst.msk [vmem:[#allocation2 + $0x98] sm:$0xff] %vm15852_vm3, %v15831_v61  ;;  %v14348_v45 = vpop.xlane.xlu0 %14347  ;;  %v15944_v59 = vmul.f32 5e-05, %v15904_v51  ;;  %v12727_v61 = vld [vmem:[#allocation2 + $0x118] sm:$0xff] }
 0x61d   : > { %v15832_v1 = vadd.f32 %v14348_v45, %v12712_v62  ;;  %15978 = vxpose.xlu0.b32.cont [6/16] (narrow) %v15938_v63, 8  ;;  %v14425_v2 = vpop.xlane.xlu1 %14424  ;;  %v12731_v40 = vld [vmem:[#allocation2 + $0x138] sm:$0xff] }
 0x61e   : > { %v15833_v3 = vadd.f32 %v14425_v2, %v12713_v46  ;;  %v15909_v20 = vld [vmem:[#allocation2 + $0x80] sm:$0xff] }
 0x61f   : > { %15873 = vst.msk [vmem:[#allocation2 + $0xa0] sm:$0xff] %vm15852_vm3, %v15832_v1  ;;  %v15949_v7 = vmul.f32 5e-05, %v15909_v20  ;;  %v15910_v10 = vld [vmem:[#allocation2 + $0x88] sm:$0xff] }
 0x620   : > { %15874 = vst.msk [vmem:[#allocation2 + $0xa8] sm:$0xff] %vm15852_vm3, %v15833_v3  ;;  %v14502_v11 = vpop.xlane.xlu0 %14501  ;;  %v15950_v13 = vmul.f32 5e-05, %v15910_v10  ;;  %v12705_v1 = vld [vmem:[#allocation2 + $0x68] sm:$0xff]  ;;  %v12728_v10 = vld [vmem:[#allocation2 + $0x120] sm:$0xff] }
 0x621   : > { %v15834_v12 = vadd.f32 %v14502_v11, %v12714_v6  ;;  %15979 = vxpose.xlu0.b32.cont [7/16] (narrow) %v15939_v43, 8  ;;  %16005 = vxpose.xlu1.b32.start [1/16] (narrow) %v15949_v7, 8  ;;  %v14579_v8 = vpop.xlane.xlu1 %14578  ;;  %v12721_v3 = vld [vmem:[#allocation2 + $0xe8] sm:$0xff] }
 0x622   : > { %v15835_v14 = vadd.f32 %v14579_v8, %v12715_v50  ;;  %v15911_v22 = vld [vmem:[#allocation2 + $0x90] sm:$0xff] }
 0x623   : > { %15875 = vst.msk [vmem:[#allocation2 + $0xb0] sm:$0xff] %vm15852_vm3, %v15834_v12  ;;  %v15951_v26 = vmul.f32 5e-05, %v15911_v22  ;;  %v15912_v28 = vld [vmem:[#allocation2 + $0x98] sm:$0xff]  ;;  %v12729_v22 = vld [vmem:[#allocation2 + $0x128] sm:$0xff] }
 0x624   : > { %15876 = vst.msk [vmem:[#allocation2 + $0xb8] sm:$0xff] %vm15852_vm3, %v15835_v14  ;;  %v14656_v4 = vpop.xlane.xlu0 %14655  ;;  %v15952_v37 = vmul.f32 5e-05, %v15912_v28  ;;  %v12723_v28 = vld [vmem:[#allocation2 + $0xf8] sm:$0xff] }
 0x625   : > { %v15836_v23 = vadd.f32 %v14656_v4, %v12716_v15  ;;  %15980 = vxpose.xlu0.b32.cont [8/16] (narrow) %v15940_v16, 8  ;;  %16006 = vxpose.xlu1.b32.cont [2/16] (narrow) %v15950_v13, 8  ;;  %v14733_v57 = vpop.xlane.xlu1 %14732  ;;  %v12722_v4 = vld [vmem:[#allocation2 + $0xf0] sm:$0xff] }
 0x626   : > { %v15837_v58 = vadd.f32 %v14733_v57, %v12717_v5  ;;  %v15913_v54 = vld [vmem:[#allocation2 + $0xa0] sm:$0xff] }
 0x627   : > { %15877 = vst.msk [vmem:[#allocation2 + $0xc0] sm:$0xff] %vm15852_vm3, %v15836_v23  ;;  %v15953_v47 = vmul.f32 5e-05, %v15913_v54  ;;  %v15914_v52 = vld [vmem:[#allocation2 + $0xa8] sm:$0xff] }
 0x628   : > { %15878 = vst.msk [vmem:[#allocation2 + $0xc8] sm:$0xff] %vm15852_vm3, %v15837_v58  ;;  %v15272_v25 = vpop.xlane.xlu0 %15271  ;;  %v15954_v60 = vmul.f32 5e-05, %v15914_v52 }
 0x629   : > { %v15844_v29 = vadd.f32 %v15272_v25, %v12724_v32  ;;  %15981 = vxpose.xlu0.b32.cont [9/16] (narrow) %v15941_v31, 8  ;;  %16007 = vxpose.xlu1.b32.cont [3/16] (narrow) %v15951_v26, 8  ;;  %v14810_v30 = vpop.xlane.xlu1 %14809  ;;  %v12707_v31 = vld [vmem:[#allocation2 + $0x78] sm:$0xff] }
 0x62a   : > { %v15838_v33 = vadd.f32 %v14810_v30, %v12718_v27  ;;  %v15915_v63 = vld [vmem:[#allocation2 + $0xb0] sm:$0xff] }
 0x62b   : > { %15885 = vst.msk [vmem:[#allocation2 + $0x100] sm:$0xff] %vm15852_vm3, %v15844_v29  ;;  %v15955_v2 = vmul.f32 5e-05, %v15915_v63  ;;  %v15916_v20 = vld [vmem:[#allocation2 + $0xb8] sm:$0xff] }
 0x62c   : > { %15879 = vst.msk [vmem:[#allocation2 + $0xd0] sm:$0xff] %vm15852_vm3, %v15838_v33  ;;  %v15349_v39 = vpop.xlane.xlu0 %15348  ;;  %v15956_v11 = vmul.f32 5e-05, %v15916_v20 }
 0x62d   : > { %v15845_v53 = vadd.f32 %v15349_v39, %v12725_v34  ;;  %15982 = vxpose.xlu0.b32.cont [10/16] (narrow) %v15942_v35, 8  ;;  %16008 = vxpose.xlu1.b32.cont [4/16] (narrow) %v15952_v37, 8  ;;  %v14887_v41 = vpop.xlane.xlu1 %14886  ;;  %v12730_v37 = vld [vmem:[#allocation2 + $0x130] sm:$0xff] }
 0x62e   : > { %v15839_v42 = vadd.f32 %v14887_v41, %v12719_v38  ;;  %v15917_v14 = vld [vmem:[#allocation2 + $0xc0] sm:$0xff] }
 0x62f   : > { %15886 = vst.msk [vmem:[#allocation2 + $0x108] sm:$0xff] %vm15852_vm3, %v15845_v53  ;;  %v15957_v21 = vmul.f32 5e-05, %v15917_v14  ;;  %v15918_v57 = vld [vmem:[#allocation2 + $0xc8] sm:$0xff] }
 0x630   : > { %15880 = vst.msk [vmem:[#allocation2 + $0xd8] sm:$0xff] %vm15852_vm3, %v15839_v42  ;;  %v15426_v49 = vpop.xlane.xlu0 %15425  ;;  %v15958_v25 = vmul.f32 5e-05, %v15918_v57 }
 0x631   : > { %v15846_v55 = vadd.f32 %v15426_v49, %v12726_v19  ;;  %15983 = vxpose.xlu0.b32.cont [11/16] (narrow) %v15943_v44, 8  ;;  %16009 = vxpose.xlu1.b32.cont [5/16] (narrow) %v15953_v47, 8  ;;  %v13732_v18 = vpop.xlane.xlu1 %13731 }
 0x632   : > { %v15824_v17 = vadd.f32 %v13732_v18, %v12704_v48  ;;  %v15925_v18 = vld [vmem:[#allocation2 + $0x100] sm:$0xff] }
 0x633   : > { %15887 = vst.msk [vmem:[#allocation2 + $0x110] sm:$0xff] %vm15852_vm3, %v15846_v55  ;;  %v15919_v30 = vld [vmem:[#allocation2 + $0xd0] sm:$0xff] }
 0x634   : > { %15865 = vst.msk [vmem:[#allocation2 + $0x60] sm:$0xff] %vm15852_vm3, %v15824_v17  ;;  %v14964_v62 = vpop.xlane.xlu0 %14963  ;;  %v15959_v38 = vmul.f32 5e-05, %v15919_v30 }
 0x635   : > { %v15840_v46 = vadd.f32 %v14964_v62, %v12720_v56  ;;  %15984 = vxpose.xlu0.b32.cont [12/16] (narrow) %v15944_v59, 8  ;;  %16010 = vxpose.xlu1.b32.cont [6/16] (narrow) %v15954_v60, 8  ;;  %v15503_v45 = vpop.xlane.xlu1 %15502  ;;  %v15965_v56 = vmul.f32 5e-05, %v15925_v18 }
 0x636   : > { %v15847_v0 = vadd.f32 %v15503_v45, %v12727_v61  ;;  %v15926_v60 = vld [vmem:[#allocation2 + $0x108] sm:$0xff] }
 0x637   : > { %15881 = vst.msk [vmem:[#allocation2 + $0xe0] sm:$0xff] %vm15852_vm3, %v15840_v46  ;;  %v15920_v54 = vld [vmem:[#allocation2 + $0xd8] sm:$0xff]  ;;  %v15966_v63 = vmul.f32 5e-05, %v15926_v60 }
 0x638   : > { %15888 = vst.msk [vmem:[#allocation2 + $0x118] sm:$0xff] %vm15852_vm3, %v15847_v0  ;;  %v13809_v6 = vpop.xlane.xlu0 %13808  ;;  %v15960_v47 = vmul.f32 5e-05, %v15920_v54 }
 0x639   : > { %v15825_v43 = vadd.f32 %v13809_v6, %v12705_v1  ;;  %16011 = vxpose.xlu1.b32.cont [7/16] (narrow) %v15955_v2, 8  ;;  %v15041_v7 = vpop.xlane.xlu1 %15040 }
 0x63a   : > { %v15841_v50 = vadd.f32 %v15041_v7, %v12721_v3  ;;  %v15927_v46 = vld [vmem:[#allocation2 + $0x110] sm:$0xff] }
 0x63b   : > { %15866 = vst.msk [vmem:[#allocation2 + $0x68] sm:$0xff] %vm15852_vm3, %v15825_v43  ;;  %v15905_v12 = vld [vmem:[#allocation2 + $0x60] sm:$0xff]  ;;  %v15967_v0 = vmul.f32 5e-05, %v15927_v46 }
 0x63c   : > { %15882 = vst.msk [vmem:[#allocation2 + $0xe8] sm:$0xff] %vm15852_vm3, %v15841_v50  ;;  %v15580_v8 = vpop.xlane.xlu0 %15579  ;;  %v15945_v13 = vmul.f32 5e-05, %v15905_v12 }
 0x63d   : > { %v15848_v15 = vadd.f32 %v15580_v8, %v12728_v10  ;;  %16012 = vxpose.xlu1.b32.cont [8/16] (narrow) %v15956_v11, 8  ;;  %v13886_v16 = vpop.xlane.xlu1 %13885 }
 0x63e   : > { %v15826_v5 = vadd.f32 %v13886_v16, %v12706_v9  ;;  %15985 = vxpose.xlu0.b32.cont [13/16] (narrow) %v15945_v13, 8  ;;  %v15921_v48 = vld [vmem:[#allocation2 + $0xe0] sm:$0xff]  ;;  %v16479_v9 = vmov 1966171168   ;;  %v16077_v13 = vshrl.u32 %v9499_v36, 7 }
 0x63f   : > { %15889 = vst.msk [vmem:[#allocation2 + $0x120] sm:$0xff] %vm15852_vm3, %v15848_v15  ;;  %v15961_v51 = vmul.f32 5e-05, %v15921_v48  ;;  %v15928_v1 = vld [vmem:[#allocation2 + $0x118] sm:$0xff]  ;;  %v16074_v12 = vunpack.c.l.s4 %v16479_v9 }
 0x640   : > { %15867 = vst.msk [vmem:[#allocation2 + $0x70] sm:$0xff] %vm15852_vm3, %v15826_v5  ;;  %v15118_v23 = vpop.xlane.xlu0 %15117  ;;  %v15968_v2 = vmul.f32 5e-05, %v15928_v1 }
 0x641   : > { %v15842_v58 = vadd.f32 %v15118_v23, %v12722_v4  ;;  %16013 = vxpose.xlu1.b32.cont [9/16] (narrow) %v15957_v21, 8  ;;  %v15657_v32 = vpop.xlane.xlu1 %15656  ;;  %v16075_v8 = vunpack.c.0.s8 %v16074_v12 }
 0x642   : > { %v15906_v26 = vld [vmem:[#allocation2 + $0x68] sm:$0xff]  ;;  %v15849_v27 = vadd.f32 %v15657_v32, %v12729_v22 }
 0x643   : > { %15883 = vst.msk [vmem:[#allocation2 + $0xf0] sm:$0xff] %vm15852_vm3, %v15842_v58  ;;  %v15946_v24 = vmul.f32 5e-05, %v15906_v26  ;;  %v15922_v55 = vld [vmem:[#allocation2 + $0xe8] sm:$0xff]  ;;  %v16078_v16 = vsub.s32 %v16075_v8, %v16077_v13 }
 0x644   : > { %v13963_v29 = vpop.xlane.xlu0 %13962  ;;  %15890 = vst.msk [vmem:[#allocation2 + $0x128] sm:$0xff] %vm15852_vm3, %v15849_v27  ;;  %v15962_v17 = vmul.f32 5e-05, %v15922_v55 }
 0x645   : > { %v15827_v33 = vadd.f32 %v13963_v29, %v12707_v31  ;;  %16014 = vxpose.xlu1.b32.cont [10/16] (narrow) %v15958_v25, 8  ;;  %15986 = vxpose.xlu0.b32.cont [14/16] (narrow) %v15946_v24, 8  ;;  %v15195_v34 = vpop.xlane.xlu1 %15194 }
 0x646   : > { %v15843_v35 = vadd.f32 %v15195_v34, %v12723_v28  ;;  %v15929_v3 = vld [vmem:[#allocation2 + $0x120] sm:$0xff] }
 0x647   : > { %15868 = vst.msk [vmem:[#allocation2 + $0x78] sm:$0xff] %vm15852_vm3, %v15827_v33  ;;  %v15907_v39 = vld [vmem:[#allocation2 + $0x70] sm:$0xff]  ;;  %v15969_v20 = vmul.f32 5e-05, %v15929_v3 }
 0x648   : > { %v15947_v53 = vmul.f32 5e-05, %v15907_v39  ;;  %15884 = vst.msk [vmem:[#allocation2 + $0xf8] sm:$0xff] %vm15852_vm3, %v15843_v35  ;;  %v15734_v41 = vpop.xlane.xlu0 %15733 }
 0x649   : > { %16015 = vxpose.xlu1.b32.cont [11/16] (narrow) %v15959_v38, 8  ;;  %v15850_v42 = vadd.f32 %v15734_v41, %v12730_v37  ;;  %v15811_v19 = vpop.xlane.xlu1 %15810 }
 0x64a   : > { %15987 = vxpose.xlu0.b32.cont [15/16] (narrow) %v15947_v53, 8  ;;  %v15851_v44 = vadd.f32 %v15811_v19, %v12731_v40  ;;  %v15923_v59 = vld [vmem:[#allocation2 + $0xf0] sm:$0xff] }
 0x64b   : > { %15891 = vst.msk [vmem:[#allocation2 + $0x130] sm:$0xff] %vm15852_vm3, %v15850_v42  ;;  %v15963_v62 = vmul.f32 5e-05, %v15923_v59  ;;  %v15930_v6 = vld [vmem:[#allocation2 + $0x128] sm:$0xff] }
 0x64c   : > { %15892 = vst.msk [vmem:[#allocation2 + $0x138] sm:$0xff] %vm15852_vm3, %v15851_v44  ;;  %v15970_v43 = vmul.f32 5e-05, %v15930_v6 }
 0x64d   : > { %16016 = vxpose.xlu1.b32.cont [12/16] (narrow) %v15960_v47, 8 }
 0x64e   : > { %v15908_v49 = vld [vmem:[#allocation2 + $0x78] sm:$0xff] }
 0x64f   : > { %v15948_v52 = vmul.f32 5e-05, %v15908_v49  ;;  %v15924_v61 = vld [vmem:[#allocation2 + $0xf8] sm:$0xff] }
 0x650   : > { %v15964_v45 = vmul.f32 5e-05, %v15924_v61 }
 0x651   : > { %16017 = vxpose.xlu1.b32.cont [13/16] (narrow) %v15961_v51, 8  ;;  %15988 = vxpose.xlu0.b32.end [16/16] (narrow) %v15948_v52, 8 }
 0x652   : > { %v15931_v7 = vld [vmem:[#allocation2 + $0x130] sm:$0xff] }
 0x653   : > { %v15971_v50 = vmul.f32 5e-05, %v15931_v7  ;;  %v15932_v10 = vld [vmem:[#allocation2 + $0x138] sm:$0xff] }
 0x654   : > { %v15972_v11 = vmul.f32 5e-05, %v15932_v10 }
 0x655   : > { %16018 = vxpose.xlu1.b32.cont [14/16] (narrow) %v15962_v17, 8  ;;  %16037 = vxpose.xlu0.b32.start [1/8] (short) (narrow) %v15965_v56, 8 }
 0x659   : > { %16019 = vxpose.xlu1.b32.cont [15/16] (narrow) %v15963_v62, 8  ;;  %16038 = vxpose.xlu0.b32.cont [2/8] (short) (narrow) %v15966_v63, 8 }
 0x65d   : > { %16039 = vxpose.xlu0.b32.cont [3/8] (short) (narrow) %v15967_v0, 8  ;;  %16020 = vxpose.xlu1.b32.end [16/16] (narrow) %v15964_v45, 8 }
 0x661   : > { %16040 = vxpose.xlu0.b32.cont [4/8] (short) (narrow) %v15968_v2, 8 }
 0x665   : > { %16041 = vxpose.xlu0.b32.cont [5/8] (short) (narrow) %v15969_v20, 8 }
 0x669   : > { %16042 = vxpose.xlu0.b32.cont [6/8] (short) (narrow) %v15970_v43, 8 }
 0x66d   : > { %16043 = vxpose.xlu0.b32.cont [7/8] (short) (narrow) %v15971_v50, 8 }
 0x671   : > { %16044 = vxpose.xlu0.b32.end [8/8] (short) (narrow) %v15972_v11, 8 }
 0x695   : > { %v15989_v15 = vpop.trf.xlu0 }
 0x6a1   : > { %v16021_v14 = vpop.trf.xlu1 }
 0x6a2   : > { %v16072_v5 = vcombine.low %v15989_v15, %v16021_v14 }
 0x6a4   : > { %v16079_v21 = vrot.slane %v16072_v5, %v16078_v16 }
 0x6d5   : > { %v16053_v4 = vpop.trf.xlu0 }
 0x6d6   : > { %v16086_v22 = vrot.slane %v16053_v4, %v16078_v16 }
 0x6d8   : > { %v16087_v23 = vcombine.low %v16079_v21, %v16086_v22 }
 0x6da   : > { %v16094_v57 = vrot.slane %v16087_v23, %v16078_v16 }
 0x6dc   : > { %16100 = vst.msk [vmem:[%s158_s21] sm:$0x7] %vm16098_vm4, %v16094_v57 }
 0x6dd PF: > { %s16220_s12 = smul.u32 48, %s16461_s13  ;;  %s16116_s25 = sshll.u32 %s158_s21, 4  ;;  %s16117_s25 = int_to_ptr.vmem [resolvable:$true] %s16116_s25 }
 0x6de   : > { %s16102_s19 = scalar_lea.sflag [#allocation5], %s156_s9  ;;  %s16351_s20 = scalar_lea.vmem %s16117_s25, 48 }
 0x6df   : > { %s20172_s3 = scalar_lea.hbm %s20231_s1, %s16220_s12  ;;  %p16352_p2 = scmp.ne.s32.totalorder %s16117_s25, %s16351_s20 }
 0x6e0   : > { %s16480_s18 = smov [#allocation6]  }
 0x6e1   : > { %p16353_p4 = pnand %p16352_p2, %p16573_p12  ;;  %s16355_s4 = sshll.u32 %s16480_s18, 4  ;;  %s16356_s4 = int_to_ptr.vmem [resolvable:$false] %s16355_s4 }
 0x6e2   : > { %s16357_s22 = scalar_lea.vmem %s16356_s4, 96  ;;  %p16358_p6 = scmp.lt.s32.totalorder %s16117_s25, %s16356_s4 }
 0x6e3   : > { %p16354_p5 = pneg %p16353_p4  ;;  %p16359_p9 = scmp.lt.s32.totalorder %s16357_s22, %s16351_s20 }
 0x6e5   : > { %p16360_p10 = por %p16359_p9, %p16358_p6 }
 0x6e7   : > { %p16361_p11 = pnand %p16360_p10, %p16354_p5 }
 0x6e9   : > { %16364 = shalt.err (!%p16361_p11)
}
 0x6ea   : > { %s16365_s13 = scalar_lea.hbm %s20172_s3, 48  ;;  %s16369_s27 = scalar_lea.hbm %s20231_s1, 96 }
 0x6eb   : > { %p16366_p8 = scmp.ne.s32.totalorder %s20172_s3, %s16365_s13  ;;  %p16370_p3 = scmp.lt.u32.totalorder %s20172_s3, %s20231_s1 }
 0x6ec   : > { %p16371_p7 = scmp.lt.u32.totalorder %s16369_s27, %s16365_s13  ;;  %p16373_p2 = scmp.lt.u32.totalorder %s16365_s13, %s20172_s3 }
 0x6ed   : > { %p16367_p13 = pnand %p16366_p8, %p16573_p12 }
 0x6ee   : > { %p16372_p0 = por %p16371_p7, %p16370_p3 }
 0x6ef   : > { %p16368_p1 = pneg %p16367_p13 }
 0x6f0   : > { %p16374_p4 = por %p16373_p2, %p16372_p0 }
 0x6f2   : > { %p16375_p5 = pnand %p16374_p4, %p16368_p1 }
 0x6f4   : > { %16378 = shalt.err (!%p16375_p5)
}
 0x6f5   : > { %16222 = dma.vmem_to_hbm [thread:$0]  (%p16573_p12), %s16117_s25, 48, %s20172_s3, %s16102_s19  }
 0x6f6 PF: > { %p16229_p6 = scmp.ge.s32.totalorder %s16473_s16, 2  ;;  %s16128_s17 = sand.u32 1, %s16433_s6  }
 0x6f7   : > { %p20242_p9 = scmp.ne.s32.totalorder %s20241_s2, 0  ;;  %s16129_s21 = scalar_lea.sflag [#allocation5], %s16128_s17 }
 0x6f9   : > { %p16225_p10 = pnand %p16229_p6, %p20242_p9 }
 0x6fb   : > { %16428 = dma.done.wait (!%p16225_p10), %s16129_s21, 48  }
 0x6fc   : > { %16430 = vsyncadd (!%p16225_p10), %s16129_s21, 4294967248  ;;  %s17_s16 = sadd.s32 1, %s16473_s16   ;;  %s20243_s12 = sld [smem:[#allocation9_spill]] }
 0x6fd   : > { %p14_p11 = scmp.ge.s32.totalorder %s17_s16, 8   ;;  %s20244_s14 = sld [smem:[#allocation10_spill]] }
 0x6fe   : > { %s20245_s28 = sld [smem:[#allocation11_spill]]  ;;  %s20246_s6 = smov %s16437_s7 }
 0x6ff   : > { %s20247_s7 = smov %s16441_s8  ;;  %s20248_s8 = smov %s16578_s29 }
 0x700   : > { %s20249_s9 = smov %s16449_s10  ;;  %s20250_s10 = smov %s16453_s11 }
 0x701   : > { %s20251_s11 = smov %s16581_s30  ;;  %s20252_s13 = smov %s16469_s15 }
 0x702   :  { %16 = sbr.rel (!%p14_p11) target bundleno = 9 (0x9), region = 81 }
 0x704   : > { %s20253_s15 = smov %s20245_s28 }
 0x709   :  { %16134 = vsyncpa [#allocation4], 1 }
 0x70a   :  { %16136 = vsyncpa [#allocation4 + $0x1], 1 }
 0x70b   :  { %16137 = vsyncpa [#allocation5], 1 }
 0x70c   :  { %16139 = vsyncpa [#allocation5 + $0x1], 1 }

</bundles_post_ra>
